<compile_context>
chip_gen: v7x
topology: tpu7x:2x2x1
jax: 0.10.0
libtpu: 0.0.40
codegen_flags: <defaults>
</compile_context>

<pallas_src>
import jax
import jax.numpy as jnp
from jax.experimental import pallas as pl
from jax.experimental.pallas import tpu as pltpu

C_FEAT = 1920        # densenet201.features output channels
HIDDEN = 512
N_OUT = 2
BN_EPS = 1e-5


def _head_kernel(feat_ref, w1a_ref, w1b_ref, b1_ref, s2_ref, t2_ref,
                 out_ref, acc_avg_ref, acc_max_ref):
    k = pl.program_id(1)

    @pl.when(k == 0)
    def _():
        acc_avg_ref[...] = jnp.zeros_like(acc_avg_ref)
        acc_max_ref[...] = jnp.zeros_like(acc_max_ref)

    # feat block: [TB, TK, HW] f32, channels on sublanes, spatial on lanes.
    # Block is full-extent in HW, so reductions over the logical last axis are
    # safe w.r.t. lane padding (Mosaic inserts neutral elements).
    feat = feat_ref[...]
    sum_k = jnp.sum(feat, axis=-1)                            # [TB, TK]
    max_k = jnp.max(feat, axis=-1)                            # [TB, TK]

    # BN1 is pre-folded into w1a/w1b/b1; bf16 MXU operands, f32 accumulation.
    acc_avg_ref[...] += jnp.dot(sum_k.astype(jnp.bfloat16), w1a_ref[...],
                                preferred_element_type=jnp.float32)
    acc_max_ref[...] += jnp.dot(max_k.astype(jnp.bfloat16), w1b_ref[...],
                                preferred_element_type=jnp.float32)

    @pl.when(k == pl.num_programs(1) - 1)
    def _():
        hw = feat_ref.shape[-1]                               # static
        # Apply 1/HW to the avg half once, add Linear(3840,512) bias.
        h = acc_avg_ref[...] * (1.0 / hw) + acc_max_ref[...] + b1_ref[...]
        # ELU(alpha=1); dropout layers are identity in eval mode.
        h = jnp.where(h > 0.0, h, jnp.exp(jnp.minimum(h, 0.0)) - 1.0)
        # BatchNorm1d(512) eval mode, pre-folded to scale/shift.
        out_ref[...] = h * s2_ref[...] + t2_ref[...]


def _pick_tiles(B, HW):
    """Pick (TB, TK): big steps, but keep double-buffered feat blocks modest."""
    if B <= 32:
        TB = B                      # small-batch inference: whole batch per tile
    else:
        TB = 32                     # sublane-aligned tile; megacore splits batch
        assert B % TB == 0, "batch must be a multiple of 32 when B > 32"
    hw_pad = pl.cdiv(HW, 128) * 128              # lane-padded VMEM footprint
    budget = 6 * 1024 * 1024                     # per feature buffer (x2 dbl-buf)
    tk = 8
    for cand in (960, 640, 480, 384, 320, 240, 192, 160, 128,
                 96, 80, 64, 48, 40, 32, 24, 16, 8):
        if C_FEAT % cand == 0 and TB * cand * hw_pad * 4 <= budget:
            tk = cand
            break
    return TB, tk


def prepare_params(raw):
    """Fold the eval-mode BatchNorms into the adjacent linears; cast w1 to bf16."""
    inv1 = jax.lax.rsqrt(raw["bn1_var"] + BN_EPS)             # [3840]
    scale1 = raw["bn1_gamma"] * inv1
    shift1 = raw["bn1_beta"] - raw["bn1_mean"] * scale1
    w1f = raw["w1"] * scale1[:, None]                         # [3840, 512]
    b1f = raw["b1"] + shift1 @ raw["w1"]                      # [512]

    inv2 = jax.lax.rsqrt(raw["bn2_var"] + BN_EPS)             # [512]
    scale2 = raw["bn2_gamma"] * inv2
    shift2 = raw["bn2_beta"] - raw["bn2_mean"] * scale2

    return {
        "w1a": w1f[:C_FEAT].astype(jnp.bfloat16),             # avg-half  [1920, 512]
        "w1b": w1f[C_FEAT:].astype(jnp.bfloat16),             # max-half  [1920, 512]
        "b1": b1f.reshape(1, HIDDEN).astype(jnp.float32),
        "bn2_scale": scale2.reshape(1, HIDDEN).astype(jnp.float32),
        "bn2_shift": shift2.reshape(1, HIDDEN).astype(jnp.float32),
        "w2": raw["w2"],                                      # [512, 2]
        "b2": raw["b2"],                                      # [2]
    }


def classifie_head(features_nchw, pp):
    """features_nchw: [B, 1920, H, W] f32 (output of densenet201.features)."""
    B, C, H, W = features_nchw.shape
    assert C == C_FEAT
    HW = H * W
    feat = features_nchw.reshape(B, C, HW)                    # free contiguous reshape

    TB, TK = _pick_tiles(B, HW)
    nb = B // TB
    nk = C_FEAT // TK

    in_specs = [
        pl.BlockSpec((TB, TK, HW), lambda b, k: (b, k, 0)),   # feature-map slice
        pl.BlockSpec((TK, HIDDEN), lambda b, k: (k, 0)),      # w1 (avg half), bf16
        pl.BlockSpec((TK, HIDDEN), lambda b, k: (k, 0)),      # w1 (max half), bf16
        pl.BlockSpec((1, HIDDEN), lambda b, k: (0, 0)),       # folded bias
        pl.BlockSpec((1, HIDDEN), lambda b, k: (0, 0)),       # BN2 scale
        pl.BlockSpec((1, HIDDEN), lambda b, k: (0, 0)),       # BN2 shift
    ]
    out_spec = pl.BlockSpec((TB, HIDDEN), lambda b, k: (b, 0))

    h = pl.pallas_call(
        _head_kernel,
        out_shape=jax.ShapeDtypeStruct((B, HIDDEN), jnp.float32),
        grid=(nb, nk),                                        # batch outer, K inner
        in_specs=in_specs,
        out_specs=out_spec,
        scratch_shapes=[pltpu.VMEM((TB, HIDDEN), jnp.float32),   # avg accumulator
                        pltpu.VMEM((TB, HIDDEN), jnp.float32)],  # max accumulator
        compiler_params=pltpu.CompilerParams(
            dimension_semantics=("parallel", "arbitrary")),
    )(feat, pp["w1a"], pp["w1b"], pp["b1"], pp["bn2_scale"], pp["bn2_shift"])

    # Final Linear(512, 2): tiny N=2 matmul, done outside the kernel so the
    # kernel output stays lane-dense (no masked 2-lane stores / wasted MXU pass).
    return h @ pp["w2"] + pp["b2"]


def init_params(key):
    """Raw (PyTorch-equivalent) parameters; linears stored transposed for x @ W."""
    ks = jax.random.split(key, 12)
    p = {}
    p["bn1_gamma"] = jax.random.uniform(ks[0], (2 * C_FEAT,), jnp.float32, 0.5, 1.5)
    p["bn1_beta"] = 0.1 * jax.random.normal(ks[1], (2 * C_FEAT,), jnp.float32)
    p["bn1_mean"] = 0.1 * jax.random.normal(ks[2], (2 * C_FEAT,), jnp.float32)
    p["bn1_var"] = jax.random.uniform(ks[3], (2 * C_FEAT,), jnp.float32, 0.5, 1.5)
    p["w1"] = jax.random.normal(ks[4], (2 * C_FEAT, HIDDEN), jnp.float32) / jnp.sqrt(2.0 * C_FEAT)
    p["b1"] = 0.01 * jax.random.normal(ks[5], (HIDDEN,), jnp.float32)
    p["bn2_gamma"] = jax.random.uniform(ks[6], (HIDDEN,), jnp.float32, 0.5, 1.5)
    p["bn2_beta"] = 0.1 * jax.random.normal(ks[7], (HIDDEN,), jnp.float32)
    p["bn2_mean"] = 0.1 * jax.random.normal(ks[8], (HIDDEN,), jnp.float32)
    p["bn2_var"] = jax.random.uniform(ks[9], (HIDDEN,), jnp.float32, 0.5, 1.5)
    p["w2"] = jax.random.normal(ks[10], (HIDDEN, N_OUT), jnp.float32) / jnp.sqrt(float(HIDDEN))
    p["b2"] = 0.01 * jax.random.normal(ks[11], (N_OUT,), jnp.float32)
    return p


def _reference_head(features_nchw, raw):
    """Pure-JAX f32 reference with the original (unfolded) module semantics."""
    B, C, H, W = features_nchw.shape
    x = features_nchw.reshape(B, C, H * W)
    avg = jnp.mean(x, axis=-1)
    mx = jnp.max(x, axis=-1)
    cat = jnp.concatenate([avg, mx], axis=1)                  # [B, 3840]
    inv1 = jax.lax.rsqrt(raw["bn1_var"] + BN_EPS)
    cat = (cat - raw["bn1_mean"]) * inv1 * raw["bn1_gamma"] + raw["bn1_beta"]
    h = cat @ raw["w1"] + raw["b1"]
    h = jnp.where(h > 0, h, jnp.exp(jnp.minimum(h, 0.0)) - 1.0)
    inv2 = jax.lax.rsqrt(raw["bn2_var"] + BN_EPS)
    h = (h - raw["bn2_mean"]) * inv2 * raw["bn2_gamma"] + raw["bn2_beta"]
    return h @ raw["w2"] + raw["b2"]


if __name__ == "__main__":
    key = jax.random.PRNGKey(0)
    k_feat, k_param = jax.random.split(key)

    # Small feature-map shape consistent with densenet201.features output
    # (1920 channels; tiny 4x4 spatial instead of 7x7).
    B, H, W = 2, 4, 4
    features = jax.random.normal(k_feat, (B, C_FEAT, H, W), jnp.float32)

    raw = init_params(k_param)
    pp = prepare_params(raw)

    out = jax.jit(classifie_head)(features, pp)
    out = jax.block_until_ready(out)

    assert out.shape == (B, N_OUT)
    assert bool(jnp.all(jnp.isfinite(out)))

    # Loose tolerance: w1 is stored in bf16 (f32 accumulation), reference is full f32.
    # Also re-validates the unmasked sum/max reductions over the lane-padded HW axis.
    ref = _reference_head(features, raw)
    assert bool(jnp.all(jnp.abs(out - ref) <= (0.05 + 0.05 * jnp.abs(ref)))), \
        "kernel output deviates from f32 reference beyond bf16-weight tolerance"

    print("KERNEL_OK")
</pallas_src>

<mosaic_0001>
module attributes {stable_mosaic.version = 11 : i64} {
  func.func @_head_kernel(%arg0: i32, %arg1: i32, %arg2: memref<2x960x16xf32, #tpu.memory_space<vmem>>, %arg3: memref<960x512xbf16, #tpu.memory_space<vmem>>, %arg4: memref<960x512xbf16, #tpu.memory_space<vmem>>, %arg5: memref<1x512xf32, #tpu.memory_space<vmem>>, %arg6: memref<1x512xf32, #tpu.memory_space<vmem>>, %arg7: memref<1x512xf32, #tpu.memory_space<vmem>>, %arg8: memref<2x512xf32, #tpu.memory_space<vmem>>, %arg9: memref<2x512xf32, #tpu.memory_space<vmem>>, %arg10: memref<2x512xf32, #tpu.memory_space<vmem>>) attributes {dimension_semantics = [#tpu.dimension_semantics<parallel>, #tpu.dimension_semantics<arbitrary>], iteration_bounds = array<i64: 1, 2>, scalar_prefetch = 0 : i64, scratch_operands = 2 : i64, tpu.core_type = #tpu.core_type<tc>, window_params = [{transform_indices = @transform_0, window_bounds = array<i64: 2, 960, 16>}, {transform_indices = @transform_1, window_bounds = array<i64: 960, 512>}, {transform_indices = @transform_2, window_bounds = array<i64: 960, 512>}, {pipeline_mode = #tpu.pipeline_mode<synchronous>, transform_indices = @transform_3, window_bounds = array<i64: 1, 512>}, {pipeline_mode = #tpu.pipeline_mode<synchronous>, transform_indices = @transform_4, window_bounds = array<i64: 1, 512>}, {pipeline_mode = #tpu.pipeline_mode<synchronous>, transform_indices = @transform_5, window_bounds = array<i64: 1, 512>}, {transform_indices = @transform_6, window_bounds = array<i64: 2, 512>}]} {
    %c0_i32 = arith.constant 0 : i32
    %0 = arith.cmpi eq, %arg1, %c0_i32 : i32
    %1 = arith.extui %0 : i1 to i32
    %c0_i32_0 = arith.constant 0 : i32
    %2 = arith.cmpi ne, %1, %c0_i32_0 : i32
    scf.if %2 {
      %cst_19 = arith.constant 0.000000e+00 : f32
      %21 = vector.broadcast %cst_19 : f32 to vector<2x512xf32>
      %c0_20 = arith.constant 0 : index
      %c0_21 = arith.constant 0 : index
      %22 = vector.load %arg9[%c0_20, %c0_21] : memref<2x512xf32, #tpu.memory_space<vmem>>, vector<2x512xf32>
      tpu.vector_store %arg9[%c0_20, %c0_21], %21 {strides = array<i32>} : memref<2x512xf32, #tpu.memory_space<vmem>>, vector<2x512xf32>,
      %cst_22 = arith.constant 0.000000e+00 : f32
      %23 = vector.broadcast %cst_22 : f32 to vector<2x512xf32>
      %c0_23 = arith.constant 0 : index
      %c0_24 = arith.constant 0 : index
      %24 = vector.load %arg10[%c0_23, %c0_24] : memref<2x512xf32, #tpu.memory_space<vmem>>, vector<2x512xf32>
      tpu.vector_store %arg10[%c0_23, %c0_24], %23 {strides = array<i32>} : memref<2x512xf32, #tpu.memory_space<vmem>>, vector<2x512xf32>,
    } else {
    }
    %c0 = arith.constant 0 : index
    %c0_1 = arith.constant 0 : index
    %c0_2 = arith.constant 0 : index
    %3 = vector.load %arg2[%c0, %c0_1, %c0_2] : memref<2x960x16xf32, #tpu.memory_space<vmem>>, vector<2x960x16xf32>
    %cst = arith.constant dense<0.000000e+00> : vector<2x960xf32>
    %4 = vector.multi_reduction <add>, %3, %cst [2] : vector<2x960x16xf32> to vector<2x960xf32>
    %cst_3 = arith.constant dense<0xFF800000> : vector<2x960xf32>
    %5 = vector.multi_reduction <maximumf>, %3, %cst_3 [2] : vector<2x960x16xf32> to vector<2x960xf32>
    %c0_4 = arith.constant 0 : index
    %c0_5 = arith.constant 0 : index
    %6 = vector.load %arg9[%c0_4, %c0_5] : memref<2x512xf32, #tpu.memory_space<vmem>>, vector<2x512xf32>
    %7 = arith.truncf %4 : vector<2x960xf32> to vector<2x960xbf16>
    %c0_6 = arith.constant 0 : index
    %c0_7 = arith.constant 0 : index
    %8 = vector.load %arg3[%c0_6, %c0_7] : memref<960x512xbf16, #tpu.memory_space<vmem>>, vector<960x512xbf16>
    %cst_8 = arith.constant dense<0.000000e+00> : vector<2x512xf32>
    %9 = tpu.matmul %7, %8, %cst_8 {dimension_numbers = #tpu.dot_dimension_numbers<[1], [0], [0], [1], [0, 0, 1, 1], [], []>} : vector<2x960xbf16>, vector<960x512xbf16>, vector<2x512xf32> -> vector<2x512xf32>
    %10 = arith.addf %6, %9 : vector<2x512xf32>
    %c0_9 = arith.constant 0 : index
    %c0_10 = arith.constant 0 : index
    %11 = vector.load %arg9[%c0_9, %c0_10] : memref<2x512xf32, #tpu.memory_space<vmem>>, vector<2x512xf32>
    tpu.vector_store %arg9[%c0_9, %c0_10], %10 {strides = array<i32>} : memref<2x512xf32, #tpu.memory_space<vmem>>, vector<2x512xf32>,
    %c0_11 = arith.constant 0 : index
    %c0_12 = arith.constant 0 : index
    %12 = vector.load %arg10[%c0_11, %c0_12] : memref<2x512xf32, #tpu.memory_space<vmem>>, vector<2x512xf32>
    %13 = arith.truncf %5 : vector<2x960xf32> to vector<2x960xbf16>
    %c0_13 = arith.constant 0 : index
    %c0_14 = arith.constant 0 : index
    %14 = vector.load %arg4[%c0_13, %c0_14] : memref<960x512xbf16, #tpu.memory_space<vmem>>, vector<960x512xbf16>
    %cst_15 = arith.constant dense<0.000000e+00> : vector<2x512xf32>
    %15 = tpu.matmul %13, %14, %cst_15 {dimension_numbers = #tpu.dot_dimension_numbers<[1], [0], [0], [1], [0, 0, 1, 1], [], []>} : vector<2x960xbf16>, vector<960x512xbf16>, vector<2x512xf32> -> vector<2x512xf32>
    %16 = arith.addf %12, %15 : vector<2x512xf32>
    %c0_16 = arith.constant 0 : index
    %c0_17 = arith.constant 0 : index
    %17 = vector.load %arg10[%c0_16, %c0_17] : memref<2x512xf32, #tpu.memory_space<vmem>>, vector<2x512xf32>
    tpu.vector_store %arg10[%c0_16, %c0_17], %16 {strides = array<i32>} : memref<2x512xf32, #tpu.memory_space<vmem>>, vector<2x512xf32>,
    %c1_i32 = arith.constant 1 : i32
    %18 = arith.cmpi eq, %arg1, %c1_i32 : i32
    %19 = arith.extui %18 : i1 to i32
    %c0_i32_18 = arith.constant 0 : i32
    %20 = arith.cmpi ne, %19, %c0_i32_18 : i32
    scf.if %20 {
      %c0_19 = arith.constant 0 : index
      %c0_20 = arith.constant 0 : index
      %21 = vector.load %arg9[%c0_19, %c0_20] : memref<2x512xf32, #tpu.memory_space<vmem>>, vector<2x512xf32>
      %cst_21 = arith.constant 6.250000e-02 : f32
      %22 = vector.broadcast %cst_21 : f32 to vector<2x512xf32>
      %23 = arith.mulf %21, %22 : vector<2x512xf32>
      %c0_22 = arith.constant 0 : index
      %c0_23 = arith.constant 0 : index
      %24 = vector.load %arg10[%c0_22, %c0_23] : memref<2x512xf32, #tpu.memory_space<vmem>>, vector<2x512xf32>
      %25 = arith.addf %23, %24 : vector<2x512xf32>
      %c0_24 = arith.constant 0 : index
      %c0_25 = arith.constant 0 : index
      %26 = vector.load %arg5[%c0_24, %c0_25] : memref<1x512xf32, #tpu.memory_space<vmem>>, vector<1x512xf32>
      %27 = vector.broadcast %26 : vector<1x512xf32> to vector<2x512xf32>
      %28 = arith.addf %25, %27 : vector<2x512xf32>
      %cst_26 = arith.constant 0.000000e+00 : f32
      %29 = vector.broadcast %cst_26 : f32 to vector<2x512xf32>
      %30 = arith.cmpf ogt, %28, %29 : vector<2x512xf32>
      %cst_27 = arith.constant 0.000000e+00 : f32
      %31 = vector.broadcast %cst_27 : f32 to vector<2x512xf32>
      %32 = arith.minimumf %28, %31 : vector<2x512xf32>
      %33 = math.exp %32 : vector<2x512xf32>
      %cst_28 = arith.constant 1.000000e+00 : f32
      %34 = vector.broadcast %cst_28 : f32 to vector<2x512xf32>
      %35 = arith.subf %33, %34 : vector<2x512xf32>
      %36 = arith.select %30, %28, %35 : vector<2x512xi1>, vector<2x512xf32>
      %c0_29 = arith.constant 0 : index
      %c0_30 = arith.constant 0 : index
      %37 = vector.load %arg6[%c0_29, %c0_30] : memref<1x512xf32, #tpu.memory_space<vmem>>, vector<1x512xf32>
      %38 = vector.broadcast %37 : vector<1x512xf32> to vector<2x512xf32>
      %39 = arith.mulf %36, %38 : vector<2x512xf32>
      %c0_31 = arith.constant 0 : index
      %c0_32 = arith.constant 0 : index
      %40 = vector.load %arg7[%c0_31, %c0_32] : memref<1x512xf32, #tpu.memory_space<vmem>>, vector<1x512xf32>
      %41 = vector.broadcast %40 : vector<1x512xf32> to vector<2x512xf32>
      %42 = arith.addf %39, %41 : vector<2x512xf32>
      %c0_33 = arith.constant 0 : index
      %c0_34 = arith.constant 0 : index
      %43 = vector.load %arg8[%c0_33, %c0_34] : memref<2x512xf32, #tpu.memory_space<vmem>>, vector<2x512xf32>
      tpu.vector_store %arg8[%c0_33, %c0_34], %42 {strides = array<i32>} : memref<2x512xf32, #tpu.memory_space<vmem>>, vector<2x512xf32>,
    } else {
    }
    return
  }
  func.func @transform_0(%arg0: i32, %arg1: i32) -> (i32, i32, i32) {
    %c0_i32 = arith.constant 0 : i32
    %c0_i32_0 = arith.constant 0 : i32
    return %arg0, %arg1, %c0_i32 : i32, i32, i32
  }
  func.func @transform_1(%arg0: i32, %arg1: i32) -> (i32, i32) {
    %c0_i32 = arith.constant 0 : i32
    %c0_i32_0 = arith.constant 0 : i32
    return %arg1, %c0_i32 : i32, i32
  }
  func.func @transform_2(%arg0: i32, %arg1: i32) -> (i32, i32) {
    %c0_i32 = arith.constant 0 : i32
    %c0_i32_0 = arith.constant 0 : i32
    return %arg1, %c0_i32 : i32, i32
  }
  func.func @transform_3(%arg0: i32, %arg1: i32) -> (i32, i32) {
    %c0_i32 = arith.constant 0 : i32
    %c0_i32_0 = arith.constant 0 : i32
    %c0_i32_1 = arith.constant 0 : i32
    return %c0_i32, %c0_i32_0 : i32, i32
  }
  func.func @transform_4(%arg0: i32, %arg1: i32) -> (i32, i32) {
    %c0_i32 = arith.constant 0 : i32
    %c0_i32_0 = arith.constant 0 : i32
    %c0_i32_1 = arith.constant 0 : i32
    return %c0_i32, %c0_i32_0 : i32, i32
  }
  func.func @transform_5(%arg0: i32, %arg1: i32) -> (i32, i32) {
    %c0_i32 = arith.constant 0 : i32
    %c0_i32_0 = arith.constant 0 : i32
    %c0_i32_1 = arith.constant 0 : i32
    return %c0_i32, %c0_i32_0 : i32, i32
  }
  func.func @transform_6(%arg0: i32, %arg1: i32) -> (i32, i32) {
    %c0_i32 = arith.constant 0 : i32
    %c0_i32_0 = arith.constant 0 : i32
    return %arg0, %c0_i32 : i32, i32
  }
}

</mosaic_0001>

<bundles_post_ra>
// kernel: classifie_head.1
= control target key start
LH: loop header
LB: loop body
LE: loop exit
PB: predicated region body
PF: predicated region fallthrough
CT: control target
= control target key end

     0   :  { %11 = vsyncpa [#allocation6], 0  ;;  %s15707_s0 = inlined_call_operand.vmem [shape: f32[2,1920,16], index: 0, kind: input, shape index: {}]   ;;  %s15708_s1 = inlined_call_operand.vmem [shape: bf16[1920,512], index: 1, kind: input, shape index: {}]   ;;  %s15709_s2 = inlined_call_operand.hbm [shape: bf16[1920,512], index: 2, kind: input, shape index: {}]   ;;  %s15710_s3 = inlined_call_operand.vmem [shape: f32[1,512], index: 3, kind: input, shape index: {}]   ;;  %s15711_s4 = inlined_call_operand.vmem [shape: f32[1,512], index: 4, kind: input, shape index: {}]   ;;  %s15712_s5 = inlined_call_operand.vmem [shape: f32[1,512], index: 5, kind: input, shape index: {}]   ;;  %s15713_s6 = inlined_call_operand.vmem [shape: f32[2,512], index: 6, kind: output, shape index: {}]  }
   0x1   :  { %13 = vsyncpa [#allocation6 + $0x1], 0  ;;  %s11939_s21 = smov 0   ;;  %s11941_s22 = smov 0  }
   0x2   :  { %s11943_s23 = smov 0   ;;  %s11945_s24 = smov 0  }
   0x3   :  { %s11947_s25 = smov 0   ;;  %s11949_s26 = smov 0  }
   0x4 LB: > { %s10248_s27 = sadd.s32 4294967295, %s11897_s26   ;;  %s28_s28 = sadd.s32 1, %s11893_s25  ;;  %s11897_s26 = sphi %s11949_s26, %s19_s26   ;;  %s11893_s25 = sphi %s11947_s25, %s15823_s25   ;;  %s11889_s24 = sphi %s11945_s24, %s15822_s24   ;;  %s11885_s23 = sphi %s11943_s23, %s15821_s23   ;;  %s11881_s22 = sphi %s11941_s22, %s15820_s22   ;;  %s11877_s21 = sphi %s11939_s21, %s15819_s21  }
   0x5   : > { %p29_p0 = scmp.ge.s32.totalorder %s28_s28, 2  ;;  %s40_s29 = sadd.s32 1, %s11885_s23 }
   0x6   : > { %p47_p1 = scmp.ne.s32.totalorder %s11885_s23, %s11881_s22  ;;  %p48_p2 = scmp.eq.s32.totalorder %s11897_s26, 0 }
   0x7   : > { %s15825_s28 = smov (%p29_p0, %s28_s28), 0  ;;  %p105_p4 = scmp.ne.s32.totalorder %s11881_s22, %s11877_s21 }
   0x8   : > { %p11975_p3 = por %p48_p2, %p47_p1  ;;  %s36_s7 = ssub.s32 %s11893_s25, %s15825_s28 }
   0x9   : > { %p106_p5 = scmp.eq.s32.totalorder %s10248_s27, 0  ;;  %p38_p6 = scmp.eq.s32.totalorder %s36_s7, 0 }
   0xa   : > { %p10250_p8 = scmp.ge.s32.totalorder %s11897_s26, 2 }
   0xb   : > { %p11982_p7 = por %p106_p5, %p105_p4 }
   0xc   : > { %s11987_s9 = scalar_select %p38_p6, %s11885_s23, %s40_s29  }
   0xd   : > { %223 = sbr.rel (%p10250_p8) target bundleno = 171 (0xab), region = 28 }
  0x14   : > { %226 = sbr.rel (!%p11975_p3) target bundleno = 145 (0x91), region = 32  ;;  %s228_s10 = sand.u32 (%p11975_p3), 1, %s11885_s23  }
  0x15   : > { %s10747_s11 = smul.u32 (%p11975_p3), 960, %s11893_s25 }
  0x16   : > { %s10800_s12 = smul.u32 (%p11975_p3), 1920, %s228_s10 }
  0x17   : > { %s11997_s15 = scalar_lea.vmem (%p11975_p3), %s15707_s0, %s10747_s11 }
  0x18   : > { %v742_v0 = vld [vmem:[%s11997_s15] sm:$0xff] (%p11975_p3)  ;;  %v744_v1 = vld [vmem:[%s11997_s15 + $0x8] sm:$0xff] (%p11975_p3)  ;;  %v746_v2 = vld [vmem:[%s11997_s15 + $0x10] sm:$0xff] (%p11975_p3)  ;;  %s12002_s16 = scalar_lea.vmem (%p11975_p3), [#allocation4], %s10800_s12 }
  0x19   : > { %743 = vst [vmem:[%s12002_s16] sm:$0xff] (%p11975_p3), %v742_v0  ;;  %745 = vst [vmem:[%s12002_s16 + $0x8] sm:$0xff] (%p11975_p3), %v744_v1  ;;  %v748_v3 = vld [vmem:[%s11997_s15 + $0x18] sm:$0xff] (%p11975_p3)  ;;  %v750_v4 = vld [vmem:[%s11997_s15 + $0x20] sm:$0xff] (%p11975_p3) }
  0x1a   : > { %747 = vst [vmem:[%s12002_s16 + $0x10] sm:$0xff] (%p11975_p3), %v746_v2  ;;  %v752_v5 = vld [vmem:[%s11997_s15 + $0x28] sm:$0xff] (%p11975_p3)  ;;  %749 = vst [vmem:[%s12002_s16 + $0x18] sm:$0xff] (%p11975_p3), %v748_v3  ;;  %v754_v6 = vld [vmem:[%s11997_s15 + $0x30] sm:$0xff] (%p11975_p3) }
  0x1b   : > { %751 = vst [vmem:[%s12002_s16 + $0x20] sm:$0xff] %v750_v4  ;;  %753 = vst [vmem:[%s12002_s16 + $0x28] sm:$0xff] %v752_v5  ;;  %v756_v7 = vld [vmem:[%s11997_s15 + $0x38] sm:$0xff]  ;;  %v758_v8 = vld [vmem:[%s11997_s15 + $0x40] sm:$0xff] }
  0x1c   : > { %755 = vst [vmem:[%s12002_s16 + $0x30] sm:$0xff] %v754_v6  ;;  %757 = vst [vmem:[%s12002_s16 + $0x38] sm:$0xff] %v756_v7  ;;  %v760_v9 = vld [vmem:[%s11997_s15 + $0x48] sm:$0xff]  ;;  %v762_v10 = vld [vmem:[%s11997_s15 + $0x50] sm:$0xff] }
  0x1d   : > { %759 = vst [vmem:[%s12002_s16 + $0x40] sm:$0xff] %v758_v8  ;;  %v764_v11 = vld [vmem:[%s11997_s15 + $0x58] sm:$0xff]  ;;  %761 = vst [vmem:[%s12002_s16 + $0x48] sm:$0xff] %v760_v9  ;;  %v766_v12 = vld [vmem:[%s11997_s15 + $0x60] sm:$0xff] }
  0x1e   : > { %763 = vst [vmem:[%s12002_s16 + $0x50] sm:$0xff] %v762_v10  ;;  %765 = vst [vmem:[%s12002_s16 + $0x58] sm:$0xff] %v764_v11  ;;  %v768_v13 = vld [vmem:[%s11997_s15 + $0x68] sm:$0xff]  ;;  %v770_v14 = vld [vmem:[%s11997_s15 + $0x70] sm:$0xff] }
  0x1f   : > { %767 = vst [vmem:[%s12002_s16 + $0x60] sm:$0xff] %v766_v12  ;;  %769 = vst [vmem:[%s12002_s16 + $0x68] sm:$0xff] %v768_v13  ;;  %v772_v15 = vld [vmem:[%s11997_s15 + $0x78] sm:$0xff]  ;;  %v774_v16 = vld [vmem:[%s11997_s15 + $0x80] sm:$0xff] }
  0x20   : > { %771 = vst [vmem:[%s12002_s16 + $0x70] sm:$0xff] %v770_v14  ;;  %v776_v17 = vld [vmem:[%s11997_s15 + $0x88] sm:$0xff]  ;;  %773 = vst [vmem:[%s12002_s16 + $0x78] sm:$0xff] %v772_v15  ;;  %v778_v18 = vld [vmem:[%s11997_s15 + $0x90] sm:$0xff] }
  0x21   : > { %775 = vst [vmem:[%s12002_s16 + $0x80] sm:$0xff] %v774_v16  ;;  %777 = vst [vmem:[%s12002_s16 + $0x88] sm:$0xff] %v776_v17  ;;  %v780_v19 = vld [vmem:[%s11997_s15 + $0x98] sm:$0xff]  ;;  %v782_v20 = vld [vmem:[%s11997_s15 + $0xa0] sm:$0xff] }
  0x22   : > { %779 = vst [vmem:[%s12002_s16 + $0x90] sm:$0xff] %v778_v18  ;;  %781 = vst [vmem:[%s12002_s16 + $0x98] sm:$0xff] %v780_v19  ;;  %v784_v21 = vld [vmem:[%s11997_s15 + $0xa8] sm:$0xff]  ;;  %v786_v22 = vld [vmem:[%s11997_s15 + $0xb0] sm:$0xff] }
  0x23   : > { %783 = vst [vmem:[%s12002_s16 + $0xa0] sm:$0xff] %v782_v20  ;;  %v788_v23 = vld [vmem:[%s11997_s15 + $0xb8] sm:$0xff]  ;;  %785 = vst [vmem:[%s12002_s16 + $0xa8] sm:$0xff] %v784_v21  ;;  %v790_v24 = vld [vmem:[%s11997_s15 + $0xc0] sm:$0xff] }
  0x24   : > { %787 = vst [vmem:[%s12002_s16 + $0xb0] sm:$0xff] %v786_v22  ;;  %789 = vst [vmem:[%s12002_s16 + $0xb8] sm:$0xff] %v788_v23  ;;  %v792_v25 = vld [vmem:[%s11997_s15 + $0xc8] sm:$0xff]  ;;  %v794_v26 = vld [vmem:[%s11997_s15 + $0xd0] sm:$0xff] }
  0x25   : > { %791 = vst [vmem:[%s12002_s16 + $0xc0] sm:$0xff] %v790_v24  ;;  %793 = vst [vmem:[%s12002_s16 + $0xc8] sm:$0xff] %v792_v25  ;;  %v796_v27 = vld [vmem:[%s11997_s15 + $0xd8] sm:$0xff]  ;;  %v798_v28 = vld [vmem:[%s11997_s15 + $0xe0] sm:$0xff] }
  0x26   : > { %795 = vst [vmem:[%s12002_s16 + $0xd0] sm:$0xff] %v794_v26  ;;  %v800_v29 = vld [vmem:[%s11997_s15 + $0xe8] sm:$0xff]  ;;  %797 = vst [vmem:[%s12002_s16 + $0xd8] sm:$0xff] %v796_v27  ;;  %v802_v30 = vld [vmem:[%s11997_s15 + $0xf0] sm:$0xff] }
  0x27   : > { %799 = vst [vmem:[%s12002_s16 + $0xe0] sm:$0xff] %v798_v28  ;;  %801 = vst [vmem:[%s12002_s16 + $0xe8] sm:$0xff] %v800_v29  ;;  %v804_v31 = vld [vmem:[%s11997_s15 + $0xf8] sm:$0xff]  ;;  %v806_v32 = vld [vmem:[%s11997_s15 + $0x100] sm:$0xff] }
  0x28   : > { %803 = vst [vmem:[%s12002_s16 + $0xf0] sm:$0xff] %v802_v30  ;;  %805 = vst [vmem:[%s12002_s16 + $0xf8] sm:$0xff] %v804_v31  ;;  %v808_v33 = vld [vmem:[%s11997_s15 + $0x108] sm:$0xff]  ;;  %v810_v34 = vld [vmem:[%s11997_s15 + $0x110] sm:$0xff] }
  0x29   : > { %807 = vst [vmem:[%s12002_s16 + $0x100] sm:$0xff] %v806_v32  ;;  %v812_v35 = vld [vmem:[%s11997_s15 + $0x118] sm:$0xff]  ;;  %809 = vst [vmem:[%s12002_s16 + $0x108] sm:$0xff] %v808_v33  ;;  %v814_v36 = vld [vmem:[%s11997_s15 + $0x120] sm:$0xff] }
  0x2a   : > { %811 = vst [vmem:[%s12002_s16 + $0x110] sm:$0xff] %v810_v34  ;;  %813 = vst [vmem:[%s12002_s16 + $0x118] sm:$0xff] %v812_v35  ;;  %v816_v37 = vld [vmem:[%s11997_s15 + $0x128] sm:$0xff]  ;;  %v818_v38 = vld [vmem:[%s11997_s15 + $0x130] sm:$0xff] }
  0x2b   : > { %815 = vst [vmem:[%s12002_s16 + $0x120] sm:$0xff] %v814_v36  ;;  %817 = vst [vmem:[%s12002_s16 + $0x128] sm:$0xff] %v816_v37  ;;  %v820_v39 = vld [vmem:[%s11997_s15 + $0x138] sm:$0xff]  ;;  %v822_v40 = vld [vmem:[%s11997_s15 + $0x140] sm:$0xff] }
  0x2c   : > { %819 = vst [vmem:[%s12002_s16 + $0x130] sm:$0xff] %v818_v38  ;;  %v824_v41 = vld [vmem:[%s11997_s15 + $0x148] sm:$0xff]  ;;  %821 = vst [vmem:[%s12002_s16 + $0x138] sm:$0xff] %v820_v39  ;;  %v826_v42 = vld [vmem:[%s11997_s15 + $0x150] sm:$0xff] }
  0x2d   : > { %823 = vst [vmem:[%s12002_s16 + $0x140] sm:$0xff] %v822_v40  ;;  %825 = vst [vmem:[%s12002_s16 + $0x148] sm:$0xff] %v824_v41  ;;  %v828_v43 = vld [vmem:[%s11997_s15 + $0x158] sm:$0xff]  ;;  %v830_v44 = vld [vmem:[%s11997_s15 + $0x160] sm:$0xff] }
  0x2e   : > { %827 = vst [vmem:[%s12002_s16 + $0x150] sm:$0xff] %v826_v42  ;;  %829 = vst [vmem:[%s12002_s16 + $0x158] sm:$0xff] %v828_v43  ;;  %v832_v45 = vld [vmem:[%s11997_s15 + $0x168] sm:$0xff]  ;;  %v834_v46 = vld [vmem:[%s11997_s15 + $0x170] sm:$0xff] }
  0x2f   : > { %831 = vst [vmem:[%s12002_s16 + $0x160] sm:$0xff] %v830_v44  ;;  %v836_v47 = vld [vmem:[%s11997_s15 + $0x178] sm:$0xff]  ;;  %833 = vst [vmem:[%s12002_s16 + $0x168] sm:$0xff] %v832_v45  ;;  %v838_v48 = vld [vmem:[%s11997_s15 + $0x180] sm:$0xff] }
  0x30   : > { %835 = vst [vmem:[%s12002_s16 + $0x170] sm:$0xff] %v834_v46  ;;  %837 = vst [vmem:[%s12002_s16 + $0x178] sm:$0xff] %v836_v47  ;;  %v840_v49 = vld [vmem:[%s11997_s15 + $0x188] sm:$0xff]  ;;  %v842_v50 = vld [vmem:[%s11997_s15 + $0x190] sm:$0xff] }
  0x31   : > { %839 = vst [vmem:[%s12002_s16 + $0x180] sm:$0xff] %v838_v48  ;;  %841 = vst [vmem:[%s12002_s16 + $0x188] sm:$0xff] %v840_v49  ;;  %v844_v51 = vld [vmem:[%s11997_s15 + $0x198] sm:$0xff]  ;;  %v846_v52 = vld [vmem:[%s11997_s15 + $0x1a0] sm:$0xff] }
  0x32   : > { %843 = vst [vmem:[%s12002_s16 + $0x190] sm:$0xff] %v842_v50  ;;  %v848_v53 = vld [vmem:[%s11997_s15 + $0x1a8] sm:$0xff]  ;;  %845 = vst [vmem:[%s12002_s16 + $0x198] sm:$0xff] %v844_v51  ;;  %v850_v54 = vld [vmem:[%s11997_s15 + $0x1b0] sm:$0xff] }
  0x33   : > { %847 = vst [vmem:[%s12002_s16 + $0x1a0] sm:$0xff] %v846_v52  ;;  %849 = vst [vmem:[%s12002_s16 + $0x1a8] sm:$0xff] %v848_v53  ;;  %v852_v55 = vld [vmem:[%s11997_s15 + $0x1b8] sm:$0xff]  ;;  %v854_v56 = vld [vmem:[%s11997_s15 + $0x1c0] sm:$0xff] }
  0x34   : > { %851 = vst [vmem:[%s12002_s16 + $0x1b0] sm:$0xff] %v850_v54  ;;  %853 = vst [vmem:[%s12002_s16 + $0x1b8] sm:$0xff] %v852_v55  ;;  %v856_v57 = vld [vmem:[%s11997_s15 + $0x1c8] sm:$0xff]  ;;  %v858_v58 = vld [vmem:[%s11997_s15 + $0x1d0] sm:$0xff] }
  0x35   : > { %855 = vst [vmem:[%s12002_s16 + $0x1c0] sm:$0xff] %v854_v56  ;;  %v860_v59 = vld [vmem:[%s11997_s15 + $0x1d8] sm:$0xff]  ;;  %857 = vst [vmem:[%s12002_s16 + $0x1c8] sm:$0xff] %v856_v57  ;;  %v862_v60 = vld [vmem:[%s11997_s15 + $0x1e0] sm:$0xff] }
  0x36   : > { %859 = vst [vmem:[%s12002_s16 + $0x1d0] sm:$0xff] %v858_v58  ;;  %861 = vst [vmem:[%s12002_s16 + $0x1d8] sm:$0xff] %v860_v59  ;;  %v864_v61 = vld [vmem:[%s11997_s15 + $0x1e8] sm:$0xff]  ;;  %v866_v62 = vld [vmem:[%s11997_s15 + $0x1f0] sm:$0xff] }
  0x37   : > { %863 = vst [vmem:[%s12002_s16 + $0x1e0] sm:$0xff] %v862_v60  ;;  %865 = vst [vmem:[%s12002_s16 + $0x1e8] sm:$0xff] %v864_v61  ;;  %v868_v63 = vld [vmem:[%s11997_s15 + $0x1f8] sm:$0xff]  ;;  %v870_v0 = vld [vmem:[%s11997_s15 + $0x200] sm:$0xff] }
  0x38   : > { %867 = vst [vmem:[%s12002_s16 + $0x1f0] sm:$0xff] %v866_v62  ;;  %v872_v1 = vld [vmem:[%s11997_s15 + $0x208] sm:$0xff]  ;;  %869 = vst [vmem:[%s12002_s16 + $0x1f8] sm:$0xff] %v868_v63  ;;  %v874_v2 = vld [vmem:[%s11997_s15 + $0x210] sm:$0xff] }
  0x39   : > { %871 = vst [vmem:[%s12002_s16 + $0x200] sm:$0xff] %v870_v0  ;;  %873 = vst [vmem:[%s12002_s16 + $0x208] sm:$0xff] %v872_v1  ;;  %v876_v3 = vld [vmem:[%s11997_s15 + $0x218] sm:$0xff]  ;;  %v878_v4 = vld [vmem:[%s11997_s15 + $0x220] sm:$0xff] }
  0x3a   : > { %875 = vst [vmem:[%s12002_s16 + $0x210] sm:$0xff] %v874_v2  ;;  %877 = vst [vmem:[%s12002_s16 + $0x218] sm:$0xff] %v876_v3  ;;  %v880_v5 = vld [vmem:[%s11997_s15 + $0x228] sm:$0xff]  ;;  %v882_v6 = vld [vmem:[%s11997_s15 + $0x230] sm:$0xff] }
  0x3b   : > { %879 = vst [vmem:[%s12002_s16 + $0x220] sm:$0xff] %v878_v4  ;;  %v884_v7 = vld [vmem:[%s11997_s15 + $0x238] sm:$0xff]  ;;  %881 = vst [vmem:[%s12002_s16 + $0x228] sm:$0xff] %v880_v5  ;;  %v886_v8 = vld [vmem:[%s11997_s15 + $0x240] sm:$0xff] }
  0x3c   : > { %883 = vst [vmem:[%s12002_s16 + $0x230] sm:$0xff] %v882_v6  ;;  %885 = vst [vmem:[%s12002_s16 + $0x238] sm:$0xff] %v884_v7  ;;  %v888_v9 = vld [vmem:[%s11997_s15 + $0x248] sm:$0xff]  ;;  %v890_v10 = vld [vmem:[%s11997_s15 + $0x250] sm:$0xff] }
  0x3d   : > { %887 = vst [vmem:[%s12002_s16 + $0x240] sm:$0xff] %v886_v8  ;;  %889 = vst [vmem:[%s12002_s16 + $0x248] sm:$0xff] %v888_v9  ;;  %v892_v11 = vld [vmem:[%s11997_s15 + $0x258] sm:$0xff]  ;;  %v894_v12 = vld [vmem:[%s11997_s15 + $0x260] sm:$0xff] }
  0x3e   : > { %891 = vst [vmem:[%s12002_s16 + $0x250] sm:$0xff] %v890_v10  ;;  %v896_v13 = vld [vmem:[%s11997_s15 + $0x268] sm:$0xff]  ;;  %893 = vst [vmem:[%s12002_s16 + $0x258] sm:$0xff] %v892_v11  ;;  %v898_v14 = vld [vmem:[%s11997_s15 + $0x270] sm:$0xff] }
  0x3f   : > { %895 = vst [vmem:[%s12002_s16 + $0x260] sm:$0xff] %v894_v12  ;;  %897 = vst [vmem:[%s12002_s16 + $0x268] sm:$0xff] %v896_v13  ;;  %v900_v15 = vld [vmem:[%s11997_s15 + $0x278] sm:$0xff]  ;;  %v902_v16 = vld [vmem:[%s11997_s15 + $0x280] sm:$0xff] }
  0x40   : > { %899 = vst [vmem:[%s12002_s16 + $0x270] sm:$0xff] %v898_v14  ;;  %901 = vst [vmem:[%s12002_s16 + $0x278] sm:$0xff] %v900_v15  ;;  %v904_v17 = vld [vmem:[%s11997_s15 + $0x288] sm:$0xff]  ;;  %v906_v18 = vld [vmem:[%s11997_s15 + $0x290] sm:$0xff] }
  0x41   : > { %903 = vst [vmem:[%s12002_s16 + $0x280] sm:$0xff] %v902_v16  ;;  %v908_v19 = vld [vmem:[%s11997_s15 + $0x298] sm:$0xff]  ;;  %905 = vst [vmem:[%s12002_s16 + $0x288] sm:$0xff] %v904_v17  ;;  %v910_v20 = vld [vmem:[%s11997_s15 + $0x2a0] sm:$0xff] }
  0x42   : > { %907 = vst [vmem:[%s12002_s16 + $0x290] sm:$0xff] %v906_v18  ;;  %909 = vst [vmem:[%s12002_s16 + $0x298] sm:$0xff] %v908_v19  ;;  %v912_v21 = vld [vmem:[%s11997_s15 + $0x2a8] sm:$0xff]  ;;  %v914_v22 = vld [vmem:[%s11997_s15 + $0x2b0] sm:$0xff] }
  0x43   : > { %911 = vst [vmem:[%s12002_s16 + $0x2a0] sm:$0xff] %v910_v20  ;;  %913 = vst [vmem:[%s12002_s16 + $0x2a8] sm:$0xff] %v912_v21  ;;  %v916_v23 = vld [vmem:[%s11997_s15 + $0x2b8] sm:$0xff]  ;;  %v918_v24 = vld [vmem:[%s11997_s15 + $0x2c0] sm:$0xff] }
  0x44   : > { %915 = vst [vmem:[%s12002_s16 + $0x2b0] sm:$0xff] %v914_v22  ;;  %v920_v25 = vld [vmem:[%s11997_s15 + $0x2c8] sm:$0xff]  ;;  %917 = vst [vmem:[%s12002_s16 + $0x2b8] sm:$0xff] %v916_v23  ;;  %v922_v26 = vld [vmem:[%s11997_s15 + $0x2d0] sm:$0xff] }
  0x45   : > { %919 = vst [vmem:[%s12002_s16 + $0x2c0] sm:$0xff] %v918_v24  ;;  %921 = vst [vmem:[%s12002_s16 + $0x2c8] sm:$0xff] %v920_v25  ;;  %v924_v27 = vld [vmem:[%s11997_s15 + $0x2d8] sm:$0xff]  ;;  %v926_v28 = vld [vmem:[%s11997_s15 + $0x2e0] sm:$0xff] }
  0x46   : > { %923 = vst [vmem:[%s12002_s16 + $0x2d0] sm:$0xff] %v922_v26  ;;  %925 = vst [vmem:[%s12002_s16 + $0x2d8] sm:$0xff] %v924_v27  ;;  %v928_v29 = vld [vmem:[%s11997_s15 + $0x2e8] sm:$0xff]  ;;  %v930_v30 = vld [vmem:[%s11997_s15 + $0x2f0] sm:$0xff] }
  0x47   : > { %927 = vst [vmem:[%s12002_s16 + $0x2e0] sm:$0xff] %v926_v28  ;;  %v932_v31 = vld [vmem:[%s11997_s15 + $0x2f8] sm:$0xff]  ;;  %929 = vst [vmem:[%s12002_s16 + $0x2e8] sm:$0xff] %v928_v29  ;;  %v934_v32 = vld [vmem:[%s11997_s15 + $0x300] sm:$0xff] }
  0x48   : > { %931 = vst [vmem:[%s12002_s16 + $0x2f0] sm:$0xff] %v930_v30  ;;  %933 = vst [vmem:[%s12002_s16 + $0x2f8] sm:$0xff] %v932_v31  ;;  %v936_v33 = vld [vmem:[%s11997_s15 + $0x308] sm:$0xff]  ;;  %v938_v34 = vld [vmem:[%s11997_s15 + $0x310] sm:$0xff] }
  0x49   : > { %935 = vst [vmem:[%s12002_s16 + $0x300] sm:$0xff] %v934_v32  ;;  %937 = vst [vmem:[%s12002_s16 + $0x308] sm:$0xff] %v936_v33  ;;  %v940_v35 = vld [vmem:[%s11997_s15 + $0x318] sm:$0xff]  ;;  %v942_v36 = vld [vmem:[%s11997_s15 + $0x320] sm:$0xff] }
  0x4a   : > { %939 = vst [vmem:[%s12002_s16 + $0x310] sm:$0xff] %v938_v34  ;;  %v944_v37 = vld [vmem:[%s11997_s15 + $0x328] sm:$0xff]  ;;  %941 = vst [vmem:[%s12002_s16 + $0x318] sm:$0xff] %v940_v35  ;;  %v946_v38 = vld [vmem:[%s11997_s15 + $0x330] sm:$0xff] }
  0x4b   : > { %943 = vst [vmem:[%s12002_s16 + $0x320] sm:$0xff] %v942_v36  ;;  %945 = vst [vmem:[%s12002_s16 + $0x328] sm:$0xff] %v944_v37  ;;  %v948_v39 = vld [vmem:[%s11997_s15 + $0x338] sm:$0xff]  ;;  %v950_v40 = vld [vmem:[%s11997_s15 + $0x340] sm:$0xff] }
  0x4c   : > { %947 = vst [vmem:[%s12002_s16 + $0x330] sm:$0xff] %v946_v38  ;;  %949 = vst [vmem:[%s12002_s16 + $0x338] sm:$0xff] %v948_v39  ;;  %v952_v41 = vld [vmem:[%s11997_s15 + $0x348] sm:$0xff]  ;;  %v954_v42 = vld [vmem:[%s11997_s15 + $0x350] sm:$0xff] }
  0x4d   : > { %951 = vst [vmem:[%s12002_s16 + $0x340] sm:$0xff] %v950_v40  ;;  %v956_v43 = vld [vmem:[%s11997_s15 + $0x358] sm:$0xff]  ;;  %953 = vst [vmem:[%s12002_s16 + $0x348] sm:$0xff] %v952_v41  ;;  %v958_v44 = vld [vmem:[%s11997_s15 + $0x360] sm:$0xff] }
  0x4e   : > { %955 = vst [vmem:[%s12002_s16 + $0x350] sm:$0xff] %v954_v42  ;;  %957 = vst [vmem:[%s12002_s16 + $0x358] sm:$0xff] %v956_v43  ;;  %v960_v45 = vld [vmem:[%s11997_s15 + $0x368] sm:$0xff]  ;;  %v962_v46 = vld [vmem:[%s11997_s15 + $0x370] sm:$0xff] }
  0x4f   : > { %959 = vst [vmem:[%s12002_s16 + $0x360] sm:$0xff] %v958_v44  ;;  %961 = vst [vmem:[%s12002_s16 + $0x368] sm:$0xff] %v960_v45  ;;  %v964_v47 = vld [vmem:[%s11997_s15 + $0x378] sm:$0xff]  ;;  %v966_v48 = vld [vmem:[%s11997_s15 + $0x380] sm:$0xff] }
  0x50   : > { %963 = vst [vmem:[%s12002_s16 + $0x370] sm:$0xff] %v962_v46  ;;  %v968_v49 = vld [vmem:[%s11997_s15 + $0x388] sm:$0xff]  ;;  %965 = vst [vmem:[%s12002_s16 + $0x378] sm:$0xff] %v964_v47  ;;  %v970_v50 = vld [vmem:[%s11997_s15 + $0x390] sm:$0xff] }
  0x51   : > { %967 = vst [vmem:[%s12002_s16 + $0x380] sm:$0xff] %v966_v48  ;;  %969 = vst [vmem:[%s12002_s16 + $0x388] sm:$0xff] %v968_v49  ;;  %v972_v51 = vld [vmem:[%s11997_s15 + $0x398] sm:$0xff]  ;;  %v974_v52 = vld [vmem:[%s11997_s15 + $0x3a0] sm:$0xff] }
  0x52   : > { %971 = vst [vmem:[%s12002_s16 + $0x390] sm:$0xff] %v970_v50  ;;  %973 = vst [vmem:[%s12002_s16 + $0x398] sm:$0xff] %v972_v51  ;;  %v976_v53 = vld [vmem:[%s11997_s15 + $0x3a8] sm:$0xff]  ;;  %v978_v54 = vld [vmem:[%s11997_s15 + $0x3b0] sm:$0xff] }
  0x53   : > { %975 = vst [vmem:[%s12002_s16 + $0x3a0] sm:$0xff] %v974_v52  ;;  %v980_v55 = vld [vmem:[%s11997_s15 + $0x3b8] sm:$0xff]  ;;  %977 = vst [vmem:[%s12002_s16 + $0x3a8] sm:$0xff] %v976_v53  ;;  %v982_v56 = vld [vmem:[%s11997_s15 + $0x780] sm:$0xff] }
  0x54   : > { %979 = vst [vmem:[%s12002_s16 + $0x3b0] sm:$0xff] %v978_v54  ;;  %981 = vst [vmem:[%s12002_s16 + $0x3b8] sm:$0xff] %v980_v55  ;;  %v984_v57 = vld [vmem:[%s11997_s15 + $0x788] sm:$0xff]  ;;  %v986_v58 = vld [vmem:[%s11997_s15 + $0x790] sm:$0xff] }
  0x55   : > { %983 = vst [vmem:[%s12002_s16 + $0x3c0] sm:$0xff] %v982_v56  ;;  %985 = vst [vmem:[%s12002_s16 + $0x3c8] sm:$0xff] %v984_v57  ;;  %v988_v59 = vld [vmem:[%s11997_s15 + $0x798] sm:$0xff]  ;;  %v990_v60 = vld [vmem:[%s11997_s15 + $0x7a0] sm:$0xff] }
  0x56   : > { %987 = vst [vmem:[%s12002_s16 + $0x3d0] sm:$0xff] %v986_v58  ;;  %v992_v61 = vld [vmem:[%s11997_s15 + $0x7a8] sm:$0xff]  ;;  %989 = vst [vmem:[%s12002_s16 + $0x3d8] sm:$0xff] %v988_v59  ;;  %v994_v62 = vld [vmem:[%s11997_s15 + $0x7b0] sm:$0xff] }
  0x57   : > { %991 = vst [vmem:[%s12002_s16 + $0x3e0] sm:$0xff] %v990_v60  ;;  %993 = vst [vmem:[%s12002_s16 + $0x3e8] sm:$0xff] %v992_v61  ;;  %v996_v63 = vld [vmem:[%s11997_s15 + $0x7b8] sm:$0xff]  ;;  %v998_v0 = vld [vmem:[%s11997_s15 + $0x7c0] sm:$0xff] }
  0x58   : > { %995 = vst [vmem:[%s12002_s16 + $0x3f0] sm:$0xff] %v994_v62  ;;  %997 = vst [vmem:[%s12002_s16 + $0x3f8] sm:$0xff] %v996_v63  ;;  %v1000_v1 = vld [vmem:[%s11997_s15 + $0x7c8] sm:$0xff]  ;;  %v1002_v2 = vld [vmem:[%s11997_s15 + $0x7d0] sm:$0xff] }
  0x59   : > { %999 = vst [vmem:[%s12002_s16 + $0x400] sm:$0xff] %v998_v0  ;;  %v1004_v3 = vld [vmem:[%s11997_s15 + $0x7d8] sm:$0xff]  ;;  %1001 = vst [vmem:[%s12002_s16 + $0x408] sm:$0xff] %v1000_v1  ;;  %v1006_v4 = vld [vmem:[%s11997_s15 + $0x7e0] sm:$0xff] }
  0x5a   : > { %1003 = vst [vmem:[%s12002_s16 + $0x410] sm:$0xff] %v1002_v2  ;;  %1005 = vst [vmem:[%s12002_s16 + $0x418] sm:$0xff] %v1004_v3  ;;  %v1008_v5 = vld [vmem:[%s11997_s15 + $0x7e8] sm:$0xff]  ;;  %v1010_v6 = vld [vmem:[%s11997_s15 + $0x7f0] sm:$0xff] }
  0x5b   : > { %1007 = vst [vmem:[%s12002_s16 + $0x420] sm:$0xff] %v1006_v4  ;;  %1009 = vst [vmem:[%s12002_s16 + $0x428] sm:$0xff] %v1008_v5  ;;  %v1012_v7 = vld [vmem:[%s11997_s15 + $0x7f8] sm:$0xff]  ;;  %v1014_v8 = vld [vmem:[%s11997_s15 + $0x800] sm:$0xff] }
  0x5c   : > { %1011 = vst [vmem:[%s12002_s16 + $0x430] sm:$0xff] %v1010_v6  ;;  %v1016_v9 = vld [vmem:[%s11997_s15 + $0x808] sm:$0xff]  ;;  %1013 = vst [vmem:[%s12002_s16 + $0x438] sm:$0xff] %v1012_v7  ;;  %v1018_v10 = vld [vmem:[%s11997_s15 + $0x810] sm:$0xff] }
  0x5d   : > { %1015 = vst [vmem:[%s12002_s16 + $0x440] sm:$0xff] %v1014_v8  ;;  %1017 = vst [vmem:[%s12002_s16 + $0x448] sm:$0xff] %v1016_v9  ;;  %v1020_v11 = vld [vmem:[%s11997_s15 + $0x818] sm:$0xff]  ;;  %v1022_v12 = vld [vmem:[%s11997_s15 + $0x820] sm:$0xff] }
  0x5e   : > { %1019 = vst [vmem:[%s12002_s16 + $0x450] sm:$0xff] %v1018_v10  ;;  %1021 = vst [vmem:[%s12002_s16 + $0x458] sm:$0xff] %v1020_v11  ;;  %v1024_v13 = vld [vmem:[%s11997_s15 + $0x828] sm:$0xff]  ;;  %v1026_v14 = vld [vmem:[%s11997_s15 + $0x830] sm:$0xff] }
  0x5f   : > { %1023 = vst [vmem:[%s12002_s16 + $0x460] sm:$0xff] %v1022_v12  ;;  %v1028_v15 = vld [vmem:[%s11997_s15 + $0x838] sm:$0xff]  ;;  %1025 = vst [vmem:[%s12002_s16 + $0x468] sm:$0xff] %v1024_v13  ;;  %v1030_v16 = vld [vmem:[%s11997_s15 + $0x840] sm:$0xff] }
  0x60   : > { %1027 = vst [vmem:[%s12002_s16 + $0x470] sm:$0xff] %v1026_v14  ;;  %1029 = vst [vmem:[%s12002_s16 + $0x478] sm:$0xff] %v1028_v15  ;;  %v1032_v17 = vld [vmem:[%s11997_s15 + $0x848] sm:$0xff]  ;;  %v1034_v18 = vld [vmem:[%s11997_s15 + $0x850] sm:$0xff] }
  0x61   : > { %1031 = vst [vmem:[%s12002_s16 + $0x480] sm:$0xff] %v1030_v16  ;;  %1033 = vst [vmem:[%s12002_s16 + $0x488] sm:$0xff] %v1032_v17  ;;  %v1036_v19 = vld [vmem:[%s11997_s15 + $0x858] sm:$0xff]  ;;  %v1038_v20 = vld [vmem:[%s11997_s15 + $0x860] sm:$0xff] }
  0x62   : > { %1035 = vst [vmem:[%s12002_s16 + $0x490] sm:$0xff] %v1034_v18  ;;  %v1040_v21 = vld [vmem:[%s11997_s15 + $0x868] sm:$0xff]  ;;  %1037 = vst [vmem:[%s12002_s16 + $0x498] sm:$0xff] %v1036_v19  ;;  %v1042_v22 = vld [vmem:[%s11997_s15 + $0x870] sm:$0xff] }
  0x63   : > { %1039 = vst [vmem:[%s12002_s16 + $0x4a0] sm:$0xff] %v1038_v20  ;;  %1041 = vst [vmem:[%s12002_s16 + $0x4a8] sm:$0xff] %v1040_v21  ;;  %v1044_v23 = vld [vmem:[%s11997_s15 + $0x878] sm:$0xff]  ;;  %v1046_v24 = vld [vmem:[%s11997_s15 + $0x880] sm:$0xff] }
  0x64   : > { %1043 = vst [vmem:[%s12002_s16 + $0x4b0] sm:$0xff] %v1042_v22  ;;  %1045 = vst [vmem:[%s12002_s16 + $0x4b8] sm:$0xff] %v1044_v23  ;;  %v1048_v25 = vld [vmem:[%s11997_s15 + $0x888] sm:$0xff]  ;;  %v1050_v26 = vld [vmem:[%s11997_s15 + $0x890] sm:$0xff] }
  0x65   : > { %1047 = vst [vmem:[%s12002_s16 + $0x4c0] sm:$0xff] %v1046_v24  ;;  %v1052_v27 = vld [vmem:[%s11997_s15 + $0x898] sm:$0xff]  ;;  %1049 = vst [vmem:[%s12002_s16 + $0x4c8] sm:$0xff] %v1048_v25  ;;  %v1054_v28 = vld [vmem:[%s11997_s15 + $0x8a0] sm:$0xff] }
  0x66   : > { %1051 = vst [vmem:[%s12002_s16 + $0x4d0] sm:$0xff] %v1050_v26  ;;  %1053 = vst [vmem:[%s12002_s16 + $0x4d8] sm:$0xff] %v1052_v27  ;;  %v1056_v29 = vld [vmem:[%s11997_s15 + $0x8a8] sm:$0xff]  ;;  %v1058_v30 = vld [vmem:[%s11997_s15 + $0x8b0] sm:$0xff] }
  0x67   : > { %1055 = vst [vmem:[%s12002_s16 + $0x4e0] sm:$0xff] %v1054_v28  ;;  %1057 = vst [vmem:[%s12002_s16 + $0x4e8] sm:$0xff] %v1056_v29  ;;  %v1060_v31 = vld [vmem:[%s11997_s15 + $0x8b8] sm:$0xff]  ;;  %v1062_v32 = vld [vmem:[%s11997_s15 + $0x8c0] sm:$0xff] }
  0x68   : > { %1059 = vst [vmem:[%s12002_s16 + $0x4f0] sm:$0xff] %v1058_v30  ;;  %v1064_v33 = vld [vmem:[%s11997_s15 + $0x8c8] sm:$0xff]  ;;  %1061 = vst [vmem:[%s12002_s16 + $0x4f8] sm:$0xff] %v1060_v31  ;;  %v1066_v34 = vld [vmem:[%s11997_s15 + $0x8d0] sm:$0xff] }
  0x69   : > { %1063 = vst [vmem:[%s12002_s16 + $0x500] sm:$0xff] %v1062_v32  ;;  %1065 = vst [vmem:[%s12002_s16 + $0x508] sm:$0xff] %v1064_v33  ;;  %v1068_v35 = vld [vmem:[%s11997_s15 + $0x8d8] sm:$0xff]  ;;  %v1070_v36 = vld [vmem:[%s11997_s15 + $0x8e0] sm:$0xff] }
  0x6a   : > { %1067 = vst [vmem:[%s12002_s16 + $0x510] sm:$0xff] %v1066_v34  ;;  %1069 = vst [vmem:[%s12002_s16 + $0x518] sm:$0xff] %v1068_v35  ;;  %v1072_v37 = vld [vmem:[%s11997_s15 + $0x8e8] sm:$0xff]  ;;  %v1074_v38 = vld [vmem:[%s11997_s15 + $0x8f0] sm:$0xff] }
  0x6b   : > { %1071 = vst [vmem:[%s12002_s16 + $0x520] sm:$0xff] %v1070_v36  ;;  %v1076_v39 = vld [vmem:[%s11997_s15 + $0x8f8] sm:$0xff]  ;;  %1073 = vst [vmem:[%s12002_s16 + $0x528] sm:$0xff] %v1072_v37  ;;  %v1078_v40 = vld [vmem:[%s11997_s15 + $0x900] sm:$0xff] }
  0x6c   : > { %1075 = vst [vmem:[%s12002_s16 + $0x530] sm:$0xff] %v1074_v38  ;;  %1077 = vst [vmem:[%s12002_s16 + $0x538] sm:$0xff] %v1076_v39  ;;  %v1080_v41 = vld [vmem:[%s11997_s15 + $0x908] sm:$0xff]  ;;  %v1082_v42 = vld [vmem:[%s11997_s15 + $0x910] sm:$0xff] }
  0x6d   : > { %1079 = vst [vmem:[%s12002_s16 + $0x540] sm:$0xff] %v1078_v40  ;;  %1081 = vst [vmem:[%s12002_s16 + $0x548] sm:$0xff] %v1080_v41  ;;  %v1084_v43 = vld [vmem:[%s11997_s15 + $0x918] sm:$0xff]  ;;  %v1086_v44 = vld [vmem:[%s11997_s15 + $0x920] sm:$0xff] }
  0x6e   : > { %1083 = vst [vmem:[%s12002_s16 + $0x550] sm:$0xff] %v1082_v42  ;;  %v1088_v45 = vld [vmem:[%s11997_s15 + $0x928] sm:$0xff]  ;;  %1085 = vst [vmem:[%s12002_s16 + $0x558] sm:$0xff] %v1084_v43  ;;  %v1090_v46 = vld [vmem:[%s11997_s15 + $0x930] sm:$0xff] }
  0x6f   : > { %1087 = vst [vmem:[%s12002_s16 + $0x560] sm:$0xff] %v1086_v44  ;;  %1089 = vst [vmem:[%s12002_s16 + $0x568] sm:$0xff] %v1088_v45  ;;  %v1092_v47 = vld [vmem:[%s11997_s15 + $0x938] sm:$0xff]  ;;  %v1094_v48 = vld [vmem:[%s11997_s15 + $0x940] sm:$0xff] }
  0x70   : > { %1091 = vst [vmem:[%s12002_s16 + $0x570] sm:$0xff] %v1090_v46  ;;  %1093 = vst [vmem:[%s12002_s16 + $0x578] sm:$0xff] %v1092_v47  ;;  %v1096_v49 = vld [vmem:[%s11997_s15 + $0x948] sm:$0xff]  ;;  %v1098_v50 = vld [vmem:[%s11997_s15 + $0x950] sm:$0xff] }
  0x71   : > { %1095 = vst [vmem:[%s12002_s16 + $0x580] sm:$0xff] %v1094_v48  ;;  %v1100_v51 = vld [vmem:[%s11997_s15 + $0x958] sm:$0xff]  ;;  %1097 = vst [vmem:[%s12002_s16 + $0x588] sm:$0xff] %v1096_v49  ;;  %v1102_v52 = vld [vmem:[%s11997_s15 + $0x960] sm:$0xff] }
  0x72   : > { %1099 = vst [vmem:[%s12002_s16 + $0x590] sm:$0xff] %v1098_v50  ;;  %1101 = vst [vmem:[%s12002_s16 + $0x598] sm:$0xff] %v1100_v51  ;;  %v1104_v53 = vld [vmem:[%s11997_s15 + $0x968] sm:$0xff]  ;;  %v1106_v54 = vld [vmem:[%s11997_s15 + $0x970] sm:$0xff] }
  0x73   : > { %1103 = vst [vmem:[%s12002_s16 + $0x5a0] sm:$0xff] %v1102_v52  ;;  %1105 = vst [vmem:[%s12002_s16 + $0x5a8] sm:$0xff] %v1104_v53  ;;  %v1108_v55 = vld [vmem:[%s11997_s15 + $0x978] sm:$0xff]  ;;  %v1110_v56 = vld [vmem:[%s11997_s15 + $0x980] sm:$0xff] }
  0x74   : > { %1107 = vst [vmem:[%s12002_s16 + $0x5b0] sm:$0xff] %v1106_v54  ;;  %v1112_v57 = vld [vmem:[%s11997_s15 + $0x988] sm:$0xff]  ;;  %1109 = vst [vmem:[%s12002_s16 + $0x5b8] sm:$0xff] %v1108_v55  ;;  %v1114_v58 = vld [vmem:[%s11997_s15 + $0x990] sm:$0xff] }
  0x75   : > { %1111 = vst [vmem:[%s12002_s16 + $0x5c0] sm:$0xff] %v1110_v56  ;;  %1113 = vst [vmem:[%s12002_s16 + $0x5c8] sm:$0xff] %v1112_v57  ;;  %v1116_v59 = vld [vmem:[%s11997_s15 + $0x998] sm:$0xff]  ;;  %v1118_v60 = vld [vmem:[%s11997_s15 + $0x9a0] sm:$0xff] }
  0x76   : > { %1115 = vst [vmem:[%s12002_s16 + $0x5d0] sm:$0xff] %v1114_v58  ;;  %1117 = vst [vmem:[%s12002_s16 + $0x5d8] sm:$0xff] %v1116_v59  ;;  %v1120_v61 = vld [vmem:[%s11997_s15 + $0x9a8] sm:$0xff]  ;;  %v1122_v62 = vld [vmem:[%s11997_s15 + $0x9b0] sm:$0xff] }
  0x77   : > { %1119 = vst [vmem:[%s12002_s16 + $0x5e0] sm:$0xff] %v1118_v60  ;;  %v1124_v63 = vld [vmem:[%s11997_s15 + $0x9b8] sm:$0xff]  ;;  %1121 = vst [vmem:[%s12002_s16 + $0x5e8] sm:$0xff] %v1120_v61  ;;  %v1126_v0 = vld [vmem:[%s11997_s15 + $0x9c0] sm:$0xff] }
  0x78   : > { %1123 = vst [vmem:[%s12002_s16 + $0x5f0] sm:$0xff] %v1122_v62  ;;  %1125 = vst [vmem:[%s12002_s16 + $0x5f8] sm:$0xff] %v1124_v63  ;;  %v1128_v1 = vld [vmem:[%s11997_s15 + $0x9c8] sm:$0xff]  ;;  %v1130_v2 = vld [vmem:[%s11997_s15 + $0x9d0] sm:$0xff] }
  0x79   : > { %1127 = vst [vmem:[%s12002_s16 + $0x600] sm:$0xff] %v1126_v0  ;;  %1129 = vst [vmem:[%s12002_s16 + $0x608] sm:$0xff] %v1128_v1  ;;  %v1132_v3 = vld [vmem:[%s11997_s15 + $0x9d8] sm:$0xff]  ;;  %v1134_v4 = vld [vmem:[%s11997_s15 + $0x9e0] sm:$0xff] }
  0x7a   : > { %1131 = vst [vmem:[%s12002_s16 + $0x610] sm:$0xff] %v1130_v2  ;;  %v1136_v5 = vld [vmem:[%s11997_s15 + $0x9e8] sm:$0xff]  ;;  %1133 = vst [vmem:[%s12002_s16 + $0x618] sm:$0xff] %v1132_v3  ;;  %v1138_v6 = vld [vmem:[%s11997_s15 + $0x9f0] sm:$0xff] }
  0x7b   : > { %1135 = vst [vmem:[%s12002_s16 + $0x620] sm:$0xff] %v1134_v4  ;;  %1137 = vst [vmem:[%s12002_s16 + $0x628] sm:$0xff] %v1136_v5  ;;  %v1140_v7 = vld [vmem:[%s11997_s15 + $0x9f8] sm:$0xff]  ;;  %v1142_v8 = vld [vmem:[%s11997_s15 + $0xa00] sm:$0xff] }
  0x7c   : > { %1139 = vst [vmem:[%s12002_s16 + $0x630] sm:$0xff] %v1138_v6  ;;  %1141 = vst [vmem:[%s12002_s16 + $0x638] sm:$0xff] %v1140_v7  ;;  %v1144_v9 = vld [vmem:[%s11997_s15 + $0xa08] sm:$0xff]  ;;  %v1146_v10 = vld [vmem:[%s11997_s15 + $0xa10] sm:$0xff] }
  0x7d   : > { %1143 = vst [vmem:[%s12002_s16 + $0x640] sm:$0xff] %v1142_v8  ;;  %v1148_v11 = vld [vmem:[%s11997_s15 + $0xa18] sm:$0xff]  ;;  %1145 = vst [vmem:[%s12002_s16 + $0x648] sm:$0xff] %v1144_v9  ;;  %v1150_v12 = vld [vmem:[%s11997_s15 + $0xa20] sm:$0xff] }
  0x7e   : > { %1147 = vst [vmem:[%s12002_s16 + $0x650] sm:$0xff] %v1146_v10  ;;  %1149 = vst [vmem:[%s12002_s16 + $0x658] sm:$0xff] %v1148_v11  ;;  %v1152_v13 = vld [vmem:[%s11997_s15 + $0xa28] sm:$0xff]  ;;  %v1154_v14 = vld [vmem:[%s11997_s15 + $0xa30] sm:$0xff] }
  0x7f   : > { %1151 = vst [vmem:[%s12002_s16 + $0x660] sm:$0xff] %v1150_v12  ;;  %1153 = vst [vmem:[%s12002_s16 + $0x668] sm:$0xff] %v1152_v13  ;;  %v1156_v15 = vld [vmem:[%s11997_s15 + $0xa38] sm:$0xff]  ;;  %v1158_v16 = vld [vmem:[%s11997_s15 + $0xa40] sm:$0xff] }
  0x80   : > { %1155 = vst [vmem:[%s12002_s16 + $0x670] sm:$0xff] %v1154_v14  ;;  %v1160_v17 = vld [vmem:[%s11997_s15 + $0xa48] sm:$0xff]  ;;  %1157 = vst [vmem:[%s12002_s16 + $0x678] sm:$0xff] %v1156_v15  ;;  %v1162_v18 = vld [vmem:[%s11997_s15 + $0xa50] sm:$0xff] }
  0x81   : > { %1159 = vst [vmem:[%s12002_s16 + $0x680] sm:$0xff] %v1158_v16  ;;  %1161 = vst [vmem:[%s12002_s16 + $0x688] sm:$0xff] %v1160_v17  ;;  %v1164_v19 = vld [vmem:[%s11997_s15 + $0xa58] sm:$0xff]  ;;  %v1166_v20 = vld [vmem:[%s11997_s15 + $0xa60] sm:$0xff] }
  0x82   : > { %1163 = vst [vmem:[%s12002_s16 + $0x690] sm:$0xff] %v1162_v18  ;;  %1165 = vst [vmem:[%s12002_s16 + $0x698] sm:$0xff] %v1164_v19  ;;  %v1168_v21 = vld [vmem:[%s11997_s15 + $0xa68] sm:$0xff]  ;;  %v1170_v22 = vld [vmem:[%s11997_s15 + $0xa70] sm:$0xff] }
  0x83   : > { %1167 = vst [vmem:[%s12002_s16 + $0x6a0] sm:$0xff] %v1166_v20  ;;  %v1172_v23 = vld [vmem:[%s11997_s15 + $0xa78] sm:$0xff]  ;;  %1169 = vst [vmem:[%s12002_s16 + $0x6a8] sm:$0xff] %v1168_v21  ;;  %v1174_v24 = vld [vmem:[%s11997_s15 + $0xa80] sm:$0xff] }
  0x84   : > { %1171 = vst [vmem:[%s12002_s16 + $0x6b0] sm:$0xff] %v1170_v22  ;;  %1173 = vst [vmem:[%s12002_s16 + $0x6b8] sm:$0xff] %v1172_v23  ;;  %v1176_v25 = vld [vmem:[%s11997_s15 + $0xa88] sm:$0xff]  ;;  %v1178_v26 = vld [vmem:[%s11997_s15 + $0xa90] sm:$0xff] }
  0x85   : > { %1175 = vst [vmem:[%s12002_s16 + $0x6c0] sm:$0xff] %v1174_v24  ;;  %1177 = vst [vmem:[%s12002_s16 + $0x6c8] sm:$0xff] %v1176_v25  ;;  %v1180_v27 = vld [vmem:[%s11997_s15 + $0xa98] sm:$0xff]  ;;  %v1182_v28 = vld [vmem:[%s11997_s15 + $0xaa0] sm:$0xff] }
  0x86   : > { %1179 = vst [vmem:[%s12002_s16 + $0x6d0] sm:$0xff] %v1178_v26  ;;  %v1184_v29 = vld [vmem:[%s11997_s15 + $0xaa8] sm:$0xff]  ;;  %1181 = vst [vmem:[%s12002_s16 + $0x6d8] sm:$0xff] %v1180_v27  ;;  %v1186_v30 = vld [vmem:[%s11997_s15 + $0xab0] sm:$0xff] }
  0x87   : > { %1183 = vst [vmem:[%s12002_s16 + $0x6e0] sm:$0xff] %v1182_v28  ;;  %1185 = vst [vmem:[%s12002_s16 + $0x6e8] sm:$0xff] %v1184_v29  ;;  %v1188_v31 = vld [vmem:[%s11997_s15 + $0xab8] sm:$0xff]  ;;  %v1190_v32 = vld [vmem:[%s11997_s15 + $0xac0] sm:$0xff] }
  0x88   : > { %1187 = vst [vmem:[%s12002_s16 + $0x6f0] sm:$0xff] %v1186_v30  ;;  %1189 = vst [vmem:[%s12002_s16 + $0x6f8] sm:$0xff] %v1188_v31  ;;  %v1192_v33 = vld [vmem:[%s11997_s15 + $0xac8] sm:$0xff]  ;;  %v1194_v34 = vld [vmem:[%s11997_s15 + $0xad0] sm:$0xff] }
  0x89   : > { %1191 = vst [vmem:[%s12002_s16 + $0x700] sm:$0xff] %v1190_v32  ;;  %v1196_v35 = vld [vmem:[%s11997_s15 + $0xad8] sm:$0xff]  ;;  %1193 = vst [vmem:[%s12002_s16 + $0x708] sm:$0xff] %v1192_v33  ;;  %v1198_v36 = vld [vmem:[%s11997_s15 + $0xae0] sm:$0xff] }
  0x8a   : > { %1195 = vst [vmem:[%s12002_s16 + $0x710] sm:$0xff] %v1194_v34  ;;  %1197 = vst [vmem:[%s12002_s16 + $0x718] sm:$0xff] %v1196_v35  ;;  %v1200_v37 = vld [vmem:[%s11997_s15 + $0xae8] sm:$0xff]  ;;  %v1202_v38 = vld [vmem:[%s11997_s15 + $0xaf0] sm:$0xff] }
  0x8b   : > { %1199 = vst [vmem:[%s12002_s16 + $0x720] sm:$0xff] %v1198_v36  ;;  %1201 = vst [vmem:[%s12002_s16 + $0x728] sm:$0xff] %v1200_v37  ;;  %v1204_v39 = vld [vmem:[%s11997_s15 + $0xaf8] sm:$0xff]  ;;  %v1206_v40 = vld [vmem:[%s11997_s15 + $0xb00] sm:$0xff] }
  0x8c   : > { %1203 = vst [vmem:[%s12002_s16 + $0x730] sm:$0xff] %v1202_v38  ;;  %v1208_v41 = vld [vmem:[%s11997_s15 + $0xb08] sm:$0xff]  ;;  %1205 = vst [vmem:[%s12002_s16 + $0x738] sm:$0xff] %v1204_v39  ;;  %v1210_v42 = vld [vmem:[%s11997_s15 + $0xb10] sm:$0xff] }
  0x8d   : > { %1207 = vst [vmem:[%s12002_s16 + $0x740] sm:$0xff] %v1206_v40  ;;  %1209 = vst [vmem:[%s12002_s16 + $0x748] sm:$0xff] %v1208_v41  ;;  %v1212_v43 = vld [vmem:[%s11997_s15 + $0xb18] sm:$0xff]  ;;  %v1214_v44 = vld [vmem:[%s11997_s15 + $0xb20] sm:$0xff] }
  0x8e   : > { %1211 = vst [vmem:[%s12002_s16 + $0x750] sm:$0xff] %v1210_v42  ;;  %1213 = vst [vmem:[%s12002_s16 + $0x758] sm:$0xff] %v1212_v43  ;;  %v1216_v45 = vld [vmem:[%s11997_s15 + $0xb28] sm:$0xff]  ;;  %v1218_v46 = vld [vmem:[%s11997_s15 + $0xb30] sm:$0xff] }
  0x8f   : > { %1215 = vst [vmem:[%s12002_s16 + $0x760] sm:$0xff] %v1214_v44  ;;  %v1220_v47 = vld [vmem:[%s11997_s15 + $0xb38] sm:$0xff]  ;;  %1217 = vst [vmem:[%s12002_s16 + $0x768] sm:$0xff] %v1216_v45 }
  0x90   : > { %1219 = vst [vmem:[%s12002_s16 + $0x770] sm:$0xff] %v1218_v46  ;;  %1221 = vst [vmem:[%s12002_s16 + $0x778] sm:$0xff] %v1220_v47 }
  0x91 PF: > { %s1238_s17 = sand.u32 1, %s11885_s23   ;;  %s10751_s18 = smul.u32 30720, %s11893_s25 }
  0x92   : > { %s10801_s19 = smul.u32 1920, %s1238_s17  ;;  %s12490_s10 = scalar_lea.sflag [#allocation6], %s1238_s17 }
  0x93   : > { %s12486_s27 = scalar_lea.hbm %s15709_s2, %s10751_s18  ;;  %s11823_s14 = scalar_lea.hbm %s15709_s2, 61440 }
  0x94   : > { %s1242_s29 = scalar_lea.vmem [#allocation5], %s10801_s19  ;;  %s11819_s11 = scalar_lea.hbm %s12486_s27, 30720 }
  0x95   : > { %s1250_s7 = sshll.u32 %s1242_s29, 4  ;;  %p11820_p9 = scmp.ne.s32.totalorder %s12486_s27, %s11819_s11  ;;  %s12488_s7 = int_to_ptr.vmem [resolvable:$true] %s1250_s7 }
  0x96   : > { %p11824_p12 = scmp.lt.u32.totalorder %s12486_s27, %s15709_s2  ;;  %p11825_p13 = scmp.lt.u32.totalorder %s11823_s14, %s11819_s11 }
  0x97   : > { %p11821_p10 = pnand %p11820_p9, %p11975_p3  ;;  %p11827_p1 = scmp.lt.u32.totalorder %s11819_s11, %s12486_s27 }
  0x98   : > { %p11826_p0 = por %p11825_p13, %p11824_p12 }
  0x99   : > { %p11822_p11 = pneg %p11821_p10 }
  0x9a   : > { %p11828_p2 = por %p11827_p1, %p11826_p0 }
  0x9c   : > { %p11829_p4 = pnand %p11828_p2, %p11822_p11 }
  0x9e   : > { %11832 = shalt.err (!%p11829_p4)
}
  0x9f   : > { %s11833_s17 = scalar_lea.vmem %s12488_s7, 30720  ;;  %s11899_s18 = smov [#allocation5]  }
  0xa0   : > { %p11834_p5 = scmp.ne.s32.totalorder %s12488_s7, %s11833_s17  ;;  %s11837_s19 = sshll.u32 %s11899_s18, 4  ;;  %s11838_s19 = int_to_ptr.vmem [resolvable:$false] %s11837_s19 }
  0xa1   : > { %s11839_s20 = scalar_lea.vmem %s11838_s19, 61440  ;;  %p11840_p9 = scmp.lt.s32.totalorder %s12488_s7, %s11838_s19 }
  0xa2   : > { %p11835_p6 = pnand %p11834_p5, %p11975_p3  ;;  %p11841_p10 = scmp.lt.s32.totalorder %s11839_s20, %s11833_s17 }
  0xa4   : > { %p11836_p8 = pneg %p11835_p6  ;;  %p11842_p12 = por %p11841_p10, %p11840_p9 }
  0xa6   : > { %p11843_p13 = pnand %p11842_p12, %p11836_p8 }
  0xa8   : > { %11846 = shalt.err (!%p11843_p13)
}
  0xa9   : > { %s11900_s21 = smov 256   ;;  %s11901_s29 = smov 16  }
  0xaa   : > { %10803 = dma.hbm_to_vmem [thread:$0]  (%p11975_p3), %s12486_s27, 30720, %s12488_s7, %s12490_s10, %s11900_s21, %s11900_s21, %s11901_s29  }
  0xab PF: > { %p10254_p11 = scmp.ge.s32.totalorder %s11897_s26, 1  ;;  %p1258_p0 = scmp.lt.s32.totalorder %s11897_s26, 3 }
  0xad   : > { %p1259_p1 = pnand %p10254_p11, %p1258_p0 }
  0xaf   : > { %1262 = sbr.rel (%p1259_p1) target bundleno = 1564 (0x61c), region = 78 }
  0xb6   : > { %s1265_s11 = sand.u32 1, %s11881_s22  }
  0xb7   : > { %s10802_s12 = smul.u32 1920, %s1265_s11  ;;  %s1272_s14 = scalar_lea.sflag [#allocation6], %s1265_s11 }
  0xb9   : > { %s12517_s13 = scalar_lea.vmem [#allocation4], %s10802_s12  ;;  %s12519_s15 = scalar_lea.vmem [#allocation5], %s10802_s12 }
  0xba   : > { %11872 = dma.done.wait (%p11982_p7), %s1272_s14, 30720  }
  0xbb   : > { %11874 = vsyncadd (%p11982_p7), %s1272_s14, 4294936576  ;;  %s1316_s30 = smul.u32 120, %s11889_s24  ;;  %p10257_p2 = scmp.ne.s32.totalorder %s11889_s24, 0 }
  0xbc   : > { %v11902_v48 = vmov (!%p10257_p2), 0.0  }
  0xbd   : > { %p1317_p3 = scmp.lt.s32.totalorder %s1316_s30, 239  ;;  %1333 = sbr.rel (%p10257_p2) target bundleno = 196 (0xc4), region = 90  ;;  %1334 = vst [vmem:[#allocation2] sm:$0xff] (!%p10257_p2), %v11902_v48  ;;  %1335 = vst [vmem:[#allocation3] sm:$0xff] (!%p10257_p2), %v11902_v48 }
  0xbf   : > { %s15827_s30 = smov (!%p1317_p3, %s1316_s30), 239 }
  0xc0   : > { %s10750_s27 = sshll.u32 %s15827_s30, 4 }
  0xc1   : > { %s12529_s16 = scalar_lea.vmem %s15708_s1, %s10750_s27 }
  0xc4 PF: > { %v1338_v49 = vld [vmem:[%s12517_s13 + $0x10] sm:$0xff]  ;;  %vm1576_vm0 = vcmask 130048   ;;  %v1336_v50 = vld [vmem:[%s12517_s13] sm:$0xff]  ;;  %v1339_v51 = vld [vmem:[%s12517_s13 + $0x18] sm:$0xff]  ;;  %vm3749_vm1 = vcmask 130112   ;;  %vm3756_vm2 = vcmask 195712  }
  0xc5   : > { %v1583_v52 = vsel %vm1576_vm0, %v1338_v49, 0.0  ;;  %v1577_v53 = vsel %vm1576_vm0, %v1336_v50, 0.0  ;;  %v1337_v54 = vld [vmem:[%s12517_s13 + $0x8] sm:$0xff]  ;;  %v1586_v55 = vsel %vm1576_vm0, %v1339_v51, 0.0  ;;  %v1340_v58 = vld [vmem:[%s12517_s13 + $0x20] sm:$0xff]  ;;  %v1343_v61 = vld [vmem:[%s12517_s13 + $0x38] sm:$0xff] }
  0xc6   : > { %1584 = vadd.xlane.f32.xlu1 %v1583_v52  ;;  %1578 = vadd.xlane.f32.xlu0 %v1577_v53  ;;  %v1580_v56 = vsel %vm1576_vm0, %v1337_v54, 0.0  ;;  %v1341_v57 = vld [vmem:[%s12517_s13 + $0x28] sm:$0xff]  ;;  %v1589_v60 = vsel %vm1576_vm0, %v1340_v58, 0.0  ;;  %v1342_v62 = vld [vmem:[%s12517_s13 + $0x30] sm:$0xff]  ;;  %v1598_v63 = vsel %vm1576_vm0, %v1343_v61, 0.0  ;;  %v1344_v2 = vld [vmem:[%s12517_s13 + $0x40] sm:$0xff] }
  0xc7   : > { %v1592_v59 = vsel %vm1576_vm0, %v1341_v57, 0.0  ;;  %v1595_v0 = vsel %vm1576_vm0, %v1342_v62, 0.0  ;;  %v1345_v1 = vld [vmem:[%s12517_s13 + $0x48] sm:$0xff]  ;;  %v1601_v4 = vsel %vm1576_vm0, %v1344_v2, 0.0  ;;  %v1347_v5 = vld [vmem:[%s12517_s13 + $0x58] sm:$0xff]  ;;  %v1346_v6 = vld [vmem:[%s12517_s13 + $0x50] sm:$0xff] }
  0xc8   : > { %v1604_v3 = vsel %vm1576_vm0, %v1345_v1, 0.0  ;;  %v1610_v7 = vsel %vm1576_vm0, %v1347_v5, 0.0  ;;  %v1607_v8 = vsel %vm1576_vm0, %v1346_v6, 0.0  ;;  %v1349_v9 = vld [vmem:[%s12517_s13 + $0x68] sm:$0xff]  ;;  %v1348_v10 = vld [vmem:[%s12517_s13 + $0x60] sm:$0xff]  ;;  %v1351_v13 = vld [vmem:[%s12517_s13 + $0x78] sm:$0xff] }
  0xc9   : > { %v1616_v11 = vsel %vm1576_vm0, %v1349_v9, 0.0  ;;  %v1613_v12 = vsel %vm1576_vm0, %v1348_v10, 0.0  ;;  %v1350_v14 = vld [vmem:[%s12517_s13 + $0x70] sm:$0xff]  ;;  %v1353_v15 = vld [vmem:[%s12517_s13 + $0x88] sm:$0xff]  ;;  %v1352_v16 = vld [vmem:[%s12517_s13 + $0x80] sm:$0xff]  ;;  %v1622_v17 = vsel %vm1576_vm0, %v1351_v13, 0.0 }
  0xca   : > { %1587 = vadd.xlane.f32.xlu1 %v1586_v55  ;;  %1581 = vadd.xlane.f32.xlu0 %v1580_v56  ;;  %v1619_v18 = vsel %vm1576_vm0, %v1350_v14, 0.0  ;;  %v1355_v19 = vld [vmem:[%s12517_s13 + $0x98] sm:$0xff]  ;;  %v1354_v20 = vld [vmem:[%s12517_s13 + $0x90] sm:$0xff]  ;;  %v1628_v21 = vsel %vm1576_vm0, %v1353_v15, 0.0  ;;  %v1625_v22 = vsel %vm1576_vm0, %v1352_v16, 0.0  ;;  %v1357_v23 = vld [vmem:[%s12517_s13 + $0xa8] sm:$0xff] }
  0xcb   : > { %v1356_v24 = vld [vmem:[%s12517_s13 + $0xa0] sm:$0xff]  ;;  %v1634_v25 = vsel %vm1576_vm0, %v1355_v19, 0.0  ;;  %v1631_v26 = vsel %vm1576_vm0, %v1354_v20, 0.0  ;;  %v1359_v27 = vld [vmem:[%s12517_s13 + $0xb8] sm:$0xff]  ;;  %v1358_v28 = vld [vmem:[%s12517_s13 + $0xb0] sm:$0xff]  ;;  %v1640_v29 = vsel %vm1576_vm0, %v1357_v23, 0.0 }
  0xcc   : > { %v1637_v30 = vsel %vm1576_vm0, %v1356_v24, 0.0  ;;  %v1361_v31 = vld [vmem:[%s12517_s13 + $0xc8] sm:$0xff]  ;;  %v1360_v32 = vld [vmem:[%s12517_s13 + $0xc0] sm:$0xff]  ;;  %v1646_v33 = vsel %vm1576_vm0, %v1359_v27, 0.0  ;;  %v1643_v34 = vsel %vm1576_vm0, %v1358_v28, 0.0  ;;  %v1363_v35 = vld [vmem:[%s12517_s13 + $0xd8] sm:$0xff] }
  0xcd   : > { %v1362_v36 = vld [vmem:[%s12517_s13 + $0xd0] sm:$0xff]  ;;  %v1652_v37 = vsel %vm1576_vm0, %v1361_v31, 0.0  ;;  %v1649_v38 = vsel %vm1576_vm0, %v1360_v32, 0.0  ;;  %v1365_v39 = vld [vmem:[%s12517_s13 + $0xe8] sm:$0xff]  ;;  %v1364_v40 = vld [vmem:[%s12517_s13 + $0xe0] sm:$0xff]  ;;  %v1658_v41 = vsel %vm1576_vm0, %v1363_v35, 0.0 }
  0xce   : > { %1593 = vadd.xlane.f32.xlu1 %v1592_v59  ;;  %1590 = vadd.xlane.f32.xlu0 %v1589_v60  ;;  %v1655_v42 = vsel %vm1576_vm0, %v1362_v36, 0.0  ;;  %v1367_v43 = vld [vmem:[%s12517_s13 + $0xf8] sm:$0xff]  ;;  %v1366_v44 = vld [vmem:[%s12517_s13 + $0xf0] sm:$0xff]  ;;  %v1664_v45 = vsel %vm1576_vm0, %v1365_v39, 0.0  ;;  %v1661_v46 = vsel %vm1576_vm0, %v1364_v40, 0.0  ;;  %v1369_v47 = vld [vmem:[%s12517_s13 + $0x108] sm:$0xff] }
  0xcf   : > { %v1368_v48 = vld [vmem:[%s12517_s13 + $0x100] sm:$0xff]  ;;  %v1670_v49 = vsel %vm1576_vm0, %v1367_v43, 0.0  ;;  %v1667_v50 = vsel %vm1576_vm0, %v1366_v44, 0.0  ;;  %v1371_v51 = vld [vmem:[%s12517_s13 + $0x118] sm:$0xff]  ;;  %v1370_v52 = vld [vmem:[%s12517_s13 + $0x110] sm:$0xff]  ;;  %v1676_v53 = vsel %vm1576_vm0, %v1369_v47, 0.0 }
  0xd0   : > { %v1673_v54 = vsel %vm1576_vm0, %v1368_v48, 0.0  ;;  %v1373_v55 = vld [vmem:[%s12517_s13 + $0x128] sm:$0xff]  ;;  %v1372_v56 = vld [vmem:[%s12517_s13 + $0x120] sm:$0xff]  ;;  %v1682_v57 = vsel %vm1576_vm0, %v1371_v51, 0.0  ;;  %v1679_v58 = vsel %vm1576_vm0, %v1370_v52, 0.0  ;;  %v1375_v59 = vld [vmem:[%s12517_s13 + $0x138] sm:$0xff] }
  0xd1   : > { %v1374_v60 = vld [vmem:[%s12517_s13 + $0x130] sm:$0xff]  ;;  %v1688_v61 = vsel %vm1576_vm0, %v1373_v55, 0.0  ;;  %v1685_v62 = vsel %vm1576_vm0, %v1372_v56, 0.0  ;;  %v1694_v1 = vsel %vm1576_vm0, %v1375_v59, 0.0  ;;  %v1385_v15 = vld [vmem:[%s12517_s13 + $0x188] sm:$0xff]  ;;  %v1384_v16 = vld [vmem:[%s12517_s13 + $0x180] sm:$0xff] }
  0xd2   : > { %1599 = vadd.xlane.f32.xlu1 %v1598_v63  ;;  %1596 = vadd.xlane.f32.xlu0 %v1595_v0  ;;  %v1377_v63 = vld [vmem:[%s12517_s13 + $0x148] sm:$0xff]  ;;  %v1376_v0 = vld [vmem:[%s12517_s13 + $0x140] sm:$0xff]  ;;  %v1691_v2 = vsel %vm1576_vm0, %v1374_v60, 0.0  ;;  %v1387_v19 = vld [vmem:[%s12517_s13 + $0x198] sm:$0xff]  ;;  %vm3763_vm3 = vcmask 261312   ;;  %vm3770_vm4 = vcmask 326912  }
  0xd3   : > { %v1700_v5 = vsel %vm1576_vm0, %v1377_v63, 0.0  ;;  %v1697_v6 = vsel %vm1576_vm0, %v1376_v0, 0.0  ;;  %v1386_v20 = vld [vmem:[%s12517_s13 + $0x190] sm:$0xff]  ;;  %v1389_v23 = vld [vmem:[%s12517_s13 + $0x1a8] sm:$0xff]  ;;  %v1388_v24 = vld [vmem:[%s12517_s13 + $0x1a0] sm:$0xff]  ;;  %v3738_v63 = vlaneseq  ;;  %vm3777_vm5 = vcmask 392512  }
  0xd4   : > { %v1391_v27 = vld [vmem:[%s12517_s13 + $0x1b8] sm:$0xff]  ;;  %v1390_v28 = vld [vmem:[%s12517_s13 + $0x1b0] sm:$0xff]  ;;  %v1393_v31 = vld [vmem:[%s12517_s13 + $0x1c8] sm:$0xff]  ;;  %vm15723_vm6 = vcmask 458112   ;;  %vm15715_vm7 = vcmask 523712   ;;  %vm3798_vm8 = vcmask 589312  }
  0xd5   : > { %v1392_v32 = vld [vmem:[%s12517_s13 + $0x1c0] sm:$0xff]  ;;  %v1395_v35 = vld [vmem:[%s12517_s13 + $0x1d8] sm:$0xff]  ;;  %v1394_v36 = vld [vmem:[%s12517_s13 + $0x1d0] sm:$0xff]  ;;  %vm15717_vm9 = vcmask 654912   ;;  %vm15714_vm10 = vcmask 720512   ;;  %vm15716_vm11 = vcmask 786112  }
  0xd6   : > { %1605 = vadd.xlane.f32.xlu1 %v1604_v3  ;;  %1602 = vadd.xlane.f32.xlu0 %v1601_v4  ;;  %v1379_v3 = vld [vmem:[%s12517_s13 + $0x158] sm:$0xff]  ;;  %v1378_v4 = vld [vmem:[%s12517_s13 + $0x150] sm:$0xff]  ;;  %v1397_v39 = vld [vmem:[%s12517_s13 + $0x1e8] sm:$0xff]  ;;  %vm3826_vm12 = vcmask 851712   ;;  %vm3833_vm13 = vcmask 917312   ;;  %vm3840_vm14 = vcmask 982912  }
  0xd7   : > { %v1706_v9 = vsel %vm1576_vm0, %v1379_v3, 0.0  ;;  %v1703_v10 = vsel %vm1576_vm0, %v1378_v4, 0.0  ;;  %v1396_v40 = vld [vmem:[%s12517_s13 + $0x1e0] sm:$0xff]  ;;  %v1399_v43 = vld [vmem:[%s12517_s13 + $0x1f8] sm:$0xff]  ;;  %v1398_v44 = vld [vmem:[%s12517_s13 + $0x1f0] sm:$0xff]  ;;  %v12678_v4 = vand.u32 127, %v3738_v63 }
  0xd8   : > { %v1401_v47 = vld [vmem:[%s12517_s13 + $0x208] sm:$0xff]  ;;  %v1400_v48 = vld [vmem:[%s12517_s13 + $0x200] sm:$0xff]  ;;  %v1403_v51 = vld [vmem:[%s12517_s13 + $0x218] sm:$0xff]  ;;  %vm3847_vm15 = vcmask 1048512   ;;  %p10742_p7 = scmp.ne.s32.totalorder %s11889_s24, 1 }
  0xd9   : > { %v1402_v52 = vld [vmem:[%s12517_s13 + $0x210] sm:$0xff]  ;;  %v1405_v55 = vld [vmem:[%s12517_s13 + $0x228] sm:$0xff]  ;;  %v1404_v56 = vld [vmem:[%s12517_s13 + $0x220] sm:$0xff] }
  0xda   : > { %1611 = vadd.xlane.f32.xlu1 %v1610_v7  ;;  %1608 = vadd.xlane.f32.xlu0 %v1607_v8  ;;  %v1381_v7 = vld [vmem:[%s12517_s13 + $0x168] sm:$0xff]  ;;  %v1380_v8 = vld [vmem:[%s12517_s13 + $0x160] sm:$0xff]  ;;  %v1407_v59 = vld [vmem:[%s12517_s13 + $0x238] sm:$0xff] }
  0xdb   : > { %v1712_v13 = vsel %vm1576_vm0, %v1381_v7, 0.0  ;;  %v1709_v14 = vsel %vm1576_vm0, %v1380_v8, 0.0  ;;  %v1406_v60 = vld [vmem:[%s12517_s13 + $0x230] sm:$0xff]  ;;  %v1409_v0 = vld [vmem:[%s12517_s13 + $0x248] sm:$0xff] }
  0xdc   : > { %v1787_v3 = vsel %vm1576_vm0, %v1406_v60, 0.0  ;;  %v3800_v60 = vadd.s32 4294967224, %v12678_v4 }
  0xde   : > { %1617 = vadd.xlane.f32.xlu1 %v1616_v11  ;;  %1614 = vadd.xlane.f32.xlu0 %v1613_v12  ;;  %v1383_v11 = vld [vmem:[%s12517_s13 + $0x178] sm:$0xff]  ;;  %v1382_v12 = vld [vmem:[%s12517_s13 + $0x170] sm:$0xff] }
  0xe2   : > { %1623 = vadd.xlane.f32.xlu1 %v1622_v17  ;;  %1620 = vadd.xlane.f32.xlu0 %v1619_v18  ;;  %v1718_v17 = vsel %vm1576_vm0, %v1383_v11, 0.0  ;;  %v1715_v18 = vsel %vm1576_vm0, %v1382_v12, 0.0  ;;  %v12684_v11 = vshrl.u32 %v3738_v63, 7  ;;  %v3751_v12 = vadd.s32 4294967280, %v12678_v4 }
  0xe4   : > { %15734 = vst [vmem:[#allocation8_spill] sm:$0xff] %v12684_v11 }
  0xe6   : > { %1629 = vadd.xlane.f32.xlu1 %v1628_v21  ;;  %1626 = vadd.xlane.f32.xlu0 %v1625_v22  ;;  %v1724_v21 = vsel %vm1576_vm0, %v1385_v15, 0.0  ;;  %v1721_v22 = vsel %vm1576_vm0, %v1384_v16, 0.0  ;;  %v1413_v16 = vld [vmem:[%s12517_s13 + $0x268] sm:$0xff] }
  0xea   : > { %1635 = vadd.xlane.f32.xlu1 %v1634_v25  ;;  %1632 = vadd.xlane.f32.xlu0 %v1631_v26  ;;  %v1730_v25 = vsel %vm1576_vm0, %v1387_v19, 0.0  ;;  %v1727_v26 = vsel %vm1576_vm0, %v1386_v20, 0.0  ;;  %v12694_v19 = vsub.s32 %v12678_v4, %v12684_v11 }
  0xee   : > { %1641 = vadd.xlane.f32.xlu1 %v1640_v29  ;;  %1638 = vadd.xlane.f32.xlu0 %v1637_v30  ;;  %v1736_v29 = vsel %vm1576_vm0, %v1389_v23, 0.0  ;;  %v1733_v30 = vsel %vm1576_vm0, %v1388_v24, 0.0  ;;  %v12699_v23 = vsub.s32 %v3751_v12, %v12684_v11 }
  0xf0   : > { %15735 = vst [vmem:[#allocation9_spill] sm:$0xff] %v12699_v23 }
  0xf2   : > { %1647 = vadd.xlane.f32.xlu1 %v1646_v33  ;;  %1644 = vadd.xlane.f32.xlu0 %v1643_v34  ;;  %v1742_v33 = vsel %vm1576_vm0, %v1391_v27, 0.0  ;;  %v1739_v34 = vsel %vm1576_vm0, %v1390_v28, 0.0  ;;  %v3772_v28 = vadd.s32 4294967256, %v12678_v4 }
  0xf6   : > { %1653 = vadd.xlane.f32.xlu1 %v1652_v37  ;;  %1650 = vadd.xlane.f32.xlu0 %v1649_v38  ;;  %v1748_v37 = vsel %vm1576_vm0, %v1393_v31, 0.0  ;;  %v1745_v38 = vsel %vm1576_vm0, %v1392_v32, 0.0  ;;  %v1414_v31 = vld [vmem:[%s12517_s13 + $0x270] sm:$0xff] }
  0xfa   : > { %1659 = vadd.xlane.f32.xlu1 %v1658_v41  ;;  %1656 = vadd.xlane.f32.xlu0 %v1655_v42  ;;  %v1754_v41 = vsel %vm1576_vm0, %v1395_v35, 0.0  ;;  %v1751_v42 = vsel %vm1576_vm0, %v1394_v36, 0.0 }
  0xfe   : > { %1665 = vadd.xlane.f32.xlu1 %v1664_v45  ;;  %1662 = vadd.xlane.f32.xlu0 %v1661_v46  ;;  %v1760_v45 = vsel %vm1576_vm0, %v1397_v39, 0.0  ;;  %v1757_v46 = vsel %vm1576_vm0, %v1396_v40, 0.0  ;;  %v1808_v39 = vsel %vm1576_vm0, %v1413_v16, 0.0  ;;  %v3814_v16 = vadd.s32 4294967208, %v12678_v4 }
 0x102   : > { %1671 = vadd.xlane.f32.xlu1 %v1670_v49  ;;  %1668 = vadd.xlane.f32.xlu0 %v1667_v50  ;;  %v1766_v49 = vsel %vm1576_vm0, %v1399_v43, 0.0  ;;  %v1763_v50 = vsel %vm1576_vm0, %v1398_v44, 0.0  ;;  %v3786_v44 = vadd.s32 4294967240, %v12678_v4 }
 0x106   : > { %1677 = vadd.xlane.f32.xlu1 %v1676_v53  ;;  %1674 = vadd.xlane.f32.xlu0 %v1673_v54  ;;  %v1772_v53 = vsel %vm1576_vm0, %v1401_v47, 0.0  ;;  %v1769_v54 = vsel %vm1576_vm0, %v1400_v48, 0.0  ;;  %v1811_v48 = vsel %vm1576_vm0, %v1414_v31, 0.0 }
 0x10a   : > { %1683 = vadd.xlane.f32.xlu1 %v1682_v57  ;;  %1680 = vadd.xlane.f32.xlu0 %v1679_v58  ;;  %v1778_v57 = vsel %vm1576_vm0, %v1403_v51, 0.0  ;;  %v1775_v58 = vsel %vm1576_vm0, %v1402_v52, 0.0 }
 0x10e   : > { %1689 = vadd.xlane.f32.xlu1 %v1688_v61  ;;  %1686 = vadd.xlane.f32.xlu0 %v1685_v62  ;;  %v1784_v61 = vsel %vm1576_vm0, %v1405_v55, 0.0  ;;  %v1781_v62 = vsel %vm1576_vm0, %v1404_v56, 0.0 }
 0x112   : > { %1695 = vadd.xlane.f32.xlu1 %v1694_v1  ;;  %1692 = vadd.xlane.f32.xlu0 %v1691_v2  ;;  %v1408_v1 = vld [vmem:[%s12517_s13 + $0x240] sm:$0xff]  ;;  %v1790_v2 = vsel %vm1576_vm0, %v1407_v59, 0.0 }
 0x116   : > { %1701 = vadd.xlane.f32.xlu1 %v1700_v5  ;;  %1698 = vadd.xlane.f32.xlu0 %v1697_v6  ;;  %v1411_v5 = vld [vmem:[%s12517_s13 + $0x258] sm:$0xff]  ;;  %v1410_v6 = vld [vmem:[%s12517_s13 + $0x250] sm:$0xff] }
 0x117   : > { %v1802_v15 = vsel %vm1576_vm0, %v1411_v5, 0.0  ;;  %v1418_v5 = vld [vmem:[%s12517_s13 + $0x290] sm:$0xff] }
 0x118   : > { %v1823_v31 = vsel %vm1576_vm0, %v1418_v5, 0.0 }
 0x11a   : > { %1707 = vadd.xlane.f32.xlu1 %v1706_v9  ;;  %1704 = vadd.xlane.f32.xlu0 %v1703_v10  ;;  %v1796_v9 = vsel %vm1576_vm0, %v1409_v0, 0.0  ;;  %v1793_v10 = vsel %vm1576_vm0, %v1408_v1, 0.0 }
 0x11e   : > { %1713 = vadd.xlane.f32.xlu1 %v1712_v13  ;;  %1710 = vadd.xlane.f32.xlu0 %v1709_v14  ;;  %v3744_v13 = vadd.s32 4294967288, %v12678_v4  ;;  %v3758_v14 = vadd.s32 4294967272, %v12678_v4 }
 0x120   : > { %v12705_v27 = vsub.s32 %v3758_v14, %v12684_v11 }
 0x122   : > { %1719 = vadd.xlane.f32.xlu1 %v1718_v17  ;;  %1716 = vadd.xlane.f32.xlu0 %v1715_v18  ;;  %v1412_v17 = vld [vmem:[%s12517_s13 + $0x260] sm:$0xff]  ;;  %15736 = vst [vmem:[#allocation10_spill] sm:$0xff] %v12705_v27 }
 0x123   : > { %v1805_v40 = vsel %vm1576_vm0, %v1412_v17, 0.0 }
 0x126   : > { %1725 = vadd.xlane.f32.xlu1 %v1724_v21  ;;  %1722 = vadd.xlane.f32.xlu0 %v1721_v22  ;;  %v1799_v21 = vsel %vm1576_vm0, %v1410_v6, 0.0  ;;  %v3765_v22 = vadd.s32 4294967264, %v12678_v4 }
 0x12a   : > { %1731 = vadd.xlane.f32.xlu1 %v1730_v25  ;;  %1728 = vadd.xlane.f32.xlu0 %v1727_v26  ;;  %v12702_v25 = vsub.s32 %v3744_v13, %v12684_v11  ;;  %v12750_v13 = vsub.s32 %v3800_v60, %v12684_v11 }
 0x12e   : > { %1737 = vadd.xlane.f32.xlu1 %v1736_v29  ;;  %1734 = vadd.xlane.f32.xlu0 %v1733_v30  ;;  %v3779_v29 = vadd.s32 4294967248, %v12678_v4  ;;  %v1415_v30 = vld [vmem:[%s12517_s13 + $0x278] sm:$0xff] }
 0x12f   : > { %v1814_v47 = vsel %vm1576_vm0, %v1415_v30, 0.0 }
 0x132   : > { %1743 = vadd.xlane.f32.xlu1 %v1742_v33  ;;  %1740 = vadd.xlane.f32.xlu0 %v1739_v34 }
 0x136   : > { %1749 = vadd.xlane.f32.xlu1 %v1748_v37  ;;  %1746 = vadd.xlane.f32.xlu0 %v1745_v38  ;;  %v12712_v37 = vsub.s32 %v3765_v22, %v12684_v11 }
 0x138   : > { %15737 = vst [vmem:[#allocation11_spill] sm:$0xff] %v12712_v37 }
 0x13a   : > { %1755 = vadd.xlane.f32.xlu1 %v1754_v41  ;;  %1752 = vadd.xlane.f32.xlu0 %v1751_v42 }
 0x13e   : > { %1761 = vadd.xlane.f32.xlu1 %v1760_v45  ;;  %1758 = vadd.xlane.f32.xlu0 %v1757_v46  ;;  %v12721_v45 = vsub.s32 %v3772_v28, %v12684_v11 }
 0x140   : > { %15738 = vst [vmem:[#allocation12_spill] sm:$0xff] %v12721_v45 }
 0x142   : > { %1767 = vadd.xlane.f32.xlu1 %v1766_v49  ;;  %1764 = vadd.xlane.f32.xlu0 %v1763_v50  ;;  %v1417_v49 = vld [vmem:[%s12517_s13 + $0x288] sm:$0xff]  ;;  %v1416_v50 = vld [vmem:[%s12517_s13 + $0x280] sm:$0xff] }
 0x146   : > { %1773 = vadd.xlane.f32.xlu1 %v1772_v53  ;;  %1770 = vadd.xlane.f32.xlu0 %v1769_v54  ;;  %v12730_v53 = vsub.s32 %v3779_v29, %v12684_v11  ;;  %v3793_v54 = vadd.s32 4294967232, %v12678_v4 }
 0x148   : > { %15739 = vst [vmem:[#allocation13_spill] sm:$0xff] %v12730_v53 }
 0x14a   : > { %1779 = vadd.xlane.f32.xlu1 %v1778_v57  ;;  %1776 = vadd.xlane.f32.xlu0 %v1775_v58 }
 0x14e   : > { %1785 = vadd.xlane.f32.xlu1 %v1784_v61  ;;  %1782 = vadd.xlane.f32.xlu0 %v1781_v62  ;;  %v12737_v62 = vsub.s32 %v3786_v44, %v12684_v11 }
 0x152   : > { %1791 = vadd.xlane.f32.xlu1 %v1790_v2  ;;  %1788 = vadd.xlane.f32.xlu0 %v1787_v3  ;;  %v1820_v2 = vsel %vm1576_vm0, %v1417_v49, 0.0  ;;  %v1419_v3 = vld [vmem:[%s12517_s13 + $0x298] sm:$0xff] }
 0x153   : > { %v1585_v7 = vpop.xlane.xlu1 %1584  ;;  %v1579_v8 = vpop.xlane.xlu0 %1578  ;;  %v1826_v22 = vsel %vm1576_vm0, %v1419_v3, 0.0  ;;  %v1423_v49 = vld [vmem:[%s12517_s13 + $0x2b8] sm:$0xff]  ;;  %v1424_v3 = vld [vmem:[%s12517_s13 + $0x2c0] sm:$0xff] }
 0x156   : > { %1797 = vadd.xlane.f32.xlu1 %v1796_v9  ;;  %1794 = vadd.xlane.f32.xlu0 %v1793_v10  ;;  %v1817_v9 = vsel %vm1576_vm0, %v1416_v50, 0.0  ;;  %v1422_v50 = vld [vmem:[%s12517_s13 + $0x2b0] sm:$0xff] }
 0x157   : > { %v1588_v18 = vpop.xlane.xlu1 %1587  ;;  %v1582_v20 = vpop.xlane.xlu0 %1581 }
 0x158   : > { %v3019_v24 = vpack.c.bf16 %v1588_v18, %v1585_v7  ;;  %v3018_v26 = vpack.c.bf16 %v1582_v20, %v1579_v8  ;;  %v12745_v8 = vsub.s32 %v3793_v54, %v12684_v11 }
 0x15a   : > { %v3500_v32 = vunpack.c.l.b16 %v3019_v24  ;;  %v3501_v33 = vunpack.c.h.b16 %v3019_v24  ;;  %v3498_v34 = vunpack.c.l.b16 %v3018_v26  ;;  %v3499_v35 = vunpack.c.h.b16 %v3018_v26  ;;  %1803 = vadd.xlane.f32.xlu1 %v1802_v15  ;;  %1800 = vadd.xlane.f32.xlu0 %v1799_v21  ;;  %v1421_v24 = vld [vmem:[%s12517_s13 + $0x2a8] sm:$0xff]  ;;  %v1420_v26 = vld [vmem:[%s12517_s13 + $0x2a0] sm:$0xff] }
 0x15b   : > { %v1594_v36 = vpop.xlane.xlu1 %1593  ;;  %v1591_v38 = vpop.xlane.xlu0 %1590  ;;  %v3807_v15 = vadd.s32 4294967216, %v12678_v4 }
 0x15c   : > { %v3755_v41 = vrot.slane %v3500_v32, %v12699_v23  ;;  %v3743_v42 = vrot.slane %v3498_v34, %v12694_v19  ;;  %v3748_v43 = vrot.slane %v3499_v35, %v12702_v25  ;;  %v3020_v46 = vpack.c.bf16 %v1594_v36, %v1591_v38 }
 0x15d   : > { %v3762_v51 = vrot.slane %v3501_v33, %v12705_v27  ;;  %v12764_v34 = vsub.s32 %v3807_v15, %v12684_v11  ;;  %v3821_v36 = vadd.s32 4294967200, %v12678_v4  ;;  %v3828_v38 = vadd.s32 4294967192, %v12678_v4 }
 0x15e   : > { %v3750_v52 = vsel %vm3749_vm1, %v3748_v43, %v3743_v42  ;;  %1809 = vadd.xlane.f32.xlu1 %v1808_v39  ;;  %1806 = vadd.xlane.f32.xlu0 %v1805_v40  ;;  %v3502_v56 = vunpack.c.l.b16 %v3020_v46  ;;  %v3503_v57 = vunpack.c.h.b16 %v3020_v46  ;;  %v1832_v43 = vsel %vm1576_vm0, %v1421_v24, 0.0 }
 0x15f   : > { %v3757_v55 = vsel %vm3756_vm2, %v3755_v41, %v3750_v52  ;;  %v1600_v58 = vpop.xlane.xlu1 %1599  ;;  %v1597_v59 = vpop.xlane.xlu0 %1596  ;;  %v12771_v41 = vsub.s32 %v3814_v16, %v12684_v11  ;;  %v12780_v54 = vsub.s32 %v3821_v36, %v12684_v11 }
 0x160   : > { %v3764_v61 = vsel %vm3763_vm3, %v3762_v51, %v3757_v55  ;;  %v3021_v63 = vpack.c.bf16 %v1600_v58, %v1597_v59  ;;  %v3769_v0 = vrot.slane %v3502_v56, %v12712_v37  ;;  %v3776_v1 = vrot.slane %v3503_v57, %v12721_v45 }
 0x161   : > { %v12783_v55 = vsub.s32 %v3828_v38, %v12684_v11  ;;  %v3835_v57 = vadd.s32 4294967184, %v12678_v4  ;;  %v1429_v38 = vld [vmem:[%s12517_s13 + $0x2e8] sm:$0xff] }
 0x162   : > { %v3504_v6 = vunpack.c.l.b16 %v3021_v63  ;;  %v3505_v7 = vunpack.c.h.b16 %v3021_v63  ;;  %1815 = vadd.xlane.f32.xlu1 %v1814_v47  ;;  %1812 = vadd.xlane.f32.xlu0 %v1811_v48  ;;  %v3771_v10 = vsel %vm3770_vm4, %v3769_v0, %v3764_v61  ;;  %v1829_v48 = vsel %vm1576_vm0, %v1420_v26, 0.0 }
 0x163   : > { %v1606_v12 = vpop.xlane.xlu1 %1605  ;;  %v1603_v14 = vpop.xlane.xlu0 %1602  ;;  %v3778_v17 = vsel %vm3777_vm5, %v3776_v1, %v3771_v10  ;;  %v3842_v61 = vadd.s32 4294967176, %v12678_v4  ;;  %v1838_v4 = vsel %vm1576_vm0, %v1423_v49, 0.0  ;;  %v1835_v10 = vsel %vm1576_vm0, %v1422_v50, 0.0 }
 0x164   : > { %v3783_v18 = vrot.slane %v3504_v6, %v12730_v53  ;;  %v3790_v20 = vrot.slane %v3505_v7, %v12737_v62  ;;  %v3022_v21 = vpack.c.bf16 %v1606_v12, %v1603_v14  ;;  %v12794_v7 = vsub.s32 %v3835_v57, %v12684_v11  ;;  %v1430_v57 = vld [vmem:[%s12517_s13 + $0x2f0] sm:$0xff] }
 0x165   : > { %v12801_v15 = vsub.s32 %v3842_v61, %v12684_v11  ;;  %v11709_v11 = vld [vmem:[%s12517_s13 + $0x208] sm:$0xff] }
 0x166   : > { %v3785_v28 = vsel %vm15723_vm6, %v3783_v18, %v3778_v17  ;;  %v3506_v29 = vunpack.c.l.b16 %v3022_v21  ;;  %v3507_v30 = vunpack.c.h.b16 %v3022_v21  ;;  %1821 = vadd.xlane.f32.xlu1 %v1820_v2  ;;  %1818 = vadd.xlane.f32.xlu0 %v1817_v9  ;;  %v1425_v2 = vld [vmem:[%s12517_s13 + $0x2c8] sm:$0xff]  ;;  %v1427_v21 = vld [vmem:[%s12517_s13 + $0x2d8] sm:$0xff] }
 0x167   : > { %v3792_v32 = vsel %vm15715_vm7, %v3790_v20, %v3785_v28  ;;  %v1612_v33 = vpop.xlane.xlu1 %1611  ;;  %v1609_v35 = vpop.xlane.xlu0 %1608 }
 0x168   : > { %v3797_v39 = vrot.slane %v3506_v29, %v12745_v8  ;;  %v3804_v40 = vrot.slane %v3507_v30, %v12750_v13  ;;  %v3023_v42 = vpack.c.bf16 %v1612_v33, %v1609_v35  ;;  %v1844_v29 = vsel %vm1576_vm0, %v1425_v2, 0.0 }
 0x169   : > { %v1841_v30 = vsel %vm1576_vm0, %v1424_v3, 0.0 }
 0x16a   : > { %v3799_v44 = vsel %vm3798_vm8, %v3797_v39, %v3792_v32  ;;  %v3508_v46 = vunpack.c.l.b16 %v3023_v42  ;;  %v3509_v47 = vunpack.c.h.b16 %v3023_v42  ;;  %1827 = vadd.xlane.f32.xlu1 %v1826_v22  ;;  %1824 = vadd.xlane.f32.xlu0 %v1823_v31  ;;  %v1426_v22 = vld [vmem:[%s12517_s13 + $0x2d0] sm:$0xff]  ;;  %v1428_v39 = vld [vmem:[%s12517_s13 + $0x2e0] sm:$0xff] }
 0x16b   : > { %v3806_v51 = vsel %vm15717_vm9, %v3804_v40, %v3799_v44  ;;  %v1618_v52 = vpop.xlane.xlu1 %1617  ;;  %v1615_v56 = vpop.xlane.xlu0 %1614  ;;  %v1847_v44 = vsel %vm1576_vm0, %v1426_v22, 0.0  ;;  %v1853_v61 = vsel %vm1576_vm0, %v1428_v39, 0.0 }
 0x16c   : > { %v3811_v58 = vrot.slane %v3508_v46, %v12764_v34  ;;  %v3818_v59 = vrot.slane %v3509_v47, %v12771_v41  ;;  %v3024_v60 = vpack.c.bf16 %v1618_v52, %v1615_v56  ;;  %v1431_v56 = vld [vmem:[%s12517_s13 + $0x2f8] sm:$0xff] }
 0x16e   : > { %v3813_v63 = vsel %vm15714_vm10, %v3811_v58, %v3806_v51  ;;  %v3510_v0 = vunpack.c.l.b16 %v3024_v60  ;;  %v3511_v1 = vunpack.c.h.b16 %v3024_v60  ;;  %1833 = vadd.xlane.f32.xlu1 %v1832_v43  ;;  %1830 = vadd.xlane.f32.xlu0 %v1829_v48  ;;  %v1850_v43 = vsel %vm1576_vm0, %v1427_v21, 0.0 }
 0x16f   : > { %v3820_v5 = vsel %vm15716_vm11, %v3818_v59, %v3813_v63  ;;  %v1624_v6 = vpop.xlane.xlu1 %1623  ;;  %v1621_v9 = vpop.xlane.xlu0 %1620  ;;  %v1856_v60 = vsel %vm1576_vm0, %v1429_v38, 0.0 }
 0x170   : > { %v3825_v12 = vrot.slane %v3510_v0, %v12780_v54  ;;  %v3832_v14 = vrot.slane %v3511_v1, %v12783_v55  ;;  %v3025_v16 = vpack.c.bf16 %v1624_v6, %v1621_v9  ;;  %v1433_v9 = vld [vmem:[%s12517_s13 + $0x308] sm:$0xff] }
 0x172   : > { %v3827_v17 = vsel %vm3826_vm12, %v3825_v12, %v3820_v5  ;;  %v3512_v18 = vunpack.c.l.b16 %v3025_v16  ;;  %v3513_v20 = vunpack.c.h.b16 %v3025_v16  ;;  %1839 = vadd.xlane.f32.xlu1 %v1838_v4  ;;  %1836 = vadd.xlane.f32.xlu0 %v1835_v10  ;;  %v1432_v4 = vld [vmem:[%s12517_s13 + $0x300] sm:$0xff]  ;;  %v1862_v16 = vsel %vm1576_vm0, %v1431_v56, 0.0 }
 0x173   : > { %v3834_v24 = vsel %vm3833_vm13, %v3832_v14, %v3827_v17  ;;  %v1630_v26 = vpop.xlane.xlu1 %1629  ;;  %v1627_v28 = vpop.xlane.xlu0 %1626  ;;  %v1859_v17 = vsel %vm1576_vm0, %v1430_v57, 0.0 }
 0x174   : > { %v3839_v31 = vrot.slane %v3512_v18, %v12794_v7  ;;  %v3846_v32 = vrot.slane %v3513_v20, %v12801_v15  ;;  %v3026_v33 = vpack.c.bf16 %v1630_v26, %v1627_v28  ;;  %v1435_v28 = vld [vmem:[%s12517_s13 + $0x318] sm:$0xff] }
 0x176   : > { %v3514_v35 = vunpack.c.l.b16 %v3026_v33  ;;  %v3515_v36 = vunpack.c.h.b16 %v3026_v33  ;;  %1845 = vadd.xlane.f32.xlu1 %v1844_v29  ;;  %1842 = vadd.xlane.f32.xlu0 %v1841_v30  ;;  %v3841_v46 = vsel %vm3840_vm14, %v3839_v31, %v3834_v24  ;;  %v1434_v29 = vld [vmem:[%s12517_s13 + $0x310] sm:$0xff]  ;;  %v1868_v33 = vsel %vm1576_vm0, %v1433_v9, 0.0 }
 0x177   : > { %v1636_v40 = vpop.xlane.xlu1 %1635  ;;  %v1633_v42 = vpop.xlane.xlu0 %1632  ;;  %v12817_v48 = vsel %vm3847_vm15, %v3846_v32, %v3841_v46  ;;  %v1436_v46 = vld [vmem:[%s12517_s13 + $0x320] sm:$0xff] }
 0x178   : > { %v3027_v47 = vpack.c.bf16 %v1636_v40, %v1633_v42  ;;  %v3852_v49 = vrot.slane %v3514_v35, %v12694_v19  ;;  %v3856_v50 = vrot.slane %v3515_v36, %v12702_v25  ;;  %v1865_v35 = vsel %vm1576_vm0, %v1432_v4, 0.0 }
 0x17a   : > { %v3516_v51 = vunpack.c.l.b16 %v3027_v47  ;;  %v3517_v52 = vunpack.c.h.b16 %v3027_v47  ;;  %1851 = vadd.xlane.f32.xlu1 %v1850_v43  ;;  %1848 = vadd.xlane.f32.xlu0 %v1847_v44  ;;  %v3857_v2 = vsel %vm3749_vm1, %v3856_v50, %v3852_v49  ;;  %v1437_v44 = vld [vmem:[%s12517_s13 + $0x328] sm:$0xff] }
 0x17b   : > { %v1642_v58 = vpop.xlane.xlu1 %1641  ;;  %v1639_v59 = vpop.xlane.xlu0 %1638 }
 0x17c   : > { %v3861_v63 = vrot.slane %v3516_v51, %v12699_v23  ;;  %v3866_v0 = vrot.slane %v3517_v52, %v12705_v27  ;;  %v3028_v1 = vpack.c.bf16 %v1642_v58, %v1639_v59  ;;  %v1874_v51 = vsel %vm1576_vm0, %v1435_v28, 0.0 }
 0x17d   : > { %v1871_v52 = vsel %vm1576_vm0, %v1434_v29, 0.0 }
 0x17e   : > { %v3862_v3 = vsel %vm3756_vm2, %v3861_v63, %v3857_v2  ;;  %v3518_v5 = vunpack.c.l.b16 %v3028_v1  ;;  %v3519_v6 = vunpack.c.h.b16 %v3028_v1  ;;  %1857 = vadd.xlane.f32.xlu1 %v1856_v60  ;;  %1854 = vadd.xlane.f32.xlu0 %v1853_v61  ;;  %v1439_v63 = vld [vmem:[%s12517_s13 + $0x338] sm:$0xff] }
 0x17f   : > { %v3867_v10 = vsel %vm3763_vm3, %v3866_v0, %v3862_v3  ;;  %v1648_v12 = vpop.xlane.xlu1 %1647  ;;  %v1645_v14 = vpop.xlane.xlu0 %1644  ;;  %v1438_v0 = vld [vmem:[%s12517_s13 + $0x330] sm:$0xff] }
 0x180   : > { %v3871_v18 = vrot.slane %v3518_v5, %v12712_v37  ;;  %v3876_v20 = vrot.slane %v3519_v6, %v12721_v45  ;;  %v3029_v21 = vpack.c.bf16 %v1648_v12, %v1645_v14  ;;  %v1880_v5 = vsel %vm1576_vm0, %v1437_v44, 0.0 }
 0x181   : > { %v1877_v6 = vsel %vm1576_vm0, %v1436_v46, 0.0 }
 0x182   : > { %v3872_v22 = vsel %vm3770_vm4, %v3871_v18, %v3867_v10  ;;  %v3520_v24 = vunpack.c.l.b16 %v3029_v21  ;;  %v3521_v26 = vunpack.c.h.b16 %v3029_v21  ;;  %1863 = vadd.xlane.f32.xlu1 %v1862_v16  ;;  %1860 = vadd.xlane.f32.xlu0 %v1859_v17  ;;  %v1441_v17 = vld [vmem:[%s12517_s13 + $0x348] sm:$0xff]  ;;  %v1440_v18 = vld [vmem:[%s12517_s13 + $0x340] sm:$0xff] }
 0x183   : > { %v3877_v30 = vsel %vm3777_vm5, %v3876_v20, %v3872_v22  ;;  %v1654_v31 = vpop.xlane.xlu1 %1653  ;;  %v1651_v32 = vpop.xlane.xlu0 %1650 }
 0x184   : > { %v3881_v36 = vrot.slane %v3520_v24, %v12730_v53  ;;  %v3886_v38 = vrot.slane %v3521_v26, %v12737_v62  ;;  %v3030_v39 = vpack.c.bf16 %v1654_v31, %v1651_v32  ;;  %v1886_v24 = vsel %vm1576_vm0, %v1439_v63, 0.0 }
 0x185   : > { %v1883_v26 = vsel %vm1576_vm0, %v1438_v0, 0.0 }
 0x186   : > { %v3882_v40 = vsel %vm15723_vm6, %v3881_v36, %v3877_v30  ;;  %v3522_v42 = vunpack.c.l.b16 %v3030_v39  ;;  %v3523_v43 = vunpack.c.h.b16 %v3030_v39  ;;  %1869 = vadd.xlane.f32.xlu1 %v1868_v33  ;;  %1866 = vadd.xlane.f32.xlu0 %v1865_v35  ;;  %v1443_v35 = vld [vmem:[%s12517_s13 + $0x358] sm:$0xff]  ;;  %v1442_v36 = vld [vmem:[%s12517_s13 + $0x350] sm:$0xff] }
 0x187   : > { %v3887_v47 = vsel %vm15715_vm7, %v3886_v38, %v3882_v40  ;;  %v1660_v49 = vpop.xlane.xlu1 %1659  ;;  %v1657_v50 = vpop.xlane.xlu0 %1656  ;;  %v1892_v40 = vsel %vm1576_vm0, %v1441_v17, 0.0 }
 0x188   : > { %v3891_v56 = vrot.slane %v3522_v42, %v12745_v8  ;;  %v3896_v57 = vrot.slane %v3523_v43, %v12750_v13  ;;  %v3031_v58 = vpack.c.bf16 %v1660_v49, %v1657_v50  ;;  %v1889_v42 = vsel %vm1576_vm0, %v1440_v18, 0.0 }
 0x18a   : > { %v3892_v59 = vsel %vm3798_vm8, %v3891_v56, %v3887_v47  ;;  %v3524_v60 = vunpack.c.l.b16 %v3031_v58  ;;  %v3525_v61 = vunpack.c.h.b16 %v3031_v58  ;;  %1875 = vadd.xlane.f32.xlu1 %v1874_v51  ;;  %1872 = vadd.xlane.f32.xlu0 %v1871_v52  ;;  %v1445_v51 = vld [vmem:[%s12517_s13 + $0x368] sm:$0xff]  ;;  %v1444_v52 = vld [vmem:[%s12517_s13 + $0x360] sm:$0xff]  ;;  %v1898_v58 = vsel %vm1576_vm0, %v1443_v35, 0.0 }
 0x18b   : > { %v3897_v1 = vsel %vm15717_vm9, %v3896_v57, %v3892_v59  ;;  %v1666_v2 = vpop.xlane.xlu1 %1665  ;;  %v1663_v3 = vpop.xlane.xlu0 %1662  ;;  %v1895_v59 = vsel %vm1576_vm0, %v1442_v36, 0.0  ;;  %v1449_v35 = vld [vmem:[%s12517_s13 + $0x388] sm:$0xff]  ;;  %v1448_v36 = vld [vmem:[%s12517_s13 + $0x380] sm:$0xff] }
 0x18c   : > { %v3901_v9 = vrot.slane %v3524_v60, %v12764_v34  ;;  %v3906_v4 = vrot.slane %v3525_v61, %v12771_v41  ;;  %v3032_v10 = vpack.c.bf16 %v1666_v2, %v1663_v3 }
 0x18e   : > { %v3902_v12 = vsel %vm15714_vm10, %v3901_v9, %v3897_v1  ;;  %v3526_v14 = vunpack.c.l.b16 %v3032_v10  ;;  %v3527_v16 = vunpack.c.h.b16 %v3032_v10  ;;  %1881 = vadd.xlane.f32.xlu1 %v1880_v5  ;;  %1878 = vadd.xlane.f32.xlu0 %v1877_v6  ;;  %v1447_v5 = vld [vmem:[%s12517_s13 + $0x378] sm:$0xff]  ;;  %v1446_v6 = vld [vmem:[%s12517_s13 + $0x370] sm:$0xff]  ;;  %v1904_v10 = vsel %vm1576_vm0, %v1445_v51, 0.0 }
 0x18f   : > { %v3907_v20 = vsel %vm15716_vm11, %v3906_v4, %v3902_v12  ;;  %v1672_v21 = vpop.xlane.xlu1 %1671  ;;  %v1669_v22 = vpop.xlane.xlu0 %1668  ;;  %v1901_v12 = vsel %vm1576_vm0, %v1444_v52, 0.0  ;;  %v1473_v52 = vld [vmem:[%s12517_s13 + $0x448] sm:$0xff] }
 0x190   : > { %v3911_v28 = vrot.slane %v3526_v14, %v12780_v54  ;;  %v3916_v29 = vrot.slane %v3527_v16, %v12783_v55  ;;  %v3033_v30 = vpack.c.bf16 %v1672_v21, %v1669_v22 }
 0x192   : > { %v3912_v31 = vsel %vm3826_vm12, %v3911_v28, %v3907_v20  ;;  %v3528_v32 = vunpack.c.l.b16 %v3033_v30  ;;  %v3529_v33 = vunpack.c.h.b16 %v3033_v30  ;;  %1887 = vadd.xlane.f32.xlu1 %v1886_v24  ;;  %1884 = vadd.xlane.f32.xlu0 %v1883_v26  ;;  %v1907_v30 = vsel %vm1576_vm0, %v1446_v6, 0.0 }
 0x193   : > { %v1678_v38 = vpop.xlane.xlu1 %1677  ;;  %v1675_v39 = vpop.xlane.xlu0 %1674  ;;  %v3917_v43 = vsel %vm3833_vm13, %v3916_v29, %v3912_v31  ;;  %v1910_v29 = vsel %vm1576_vm0, %v1447_v5, 0.0 }
 0x194   : > { %v3921_v44 = vrot.slane %v3528_v32, %v12794_v7  ;;  %v3926_v46 = vrot.slane %v3529_v33, %v12801_v15  ;;  %v3034_v47 = vpack.c.bf16 %v1678_v38, %v1675_v39 }
 0x196   : > { %v3530_v49 = vunpack.c.l.b16 %v3034_v47  ;;  %v3531_v50 = vunpack.c.h.b16 %v3034_v47  ;;  %1893 = vadd.xlane.f32.xlu1 %v1892_v40  ;;  %1890 = vadd.xlane.f32.xlu0 %v1889_v42  ;;  %v3922_v60 = vsel %vm3840_vm14, %v3921_v44, %v3917_v43  ;;  %v1913_v47 = vsel %vm1576_vm0, %v1448_v36, 0.0 }
 0x197   : > { %v1684_v56 = vpop.xlane.xlu1 %1683  ;;  %v1681_v57 = vpop.xlane.xlu0 %1680  ;;  %v12882_v63 = vsel %vm3847_vm15, %v3926_v46, %v3922_v60  ;;  %v1916_v46 = vsel %vm1576_vm0, %v1449_v35, 0.0 }
 0x198   : > { %v3035_v61 = vpack.c.bf16 %v1684_v56, %v1681_v57  ;;  %v3931_v0 = vrot.slane %v3530_v49, %v12694_v19  ;;  %v3935_v1 = vrot.slane %v3531_v50, %v12702_v25  ;;  %v1472_v56 = vld [vmem:[%s12517_s13 + $0x440] sm:$0xff] }
 0x19a   : > { %v3532_v2 = vunpack.c.l.b16 %v3035_v61  ;;  %v3533_v3 = vunpack.c.h.b16 %v3035_v61  ;;  %1899 = vadd.xlane.f32.xlu1 %v1898_v58  ;;  %1896 = vadd.xlane.f32.xlu0 %v1895_v59  ;;  %v3936_v18 = vsel %vm3749_vm1, %v3935_v1, %v3931_v0  ;;  %v1988_v1 = vsel %vm1576_vm0, %v1473_v52, 0.0 }
 0x19b   : > { %v1690_v9 = vpop.xlane.xlu1 %1689  ;;  %v1687_v4 = vpop.xlane.xlu0 %1686 }
 0x19c   : > { %v3940_v14 = vrot.slane %v3532_v2, %v12699_v23  ;;  %v3945_v16 = vrot.slane %v3533_v3, %v12705_v27  ;;  %v3036_v17 = vpack.c.bf16 %v1690_v9, %v1687_v4  ;;  %v1985_v2 = vsel %vm1576_vm0, %v1472_v56, 0.0  ;;  %v1457_v9 = vld [vmem:[%s12517_s13 + $0x3c8] sm:$0xff]  ;;  %v1456_v4 = vld [vmem:[%s12517_s13 + $0x3c0] sm:$0xff] }
 0x19e   : > { %v3941_v20 = vsel %vm3756_vm2, %v3940_v14, %v3936_v18  ;;  %v3534_v21 = vunpack.c.l.b16 %v3036_v17  ;;  %v3535_v22 = vunpack.c.h.b16 %v3036_v17  ;;  %1905 = vadd.xlane.f32.xlu1 %v1904_v10  ;;  %1902 = vadd.xlane.f32.xlu0 %v1901_v12 }
 0x19f   : > { %v3946_v24 = vsel %vm3763_vm3, %v3945_v16, %v3941_v20  ;;  %v1696_v26 = vpop.xlane.xlu1 %1695  ;;  %v1693_v28 = vpop.xlane.xlu0 %1692  ;;  %v1940_v20 = vsel %vm1576_vm0, %v1457_v9, 0.0 }
 0x1a0   : > { %v3950_v31 = vrot.slane %v3534_v21, %v12712_v37  ;;  %v3955_v32 = vrot.slane %v3535_v22, %v12721_v45  ;;  %v3037_v33 = vpack.c.bf16 %v1696_v26, %v1693_v28  ;;  %v1937_v21 = vsel %vm1576_vm0, %v1456_v4, 0.0  ;;  %v1475_v28 = vld [vmem:[%s12517_s13 + $0x458] sm:$0xff] }
 0x1a2   : > { %v3951_v38 = vsel %vm3770_vm4, %v3950_v31, %v3946_v24  ;;  %v3536_v39 = vunpack.c.l.b16 %v3037_v33  ;;  %v3537_v40 = vunpack.c.h.b16 %v3037_v33  ;;  %1911 = vadd.xlane.f32.xlu1 %v1910_v29  ;;  %1908 = vadd.xlane.f32.xlu0 %v1907_v30  ;;  %v1474_v29 = vld [vmem:[%s12517_s13 + $0x450] sm:$0xff] }
 0x1a3   : > { %v3956_v42 = vsel %vm3777_vm5, %v3955_v32, %v3951_v38  ;;  %v1702_v43 = vpop.xlane.xlu1 %1701  ;;  %v1699_v44 = vpop.xlane.xlu0 %1698  ;;  %v1994_v38 = vsel %vm1576_vm0, %v1475_v28, 0.0 }
 0x1a4   : > { %v3960_v49 = vrot.slane %v3536_v39, %v12730_v53  ;;  %v3965_v50 = vrot.slane %v3537_v40, %v12737_v62  ;;  %v3038_v51 = vpack.c.bf16 %v1702_v43, %v1699_v44  ;;  %v1991_v39 = vsel %vm1576_vm0, %v1474_v29, 0.0  ;;  %v1459_v44 = vld [vmem:[%s12517_s13 + $0x3d8] sm:$0xff] }
 0x1a6   : > { %v3961_v57 = vsel %vm15723_vm6, %v3960_v49, %v3956_v42  ;;  %v3538_v58 = vunpack.c.l.b16 %v3038_v51  ;;  %v3539_v59 = vunpack.c.h.b16 %v3038_v51  ;;  %1917 = vadd.xlane.f32.xlu1 %v1916_v46  ;;  %1914 = vadd.xlane.f32.xlu0 %v1913_v47  ;;  %v1458_v46 = vld [vmem:[%s12517_s13 + $0x3d0] sm:$0xff] }
 0x1a7   : > { %v3966_v60 = vsel %vm15715_vm7, %v3965_v50, %v3961_v57  ;;  %v1708_v61 = vpop.xlane.xlu1 %1707  ;;  %v1705_v0 = vpop.xlane.xlu0 %1704  ;;  %v1946_v57 = vsel %vm1576_vm0, %v1459_v44, 0.0 }
 0x1a8   : > { %v3970_v3 = vrot.slane %v3538_v58, %v12745_v8  ;;  %v3975_v5 = vrot.slane %v3539_v59, %v12750_v13  ;;  %v3039_v6 = vpack.c.bf16 %v1708_v61, %v1705_v0  ;;  %v1943_v58 = vsel %vm1576_vm0, %v1458_v46, 0.0  ;;  %v1477_v0 = vld [vmem:[%s12517_s13 + $0x468] sm:$0xff] }
 0x1a9   : > { %v2000_v4 = vsel %vm1576_vm0, %v1477_v0, 0.0 }
 0x1aa   : > { %v3971_v10 = vsel %vm3798_vm8, %v3970_v3, %v3966_v60  ;;  %v3540_v12 = vunpack.c.l.b16 %v3039_v6  ;;  %v3541_v14 = vunpack.c.h.b16 %v3039_v6  ;;  %1989 = vadd.xlane.f32.xlu1 %v1988_v1  ;;  %1986 = vadd.xlane.f32.xlu0 %v1985_v2  ;;  %v1476_v1 = vld [vmem:[%s12517_s13 + $0x460] sm:$0xff] }
 0x1ab   : > { %v3976_v16 = vsel %vm15717_vm9, %v3975_v5, %v3971_v10  ;;  %v1714_v17 = vpop.xlane.xlu1 %1713  ;;  %v1711_v18 = vpop.xlane.xlu0 %1710  ;;  %v1997_v10 = vsel %vm1576_vm0, %v1476_v1, 0.0 }
 0x1ac   : > { %v3980_v22 = vrot.slane %v3540_v12, %v12764_v34  ;;  %v3985_v24 = vrot.slane %v3541_v14, %v12771_v41  ;;  %v3040_v26 = vpack.c.bf16 %v1714_v17, %v1711_v18  ;;  %v1460_v17 = vld [vmem:[%s12517_s13 + $0x3e0] sm:$0xff] }
 0x1ad   : > { %v1949_v29 = vsel %vm1576_vm0, %v1460_v17, 0.0 }
 0x1ae   : > { %v3981_v30 = vsel %vm15714_vm10, %v3980_v22, %v3976_v16  ;;  %v3542_v31 = vunpack.c.l.b16 %v3040_v26  ;;  %v3543_v32 = vunpack.c.h.b16 %v3040_v26  ;;  %1941 = vadd.xlane.f32.xlu1 %v1940_v20  ;;  %1938 = vadd.xlane.f32.xlu0 %v1937_v21  ;;  %v1461_v16 = vld [vmem:[%s12517_s13 + $0x3e8] sm:$0xff] }
 0x1af   : > { %v3986_v33 = vsel %vm15716_vm11, %v3985_v24, %v3981_v30  ;;  %v1720_v35 = vpop.xlane.xlu1 %1719  ;;  %v1717_v36 = vpop.xlane.xlu0 %1716  ;;  %v1952_v28 = vsel %vm1576_vm0, %v1461_v16, 0.0  ;;  %v10868_v16 = vld [vmem:[%s12529_s16 + $0x28] ss:$16 sps:$4 sm:$0xff]  }
 0x1b0   : > { %v3990_v40 = vrot.slane %v3542_v31, %v12780_v54  ;;  %v3995_v42 = vrot.slane %v3543_v32, %v12783_v55  ;;  %v3041_v43 = vpack.c.bf16 %v1720_v35, %v1717_v36  ;;  %v1478_v35 = vld [vmem:[%s12517_s13 + $0x470] sm:$0xff] }
 0x1b2   : > { %v3991_v47 = vsel %vm3826_vm12, %v3990_v40, %v3986_v33  ;;  %v3544_v49 = vunpack.c.l.b16 %v3041_v43  ;;  %v3545_v50 = vunpack.c.h.b16 %v3041_v43  ;;  %1995 = vadd.xlane.f32.xlu1 %v1994_v38  ;;  %1992 = vadd.xlane.f32.xlu0 %v1991_v39  ;;  %v1479_v33 = vld [vmem:[%s12517_s13 + $0x478] sm:$0xff]  ;;  %v10859_v43 = vld [vmem:[%s12529_s16 + $0xc] ss:$16 sps:$4 sm:$0xff]  }
 0x1b3   : > { %v3996_v51 = vsel %vm3833_vm13, %v3995_v42, %v3991_v47  ;;  %v1726_v52 = vpop.xlane.xlu1 %1725  ;;  %v1723_v56 = vpop.xlane.xlu0 %1722  ;;  %v10857_v42 = vld [vmem:[%s12529_s16 + $0x4] ss:$16 sps:$4 sm:$0xff]   ;;  %6346 = vmatprep.subr.bf16.mxu1 %v10859_v43 }
 0x1b4   : > { %v4000_v59 = vrot.slane %v3544_v49, %v12794_v7  ;;  %v4005_v60 = vrot.slane %v3545_v50, %v12801_v15  ;;  %v3042_v61 = vpack.c.bf16 %v1726_v52, %v1723_v56  ;;  %v2006_v49 = vsel %vm1576_vm0, %v1479_v33, 0.0  ;;  %v10862_v52 = vld [vmem:[%s12529_s16 + $0x8] ss:$16 sps:$4 sm:$0xff]   ;;  %6182 = vmatprep.subr.bf16.mxu0 %v10857_v42 }
 0x1b5   : > { %v2003_v50 = vsel %vm1576_vm0, %v1478_v35, 0.0  ;;  %6347 = vmatpush1.bf16.msra.mxu1 %v10862_v52  ;;  %v10877_v52 = vld [vmem:[%s12529_s16 + $0x6c] ss:$16 sps:$4 sm:$0xff]  }
 0x1b6   : > { %v4001_v2 = vsel %vm3840_vm14, %v4000_v59, %v3996_v51  ;;  %v3546_v3 = vunpack.c.l.b16 %v3042_v61  ;;  %v3547_v5 = vunpack.c.h.b16 %v3042_v61  ;;  %1947 = vadd.xlane.f32.xlu1 %v1946_v57  ;;  %1944 = vadd.xlane.f32.xlu0 %v1943_v58  ;;  %v10861_v51 = vld [vmem:[%s12529_s16] ss:$16 sps:$4 sm:$0xff]  }
 0x1b7   : > { %v1732_v6 = vpop.xlane.xlu1 %1731  ;;  %v1729_v9 = vpop.xlane.xlu0 %1728  ;;  %v12945_v12 = vsel %vm3847_vm15, %v4005_v60, %v4001_v2  ;;  %v1463_v59 = vld [vmem:[%s12517_s13 + $0x3f8] sm:$0xff]  ;;  %v1462_v60 = vld [vmem:[%s12517_s13 + $0x3f0] sm:$0xff]  ;;  %6183 = vmatpush1.bf16.msra.mxu0 %v10861_v51 }
 0x1b8   : > { %v3043_v14 = vpack.c.bf16 %v1732_v6, %v1729_v9  ;;  %v4010_v18 = vrot.slane %v3546_v3, %v12694_v19  ;;  %v4014_v20 = vrot.slane %v3547_v5, %v12702_v25  ;;  %v10863_v2 = vld [vmem:[%s12529_s16 + $0x24] ss:$16 sps:$4 sm:$0xff]   ;;  %v10865_v3 = vld [vmem:[%s12529_s16 + $0x2c] ss:$16 sps:$4 sm:$0xff]  }
 0x1b9   : > { %6184 = vmatprep.subr.bf16.mxu0 %v10863_v2  ;;  %6348 = vmatprep.subr.bf16.mxu1 %v10865_v3  ;;  %v10875_v51 = vld [vmem:[%s12529_s16 + $0x64] ss:$16 sps:$4 sm:$0xff]  }
 0x1ba   : > { %v3548_v21 = vunpack.c.l.b16 %v3043_v14  ;;  %v3549_v22 = vunpack.c.h.b16 %v3043_v14  ;;  %2001 = vadd.xlane.f32.xlu1 %v2000_v4  ;;  %1998 = vadd.xlane.f32.xlu0 %v1997_v10  ;;  %v4015_v36 = vsel %vm3749_vm1, %v4014_v20, %v4010_v18  ;;  %v1958_v4 = vsel %vm1576_vm0, %v1463_v59, 0.0  ;;  %v10867_v14 = vld [vmem:[%s12529_s16 + $0x20] ss:$16 sps:$4 sm:$0xff]  }
 0x1bb   : > { %v1738_v24 = vpop.xlane.xlu1 %1737  ;;  %v1735_v26 = vpop.xlane.xlu0 %1734  ;;  %v1955_v10 = vsel %vm1576_vm0, %v1462_v60, 0.0  ;;  %6185 = vmatpush1.bf16.msra.mxu0 %v10867_v14  ;;  %6349 = vmatpush1.bf16.msra.mxu1 %v10868_v16  ;;  %v10881_v14 = vld [vmem:[%s12529_s16 + $0x84] ss:$16 sps:$4 sm:$0xff]   ;;  %v10883_v16 = vld [vmem:[%s12529_s16 + $0x8c] ss:$16 sps:$4 sm:$0xff]  }
 0x1bc   : > { %v4019_v30 = vrot.slane %v3548_v21, %v12699_v23  ;;  %v4024_v31 = vrot.slane %v3549_v22, %v12705_v27  ;;  %v3044_v32 = vpack.c.bf16 %v1738_v24, %v1735_v26  ;;  %v1481_v21 = vld [vmem:[%s12517_s13 + $0x488] sm:$0xff]  ;;  %v1480_v22 = vld [vmem:[%s12517_s13 + $0x480] sm:$0xff] }
 0x1bd   : > { %v2012_v35 = vsel %vm1576_vm0, %v1481_v21, 0.0 }
 0x1be   : > { %v4020_v38 = vsel %vm3756_vm2, %v4019_v30, %v4015_v36  ;;  %v3550_v39 = vunpack.c.l.b16 %v3044_v32  ;;  %v3551_v40 = vunpack.c.h.b16 %v3044_v32  ;;  %1953 = vadd.xlane.f32.xlu1 %v1952_v28  ;;  %1950 = vadd.xlane.f32.xlu0 %v1949_v29  ;;  %v10869_v29 = vld [vmem:[%s12529_s16 + $0x44] ss:$16 sps:$4 sm:$0xff]   ;;  %v10871_v30 = vld [vmem:[%s12529_s16 + $0x4c] ss:$16 sps:$4 sm:$0xff]   ;;  %v2009_v36 = vsel %vm1576_vm0, %v1480_v22, 0.0 }
 0x1bf   : > { %v4025_v44 = vsel %vm3763_vm3, %v4024_v31, %v4020_v38  ;;  %v1744_v46 = vpop.xlane.xlu1 %1743  ;;  %v1741_v47 = vpop.xlane.xlu0 %1740  ;;  %v10873_v38 = vld [vmem:[%s12529_s16 + $0x40] ss:$16 sps:$4 sm:$0xff]   ;;  %6186 = vmatprep.subr.bf16.mxu0 %v10869_v29  ;;  %6350 = vmatprep.subr.bf16.mxu1 %v10871_v30 }
 0x1c0   : > { %v4029_v56 = vrot.slane %v3550_v39, %v12712_v37  ;;  %v4034_v57 = vrot.slane %v3551_v40, %v12721_v45  ;;  %v3045_v58 = vpack.c.bf16 %v1744_v46, %v1741_v47  ;;  %v10874_v39 = vld [vmem:[%s12529_s16 + $0x48] ss:$16 sps:$4 sm:$0xff]   ;;  %6187 = vmatpush1.bf16.msra.mxu0 %v10873_v38  ;;  %v10887_v38 = vld [vmem:[%s12529_s16 + $0xa4] ss:$16 sps:$4 sm:$0xff]  }
 0x1c1   : > { %v1464_v46 = vld [vmem:[%s12517_s13 + $0x400] sm:$0xff]  ;;  %6351 = vmatpush1.bf16.msra.mxu1 %v10874_v39  ;;  %6188 = vmatprep.subr.bf16.mxu0 %v10875_v51 }
 0x1c2   : > { %v4030_v61 = vsel %vm3770_vm4, %v4029_v56, %v4025_v44  ;;  %v3552_v0 = vunpack.c.l.b16 %v3045_v58  ;;  %v3553_v1 = vunpack.c.h.b16 %v3045_v58  ;;  %2007 = vadd.xlane.f32.xlu1 %v2006_v49  ;;  %2004 = vadd.xlane.f32.xlu0 %v2003_v50  ;;  %v1465_v44 = vld [vmem:[%s12517_s13 + $0x408] sm:$0xff]  ;;  %v1961_v60 = vsel %vm1576_vm0, %v1464_v46, 0.0  ;;  %v10889_v39 = vld [vmem:[%s12529_s16 + $0xac] ss:$16 sps:$4 sm:$0xff]  }
 0x1c3   : > { %v4035_v5 = vsel %vm3777_vm5, %v4034_v57, %v4030_v61  ;;  %v1750_v6 = vpop.xlane.xlu1 %1749  ;;  %v1747_v9 = vpop.xlane.xlu0 %1746  ;;  %v1964_v59 = vsel %vm1576_vm0, %v1465_v44, 0.0  ;;  %v10879_v61 = vld [vmem:[%s12529_s16 + $0x60] ss:$16 sps:$4 sm:$0xff]   ;;  %6352 = vmatprep.subr.bf16.mxu1 %v10877_v52 }
 0x1c4   : > { %v4039_v17 = vrot.slane %v3552_v0, %v12730_v53  ;;  %v4044_v18 = vrot.slane %v3553_v1, %v12737_v62  ;;  %v3046_v20 = vpack.c.bf16 %v1750_v6, %v1747_v9  ;;  %v10880_v0 = vld [vmem:[%s12529_s16 + $0x68] ss:$16 sps:$4 sm:$0xff]   ;;  %6189 = vmatpush1.bf16.msra.mxu0 %v10879_v61  ;;  %v1485_v52 = vld [vmem:[%s12517_s13 + $0x4a8] sm:$0xff]  ;;  %v10895_v61 = vld [vmem:[%s12529_s16 + $0xcc] ss:$16 sps:$4 sm:$0xff]  }
 0x1c5   : > { %v1482_v6 = vld [vmem:[%s12517_s13 + $0x490] sm:$0xff]  ;;  %6353 = vmatpush1.bf16.msra.mxu1 %v10880_v0  ;;  %6190 = vmatprep.subr.bf16.mxu0 %v10881_v14  ;;  %v1468_v14 = vld [vmem:[%s12517_s13 + $0x420] sm:$0xff] }
 0x1c6   : > { %v4040_v24 = vsel %vm15723_vm6, %v4039_v17, %v4035_v5  ;;  %v3554_v26 = vunpack.c.l.b16 %v3046_v20  ;;  %v3555_v28 = vunpack.c.h.b16 %v3046_v20  ;;  %1959 = vadd.xlane.f32.xlu1 %v1958_v4  ;;  %1956 = vadd.xlane.f32.xlu0 %v1955_v10  ;;  %v1483_v5 = vld [vmem:[%s12517_s13 + $0x498] sm:$0xff]  ;;  %v2015_v22 = vsel %vm1576_vm0, %v1482_v6, 0.0  ;;  %v10898_v6 = vld [vmem:[%s12529_s16 + $0xc8] ss:$16 sps:$4 sm:$0xff]  }
 0x1c7   : > { %v4045_v31 = vsel %vm15715_vm7, %v4044_v18, %v4040_v24  ;;  %v1756_v32 = vpop.xlane.xlu1 %1755  ;;  %v1753_v33 = vpop.xlane.xlu0 %1752  ;;  %v2018_v21 = vsel %vm1576_vm0, %v1483_v5, 0.0  ;;  %v10885_v24 = vld [vmem:[%s12529_s16 + $0x80] ss:$16 sps:$4 sm:$0xff]   ;;  %6354 = vmatprep.subr.bf16.mxu1 %v10883_v16 }
 0x1c8   : > { %v4049_v40 = vrot.slane %v3554_v26, %v12745_v8  ;;  %v4054_v42 = vrot.slane %v3555_v28, %v12750_v13  ;;  %v3047_v43 = vpack.c.bf16 %v1756_v32, %v1753_v33  ;;  %v10886_v26 = vld [vmem:[%s12529_s16 + $0x88] ss:$16 sps:$4 sm:$0xff]   ;;  %6191 = vmatpush1.bf16.msra.mxu0 %v10885_v24  ;;  %v10897_v5 = vld [vmem:[%s12529_s16 + $0xc0] ss:$16 sps:$4 sm:$0xff]   ;;  %v10901_v24 = vld [vmem:[%s12529_s16 + $0xec] ss:$16 sps:$4 sm:$0xff]  }
 0x1c9   : > { %v1466_v32 = vld [vmem:[%s12517_s13 + $0x410] sm:$0xff]  ;;  %6355 = vmatpush1.bf16.msra.mxu1 %v10886_v26  ;;  %6192 = vmatprep.subr.bf16.mxu0 %v10887_v38  ;;  %v1487_v38 = vld [vmem:[%s12517_s13 + $0x4b8] sm:$0xff] }
 0x1ca   : > { %v4050_v47 = vsel %vm3798_vm8, %v4049_v40, %v4045_v31  ;;  %v3556_v49 = vunpack.c.l.b16 %v3047_v43  ;;  %v3557_v50 = vunpack.c.h.b16 %v3047_v43  ;;  %2013 = vadd.xlane.f32.xlu1 %v2012_v35  ;;  %2010 = vadd.xlane.f32.xlu0 %v2009_v36  ;;  %v1467_v31 = vld [vmem:[%s12517_s13 + $0x418] sm:$0xff]  ;;  %v1967_v46 = vsel %vm1576_vm0, %v1466_v32, 0.0  ;;  %v10904_v32 = vld [vmem:[%s12529_s16 + $0xe8] ss:$16 sps:$4 sm:$0xff]  }
 0x1cb   : > { %v4055_v56 = vsel %vm15717_vm9, %v4054_v42, %v4050_v47  ;;  %v1762_v57 = vpop.xlane.xlu1 %1761  ;;  %v1759_v58 = vpop.xlane.xlu0 %1758  ;;  %v1970_v44 = vsel %vm1576_vm0, %v1467_v31, 0.0  ;;  %v10891_v47 = vld [vmem:[%s12529_s16 + $0xa0] ss:$16 sps:$4 sm:$0xff]   ;;  %6356 = vmatprep.subr.bf16.mxu1 %v10889_v39  ;;  %v1486_v39 = vld [vmem:[%s12517_s13 + $0x4b0] sm:$0xff] }
 0x1cc   : > { %v4059_v1 = vrot.slane %v3556_v49, %v12764_v34  ;;  %v4064_v2 = vrot.slane %v3557_v50, %v12771_v41  ;;  %v3048_v3 = vpack.c.bf16 %v1762_v57, %v1759_v58  ;;  %v10892_v49 = vld [vmem:[%s12529_s16 + $0xa8] ss:$16 sps:$4 sm:$0xff]   ;;  %6193 = vmatpush1.bf16.msra.mxu0 %v10891_v47  ;;  %v10903_v31 = vld [vmem:[%s12529_s16 + $0xe0] ss:$16 sps:$4 sm:$0xff]   ;;  %v10907_v47 = vld [vmem:[%s12529_s16 + $0x10c] ss:$16 sps:$4 sm:$0xff]  }
 0x1cd   : > { %6357 = vmatpush1.bf16.msra.mxu1 %v10892_v49 }
 0x1ce   : > { %v4060_v9 = vsel %vm15714_vm10, %v4059_v1, %v4055_v56  ;;  %v3558_v4 = vunpack.c.l.b16 %v3048_v3  ;;  %v3559_v10 = vunpack.c.h.b16 %v3048_v3  ;;  %1965 = vadd.xlane.f32.xlu1 %v1964_v59  ;;  %1962 = vadd.xlane.f32.xlu0 %v1961_v60  ;;  %v1484_v56 = vld [vmem:[%s12517_s13 + $0x4a0] sm:$0xff]  ;;  %v10893_v60 = vld [vmem:[%s12529_s16 + $0xc4] ss:$16 sps:$4 sm:$0xff]  }
 0x1cf   : > { %v4065_v17 = vsel %vm15716_vm11, %v4064_v2, %v4060_v9  ;;  %v1768_v18 = vpop.xlane.xlu1 %1767  ;;  %v1765_v20 = vpop.xlane.xlu0 %1764  ;;  %v2024_v2 = vsel %vm1576_vm0, %v1485_v52, 0.0  ;;  %v2021_v3 = vsel %vm1576_vm0, %v1484_v56, 0.0  ;;  %6194 = vmatprep.subr.bf16.mxu0 %v10893_v60  ;;  %6358 = vmatprep.subr.bf16.mxu1 %v10895_v61  ;;  %v2030_v52 = vsel %vm1576_vm0, %v1487_v38, 0.0 }
 0x1d0   : > { %v4069_v28 = vrot.slane %v3558_v4, %v12780_v54  ;;  %v4074_v29 = vrot.slane %v3559_v10, %v12783_v55  ;;  %v3049_v30 = vpack.c.bf16 %v1768_v18, %v1765_v20  ;;  %v1469_v10 = vld [vmem:[%s12517_s13 + $0x428] sm:$0xff]  ;;  %6195 = vmatpush1.bf16.msra.mxu0 %v10897_v5  ;;  %v2027_v56 = vsel %vm1576_vm0, %v1486_v39, 0.0 }
 0x1d1   : > { %6359 = vmatpush1.bf16.msra.mxu1 %v10898_v6  ;;  %v10911_v6 = vld [vmem:[%s12529_s16 + $0x124] ss:$16 sps:$4 sm:$0xff]  }
 0x1d2   : > { %v4070_v33 = vsel %vm3826_vm12, %v4069_v28, %v4065_v17  ;;  %v3560_v35 = vunpack.c.l.b16 %v3049_v30  ;;  %v3561_v36 = vunpack.c.h.b16 %v3049_v30  ;;  %2019 = vadd.xlane.f32.xlu1 %v2018_v21  ;;  %2016 = vadd.xlane.f32.xlu0 %v2015_v22  ;;  %v10899_v22 = vld [vmem:[%s12529_s16 + $0xe4] ss:$16 sps:$4 sm:$0xff]   ;;  %v1973_v30 = vsel %vm1576_vm0, %v1468_v14, 0.0 }
 0x1d3   : > { %v4075_v40 = vsel %vm3833_vm13, %v4074_v29, %v4070_v33  ;;  %v1774_v42 = vpop.xlane.xlu1 %1773  ;;  %v1771_v43 = vpop.xlane.xlu0 %1770  ;;  %v1976_v29 = vsel %vm1576_vm0, %v1469_v10, 0.0  ;;  %6196 = vmatprep.subr.bf16.mxu0 %v10899_v22  ;;  %6360 = vmatprep.subr.bf16.mxu1 %v10901_v24 }
 0x1d4   : > { %v4079_v50 = vrot.slane %v3560_v35, %v12794_v7  ;;  %v3050_v51 = vpack.c.bf16 %v1774_v42, %v1771_v43  ;;  %v4084_v57 = vrot.slane %v3561_v36, %v12801_v15  ;;  %6197 = vmatpush1.bf16.msra.mxu0 %v10903_v31 }
 0x1d5   : > { %6361 = vmatpush1.bf16.msra.mxu1 %v10904_v32 }
 0x1d6   : > { %v3562_v58 = vunpack.c.l.b16 %v3050_v51  ;;  %v3563_v59 = vunpack.c.h.b16 %v3050_v51  ;;  %1971 = vadd.xlane.f32.xlu1 %v1970_v44  ;;  %1968 = vadd.xlane.f32.xlu0 %v1967_v46  ;;  %v4080_v9 = vsel %vm3840_vm14, %v4079_v50, %v4075_v40  ;;  %v10905_v46 = vld [vmem:[%s12529_s16 + $0x104] ss:$16 sps:$4 sm:$0xff]  }
 0x1d7   : > { %v1780_v0 = vpop.xlane.xlu1 %1779  ;;  %v1777_v1 = vpop.xlane.xlu0 %1776  ;;  %v13042_v18 = vsel %vm3847_vm15, %v4084_v57, %v4080_v9  ;;  %v10909_v57 = vld [vmem:[%s12529_s16 + $0x100] ss:$16 sps:$4 sm:$0xff]   ;;  %6198 = vmatprep.subr.bf16.mxu0 %v10905_v46  ;;  %6362 = vmatprep.subr.bf16.mxu1 %v10907_v47  ;;  %v10913_v9 = vld [vmem:[%s12529_s16 + $0x12c] ss:$16 sps:$4 sm:$0xff]  }
 0x1d8   : > { %v3051_v4 = vpack.c.bf16 %v1780_v0, %v1777_v1  ;;  %v4089_v16 = vrot.slane %v3562_v58, %v12694_v19  ;;  %v4093_v17 = vrot.slane %v3563_v59, %v12702_v25  ;;  %v10910_v58 = vld [vmem:[%s12529_s16 + $0x108] ss:$16 sps:$4 sm:$0xff]   ;;  %v1471_v0 = vld [vmem:[%s12517_s13 + $0x438] sm:$0xff]  ;;  %6199 = vmatpush1.bf16.msra.mxu0 %v10909_v57 }
 0x1d9   : > { %v1470_v1 = vld [vmem:[%s12517_s13 + $0x430] sm:$0xff]  ;;  %6363 = vmatpush1.bf16.msra.mxu1 %v10910_v58  ;;  %6200 = vmatprep.subr.bf16.mxu0 %v10911_v6  ;;  %v10923_v58 = vld [vmem:[%s12529_s16 + $0x164] ss:$16 sps:$4 sm:$0xff]  }
 0x1da   : > { %v3564_v20 = vunpack.c.l.b16 %v3051_v4  ;;  %v3565_v21 = vunpack.c.h.b16 %v3051_v4  ;;  %2025 = vadd.xlane.f32.xlu1 %v2024_v2  ;;  %2022 = vadd.xlane.f32.xlu0 %v2021_v3  ;;  %v4094_v40 = vsel %vm3749_vm1, %v4093_v17, %v4089_v16  ;;  %v1982_v16 = vsel %vm1576_vm0, %v1471_v0, 0.0 }
 0x1db   : > { %v1786_v26 = vpop.xlane.xlu1 %1785  ;;  %v1783_v28 = vpop.xlane.xlu0 %1782  ;;  %v1979_v17 = vsel %vm1576_vm0, %v1470_v1, 0.0  ;;  %6364 = vmatprep.subr.bf16.mxu1 %v10913_v9 }
 0x1dc   : > { %v4098_v33 = vrot.slane %v3564_v20, %v12699_v23  ;;  %v4103_v35 = vrot.slane %v3565_v21, %v12705_v27  ;;  %v3052_v36 = vpack.c.bf16 %v1786_v26, %v1783_v28  ;;  %v10915_v20 = vld [vmem:[%s12529_s16 + $0x120] ss:$16 sps:$4 sm:$0xff]   ;;  %v10916_v21 = vld [vmem:[%s12529_s16 + $0x128] ss:$16 sps:$4 sm:$0xff]  }
 0x1dd   : > { %v1505_v28 = vld [vmem:[%s12517_s13 + $0x548] sm:$0xff]  ;;  %6201 = vmatpush1.bf16.msra.mxu0 %v10915_v20  ;;  %6365 = vmatpush1.bf16.msra.mxu1 %v10916_v21 }
 0x1de   : > { %v4099_v42 = vsel %vm3756_vm2, %v4098_v33, %v4094_v40  ;;  %v3566_v43 = vunpack.c.l.b16 %v3052_v36  ;;  %v3567_v44 = vunpack.c.h.b16 %v3052_v36  ;;  %1977 = vadd.xlane.f32.xlu1 %v1976_v29  ;;  %1974 = vadd.xlane.f32.xlu0 %v1973_v30  ;;  %v1504_v29 = vld [vmem:[%s12517_s13 + $0x540] sm:$0xff]  ;;  %v10917_v33 = vld [vmem:[%s12529_s16 + $0x144] ss:$16 sps:$4 sm:$0xff]   ;;  %v2084_v40 = vsel %vm1576_vm0, %v1505_v28, 0.0 }
 0x1df   : > { %v4104_v49 = vsel %vm3763_vm3, %v4103_v35, %v4099_v42  ;;  %v1792_v50 = vpop.xlane.xlu1 %1791  ;;  %v1789_v51 = vpop.xlane.xlu0 %1788  ;;  %v10919_v35 = vld [vmem:[%s12529_s16 + $0x14c] ss:$16 sps:$4 sm:$0xff]   ;;  %v2081_v42 = vsel %vm1576_vm0, %v1504_v29, 0.0  ;;  %6202 = vmatprep.subr.bf16.mxu0 %v10917_v33  ;;  %v10929_v21 = vld [vmem:[%s12529_s16 + $0x184] ss:$16 sps:$4 sm:$0xff]  }
 0x1e0   : > { %v4108_v59 = vrot.slane %v3566_v43, %v12712_v37  ;;  %v4113_v60 = vrot.slane %v3567_v44, %v12721_v45  ;;  %v3053_v61 = vpack.c.bf16 %v1792_v50, %v1789_v51  ;;  %v10921_v43 = vld [vmem:[%s12529_s16 + $0x140] ss:$16 sps:$4 sm:$0xff]   ;;  %v10922_v44 = vld [vmem:[%s12529_s16 + $0x148] ss:$16 sps:$4 sm:$0xff]   ;;  %6366 = vmatprep.subr.bf16.mxu1 %v10919_v35 }
 0x1e1   : > { %v1489_v50 = vld [vmem:[%s12517_s13 + $0x4c8] sm:$0xff]  ;;  %v1488_v51 = vld [vmem:[%s12517_s13 + $0x4c0] sm:$0xff]  ;;  %6203 = vmatpush1.bf16.msra.mxu0 %v10921_v43  ;;  %6367 = vmatpush1.bf16.msra.mxu1 %v10922_v44 }
 0x1e2   : > { %v4109_v2 = vsel %vm3770_vm4, %v4108_v59, %v4104_v49  ;;  %v3568_v3 = vunpack.c.l.b16 %v3053_v61  ;;  %v3569_v5 = vunpack.c.h.b16 %v3053_v61  ;;  %2031 = vadd.xlane.f32.xlu1 %v2030_v52  ;;  %2028 = vadd.xlane.f32.xlu0 %v2027_v56  ;;  %v10925_v59 = vld [vmem:[%s12529_s16 + $0x16c] ss:$16 sps:$4 sm:$0xff]   ;;  %v2036_v1 = vsel %vm1576_vm0, %v1489_v50, 0.0  ;;  %v10935_v44 = vld [vmem:[%s12529_s16 + $0x1a4] ss:$16 sps:$4 sm:$0xff]  }
 0x1e3   : > { %v4114_v4 = vsel %vm3777_vm5, %v4113_v60, %v4109_v2  ;;  %v1798_v10 = vpop.xlane.xlu1 %1797  ;;  %v1795_v14 = vpop.xlane.xlu0 %1794  ;;  %v2033_v2 = vsel %vm1576_vm0, %v1488_v51, 0.0  ;;  %6204 = vmatprep.subr.bf16.mxu0 %v10923_v58  ;;  %6368 = vmatprep.subr.bf16.mxu1 %v10925_v59 }
 0x1e4   : > { %v4118_v22 = vrot.slane %v3568_v3, %v12730_v53  ;;  %v4123_v24 = vrot.slane %v3569_v5, %v12737_v62  ;;  %v3054_v26 = vpack.c.bf16 %v1798_v10, %v1795_v14  ;;  %v10927_v3 = vld [vmem:[%s12529_s16 + $0x160] ss:$16 sps:$4 sm:$0xff]   ;;  %v10928_v5 = vld [vmem:[%s12529_s16 + $0x168] ss:$16 sps:$4 sm:$0xff]  }
 0x1e5   : > { %v1507_v10 = vld [vmem:[%s12517_s13 + $0x558] sm:$0xff]  ;;  %v1506_v14 = vld [vmem:[%s12517_s13 + $0x550] sm:$0xff]  ;;  %6205 = vmatpush1.bf16.msra.mxu0 %v10927_v3  ;;  %6369 = vmatpush1.bf16.msra.mxu1 %v10928_v5 }
 0x1e6   : > { %v4119_v30 = vsel %vm15723_vm6, %v4118_v22, %v4114_v4  ;;  %v3570_v31 = vunpack.c.l.b16 %v3054_v26  ;;  %v3571_v32 = vunpack.c.h.b16 %v3054_v26  ;;  %1983 = vadd.xlane.f32.xlu1 %v1982_v16  ;;  %1980 = vadd.xlane.f32.xlu0 %v1979_v17  ;;  %v10931_v22 = vld [vmem:[%s12529_s16 + $0x18c] ss:$16 sps:$4 sm:$0xff]   ;;  %v2090_v29 = vsel %vm1576_vm0, %v1507_v10, 0.0  ;;  %v10941_v5 = vld [vmem:[%s12529_s16 + $0x1c4] ss:$16 sps:$4 sm:$0xff]  }
 0x1e7   : > { %v4124_v36 = vsel %vm15715_vm7, %v4123_v24, %v4119_v30  ;;  %v1804_v38 = vpop.xlane.xlu1 %1803  ;;  %v1801_v39 = vpop.xlane.xlu0 %1800  ;;  %v2087_v30 = vsel %vm1576_vm0, %v1506_v14, 0.0  ;;  %6206 = vmatprep.subr.bf16.mxu0 %v10929_v21  ;;  %6370 = vmatprep.subr.bf16.mxu1 %v10931_v22  ;;  %v1493_v22 = vld [vmem:[%s12517_s13 + $0x4e8] sm:$0xff] }
 0x1e8   : > { %v4128_v46 = vrot.slane %v3570_v31, %v12745_v8  ;;  %v4133_v47 = vrot.slane %v3571_v32, %v12750_v13  ;;  %v3055_v49 = vpack.c.bf16 %v1804_v38, %v1801_v39  ;;  %v10933_v31 = vld [vmem:[%s12529_s16 + $0x180] ss:$16 sps:$4 sm:$0xff]   ;;  %v10934_v32 = vld [vmem:[%s12529_s16 + $0x188] ss:$16 sps:$4 sm:$0xff]  }
 0x1e9   : > { %v1491_v38 = vld [vmem:[%s12517_s13 + $0x4d8] sm:$0xff]  ;;  %v1490_v39 = vld [vmem:[%s12517_s13 + $0x4d0] sm:$0xff]  ;;  %6207 = vmatpush1.bf16.msra.mxu0 %v10933_v31  ;;  %6371 = vmatpush1.bf16.msra.mxu1 %v10934_v32 }
 0x1ea   : > { %v4129_v52 = vsel %vm3798_vm8, %v4128_v46, %v4124_v36  ;;  %v3572_v56 = vunpack.c.l.b16 %v3055_v49  ;;  %v3573_v57 = vunpack.c.h.b16 %v3055_v49  ;;  %2085 = vadd.xlane.f32.xlu1 %v2084_v40  ;;  %2082 = vadd.xlane.f32.xlu0 %v2081_v42  ;;  %v10937_v46 = vld [vmem:[%s12529_s16 + $0x1ac] ss:$16 sps:$4 sm:$0xff]   ;;  %v2042_v51 = vsel %vm1576_vm0, %v1491_v38, 0.0  ;;  %v10947_v31 = vld [vmem:[%s12529_s16 + $0x1e4] ss:$16 sps:$4 sm:$0xff]  }
 0x1eb   : > { %v4134_v60 = vsel %vm15717_vm9, %v4133_v47, %v4129_v52  ;;  %v1810_v61 = vpop.xlane.xlu1 %1809  ;;  %v1807_v0 = vpop.xlane.xlu0 %1806  ;;  %v2039_v52 = vsel %vm1576_vm0, %v1490_v39, 0.0  ;;  %6208 = vmatprep.subr.bf16.mxu0 %v10935_v44  ;;  %6372 = vmatprep.subr.bf16.mxu1 %v10937_v46  ;;  %v10949_v32 = vld [vmem:[%s12529_s16 + $0x1ec] ss:$16 sps:$4 sm:$0xff]   ;;  %v10951_v39 = vld [vmem:[%s12529_s16 + $0x1e0] ss:$16 sps:$4 sm:$0xff]  }
 0x1ec   : > { %v4138_v6 = vrot.slane %v3572_v56, %v12764_v34  ;;  %v4143_v9 = vrot.slane %v3573_v57, %v12771_v41  ;;  %v3056_v4 = vpack.c.bf16 %v1810_v61, %v1807_v0  ;;  %v10939_v56 = vld [vmem:[%s12529_s16 + $0x1a0] ss:$16 sps:$4 sm:$0xff]   ;;  %v10940_v57 = vld [vmem:[%s12529_s16 + $0x1a8] ss:$16 sps:$4 sm:$0xff]  }
 0x1ed   : > { %v1509_v61 = vld [vmem:[%s12517_s13 + $0x568] sm:$0xff]  ;;  %v1508_v0 = vld [vmem:[%s12517_s13 + $0x560] sm:$0xff]  ;;  %6209 = vmatpush1.bf16.msra.mxu0 %v10939_v56  ;;  %6373 = vmatpush1.bf16.msra.mxu1 %v10940_v57  ;;  %v1511_v46 = vld [vmem:[%s12517_s13 + $0x578] sm:$0xff] }
 0x1ee   : > { %v4139_v16 = vsel %vm15714_vm10, %v4138_v6, %v4134_v60  ;;  %v3574_v17 = vunpack.c.l.b16 %v3056_v4  ;;  %v3575_v20 = vunpack.c.h.b16 %v3056_v4  ;;  %2037 = vadd.xlane.f32.xlu1 %v2036_v1  ;;  %2034 = vadd.xlane.f32.xlu0 %v2033_v2  ;;  %v10943_v6 = vld [vmem:[%s12529_s16 + $0x1cc] ss:$16 sps:$4 sm:$0xff]   ;;  %v2096_v10 = vsel %vm1576_vm0, %v1509_v61, 0.0  ;;  %v10955_v56 = vld [vmem:[%s12529_s16 + $0x204] ss:$16 sps:$4 sm:$0xff]  }
 0x1ef   : > { %v4144_v24 = vsel %vm15716_vm11, %v4143_v9, %v4139_v16  ;;  %v1816_v26 = vpop.xlane.xlu1 %1815  ;;  %v1813_v28 = vpop.xlane.xlu0 %1812  ;;  %v2093_v14 = vsel %vm1576_vm0, %v1508_v0, 0.0  ;;  %v10945_v16 = vld [vmem:[%s12529_s16 + $0x1c0] ss:$16 sps:$4 sm:$0xff]   ;;  %6210 = vmatprep.subr.bf16.mxu0 %v10941_v5  ;;  %6374 = vmatprep.subr.bf16.mxu1 %v10943_v6  ;;  %v10958_v57 = vld [vmem:[%s12529_s16 + $0x20c] ss:$16 sps:$4 sm:$0xff]   ;;  %v2102_v61 = vsel %vm1576_vm0, %v1511_v46, 0.0 }
 0x1f0   : > { %v4148_v33 = vrot.slane %v3574_v17, %v12780_v54  ;;  %v4153_v35 = vrot.slane %v3575_v20, %v12783_v55  ;;  %v3057_v36 = vpack.c.bf16 %v1816_v26, %v1813_v28  ;;  %v10946_v17 = vld [vmem:[%s12529_s16 + $0x1c8] ss:$16 sps:$4 sm:$0xff]   ;;  %v1495_v5 = vld [vmem:[%s12517_s13 + $0x4f8] sm:$0xff]  ;;  %v1497_v46 = vld [vmem:[%s12517_s13 + $0x508] sm:$0xff] }
 0x1f1   : > { %6211 = vmatpush1.bf16.msra.mxu0 %v10945_v16  ;;  %6375 = vmatpush1.bf16.msra.mxu1 %v10946_v17  ;;  %v1494_v6 = vld [vmem:[%s12517_s13 + $0x4f0] sm:$0xff] }
 0x1f2   : > { %v4149_v40 = vsel %vm3826_vm12, %v4148_v33, %v4144_v24  ;;  %v3576_v42 = vunpack.c.l.b16 %v3057_v36  ;;  %v3577_v43 = vunpack.c.h.b16 %v3057_v36  ;;  %2091 = vadd.xlane.f32.xlu1 %v2090_v29  ;;  %2088 = vadd.xlane.f32.xlu0 %v2087_v30  ;;  %v1492_v24 = vld [vmem:[%s12517_s13 + $0x4e0] sm:$0xff]  ;;  %v2048_v36 = vsel %vm1576_vm0, %v1493_v22, 0.0 }
 0x1f3   : > { %v4154_v47 = vsel %vm3833_vm13, %v4153_v35, %v4149_v40  ;;  %v1822_v49 = vpop.xlane.xlu1 %1821  ;;  %v1819_v50 = vpop.xlane.xlu0 %1818  ;;  %v2045_v38 = vsel %vm1576_vm0, %v1492_v24, 0.0  ;;  %v10952_v40 = vld [vmem:[%s12529_s16 + $0x1e8] ss:$16 sps:$4 sm:$0xff]   ;;  %6212 = vmatprep.subr.bf16.mxu0 %v10947_v31  ;;  %6376 = vmatprep.subr.bf16.mxu1 %v10949_v32  ;;  %v2051_v22 = vsel %vm1576_vm0, %v1494_v6, 0.0 }
 0x1f4   : > { %v4158_v58 = vrot.slane %v3576_v42, %v12794_v7  ;;  %v4163_v59 = vrot.slane %v3577_v43, %v12801_v15  ;;  %v3058_v60 = vpack.c.bf16 %v1822_v49, %v1819_v50 }
 0x1f5   : > { %6213 = vmatpush1.bf16.msra.mxu0 %v10951_v39  ;;  %6377 = vmatpush1.bf16.msra.mxu1 %v10952_v40 }
 0x1f6   : > { %v4159_v1 = vsel %vm3840_vm14, %v4158_v58, %v4154_v47  ;;  %v3578_v2 = vunpack.c.l.b16 %v3058_v60  ;;  %v3579_v3 = vunpack.c.h.b16 %v3058_v60  ;;  %2043 = vadd.xlane.f32.xlu1 %v2042_v51  ;;  %2040 = vadd.xlane.f32.xlu0 %v2039_v52  ;;  %v1510_v47 = vld [vmem:[%s12517_s13 + $0x570] sm:$0xff] }
 0x1f7   : > { %v1828_v9 = vpop.xlane.xlu1 %1827  ;;  %v1825_v4 = vpop.xlane.xlu0 %1824  ;;  %v13135_v20 = vsel %vm3847_vm15, %v4163_v59, %v4159_v1  ;;  %v2099_v0 = vsel %vm1576_vm0, %v1510_v47, 0.0  ;;  %6223 = vmatprep.subr.bf16.mxu0 %v10955_v56  ;;  %6387 = vmatprep.subr.bf16.mxu1 %v10958_v57  ;;  %v1496_v47 = vld [vmem:[%s12517_s13 + $0x500] sm:$0xff] }
 0x1f8   : > { %v3059_v21 = vpack.c.bf16 %v1828_v9, %v1825_v4  ;;  %v4168_v26 = vrot.slane %v3578_v2, %v12694_v19  ;;  %v4172_v28 = vrot.slane %v3579_v3, %v12702_v25 }
 0x1fa   : > { %v3580_v29 = vunpack.c.l.b16 %v3059_v21  ;;  %v3581_v30 = vunpack.c.h.b16 %v3059_v21  ;;  %2097 = vadd.xlane.f32.xlu1 %v2096_v10  ;;  %2094 = vadd.xlane.f32.xlu0 %v2093_v14  ;;  %v4173_v49 = vsel %vm3749_vm1, %v4172_v28, %v4168_v26  ;;  %v2054_v21 = vsel %vm1576_vm0, %v1495_v5, 0.0 }
 0x1fb   : > { %v1834_v33 = vpop.xlane.xlu1 %1833  ;;  %v1831_v35 = vpop.xlane.xlu0 %1830 }
 0x1fc   : > { %v4177_v42 = vrot.slane %v3580_v29, %v12699_v23  ;;  %v4182_v43 = vrot.slane %v3581_v30, %v12705_v27  ;;  %v3060_v44 = vpack.c.bf16 %v1834_v33, %v1831_v35  ;;  %v1513_v29 = vld [vmem:[%s12517_s13 + $0x588] sm:$0xff]  ;;  %v1512_v30 = vld [vmem:[%s12517_s13 + $0x580] sm:$0xff] }
 0x1fd   : > { %v2108_v39 = vsel %vm1576_vm0, %v1513_v29, 0.0  ;;  %v2105_v40 = vsel %vm1576_vm0, %v1512_v30, 0.0 }
 0x1fe   : > { %v4178_v50 = vsel %vm3756_vm2, %v4177_v42, %v4173_v49  ;;  %v3582_v51 = vunpack.c.l.b16 %v3060_v44  ;;  %v3583_v52 = vunpack.c.h.b16 %v3060_v44  ;;  %2049 = vadd.xlane.f32.xlu1 %v2048_v36  ;;  %2046 = vadd.xlane.f32.xlu0 %v2045_v38 }
 0x1ff   : > { %v4183_v58 = vsel %vm3763_vm3, %v4182_v43, %v4178_v50  ;;  %v1840_v59 = vpop.xlane.xlu1 %1839  ;;  %v1837_v60 = vpop.xlane.xlu0 %1836 }
 0x200   : > { %v4187_v1 = vrot.slane %v3582_v51, %v12712_v37  ;;  %v4192_v2 = vrot.slane %v3583_v52, %v12721_v45  ;;  %v3061_v3 = vpack.c.bf16 %v1840_v59, %v1837_v60  ;;  %v2057_v59 = vsel %vm1576_vm0, %v1496_v47, 0.0 }
 0x202   : > { %v4188_v9 = vsel %vm3770_vm4, %v4187_v1, %v4183_v58  ;;  %v3584_v4 = vunpack.c.l.b16 %v3061_v3  ;;  %v3585_v10 = vunpack.c.h.b16 %v3061_v3  ;;  %2103 = vadd.xlane.f32.xlu1 %v2102_v61  ;;  %2100 = vadd.xlane.f32.xlu0 %v2099_v0  ;;  %v2060_v58 = vsel %vm1576_vm0, %v1497_v46, 0.0  ;;  %v1515_v1 = vld [vmem:[%s12517_s13 + $0x598] sm:$0xff] }
 0x203   : > { %v4193_v14 = vsel %vm3777_vm5, %v4192_v2, %v4188_v9  ;;  %v1846_v16 = vpop.xlane.xlu1 %1845  ;;  %v1843_v17 = vpop.xlane.xlu0 %1842  ;;  %v1514_v2 = vld [vmem:[%s12517_s13 + $0x590] sm:$0xff] }
 0x204   : > { %v4197_v24 = vrot.slane %v3584_v4, %v12730_v53  ;;  %v4202_v26 = vrot.slane %v3585_v10, %v12737_v62  ;;  %v3062_v28 = vpack.c.bf16 %v1846_v16, %v1843_v17  ;;  %v2111_v16 = vsel %vm1576_vm0, %v1514_v2, 0.0 }
 0x206   : > { %v4198_v31 = vsel %vm15723_vm6, %v4197_v24, %v4193_v14  ;;  %v3586_v32 = vunpack.c.l.b16 %v3062_v28  ;;  %v3587_v33 = vunpack.c.h.b16 %v3062_v28  ;;  %2055 = vadd.xlane.f32.xlu1 %v2054_v21  ;;  %2052 = vadd.xlane.f32.xlu0 %v2051_v22  ;;  %v2114_v14 = vsel %vm1576_vm0, %v1515_v1, 0.0  ;;  %v1499_v24 = vld [vmem:[%s12517_s13 + $0x518] sm:$0xff] }
 0x207   : > { %v4203_v35 = vsel %vm15715_vm7, %v4202_v26, %v4198_v31  ;;  %v1852_v36 = vpop.xlane.xlu1 %1851  ;;  %v1849_v38 = vpop.xlane.xlu0 %1848  ;;  %v1498_v26 = vld [vmem:[%s12517_s13 + $0x510] sm:$0xff] }
 0x208   : > { %v4207_v42 = vrot.slane %v3586_v32, %v12745_v8  ;;  %v4212_v43 = vrot.slane %v3587_v33, %v12750_v13  ;;  %v3063_v44 = vpack.c.bf16 %v1852_v36, %v1849_v38  ;;  %v2063_v36 = vsel %vm1576_vm0, %v1498_v26, 0.0 }
 0x20a   : > { %v4208_v49 = vsel %vm3798_vm8, %v4207_v42, %v4203_v35  ;;  %v3588_v50 = vunpack.c.l.b16 %v3063_v44  ;;  %v3589_v51 = vunpack.c.h.b16 %v3063_v44  ;;  %2109 = vadd.xlane.f32.xlu1 %v2108_v39  ;;  %2106 = vadd.xlane.f32.xlu0 %v2105_v40  ;;  %v2066_v35 = vsel %vm1576_vm0, %v1499_v24, 0.0  ;;  %v1517_v42 = vld [vmem:[%s12517_s13 + $0x5a8] sm:$0xff] }
 0x20b   : > { %v4213_v52 = vsel %vm15717_vm9, %v4212_v43, %v4208_v49  ;;  %v1858_v56 = vpop.xlane.xlu1 %1857  ;;  %v1855_v57 = vpop.xlane.xlu0 %1854  ;;  %v1516_v43 = vld [vmem:[%s12517_s13 + $0x5a0] sm:$0xff] }
 0x20c   : > { %v4217_v60 = vrot.slane %v3588_v50, %v12764_v34  ;;  %v4222_v61 = vrot.slane %v3589_v51, %v12771_v41  ;;  %v3064_v0 = vpack.c.bf16 %v1858_v56, %v1855_v57  ;;  %v2120_v50 = vsel %vm1576_vm0, %v1517_v42, 0.0  ;;  %v1501_v57 = vld [vmem:[%s12517_s13 + $0x528] sm:$0xff] }
 0x20d   : > { %v2117_v51 = vsel %vm1576_vm0, %v1516_v43, 0.0 }
 0x20e   : > { %v4218_v3 = vsel %vm15714_vm10, %v4217_v60, %v4213_v52  ;;  %v3590_v5 = vunpack.c.l.b16 %v3064_v0  ;;  %v3591_v6 = vunpack.c.h.b16 %v3064_v0  ;;  %2061 = vadd.xlane.f32.xlu1 %v2060_v58  ;;  %2058 = vadd.xlane.f32.xlu0 %v2057_v59  ;;  %v1500_v58 = vld [vmem:[%s12517_s13 + $0x520] sm:$0xff] }
 0x20f   : > { %v4223_v9 = vsel %vm15716_vm11, %v4222_v61, %v4218_v3  ;;  %v1864_v4 = vpop.xlane.xlu1 %1863  ;;  %v1861_v10 = vpop.xlane.xlu0 %1860 }
 0x210   : > { %v4227_v17 = vrot.slane %v3590_v5, %v12780_v54  ;;  %v4232_v21 = vrot.slane %v3591_v6, %v12783_v55  ;;  %v3065_v22 = vpack.c.bf16 %v1864_v4, %v1861_v10  ;;  %v2072_v5 = vsel %vm1576_vm0, %v1501_v57, 0.0  ;;  %v1536_v57 = vld [vmem:[%s12517_s13 + $0x640] sm:$0xff] }
 0x211   : > { %v2069_v6 = vsel %vm1576_vm0, %v1500_v58, 0.0 }
 0x212   : > { %v4228_v28 = vsel %vm3826_vm12, %v4227_v17, %v4223_v9  ;;  %v3592_v29 = vunpack.c.l.b16 %v3065_v22  ;;  %v3593_v30 = vunpack.c.h.b16 %v3065_v22  ;;  %2115 = vadd.xlane.f32.xlu1 %v2114_v14  ;;  %2112 = vadd.xlane.f32.xlu0 %v2111_v16  ;;  %v1519_v14 = vld [vmem:[%s12517_s13 + $0x5b8] sm:$0xff]  ;;  %v1518_v16 = vld [vmem:[%s12517_s13 + $0x5b0] sm:$0xff] }
 0x213   : > { %v4233_v31 = vsel %vm3833_vm13, %v4232_v21, %v4228_v28  ;;  %v1870_v32 = vpop.xlane.xlu1 %1869  ;;  %v1867_v33 = vpop.xlane.xlu0 %1866 }
 0x214   : > { %v4237_v38 = vrot.slane %v3592_v29, %v12794_v7  ;;  %v4242_v39 = vrot.slane %v3593_v30, %v12801_v15  ;;  %v3066_v40 = vpack.c.bf16 %v1870_v32, %v1867_v33  ;;  %v2126_v30 = vsel %vm1576_vm0, %v1519_v14, 0.0  ;;  %v1520_v14 = vld [vmem:[%s12517_s13 + $0x5c0] sm:$0xff] }
 0x216   : > { %v3594_v44 = vunpack.c.l.b16 %v3066_v40  ;;  %v3595_v46 = vunpack.c.h.b16 %v3066_v40  ;;  %2067 = vadd.xlane.f32.xlu1 %v2066_v35  ;;  %2064 = vadd.xlane.f32.xlu0 %v2063_v36  ;;  %v4238_v52 = vsel %vm3840_vm14, %v4237_v38, %v4233_v31  ;;  %v2123_v31 = vsel %vm1576_vm0, %v1518_v16, 0.0  ;;  %v1503_v36 = vld [vmem:[%s12517_s13 + $0x538] sm:$0xff]  ;;  %v1502_v38 = vld [vmem:[%s12517_s13 + $0x530] sm:$0xff] }
 0x217   : > { %v1876_v47 = vpop.xlane.xlu1 %1875  ;;  %v1873_v49 = vpop.xlane.xlu0 %1872  ;;  %v13208_v59 = vsel %vm3847_vm15, %v4242_v39, %v4238_v52 }
 0x218   : > { %v3067_v56 = vpack.c.bf16 %v1876_v47, %v1873_v49  ;;  %v4247_v60 = vrot.slane %v3594_v44, %v12694_v19  ;;  %v4251_v61 = vrot.slane %v3595_v46, %v12702_v25  ;;  %v2078_v47 = vsel %vm1576_vm0, %v1503_v36, 0.0 }
 0x219   : > { %v2075_v49 = vsel %vm1576_vm0, %v1502_v38, 0.0 }
 0x21a   : > { %v3596_v0 = vunpack.c.l.b16 %v3067_v56  ;;  %v3597_v1 = vunpack.c.h.b16 %v3067_v56  ;;  %2121 = vadd.xlane.f32.xlu1 %v2120_v50  ;;  %2118 = vadd.xlane.f32.xlu0 %v2117_v51  ;;  %v4252_v17 = vsel %vm3749_vm1, %v4251_v61, %v4247_v60  ;;  %v1537_v56 = vld [vmem:[%s12517_s13 + $0x648] sm:$0xff] }
 0x21b   : > { %v1882_v2 = vpop.xlane.xlu1 %1881  ;;  %v1879_v3 = vpop.xlane.xlu0 %1878 }
 0x21c   : > { %v4256_v9 = vrot.slane %v3596_v0, %v12699_v23  ;;  %v4261_v4 = vrot.slane %v3597_v1, %v12705_v27  ;;  %v3068_v10 = vpack.c.bf16 %v1882_v2, %v1879_v3  ;;  %v2180_v3 = vsel %vm1576_vm0, %v1537_v56, 0.0 }
 0x21e   : > { %v4257_v21 = vsel %vm3756_vm2, %v4256_v9, %v4252_v17  ;;  %v3598_v22 = vunpack.c.l.b16 %v3068_v10  ;;  %v3599_v24 = vunpack.c.h.b16 %v3068_v10  ;;  %2073 = vadd.xlane.f32.xlu1 %v2072_v5  ;;  %2070 = vadd.xlane.f32.xlu0 %v2069_v6  ;;  %v2177_v5 = vsel %vm1576_vm0, %v1536_v57, 0.0  ;;  %v1521_v10 = vld [vmem:[%s12517_s13 + $0x5c8] sm:$0xff] }
 0x21f   : > { %v4262_v26 = vsel %vm3763_vm3, %v4261_v4, %v4257_v21  ;;  %v1888_v28 = vpop.xlane.xlu1 %1887  ;;  %v1885_v29 = vpop.xlane.xlu0 %1884 }
 0x220   : > { %v4266_v32 = vrot.slane %v3598_v22, %v12712_v37  ;;  %v4271_v33 = vrot.slane %v3599_v24, %v12721_v45  ;;  %v3069_v35 = vpack.c.bf16 %v1888_v28, %v1885_v29  ;;  %v2132_v28 = vsel %vm1576_vm0, %v1521_v10, 0.0 }
 0x221   : > { %v2129_v29 = vsel %vm1576_vm0, %v1520_v14, 0.0 }
 0x222   : > { %v4267_v39 = vsel %vm3770_vm4, %v4266_v32, %v4262_v26  ;;  %v3600_v40 = vunpack.c.l.b16 %v3069_v35  ;;  %v3601_v42 = vunpack.c.h.b16 %v3069_v35  ;;  %2127 = vadd.xlane.f32.xlu1 %v2126_v30  ;;  %2124 = vadd.xlane.f32.xlu0 %v2123_v31  ;;  %v1538_v35 = vld [vmem:[%s12517_s13 + $0x650] sm:$0xff] }
 0x223   : > { %v4272_v43 = vsel %vm3777_vm5, %v4271_v33, %v4267_v39  ;;  %v1894_v44 = vpop.xlane.xlu1 %1893  ;;  %v1891_v46 = vpop.xlane.xlu0 %1890  ;;  %v1539_v33 = vld [vmem:[%s12517_s13 + $0x658] sm:$0xff] }
 0x224   : > { %v4276_v50 = vrot.slane %v3600_v40, %v12730_v53  ;;  %v4281_v51 = vrot.slane %v3601_v42, %v12737_v62  ;;  %v3070_v52 = vpack.c.bf16 %v1894_v44, %v1891_v46  ;;  %v2186_v44 = vsel %vm1576_vm0, %v1539_v33, 0.0  ;;  %v1542_v33 = vld [vmem:[%s12517_s13 + $0x670] sm:$0xff] }
 0x225   : > { %v2183_v46 = vsel %vm1576_vm0, %v1538_v35, 0.0 }
 0x226   : > { %v4277_v58 = vsel %vm15723_vm6, %v4276_v50, %v4272_v43  ;;  %v3602_v60 = vunpack.c.l.b16 %v3070_v52  ;;  %v3603_v61 = vunpack.c.h.b16 %v3070_v52  ;;  %2079 = vadd.xlane.f32.xlu1 %v2078_v47  ;;  %2076 = vadd.xlane.f32.xlu0 %v2075_v49  ;;  %v1522_v52 = vld [vmem:[%s12517_s13 + $0x5d0] sm:$0xff] }
 0x227   : > { %v4282_v0 = vsel %vm15715_vm7, %v4281_v51, %v4277_v58  ;;  %v1900_v1 = vpop.xlane.xlu1 %1899  ;;  %v1897_v2 = vpop.xlane.xlu0 %1896  ;;  %v1523_v51 = vld [vmem:[%s12517_s13 + $0x5d8] sm:$0xff] }
 0x228   : > { %v4286_v6 = vrot.slane %v3602_v60, %v12745_v8  ;;  %v4291_v9 = vrot.slane %v3603_v61, %v12750_v13  ;;  %v3071_v4 = vpack.c.bf16 %v1900_v1, %v1897_v2  ;;  %v2138_v1 = vsel %vm1576_vm0, %v1523_v51, 0.0 }
 0x229   : > { %v2135_v2 = vsel %vm1576_vm0, %v1522_v52, 0.0 }
 0x22a   : > { %v4287_v16 = vsel %vm3798_vm8, %v4286_v6, %v4282_v0  ;;  %v3604_v17 = vunpack.c.l.b16 %v3071_v4  ;;  %v3605_v21 = vunpack.c.h.b16 %v3071_v4  ;;  %2181 = vadd.xlane.f32.xlu1 %v2180_v3  ;;  %2178 = vadd.xlane.f32.xlu0 %v2177_v5  ;;  %v1540_v4 = vld [vmem:[%s12517_s13 + $0x660] sm:$0xff] }
 0x22b   : > { %v4292_v22 = vsel %vm15717_vm9, %v4291_v9, %v4287_v16  ;;  %v1906_v24 = vpop.xlane.xlu1 %1905  ;;  %v1903_v26 = vpop.xlane.xlu0 %1902  ;;  %v1541_v9 = vld [vmem:[%s12517_s13 + $0x668] sm:$0xff] }
 0x22c   : > { %v4296_v30 = vrot.slane %v3604_v17, %v12764_v34  ;;  %v4301_v31 = vrot.slane %v3605_v21, %v12771_v41  ;;  %v3072_v32 = vpack.c.bf16 %v1906_v24, %v1903_v26  ;;  %v2192_v17 = vsel %vm1576_vm0, %v1541_v9, 0.0  ;;  %v1525_v24 = vld [vmem:[%s12517_s13 + $0x5e8] sm:$0xff]  ;;  %v1524_v26 = vld [vmem:[%s12517_s13 + $0x5e0] sm:$0xff]  ;;  %v1546_v9 = vld [vmem:[%s12517_s13 + $0x690] sm:$0xff] }
 0x22d   : > { %v2189_v21 = vsel %vm1576_vm0, %v1540_v4, 0.0 }
 0x22e   : > { %v4297_v36 = vsel %vm15714_vm10, %v4296_v30, %v4292_v22  ;;  %v3606_v38 = vunpack.c.l.b16 %v3072_v32  ;;  %v3607_v39 = vunpack.c.h.b16 %v3072_v32  ;;  %2133 = vadd.xlane.f32.xlu1 %v2132_v28  ;;  %2130 = vadd.xlane.f32.xlu0 %v2129_v29  ;;  %v2144_v30 = vsel %vm1576_vm0, %v1525_v24, 0.0  ;;  %v1543_v32 = vld [vmem:[%s12517_s13 + $0x678] sm:$0xff] }
 0x22f   : > { %v4302_v40 = vsel %vm15716_vm11, %v4301_v31, %v4297_v36  ;;  %v1912_v42 = vpop.xlane.xlu1 %1911  ;;  %v1909_v43 = vpop.xlane.xlu0 %1908  ;;  %v2141_v31 = vsel %vm1576_vm0, %v1524_v26, 0.0 }
 0x230   : > { %v4306_v47 = vrot.slane %v3606_v38, %v12780_v54  ;;  %v4311_v49 = vrot.slane %v3607_v39, %v12783_v55  ;;  %v3073_v50 = vpack.c.bf16 %v1912_v42, %v1909_v43  ;;  %v2198_v38 = vsel %vm1576_vm0, %v1543_v32, 0.0  ;;  %v1526_v42 = vld [vmem:[%s12517_s13 + $0x5f0] sm:$0xff] }
 0x231   : > { %v2195_v39 = vsel %vm1576_vm0, %v1542_v33, 0.0 }
 0x232   : > { %v4307_v56 = vsel %vm3826_vm12, %v4306_v47, %v4302_v40  ;;  %v3608_v57 = vunpack.c.l.b16 %v3073_v50  ;;  %v3609_v58 = vunpack.c.h.b16 %v3073_v50  ;;  %2187 = vadd.xlane.f32.xlu1 %v2186_v44  ;;  %2184 = vadd.xlane.f32.xlu0 %v2183_v46  ;;  %v1527_v40 = vld [vmem:[%s12517_s13 + $0x5f8] sm:$0xff]  ;;  %v2147_v47 = vsel %vm1576_vm0, %v1526_v42, 0.0  ;;  %v1544_v50 = vld [vmem:[%s12517_s13 + $0x680] sm:$0xff] }
 0x233   : > { %v4312_v60 = vsel %vm3833_vm13, %v4311_v49, %v4307_v56  ;;  %v1918_v61 = vpop.xlane.xlu1 %1917  ;;  %v1915_v0 = vpop.xlane.xlu0 %1914  ;;  %v2150_v46 = vsel %vm1576_vm0, %v1527_v40, 0.0  ;;  %v1545_v49 = vld [vmem:[%s12517_s13 + $0x688] sm:$0xff] }
 0x234   : > { %v4316_v3 = vrot.slane %v3608_v57, %v12794_v7  ;;  %v4321_v5 = vrot.slane %v3609_v58, %v12801_v15  ;;  %v13265_v6 = vpack.c.bf16 %v1918_v61, %v1915_v0  ;;  %v2204_v56 = vsel %vm1576_vm0, %v1545_v49, 0.0  ;;  %v1529_v58 = vld [vmem:[%s12517_s13 + $0x608] sm:$0xff] }
 0x235   : > { %v2201_v57 = vsel %vm1576_vm0, %v1544_v50, 0.0  ;;  %v1549_v49 = vld [vmem:[%s12517_s13 + $0x6a8] sm:$0xff]  ;;  %v1548_v50 = vld [vmem:[%s12517_s13 + $0x6a0] sm:$0xff] }
 0x236   : > { %v4317_v10 = vsel %vm3840_vm14, %v4316_v3, %v4312_v60  ;;  %2139 = vadd.xlane.f32.xlu1 %v2138_v1  ;;  %2136 = vadd.xlane.f32.xlu0 %v2135_v2  ;;  %v1528_v60 = vld [vmem:[%s12517_s13 + $0x600] sm:$0xff]  ;;  %v2156_v2 = vsel %vm1576_vm0, %v1529_v58, 0.0 }
 0x237   : > { %v1990_v14 = vpop.xlane.xlu1 %1989  ;;  %v1987_v16 = vpop.xlane.xlu0 %1986  ;;  %v13273_v22 = vsel %vm3847_vm15, %v4321_v5, %v4317_v10  ;;  %v2153_v3 = vsel %vm1576_vm0, %v1528_v60, 0.0  ;;  %v1547_v5 = vld [vmem:[%s12517_s13 + $0x698] sm:$0xff]  ;;  %v2216_v60 = vsel %vm1576_vm0, %v1549_v49, 0.0 }
 0x238   : > { %v3086_v61 = vpack.c.bf16 %v1990_v14, %v1987_v16  ;;  %v2210_v24 = vsel %vm1576_vm0, %v1547_v5, 0.0  ;;  %v2207_v14 = vsel %vm1576_vm0, %v1546_v9, 0.0 }
 0x23a   : > { %2193 = vadd.xlane.f32.xlu1 %v2192_v17  ;;  %2190 = vadd.xlane.f32.xlu0 %v2189_v21  ;;  %v3634_v10 = vunpack.c.l.b16 %v3086_v61  ;;  %v3635_v16 = vunpack.c.h.b16 %v3086_v61  ;;  %v2213_v61 = vsel %vm1576_vm0, %v1548_v50, 0.0 }
 0x23b   : > { %v1942_v28 = vpop.xlane.xlu1 %1941  ;;  %v1939_v29 = vpop.xlane.xlu0 %1938 }
 0x23c   : > { %v3078_v26 = vpack.c.bf16 %v1942_v28, %v1939_v29 }
 0x23e   : > { %2145 = vadd.xlane.f32.xlu1 %v2144_v30  ;;  %2142 = vadd.xlane.f32.xlu0 %v2141_v31  ;;  %v1531_v30 = vld [vmem:[%s12517_s13 + $0x618] sm:$0xff]  ;;  %v1530_v31 = vld [vmem:[%s12517_s13 + $0x610] sm:$0xff]  ;;  %v3618_v28 = vunpack.c.l.b16 %v3078_v26  ;;  %v3619_v29 = vunpack.c.h.b16 %v3078_v26 }
 0x23f   : > { %v1996_v35 = vpop.xlane.xlu1 %1995  ;;  %v1993_v36 = vpop.xlane.xlu0 %1992  ;;  %v2162_v40 = vsel %vm1576_vm0, %v1531_v30, 0.0  ;;  %v2159_v42 = vsel %vm1576_vm0, %v1530_v31, 0.0 }
 0x240   : > { %v3087_v4 = vpack.c.bf16 %v1996_v35, %v1993_v36  ;;  %v4444_v35 = vrot.slane %v3634_v10, %v12694_v19  ;;  %v4369_v5 = vrot.slane %v3619_v29, %v12702_v25  ;;  %v1532_v10 = vld [vmem:[%s12517_s13 + $0x620] sm:$0xff] }
 0x242   : > { %2199 = vadd.xlane.f32.xlu1 %v2198_v38  ;;  %2196 = vadd.xlane.f32.xlu0 %v2195_v39  ;;  %v3636_v32 = vunpack.c.l.b16 %v3087_v4 }
 0x243   : > { %v1948_v43 = vpop.xlane.xlu1 %1947  ;;  %v1945_v44 = vpop.xlane.xlu0 %1944 }
 0x244   : > { %v3079_v33 = vpack.c.bf16 %v1948_v43, %v1945_v44  ;;  %v4453_v43 = vrot.slane %v3636_v32, %v12699_v23 }
 0x246   : > { %2151 = vadd.xlane.f32.xlu1 %v2150_v46  ;;  %2148 = vadd.xlane.f32.xlu0 %v2147_v47  ;;  %v4448_v46 = vrot.slane %v3635_v16, %v12702_v25  ;;  %v3637_v47 = vunpack.c.h.b16 %v3087_v4  ;;  %v3620_v44 = vunpack.c.l.b16 %v3079_v33  ;;  %v1533_v4 = vld [vmem:[%s12517_s13 + $0x628] sm:$0xff] }
 0x247   : > { %v2002_v51 = vpop.xlane.xlu1 %2001  ;;  %v1999_v52 = vpop.xlane.xlu0 %1998 }
 0x248   : > { %v3088_v38 = vpack.c.bf16 %v2002_v51, %v1999_v52  ;;  %v4458_v9 = vrot.slane %v3637_v47, %v12705_v27  ;;  %v1535_v47 = vld [vmem:[%s12517_s13 + $0x638] sm:$0xff] }
 0x24a   : > { %2205 = vadd.xlane.f32.xlu1 %v2204_v56  ;;  %2202 = vadd.xlane.f32.xlu0 %v2201_v57  ;;  %v3638_v51 = vunpack.c.l.b16 %v3088_v38 }
 0x24b   : > { %v1954_v0 = vpop.xlane.xlu1 %1953  ;;  %v1951_v1 = vpop.xlane.xlu0 %1950 }
 0x24c   : > { %v3080_v52 = vpack.c.bf16 %v1954_v0, %v1951_v1  ;;  %v3621_v1 = vunpack.c.h.b16 %v3079_v33  ;;  %v2165_v33 = vsel %vm1576_vm0, %v1532_v10, 0.0 }
 0x24e   : > { %2157 = vadd.xlane.f32.xlu1 %v2156_v2  ;;  %2154 = vadd.xlane.f32.xlu0 %v2153_v3  ;;  %v4449_v2 = vsel %vm3749_vm1, %v4448_v46, %v4444_v35  ;;  %v4365_v3 = vrot.slane %v3618_v28, %v12694_v19  ;;  %v2168_v35 = vsel %vm1576_vm0, %v1533_v4, 0.0  ;;  %v1550_v46 = vld [vmem:[%s12517_s13 + $0x6b0] sm:$0xff]  ;;  %v4379_v29 = vrot.slane %v3621_v1, %v12705_v27 }
 0x24f   : > { %v2008_v17 = vpop.xlane.xlu1 %2007  ;;  %v2005_v21 = vpop.xlane.xlu0 %2004  ;;  %v4454_v0 = vsel %vm3756_vm2, %v4453_v43, %v4449_v2  ;;  %v2219_v2 = vsel %vm1576_vm0, %v1550_v46, 0.0 }
 0x250   : > { %v3089_v56 = vpack.c.bf16 %v2008_v17, %v2005_v21  ;;  %v4374_v17 = vrot.slane %v3620_v44, %v12699_v23  ;;  %v3639_v21 = vunpack.c.h.b16 %v3088_v38  ;;  %v1551_v38 = vld [vmem:[%s12517_s13 + $0x6b8] sm:$0xff] }
 0x252   : > { %2211 = vadd.xlane.f32.xlu1 %v2210_v24  ;;  %2208 = vadd.xlane.f32.xlu0 %v2207_v14  ;;  %v4463_v24 = vrot.slane %v3638_v51, %v12712_v37  ;;  %v3622_v14 = vunpack.c.l.b16 %v3080_v52  ;;  %v3640_v16 = vunpack.c.l.b16 %v3089_v56  ;;  %v3641_v43 = vunpack.c.h.b16 %v3089_v56 }
 0x253   : > { %v1960_v36 = vpop.xlane.xlu1 %1959  ;;  %v1957_v39 = vpop.xlane.xlu0 %1956 }
 0x254   : > { %v3081_v26 = vpack.c.bf16 %v1960_v36, %v1957_v39  ;;  %v4468_v36 = vrot.slane %v3639_v21, %v12721_v45  ;;  %v3623_v39 = vunpack.c.h.b16 %v3080_v52  ;;  %v4384_v50 = vrot.slane %v3622_v14, %v12712_v37 }
 0x255   : > { %v4473_v44 = vrot.slane %v3640_v16, %v12730_v53 }
 0x256   : > { %2163 = vadd.xlane.f32.xlu1 %v2162_v40  ;;  %2160 = vadd.xlane.f32.xlu0 %v2159_v42  ;;  %v4370_v40 = vsel %vm3749_vm1, %v4369_v5, %v4365_v3  ;;  %v4459_v42 = vsel %vm3763_vm3, %v4458_v9, %v4454_v0  ;;  %v3624_v51 = vunpack.c.l.b16 %v3081_v26  ;;  %v1534_v3 = vld [vmem:[%s12517_s13 + $0x630] sm:$0xff]  ;;  %v2174_v5 = vsel %vm1576_vm0, %v1535_v47, 0.0 }
 0x257   : > { %v2014_v57 = vpop.xlane.xlu1 %2013  ;;  %v2011_v58 = vpop.xlane.xlu0 %2010  ;;  %v4375_v28 = vsel %vm3756_vm2, %v4374_v17, %v4370_v40  ;;  %v4464_v49 = vsel %vm3770_vm4, %v4463_v24, %v4459_v42  ;;  %v4389_v4 = vrot.slane %v3623_v39, %v12721_v45  ;;  %v4478_v17 = vrot.slane %v3641_v43, %v12737_v62  ;;  %v1552_v40 = vld [vmem:[%s12517_s13 + $0x6c0] sm:$0xff] }
 0x258   : > { %v3090_v30 = vpack.c.bf16 %v2014_v57, %v2011_v58  ;;  %v4380_v9 = vsel %vm3763_vm3, %v4379_v29, %v4375_v28  ;;  %v4469_v56 = vsel %vm3777_vm5, %v4468_v36, %v4464_v49  ;;  %v2171_v21 = vsel %vm1576_vm0, %v1534_v3, 0.0 }
 0x259   : > { %v4385_v0 = vsel %vm3770_vm4, %v4384_v50, %v4380_v9  ;;  %v4474_v1 = vsel %vm15723_vm6, %v4473_v44, %v4469_v56  ;;  %v3625_v24 = vunpack.c.h.b16 %v3081_v26  ;;  %v4394_v14 = vrot.slane %v3624_v51, %v12730_v53 }
 0x25a   : > { %2217 = vadd.xlane.f32.xlu1 %v2216_v60  ;;  %2214 = vadd.xlane.f32.xlu0 %v2213_v61  ;;  %v3642_v57 = vunpack.c.l.b16 %v3090_v30  ;;  %v2222_v61 = vsel %vm1576_vm0, %v1551_v38, 0.0  ;;  %v3643_v16 = vunpack.c.h.b16 %v3090_v30  ;;  %v4390_v28 = vsel %vm3777_vm5, %v4389_v4, %v4385_v0 }
 0x25b   : > { %v1966_v31 = vpop.xlane.xlu1 %1965  ;;  %v1963_v32 = vpop.xlane.xlu0 %1962  ;;  %v4479_v29 = vsel %vm15715_vm7, %v4478_v17, %v4474_v1  ;;  %v2225_v30 = vsel %vm1576_vm0, %v1552_v40, 0.0  ;;  %v4395_v36 = vsel %vm15723_vm6, %v4394_v14, %v4390_v28  ;;  %v4399_v39 = vrot.slane %v3625_v24, %v12737_v62  ;;  %v1557_v14 = vld [vmem:[%s12517_s13 + $0x6e8] sm:$0xff] }
 0x25c   : > { %v3082_v52 = vpack.c.bf16 %v1966_v31, %v1963_v32  ;;  %v4483_v31 = vrot.slane %v3642_v57, %v12745_v8  ;;  %v4488_v49 = vrot.slane %v3643_v16, %v12750_v13  ;;  %v1556_v16 = vld [vmem:[%s12517_s13 + $0x6e0] sm:$0xff] }
 0x25d   : > { %v4400_v9 = vsel %vm15715_vm7, %v4399_v39, %v4395_v36 }
 0x25e   : > { %2169 = vadd.xlane.f32.xlu1 %v2168_v35  ;;  %2166 = vadd.xlane.f32.xlu0 %v2165_v33  ;;  %v1553_v33 = vld [vmem:[%s12517_s13 + $0x6c8] sm:$0xff]  ;;  %v3626_v42 = vunpack.c.l.b16 %v3082_v52  ;;  %v4484_v47 = vsel %vm3798_vm8, %v4483_v31, %v4479_v29  ;;  %v3627_v44 = vunpack.c.h.b16 %v3082_v52  ;;  %v2240_v29 = vsel %vm1576_vm0, %v1557_v14, 0.0 }
 0x25f   : > { %v2020_v58 = vpop.xlane.xlu1 %2019  ;;  %v2017_v60 = vpop.xlane.xlu0 %2016  ;;  %v2228_v26 = vsel %vm1576_vm0, %v1553_v33, 0.0  ;;  %v4489_v56 = vsel %vm15717_vm9, %v4488_v49, %v4484_v47  ;;  %v1558_v47 = vld [vmem:[%s12517_s13 + $0x6f0] sm:$0xff] }
 0x260   : > { %v3091_v10 = vpack.c.bf16 %v2020_v58, %v2017_v60  ;;  %v4404_v51 = vrot.slane %v3626_v42, %v12745_v8  ;;  %v1555_v60 = vld [vmem:[%s12517_s13 + $0x6d8] sm:$0xff]  ;;  %v4409_v17 = vrot.slane %v3627_v44, %v12750_v13 }
 0x261   : > { %v2234_v0 = vsel %vm1576_vm0, %v1555_v60, 0.0 }
 0x262   : > { %2223 = vadd.xlane.f32.xlu1 %v2222_v61  ;;  %2220 = vadd.xlane.f32.xlu0 %v2219_v2  ;;  %v3644_v38 = vunpack.c.l.b16 %v3091_v10  ;;  %v3645_v57 = vunpack.c.h.b16 %v3091_v10  ;;  %v1554_v61 = vld [vmem:[%s12517_s13 + $0x6d0] sm:$0xff]  ;;  %v4405_v1 = vsel %vm3798_vm8, %v4404_v51, %v4400_v9 }
 0x263   : > { %v1972_v32 = vpop.xlane.xlu1 %1971  ;;  %v1969_v35 = vpop.xlane.xlu0 %1968  ;;  %v2231_v10 = vsel %vm1576_vm0, %v1554_v61, 0.0 }
 0x264   : > { %v3083_v46 = vpack.c.bf16 %v1972_v32, %v1969_v35  ;;  %v4493_v2 = vrot.slane %v3644_v38, %v12764_v34 }
 0x266   : > { %2175 = vadd.xlane.f32.xlu1 %v2174_v5  ;;  %2172 = vadd.xlane.f32.xlu0 %v2171_v21  ;;  %v3628_v3 = vunpack.c.l.b16 %v3083_v46  ;;  %v4498_v21 = vrot.slane %v3645_v57, %v12771_v41  ;;  %v4494_v31 = vsel %vm15714_vm10, %v4493_v2, %v4489_v56  ;;  %v3629_v32 = vunpack.c.h.b16 %v3083_v46  ;;  %v1559_v46 = vld [vmem:[%s12517_s13 + $0x6f8] sm:$0xff] }
 0x267   : > { %v2026_v50 = vpop.xlane.xlu1 %2025  ;;  %v2023_v43 = vpop.xlane.xlu0 %2022 }
 0x268   : > { %v3092_v58 = vpack.c.bf16 %v2026_v50, %v2023_v43  ;;  %v4414_v35 = vrot.slane %v3628_v3, %v12764_v34  ;;  %v4499_v36 = vsel %vm15716_vm11, %v4498_v21, %v4494_v31  ;;  %v4419_v50 = vrot.slane %v3629_v32, %v12771_v41 }
 0x269   : > { %v2246_v3 = vsel %vm1576_vm0, %v1559_v46, 0.0 }
 0x26a   : > { %v3646_v5 = vunpack.c.l.b16 %v3092_v58  ;;  %2229 = vadd.xlane.f32.xlu1 %v2228_v26  ;;  %2226 = vadd.xlane.f32.xlu0 %v2225_v30  ;;  %v3647_v33 = vunpack.c.h.b16 %v3092_v58  ;;  %v2237_v26 = vsel %vm1576_vm0, %v1556_v16, 0.0  ;;  %v4410_v30 = vsel %vm15717_vm9, %v4409_v17, %v4405_v1 }
 0x26b   : > { %v1978_v4 = vpop.xlane.xlu1 %1977  ;;  %v1975_v52 = vpop.xlane.xlu0 %1974  ;;  %v4415_v49 = vsel %vm15714_vm10, %v4414_v35, %v4410_v30  ;;  %vm4954_vm10 = vcmask 1041409  }
 0x26c   : > { %v3084_v24 = vpack.c.bf16 %v1978_v4, %v1975_v52  ;;  %v4503_v40 = vrot.slane %v3646_v5, %v12780_v54  ;;  %v4508_v43 = vrot.slane %v3647_v33, %v12783_v55  ;;  %v2243_v5 = vsel %vm1576_vm0, %v1558_v47, 0.0  ;;  %v1561_v52 = vld [vmem:[%s12517_s13 + $0x708] sm:$0xff] }
 0x26d   : > { %v2252_v35 = vsel %vm1576_vm0, %v1561_v52, 0.0  ;;  %v1571_v52 = vld [vmem:[%s12517_s13 + $0x758] sm:$0xff] }
 0x26e   : > { %v3630_v42 = vunpack.c.l.b16 %v3084_v24  ;;  %2235 = vadd.xlane.f32.xlu1 %v2234_v0  ;;  %2232 = vadd.xlane.f32.xlu0 %v2231_v10  ;;  %v3631_v44 = vunpack.c.h.b16 %v3084_v24  ;;  %v4504_v51 = vsel %vm3826_vm12, %v4503_v40, %v4499_v36  ;;  %v1560_v0 = vld [vmem:[%s12517_s13 + $0x700] sm:$0xff]  ;;  %v4420_v10 = vsel %vm15716_vm11, %v4419_v50, %v4415_v49  ;;  %v10953_v50 = vld [vmem:[%s12529_s16 + $0x200] ss:$16 sps:$4 sm:$0xff]  }
 0x26f   : > { %v2032_v38 = vpop.xlane.xlu1 %2031  ;;  %v2029_v28 = vpop.xlane.xlu0 %2028  ;;  %v4509_v17 = vsel %vm3833_vm13, %v4508_v43, %v4504_v51  ;;  %v2249_v33 = vsel %vm1576_vm0, %v1560_v0, 0.0  ;;  %v1570_v0 = vld [vmem:[%s12517_s13 + $0x750] sm:$0xff] }
 0x270   : > { %v3093_v39 = vpack.c.bf16 %v2032_v38, %v2029_v28  ;;  %v4424_v57 = vrot.slane %v3630_v42, %v12780_v54  ;;  %v4429_v1 = vrot.slane %v3631_v44, %v12783_v55  ;;  %v10956_v44 = vld [vmem:[%s12529_s16 + $0x208] ss:$16 sps:$4 sm:$0xff]  }
 0x272   : > { %v3648_v58 = vunpack.c.l.b16 %v3093_v39  ;;  %v3649_v60 = vunpack.c.h.b16 %v3093_v39  ;;  %2241 = vadd.xlane.f32.xlu1 %v2240_v29  ;;  %2238 = vadd.xlane.f32.xlu0 %v2237_v26  ;;  %v4425_v21 = vsel %vm3826_vm12, %v4424_v57, %v4420_v10  ;;  %v1569_v29 = vld [vmem:[%s12517_s13 + $0x748] sm:$0xff]  ;;  %v1568_v26 = vld [vmem:[%s12517_s13 + $0x740] sm:$0xff]  ;;  %v1451_v57 = vld [vmem:[%s12517_s13 + $0x398] sm:$0xff] }
 0x273   : > { %v1984_v61 = vpop.xlane.xlu1 %1983  ;;  %v1981_v2 = vpop.xlane.xlu0 %1980  ;;  %v4430_v30 = vsel %vm3833_vm13, %v4429_v1, %v4425_v21  ;;  %v2273_v49 = vsel %vm1576_vm0, %v1568_v26, 0.0  ;;  %v10967_v10 = vld [vmem:[%s12529_s16 + $0x244] ss:$16 sps:$4 sm:$0xff]   ;;  %v10970_v1 = vld [vmem:[%s12529_s16 + $0x24c] ss:$16 sps:$4 sm:$0xff]  }
 0x274   : > { %v4513_v9 = vrot.slane %v3648_v58, %v12794_v7  ;;  %v4518_v56 = vrot.slane %v3649_v60, %v12801_v15  ;;  %v3085_v4 = vpack.c.bf16 %v1984_v61, %v1981_v2  ;;  %v1450_v58 = vld [vmem:[%s12517_s13 + $0x390] sm:$0xff]  ;;  %v10961_v61 = vld [vmem:[%s12529_s16 + $0x224] ss:$16 sps:$4 sm:$0xff]  }
 0x275   : > { %v10964_v2 = vld [vmem:[%s12529_s16 + $0x22c] ss:$16 sps:$4 sm:$0xff]  }
 0x276   : > { %v3632_v24 = vunpack.c.l.b16 %v3085_v4  ;;  %v3633_v14 = vunpack.c.h.b16 %v3085_v4  ;;  %2247 = vadd.xlane.f32.xlu1 %v2246_v3  ;;  %2244 = vadd.xlane.f32.xlu0 %v2243_v5  ;;  %v4514_v16 = vsel %vm3840_vm14, %v4513_v9, %v4509_v17  ;;  %v1922_v9 = vsel %vm1576_vm0, %v1451_v57, 0.0  ;;  %v10962_v4 = vld [vmem:[%s12529_s16 + $0x228] ss:$16 sps:$4 sm:$0xff]  }
 0x277   : > { %v13393_v31 = vpop.xlane.xlu1 %2085  ;;  %v13395_v32 = vpop.xlane.xlu0 %2082  ;;  %v4519_v40 = vsel %vm3847_vm15, %v4518_v56, %v4514_v16  ;;  %v10959_v56 = vld [vmem:[%s12529_s16 + $0x220] ss:$16 sps:$4 sm:$0xff]  }
 0x278   : > { %v4434_v42 = vrot.slane %v3632_v24, %v12794_v7  ;;  %v4439_v38 = vrot.slane %v3633_v14, %v12801_v15  ;;  %v4956_v28 = vsel %vm4954_vm10, %v4519_v40, %v12882_v63  ;;  %v2276_v63 = vsel %vm1576_vm0, %v1569_v29, 0.0  ;;  %v10965_v16 = vld [vmem:[%s12529_s16 + $0x240] ss:$16 sps:$4 sm:$0xff]   ;;  %v1562_v40 = vld [vmem:[%s12517_s13 + $0x710] sm:$0xff] }
 0x279   : > { %v4964_v36 = vpack.c.b16 %v4956_v28, %v4956_v28  ;;  %v2282_v24 = vsel %vm1576_vm0, %v1571_v52, 0.0  ;;  %v2279_v14 = vsel %vm1576_vm0, %v1570_v0, 0.0 }
 0x27a   : > { %2253 = vadd.xlane.f32.xlu1 %v2252_v35  ;;  %2250 = vadd.xlane.f32.xlu0 %v2249_v33  ;;  %v4435_v39 = vsel %vm3840_vm14, %v4434_v42, %v4430_v30  ;;  %v10968_v35 = vld [vmem:[%s12529_s16 + $0x248] ss:$16 sps:$4 sm:$0xff]   ;;  %v1563_v33 = vld [vmem:[%s12517_s13 + $0x718] sm:$0xff]  ;;  %v2255_v30 = vsel %vm1576_vm0, %v1562_v40, 0.0 }
 0x27b   : > { %v13408_v46 = vpop.xlane.xlu1 %2037  ;;  %6214 = vmatprep.mubr.bf16.mxu0 %v4964_v36  ;;  %6378 = vmatprep.mubr.bf16.mxu1 %v4964_v36  ;;  %v13410_v47 = vpop.xlane.xlu0 %2034  ;;  %v4440_v43 = vsel %vm3847_vm15, %v4439_v38, %v4435_v39  ;;  %v10973_v42 = vld [vmem:[%s12529_s16 + $0x264] ss:$16 sps:$4 sm:$0xff]   ;;  %v10976_v38 = vld [vmem:[%s12529_s16 + $0x26c] ss:$16 sps:$4 sm:$0xff]   ;;  %v2258_v26 = vsel %vm1576_vm0, %v1563_v33, 0.0 }
 0x27c   : > { %v4955_v51 = vsel %vm4954_vm10, %v4440_v43, %v12817_v48  ;;  %v1919_v48 = vsel %vm1576_vm0, %v1450_v58, 0.0  ;;  %v10971_v36 = vld [vmem:[%s12529_s16 + $0x260] ss:$16 sps:$4 sm:$0xff]   ;;  %v10974_v39 = vld [vmem:[%s12529_s16 + $0x268] ss:$16 sps:$4 sm:$0xff]  }
 0x27d   : > { %v4963_v60 = vpack.c.b16 %v4955_v51, %v4955_v51  ;;  %v10982_v43 = vld [vmem:[%s12529_s16 + $0x28c] ss:$16 sps:$4 sm:$0xff]  }
 0x27e   : > { %2277 = vadd.xlane.f32.xlu1 %v2276_v63  ;;  %2274 = vadd.xlane.f32.xlu0 %v2273_v49  ;;  %v1453_v63 = vld [vmem:[%s12517_s13 + $0x3a8] sm:$0xff]  ;;  %v1452_v49 = vld [vmem:[%s12517_s13 + $0x3a0] sm:$0xff] }
 0x27f   : > { %v2092_v3 = vpop.xlane.xlu1 %2091  ;;  %6215 = vmatmul.mubr.bf16.vlgmr.msra.gmra.mrb[0].mxu0 %v4963_v60  ;;  %6379 = vmatmul.mubr.bf16.vlgmr.msra.gmra.mrb[0].mxu1 %v4963_v60  ;;  %v2089_v5 = vpop.xlane.xlu0 %2088  ;;  %v1928_v58 = vsel %vm1576_vm0, %v1453_v63, 0.0  ;;  %v1925_v60 = vsel %vm1576_vm0, %v1452_v49, 0.0  ;;  %v10992_v49 = vld [vmem:[%s12529_s16 + $0x2c8] ss:$16 sps:$4 sm:$0xff]  }
 0x280   : > { %6224 = vmatpush1.bf16.msra.mxu0 %v10953_v50  ;;  %6388 = vmatpush1.bf16.msra.mxu1 %v10956_v44  ;;  %v10979_v50 = vld [vmem:[%s12529_s16 + $0x284] ss:$16 sps:$4 sm:$0xff]   ;;  %v3102_v44 = vpack.c.bf16 %v13393_v31, %v13395_v32  ;;  %v10988_v32 = vld [vmem:[%s12529_s16 + $0x2ac] ss:$16 sps:$4 sm:$0xff]  }
 0x281   : > { %6225 = vmatprep.subr.bf16.mxu0 %v10961_v61  ;;  %6389 = vmatprep.subr.bf16.mxu1 %v10964_v2  ;;  %v10977_v61 = vld [vmem:[%s12529_s16 + $0x280] ss:$16 sps:$4 sm:$0xff]   ;;  %v10980_v2 = vld [vmem:[%s12529_s16 + $0x288] ss:$16 sps:$4 sm:$0xff]   ;;  %v10985_v31 = vld [vmem:[%s12529_s16 + $0x2a4] ss:$16 sps:$4 sm:$0xff]  }
 0x282   : > { %1923 = vadd.xlane.f32.xlu1 %v1922_v9  ;;  %1920 = vadd.xlane.f32.xlu0 %v1919_v48  ;;  %v1573_v9 = vld [vmem:[%s12517_s13 + $0x768] sm:$0xff]  ;;  %v1572_v48 = vld [vmem:[%s12517_s13 + $0x760] sm:$0xff]  ;;  %v3667_v52 = vunpack.c.h.b16 %v3102_v44 }
 0x283   : > { %v13431_v17 = vpop.xlane.xlu1 %2043  ;;  %v13433_v21 = vpop.xlane.xlu0 %2040 }
 0x284   : > { %6226 = vmatpush1.bf16.msra.mxu0 %v10959_v56  ;;  %6390 = vmatpush1.bf16.msra.mxu1 %v10962_v4  ;;  %v13459_v56 = vpack.c.bf16 %v2092_v3, %v2089_v5  ;;  %v3666_v4 = vunpack.c.l.b16 %v3102_v44  ;;  %v2285_v3 = vsel %vm1576_vm0, %v1572_v48, 0.0  ;;  %v10983_v5 = vld [vmem:[%s12529_s16 + $0x2a0] ss:$16 sps:$4 sm:$0xff]   ;;  %v13474_v40 = vpack.c.bf16 %v13431_v17, %v13433_v21 }
 0x285   : > { %6227 = vmatprep.subr.bf16.mxu0 %v10967_v10  ;;  %6391 = vmatprep.subr.bf16.mxu1 %v10970_v1  ;;  %v2288_v1 = vsel %vm1576_vm0, %v1573_v9, 0.0 }
 0x286   : > { %2283 = vadd.xlane.f32.xlu1 %v2282_v24  ;;  %2280 = vadd.xlane.f32.xlu0 %v2279_v14  ;;  %v3094_v24 = vpack.c.bf16 %v13408_v46, %v13410_v47  ;;  %v10986_v14 = vld [vmem:[%s12529_s16 + $0x2a8] ss:$16 sps:$4 sm:$0xff]   ;;  %v3668_v33 = vunpack.c.l.b16 %v13459_v56  ;;  %v4602_v46 = vrot.slane %v3666_v4, %v12694_v19  ;;  %v4606_v47 = vrot.slane %v3667_v52, %v12702_v25 }
 0x287   : > { %v2098_v28 = vpop.xlane.xlu1 %2097  ;;  %v2095_v29 = vpop.xlane.xlu0 %2094 }
 0x288   : > { %6228 = vmatpush1.bf16.msra.mxu0 %v10965_v16  ;;  %6392 = vmatpush1.bf16.msra.mxu1 %v10968_v35  ;;  %v1565_v16 = vld [vmem:[%s12517_s13 + $0x728] sm:$0xff]  ;;  %v1564_v35 = vld [vmem:[%s12517_s13 + $0x720] sm:$0xff]  ;;  %v3650_v63 = vunpack.c.l.b16 %v3094_v24  ;;  %v4611_v44 = vrot.slane %v3668_v33, %v12699_v23  ;;  %v4607_v48 = vsel %vm3749_vm1, %v4606_v47, %v4602_v46 }
 0x289   : > { %6229 = vmatprep.subr.bf16.mxu0 %v10973_v42  ;;  %6393 = vmatprep.subr.bf16.mxu1 %v10976_v38  ;;  %v10991_v42 = vld [vmem:[%s12529_s16 + $0x2c4] ss:$16 sps:$4 sm:$0xff]   ;;  %v10994_v38 = vld [vmem:[%s12529_s16 + $0x2cc] ss:$16 sps:$4 sm:$0xff]   ;;  %v2264_v17 = vsel %vm1576_vm0, %v1565_v16, 0.0  ;;  %v2261_v21 = vsel %vm1576_vm0, %v1564_v35, 0.0 }
 0x28a   : > { %2259 = vadd.xlane.f32.xlu1 %v2258_v26  ;;  %2256 = vadd.xlane.f32.xlu0 %v2255_v30  ;;  %v13478_v26 = vpack.c.bf16 %v2098_v28, %v2095_v29  ;;  %v3651_v28 = vunpack.c.h.b16 %v3094_v24  ;;  %v3669_v29 = vunpack.c.h.b16 %v13459_v56  ;;  %v4612_v24 = vsel %vm3756_vm2, %v4611_v44, %v4607_v48  ;;  %v11003_v33 = vld [vmem:[%s12529_s16 + $0x304] ss:$16 sps:$4 sm:$0xff]  }
 0x28b   : > { %v2050_v51 = vpop.xlane.xlu1 %2049  ;;  %v2047_v57 = vpop.xlane.xlu0 %2046 }
 0x28c   : > { %6230 = vmatpush1.bf16.msra.mxu0 %v10971_v36  ;;  %6394 = vmatpush1.bf16.msra.mxu1 %v10974_v39  ;;  %v10989_v39 = vld [vmem:[%s12529_s16 + $0x2c0] ss:$16 sps:$4 sm:$0xff]   ;;  %v13494_v9 = vpack.c.bf16 %v2050_v51, %v2047_v57  ;;  %v4523_v51 = vrot.slane %v3650_v63, %v12694_v19  ;;  %v4527_v57 = vrot.slane %v3651_v28, %v12702_v25  ;;  %v3671_v35 = vunpack.c.h.b16 %v13478_v26 }
 0x28d   : > { %6231 = vmatprep.subr.bf16.mxu0 %v10979_v50  ;;  %6395 = vmatprep.subr.bf16.mxu1 %v10982_v43  ;;  %v1455_v50 = vld [vmem:[%s12517_s13 + $0x3b8] sm:$0xff]  ;;  %v1454_v43 = vld [vmem:[%s12517_s13 + $0x3b0] sm:$0xff] }
 0x28e   : > { %1929 = vadd.xlane.f32.xlu1 %v1928_v58  ;;  %1926 = vadd.xlane.f32.xlu0 %v1925_v60  ;;  %v3652_v58 = vunpack.c.l.b16 %v13474_v40  ;;  %v10997_v60 = vld [vmem:[%s12529_s16 + $0x2e4] ss:$16 sps:$4 sm:$0xff]   ;;  %v1934_v4 = vsel %vm1576_vm0, %v1455_v50, 0.0  ;;  %v1931_v52 = vsel %vm1576_vm0, %v1454_v43, 0.0  ;;  %v3654_v46 = vunpack.c.l.b16 %v13494_v9  ;;  %v11001_v63 = vld [vmem:[%s12529_s16 + $0x300] ss:$16 sps:$4 sm:$0xff]  }
 0x28f   : > { %v2104_v0 = vpop.xlane.xlu1 %2103  ;;  %v2101_v10 = vpop.xlane.xlu0 %2100  ;;  %v4528_v28 = vsel %vm3749_vm1, %v4527_v57, %v4523_v51  ;;  %v11004_v50 = vld [vmem:[%s12529_s16 + $0x308] ss:$16 sps:$4 sm:$0xff]   ;;  %v3655_v48 = vunpack.c.h.b16 %v13494_v9 }
 0x290   : > { %6232 = vmatpush1.bf16.msra.mxu0 %v10977_v61  ;;  %6396 = vmatpush1.bf16.msra.mxu1 %v10980_v2  ;;  %v11000_v61 = vld [vmem:[%s12529_s16 + $0x2ec] ss:$16 sps:$4 sm:$0xff]   ;;  %v3670_v2 = vunpack.c.l.b16 %v13478_v26  ;;  %v13497_v56 = vpack.c.bf16 %v2104_v0, %v2101_v10  ;;  %v1575_v0 = vld [vmem:[%s12517_s13 + $0x778] sm:$0xff]  ;;  %v4532_v16 = vrot.slane %v3652_v58, %v12699_v23  ;;  %v4626_v58 = vrot.slane %v3671_v35, %v12721_v45 }
 0x291   : > { %6233 = vmatprep.subr.bf16.mxu0 %v10985_v31  ;;  %6397 = vmatprep.subr.bf16.mxu1 %v10988_v32  ;;  %v1574_v10 = vld [vmem:[%s12517_s13 + $0x770] sm:$0xff]  ;;  %v2294_v26 = vsel %vm1576_vm0, %v1575_v0, 0.0 }
 0x292   : > { %2289 = vadd.xlane.f32.xlu1 %v2288_v1  ;;  %2286 = vadd.xlane.f32.xlu0 %v2285_v3  ;;  %v10995_v1 = vld [vmem:[%s12529_s16 + $0x2e0] ss:$16 sps:$4 sm:$0xff]   ;;  %v4616_v3 = vrot.slane %v3669_v29, %v12705_v27  ;;  %v4533_v43 = vsel %vm3756_vm2, %v4532_v16, %v4528_v28  ;;  %v11010_v0 = vld [vmem:[%s12529_s16 + $0x328] ss:$16 sps:$4 sm:$0xff]  }
 0x293   : > { %v2056_v30 = vpop.xlane.xlu1 %2055  ;;  %v2053_v36 = vpop.xlane.xlu0 %2052  ;;  %v11577_v16 = vld [vmem:[%s12517_s13 + $0x88] sm:$0xff] }
 0x294   : > { %6234 = vmatpush1.bf16.msra.mxu0 %v10983_v5  ;;  %6398 = vmatpush1.bf16.msra.mxu1 %v10986_v14  ;;  %v10998_v5 = vld [vmem:[%s12529_s16 + $0x2e8] ss:$16 sps:$4 sm:$0xff]   ;;  %v3653_v14 = vunpack.c.h.b16 %v13474_v40  ;;  %v3672_v40 = vunpack.c.l.b16 %v13497_v56  ;;  %v13517_v47 = vpack.c.bf16 %v2056_v30, %v2053_v36  ;;  %v4617_v29 = vsel %vm3763_vm3, %v4616_v3, %v4612_v24  ;;  %v1567_v30 = vld [vmem:[%s12517_s13 + $0x738] sm:$0xff] }
 0x295   : > { %6235 = vmatprep.subr.bf16.mxu0 %v10991_v42  ;;  %6399 = vmatprep.subr.bf16.mxu1 %v10994_v38  ;;  %v11006_v42 = vld [vmem:[%s12529_s16 + $0x30c] ss:$16 sps:$4 sm:$0xff]   ;;  %v4621_v38 = vrot.slane %v3670_v2, %v12712_v37  ;;  %v2270_v57 = vsel %vm1576_vm0, %v1567_v30, 0.0  ;;  %v2348_v35 = vsel %vm1576_vm0, %v11577_v16, -inf  ;;  %v11019_v16 = vld [vmem:[%s12529_s16 + $0x360] ss:$16 sps:$4 sm:$0xff]  }
 0x296   : > { %2265 = vadd.xlane.f32.xlu1 %v2264_v17  ;;  %2262 = vadd.xlane.f32.xlu0 %v2261_v21  ;;  %v1566_v36 = vld [vmem:[%s12517_s13 + $0x730] sm:$0xff]  ;;  %v4537_v44 = vrot.slane %v3653_v14, %v12705_v27 }
 0x297   : > { %v2110_v31 = vpop.xlane.xlu1 %2109  ;;  %v2107_v32 = vpop.xlane.xlu0 %2106  ;;  %v4622_v2 = vsel %vm3770_vm4, %v4621_v38, %v4617_v29  ;;  %v2267_v9 = vsel %vm1576_vm0, %v1566_v36, 0.0 }
 0x298   : > { %6236 = vmatpush1.bf16.msra.mxu0 %v10989_v39  ;;  %6400 = vmatpush1.bf16.msra.mxu1 %v10992_v49  ;;  %v2291_v39 = vsel %vm1576_vm0, %v1574_v10, 0.0  ;;  %v13524_v49 = vpack.c.bf16 %v2110_v31, %v2107_v32  ;;  %v4542_v31 = vrot.slane %v3654_v46, %v12712_v37  ;;  %v3673_v32 = vunpack.c.h.b16 %v13497_v56  ;;  %v11007_v56 = vld [vmem:[%s12529_s16 + $0x320] ss:$16 sps:$4 sm:$0xff]  }
 0x299   : > { %6237 = vmatprep.subr.bf16.mxu0 %v10997_v60  ;;  %6401 = vmatprep.subr.bf16.mxu1 %v11000_v61  ;;  %v11009_v60 = vld [vmem:[%s12529_s16 + $0x324] ss:$16 sps:$4 sm:$0xff]   ;;  %v11012_v61 = vld [vmem:[%s12529_s16 + $0x32c] ss:$16 sps:$4 sm:$0xff]   ;;  %v4538_v10 = vsel %vm3763_vm3, %v4537_v44, %v4533_v43  ;;  %v4627_v24 = vsel %vm3777_vm5, %v4626_v58, %v4622_v2  ;;  %v4547_v46 = vrot.slane %v3655_v48, %v12721_v45  ;;  %v11013_v43 = vld [vmem:[%s12529_s16 + $0x340] ss:$16 sps:$4 sm:$0xff]  }
 0x29a   : > { %1935 = vadd.xlane.f32.xlu1 %v1934_v4  ;;  %1932 = vadd.xlane.f32.xlu0 %v1931_v52  ;;  %v4631_v4 = vrot.slane %v3672_v40, %v12730_v53  ;;  %v3656_v52 = vunpack.c.l.b16 %v13517_v47  ;;  %v3674_v3 = vunpack.c.l.b16 %v13524_v49  ;;  %v4543_v38 = vsel %vm3770_vm4, %v4542_v31, %v4538_v10  ;;  %v11016_v44 = vld [vmem:[%s12529_s16 + $0x348] ss:$16 sps:$4 sm:$0xff]   ;;  %v11579_v48 = vld [vmem:[%s12517_s13 + $0x448] sm:$0xff] }
 0x29b   : > { %v2062_v17 = vpop.xlane.xlu1 %2061  ;;  %v2059_v21 = vpop.xlane.xlu0 %2058  ;;  %v4636_v40 = vrot.slane %v3673_v32, %v12737_v62  ;;  %v3675_v28 = vunpack.c.h.b16 %v13524_v49  ;;  %v11024_v49 = vld [vmem:[%s12529_s16 + $0x36c] ss:$16 sps:$4 sm:$0xff]   ;;  %v2708_v31 = vsel %vm1576_vm0, %v11579_v48, -inf }
 0x29c   : > { %6238 = vmatpush1.bf16.msra.mxu0 %v10995_v1  ;;  %6402 = vmatpush1.bf16.msra.mxu1 %v10998_v5  ;;  %v13543_v5 = vpack.c.bf16 %v2062_v17, %v2059_v21  ;;  %v11578_v17 = vld [vmem:[%s12517_s13 + $0x80] sm:$0xff]  ;;  %v4641_v30 = vrot.slane %v3674_v3, %v12745_v8 }
 0x29d   : > { %6239 = vmatprep.subr.bf16.mxu0 %v11003_v33  ;;  %6403 = vmatprep.subr.bf16.mxu1 %v11006_v42  ;;  %v11015_v33 = vld [vmem:[%s12529_s16 + $0x344] ss:$16 sps:$4 sm:$0xff]   ;;  %v11018_v42 = vld [vmem:[%s12529_s16 + $0x34c] ss:$16 sps:$4 sm:$0xff]   ;;  %v2345_v21 = vsel %vm1576_vm0, %v11578_v17, -inf }
 0x29e   : > { %2295 = vadd.xlane.f32.xlu1 %v2294_v26  ;;  %2292 = vadd.xlane.f32.xlu0 %v2291_v39  ;;  %v4632_v26 = vsel %vm15723_vm6, %v4631_v4, %v4627_v24  ;;  %v3657_v39 = vunpack.c.h.b16 %v13517_v47  ;;  %v3658_v36 = vunpack.c.l.b16 %v13543_v5  ;;  %v11580_v32 = vld [vmem:[%s12517_s13 + $0x440] sm:$0xff] }
 0x29f   : > { %v2116_v1 = vpop.xlane.xlu1 %2115  ;;  %v2113_v51 = vpop.xlane.xlu0 %2112  ;;  %v4637_v2 = vsel %vm15715_vm7, %v4636_v40, %v4632_v26  ;;  %v2705_v4 = vsel %vm1576_vm0, %v11580_v32, -inf  ;;  %v11036_v48 = vld [vmem:[%s12529_s16 + $0x3ac] ss:$16 sps:$4 sm:$0xff]  }
 0x2a0   : > { %6240 = vmatpush1.bf16.msra.mxu0 %v11001_v63  ;;  %6404 = vmatpush1.bf16.msra.mxu1 %v11004_v50  ;;  %v13549_v14 = vpack.c.bf16 %v2116_v1, %v2113_v51  ;;  %v4552_v63 = vrot.slane %v3656_v52, %v12730_v53  ;;  %v4557_v1 = vrot.slane %v3657_v39, %v12737_v62 }
 0x2a1   : > { %6241 = vmatprep.subr.bf16.mxu0 %v11009_v60  ;;  %6405 = vmatprep.subr.bf16.mxu1 %v11012_v61  ;;  %v11021_v60 = vld [vmem:[%s12529_s16 + $0x364] ss:$16 sps:$4 sm:$0xff]   ;;  %v4548_v61 = vsel %vm3777_vm5, %v4547_v46, %v4543_v38  ;;  %v4646_v51 = vrot.slane %v3675_v28, %v12750_v13  ;;  %v11030_v38 = vld [vmem:[%s12529_s16 + $0x38c] ss:$16 sps:$4 sm:$0xff]  }
 0x2a2   : > { %2271 = vadd.xlane.f32.xlu1 %v2270_v57  ;;  %2268 = vadd.xlane.f32.xlu0 %v2267_v9  ;;  %v3676_v58 = vunpack.c.l.b16 %v13549_v14  ;;  %v4553_v52 = vsel %vm15723_vm6, %v4552_v63, %v4548_v61  ;;  %v3659_v57 = vunpack.c.h.b16 %v13543_v5  ;;  %v3677_v10 = vunpack.c.h.b16 %v13549_v14  ;;  %v11581_v14 = vld [vmem:[%s12517_s13 + $0x8] sm:$0xff]  ;;  %v11582_v28 = vld [vmem:[%s12517_s13] sm:$0xff] }
 0x2a3   : > { %v2068_v29 = vpop.xlane.xlu1 %2067  ;;  %v2065_v50 = vpop.xlane.xlu0 %2064  ;;  %v2300_v40 = vsel %vm1576_vm0, %v11581_v14, -inf  ;;  %v4558_v17 = vsel %vm15715_vm7, %v4557_v1, %v4553_v52  ;;  %vm15740_vm7 = vcmask 720512   ;;  %v11583_v1 = vld [vmem:[%s12517_s13 + $0x98] sm:$0xff] }
 0x2a4   : > { %6242 = vmatpush1.bf16.msra.mxu0 %v11007_v56  ;;  %6406 = vmatpush1.bf16.msra.mxu1 %v11010_v0  ;;  %v13569_v47 = vpack.c.bf16 %v2068_v29, %v2065_v50  ;;  %v4642_v56 = vsel %vm3798_vm8, %v4641_v30, %v4637_v2  ;;  %v4562_v0 = vrot.slane %v3658_v36, %v12745_v8  ;;  %v2297_v29 = vsel %vm1576_vm0, %v11582_v28, -inf  ;;  %v11033_v2 = vld [vmem:[%s12529_s16 + $0x3a4] ss:$16 sps:$4 sm:$0xff]  }
 0x2a5   : > { %6243 = vmatprep.subr.bf16.mxu0 %v11015_v33  ;;  %6407 = vmatprep.subr.bf16.mxu1 %v11018_v42  ;;  %v4651_v33 = vrot.slane %v3676_v58, %v12764_v34  ;;  %v11027_v42 = vld [vmem:[%s12529_s16 + $0x384] ss:$16 sps:$4 sm:$0xff]   ;;  %v4567_v26 = vrot.slane %v3659_v57, %v12750_v13  ;;  %v4656_v30 = vrot.slane %v3677_v10, %v12771_v41  ;;  %v11034_v10 = vld [vmem:[%s12529_s16 + $0x3a8] ss:$16 sps:$4 sm:$0xff]  }
 0x2a6   : > { %2349 = vmax.xlane.f32.xlu1 %v2348_v35  ;;  %2346 = vmax.xlane.f32.xlu0 %v2345_v21  ;;  %v11022_v35 = vld [vmem:[%s12529_s16 + $0x368] ss:$16 sps:$4 sm:$0xff]   ;;  %v3660_v5 = vunpack.c.l.b16 %v13569_v47  ;;  %v4647_v21 = vsel %vm15717_vm9, %v4646_v51, %v4642_v56  ;;  %v4563_v50 = vsel %vm3798_vm8, %v4562_v0, %v4558_v17  ;;  %v2354_v51 = vsel %vm1576_vm0, %v11583_v1, -inf  ;;  %v11031_v0 = vld [vmem:[%s12529_s16 + $0x3a0] ss:$16 sps:$4 sm:$0xff]  }
 0x2a7   : > { %v2122_v9 = vpop.xlane.xlu1 %2121  ;;  %v2119_v3 = vpop.xlane.xlu0 %2118  ;;  %v4652_v58 = vsel %vm15740_vm7, %v4651_v33, %v4647_v21  ;;  %v11587_v1 = vld [vmem:[%s12517_s13 + $0x458] sm:$0xff] }
 0x2a8   : > { %v3108_v24 = vpack.c.bf16 %v2122_v9, %v2119_v3  ;;  %6244 = vmatpush1.bf16.msra.mxu0 %v11013_v43  ;;  %6408 = vmatpush1.bf16.msra.mxu1 %v11016_v44  ;;  %v11025_v43 = vld [vmem:[%s12529_s16 + $0x380] ss:$16 sps:$4 sm:$0xff]   ;;  %v11028_v44 = vld [vmem:[%s12529_s16 + $0x388] ss:$16 sps:$4 sm:$0xff]   ;;  %v4568_v9 = vsel %vm15717_vm9, %v4567_v26, %v4563_v50  ;;  %v4657_v3 = vsel %vm15716_vm11, %v4656_v30, %v4652_v58 }
 0x2a9   : > { %6245 = vmatprep.subr.bf16.mxu0 %v11021_v60  ;;  %6409 = vmatprep.subr.bf16.mxu1 %v11024_v49  ;;  %v3661_v60 = vunpack.c.h.b16 %v13569_v47  ;;  %v4572_v49 = vrot.slane %v3660_v5, %v12764_v34  ;;  %v11584_v47 = vld [vmem:[%s12517_s13 + $0x90] sm:$0xff]  ;;  %v11039_v5 = vld [vmem:[%s12529_s16 + $0x3c4] ss:$16 sps:$4 sm:$0xff]  }
 0x2aa   : > { %v3678_v46 = vunpack.c.l.b16 %v3108_v24  ;;  %2709 = vmax.xlane.f32.xlu1 %v2708_v31  ;;  %2706 = vmax.xlane.f32.xlu0 %v2705_v4  ;;  %v3679_v61 = vunpack.c.h.b16 %v3108_v24  ;;  %v2351_v57 = vsel %vm1576_vm0, %v11584_v47, -inf  ;;  %v11585_v26 = vld [vmem:[%s12517_s13 + $0x3c8] sm:$0xff]  ;;  %v11588_v47 = vld [vmem:[%s12517_s13 + $0x450] sm:$0xff] }
 0x2ab   : > { %v2074_v39 = vpop.xlane.xlu1 %2073  ;;  %v2071_v63 = vpop.xlane.xlu0 %2070  ;;  %v4573_v24 = vsel %vm15740_vm7, %v4572_v49, %v4568_v9  ;;  %v11045_v49 = vld [vmem:[%s12529_s16 + $0x3e4] ss:$16 sps:$4 sm:$0xff]   ;;  %vm15741_vm7 = vcmask 523712  }
 0x2ac   : > { %v3100_v36 = vpack.c.bf16 %v2074_v39, %v2071_v63  ;;  %6246 = vmatpush1.bf16.msra.mxu0 %v11019_v16  ;;  %6410 = vmatpush1.bf16.msra.mxu1 %v11022_v35  ;;  %v4661_v31 = vrot.slane %v3678_v46, %v12780_v54  ;;  %v4577_v16 = vrot.slane %v3661_v60, %v12771_v41  ;;  %v2660_v39 = vsel %vm1576_vm0, %v11585_v26, -inf  ;;  %v11586_v63 = vld [vmem:[%s12517_s13 + $0x3c0] sm:$0xff] }
 0x2ad   : > { %6247 = vmatprep.subr.bf16.mxu0 %v11027_v42  ;;  %6411 = vmatprep.subr.bf16.mxu1 %v11030_v38  ;;  %v4666_v35 = vrot.slane %v3679_v61, %v12783_v55  ;;  %v11042_v42 = vld [vmem:[%s12529_s16 + $0x3cc] ss:$16 sps:$4 sm:$0xff]   ;;  %v2657_v28 = vsel %vm1576_vm0, %v11586_v63, -inf  ;;  %v11052_v63 = vld [vmem:[%s12529_s16 + $0x408] ss:$16 sps:$4 sm:$0xff]  }
 0x2ae   : > { %v3662_v32 = vunpack.c.l.b16 %v3100_v36  ;;  %2301 = vmax.xlane.f32.xlu1 %v2300_v40  ;;  %2298 = vmax.xlane.f32.xlu0 %v2297_v29  ;;  %v3663_v33 = vunpack.c.h.b16 %v3100_v36  ;;  %v4662_v38 = vsel %vm3826_vm12, %v4661_v31, %v4657_v3  ;;  %v11037_v36 = vld [vmem:[%s12529_s16 + $0x3c0] ss:$16 sps:$4 sm:$0xff]   ;;  %v11048_v61 = vld [vmem:[%s12529_s16 + $0x3ec] ss:$16 sps:$4 sm:$0xff]  }
 0x2af   : > { %v2128_v4 = vpop.xlane.xlu1 %2127  ;;  %v2125_v52 = vpop.xlane.xlu0 %2124  ;;  %v4667_v58 = vsel %vm3833_vm13, %v4666_v35, %v4662_v38  ;;  %v11589_v38 = vld [vmem:[%s12517_s13 + $0x18] sm:$0xff] }
 0x2b0   : > { %v3109_v56 = vpack.c.bf16 %v2128_v4, %v2125_v52  ;;  %6248 = vmatpush1.bf16.msra.mxu0 %v11025_v43  ;;  %6412 = vmatpush1.bf16.msra.mxu1 %v11028_v44  ;;  %v4582_v46 = vrot.slane %v3662_v32, %v12780_v54  ;;  %v11040_v43 = vld [vmem:[%s12529_s16 + $0x3c8] ss:$16 sps:$4 sm:$0xff]   ;;  %v4578_v44 = vsel %vm15716_vm11, %v4577_v16, %v4573_v24 }
 0x2b1   : > { %6249 = vmatprep.subr.bf16.mxu0 %v11033_v2  ;;  %6413 = vmatprep.subr.bf16.mxu1 %v11036_v48  ;;  %v4587_v60 = vrot.slane %v3663_v33, %v12783_v55  ;;  %v11046_v16 = vld [vmem:[%s12529_s16 + $0x3e8] ss:$16 sps:$4 sm:$0xff]  }
 0x2b2   : > { %v3680_v14 = vunpack.c.l.b16 %v3109_v56  ;;  %v3681_v40 = vunpack.c.h.b16 %v3109_v56  ;;  %2355 = vmax.xlane.f32.xlu1 %v2354_v51  ;;  %2352 = vmax.xlane.f32.xlu0 %v2351_v57  ;;  %v4583_v2 = vsel %vm3826_vm12, %v4582_v46, %v4578_v44  ;;  %v2714_v51 = vsel %vm1576_vm0, %v11587_v1, -inf }
 0x2b3   : > { %v2080_v17 = vpop.xlane.xlu1 %2079  ;;  %v2077_v21 = vpop.xlane.xlu0 %2076  ;;  %v2711_v57 = vsel %vm1576_vm0, %v11588_v47, -inf  ;;  %v2306_v46 = vsel %vm1576_vm0, %v11589_v38, -inf  ;;  %v11066_v47 = vld [vmem:[%s12529_s16 + $0x44c] ss:$16 sps:$4 sm:$0xff]   ;;  %v11067_v38 = vld [vmem:[%s12529_s16 + $0x460] ss:$16 sps:$4 sm:$0xff]  }
 0x2b4   : > { %v4671_v29 = vrot.slane %v3680_v14, %v12794_v7  ;;  %v4676_v50 = vrot.slane %v3681_v40, %v12801_v15  ;;  %v3101_v30 = vpack.c.bf16 %v2080_v17, %v2077_v21  ;;  %6250 = vmatpush1.bf16.msra.mxu0 %v11031_v0  ;;  %6414 = vmatpush1.bf16.msra.mxu1 %v11034_v10  ;;  %v11043_v10 = vld [vmem:[%s12529_s16 + $0x3e0] ss:$16 sps:$4 sm:$0xff]   ;;  %v11590_v14 = vld [vmem:[%s12517_s13 + $0x10] sm:$0xff]  ;;  %v11051_v17 = vld [vmem:[%s12529_s16 + $0x404] ss:$16 sps:$4 sm:$0xff]  }
 0x2b5   : > { %6251 = vmatprep.subr.bf16.mxu0 %v11039_v5  ;;  %6415 = vmatprep.subr.bf16.mxu1 %v11042_v42  ;;  %v4588_v0 = vsel %vm3833_vm13, %v4587_v60, %v4583_v2  ;;  %v2303_v40 = vsel %vm1576_vm0, %v11590_v14, -inf  ;;  %v11054_v21 = vld [vmem:[%s12529_s16 + $0x40c] ss:$16 sps:$4 sm:$0xff]   ;;  %v11055_v60 = vld [vmem:[%s12529_s16 + $0x420] ss:$16 sps:$4 sm:$0xff]  }
 0x2b6   : > { %v3664_v48 = vunpack.c.l.b16 %v3101_v30  ;;  %v3665_v31 = vunpack.c.h.b16 %v3101_v30  ;;  %2661 = vmax.xlane.f32.xlu1 %v2660_v39  ;;  %2658 = vmax.xlane.f32.xlu0 %v2657_v28  ;;  %v4672_v32 = vsel %vm3840_vm14, %v4671_v29, %v4667_v58  ;;  %v11049_v39 = vld [vmem:[%s12529_s16 + $0x400] ss:$16 sps:$4 sm:$0xff]   ;;  %v11057_v58 = vld [vmem:[%s12529_s16 + $0x424] ss:$16 sps:$4 sm:$0xff]  }
 0x2b7   : > { %v13639_v4 = vpop.xlane.xlu1 %2181  ;;  %v13641_v52 = vpop.xlane.xlu0 %2178  ;;  %v4677_v9 = vsel %vm3847_vm15, %v4676_v50, %v4672_v32  ;;  %v11591_v30 = vld [vmem:[%s12517_s13 + $0x3d8] sm:$0xff]  ;;  %v11594_v32 = vld [vmem:[%s12517_s13 + $0xa0] sm:$0xff] }
 0x2b8   : > { %v4592_v3 = vrot.slane %v3664_v48, %v12794_v7  ;;  %v4597_v56 = vrot.slane %v3665_v31, %v12801_v15  ;;  %6252 = vmatpush1.bf16.msra.mxu0 %v11037_v36  ;;  %6416 = vmatpush1.bf16.msra.mxu1 %v11040_v43  ;;  %v4958_v24 = vsel %vm4954_vm10, %v4677_v9, %v13042_v18  ;;  %v2666_v36 = vsel %vm1576_vm0, %v11591_v30, -inf  ;;  %v11592_v43 = vld [vmem:[%s12517_s13 + $0x3d0] sm:$0xff]  ;;  %v11593_v48 = vld [vmem:[%s12517_s13 + $0xa8] sm:$0xff] }
 0x2b9   : > { %6253 = vmatprep.subr.bf16.mxu0 %v11045_v49  ;;  %6417 = vmatprep.subr.bf16.mxu1 %v11048_v61  ;;  %v4966_v33 = vpack.c.b16 %v4958_v24, %v4958_v24  ;;  %v2663_v44 = vsel %vm1576_vm0, %v11592_v43, -inf  ;;  %v11058_v49 = vld [vmem:[%s12529_s16 + $0x428] ss:$16 sps:$4 sm:$0xff]   ;;  %v2360_v31 = vsel %vm1576_vm0, %v11593_v48, -inf  ;;  %v2357_v1 = vsel %vm1576_vm0, %v11594_v32, -inf }
 0x2ba   : > { %v4593_v35 = vsel %vm3840_vm14, %v4592_v3, %v4588_v0  ;;  %2715 = vmax.xlane.f32.xlu1 %v2714_v51  ;;  %2712 = vmax.xlane.f32.xlu0 %v2711_v57  ;;  %v11063_v51 = vld [vmem:[%s12529_s16 + $0x444] ss:$16 sps:$4 sm:$0xff]   ;;  %v11061_v57 = vld [vmem:[%s12529_s16 + $0x440] ss:$16 sps:$4 sm:$0xff]   ;;  %v11064_v9 = vld [vmem:[%s12529_s16 + $0x448] ss:$16 sps:$4 sm:$0xff]   ;;  %v3118_v14 = vpack.c.bf16 %v13639_v4, %v13641_v52 }
 0x2bb   : > { %v13656_v5 = vpop.xlane.xlu1 %2133  ;;  %v13658_v42 = vpop.xlane.xlu0 %2130  ;;  %v4598_v18 = vsel %vm3847_vm15, %v4597_v56, %v4593_v35  ;;  %6255 = vmatprep.mubr.bf16.mxu0 %v4966_v33  ;;  %6419 = vmatprep.mubr.bf16.mxu1 %v4966_v33  ;;  %v11595_v0 = vld [vmem:[%s12517_s13 + $0x468] sm:$0xff]  ;;  %v11596_v24 = vld [vmem:[%s12517_s13 + $0x460] sm:$0xff] }
 0x2bc   : > { %6254 = vmatpush1.bf16.msra.mxu0 %v11043_v10  ;;  %6418 = vmatpush1.bf16.msra.mxu1 %v11046_v16  ;;  %v4957_v26 = vsel %vm4954_vm10, %v4598_v18, %v12945_v12  ;;  %v11060_v12 = vld [vmem:[%s12529_s16 + $0x42c] ss:$16 sps:$4 sm:$0xff]   ;;  %v2720_v10 = vsel %vm1576_vm0, %v11595_v0, -inf  ;;  %v2717_v16 = vsel %vm1576_vm0, %v11596_v24, -inf  ;;  %v11069_v35 = vld [vmem:[%s12529_s16 + $0x464] ss:$16 sps:$4 sm:$0xff]   ;;  %v3699_v48 = vunpack.c.h.b16 %v3118_v14 }
 0x2bd   : > { %v4965_v28 = vpack.c.b16 %v4957_v26, %v4957_v26  ;;  %6264 = vmatprep.subr.bf16.mxu0 %v11051_v17  ;;  %6428 = vmatprep.subr.bf16.mxu1 %v11054_v21  ;;  %v11072_v33 = vld [vmem:[%s12529_s16 + $0x46c] ss:$16 sps:$4 sm:$0xff]   ;;  %v11597_v17 = vld [vmem:[%s12517_s13 + $0x28] sm:$0xff]  ;;  %v11076_v52 = vld [vmem:[%s12529_s16 + $0x488] ss:$16 sps:$4 sm:$0xff]  }
 0x2be   : > { %2307 = vmax.xlane.f32.xlu1 %v2306_v46  ;;  %2304 = vmax.xlane.f32.xlu0 %v2303_v40  ;;  %v11070_v46 = vld [vmem:[%s12529_s16 + $0x468] ss:$16 sps:$4 sm:$0xff]   ;;  %v2312_v21 = vsel %vm1576_vm0, %v11597_v17, -inf  ;;  %v11073_v4 = vld [vmem:[%s12529_s16 + $0x480] ss:$16 sps:$4 sm:$0xff]  }
 0x2bf   : > { %v2188_v29 = vpop.xlane.xlu1 %2187  ;;  %v2185_v50 = vpop.xlane.xlu0 %2184  ;;  %6256 = vmatmul.mubr.bf16.vlgmr.msra.gmra.mrb[0].mxu0 %v4965_v28  ;;  %6420 = vmatmul.mubr.bf16.vlgmr.msra.gmra.mrb[0].mxu1 %v4965_v28  ;;  %v11598_v26 = vld [vmem:[%s12517_s13 + $0x20] sm:$0xff]  ;;  %v11087_v24 = vld [vmem:[%s12529_s16 + $0x4c4] ss:$16 sps:$4 sm:$0xff]  }
 0x2c0   : > { %6265 = vmatpush1.bf16.msra.mxu0 %v11049_v39  ;;  %6429 = vmatpush1.bf16.msra.mxu1 %v11052_v63  ;;  %v2309_v39 = vsel %vm1576_vm0, %v11598_v26, -inf  ;;  %v11075_v63 = vld [vmem:[%s12529_s16 + $0x484] ss:$16 sps:$4 sm:$0xff]   ;;  %v11078_v28 = vld [vmem:[%s12529_s16 + $0x48c] ss:$16 sps:$4 sm:$0xff]   ;;  %v13705_v30 = vpack.c.bf16 %v2188_v29, %v2185_v50 }
 0x2c1   : > { %6266 = vmatprep.subr.bf16.mxu0 %v11057_v58  ;;  %6430 = vmatprep.subr.bf16.mxu1 %v11060_v12  ;;  %v11599_v58 = vld [vmem:[%s12517_s13 + $0x3e8] sm:$0xff]  ;;  %v11600_v29 = vld [vmem:[%s12517_s13 + $0x3e0] sm:$0xff] }
 0x2c2   : > { %2667 = vmax.xlane.f32.xlu1 %v2666_v36  ;;  %2664 = vmax.xlane.f32.xlu0 %v2663_v44  ;;  %v3698_v36 = vunpack.c.l.b16 %v3118_v14  ;;  %v2672_v12 = vsel %vm1576_vm0, %v11599_v58, -inf  ;;  %v2669_v50 = vsel %vm1576_vm0, %v11600_v29, -inf  ;;  %v3700_v32 = vunpack.c.l.b16 %v13705_v30  ;;  %v11085_v14 = vld [vmem:[%s12529_s16 + $0x4c0] ss:$16 sps:$4 sm:$0xff]   ;;  %v11088_v17 = vld [vmem:[%s12529_s16 + $0x4c8] ss:$16 sps:$4 sm:$0xff]  }
 0x2c3   : > { %v13679_v61 = vpop.xlane.xlu1 %2139  ;;  %v2137_v2 = vpop.xlane.xlu0 %2136  ;;  %v11093_v58 = vld [vmem:[%s12529_s16 + $0x4e4] ss:$16 sps:$4 sm:$0xff]  }
 0x2c4   : > { %6267 = vmatpush1.bf16.msra.mxu0 %v11055_v60  ;;  %6431 = vmatpush1.bf16.msra.mxu1 %v11058_v49  ;;  %v11081_v60 = vld [vmem:[%s12529_s16 + $0x4a4] ss:$16 sps:$4 sm:$0xff]   ;;  %v11084_v49 = vld [vmem:[%s12529_s16 + $0x4ac] ss:$16 sps:$4 sm:$0xff]  }
 0x2c5   : > { %6268 = vmatprep.subr.bf16.mxu0 %v11063_v51  ;;  %6432 = vmatprep.subr.bf16.mxu1 %v11066_v47  ;;  %v11079_v51 = vld [vmem:[%s12529_s16 + $0x4a0] ss:$16 sps:$4 sm:$0xff]   ;;  %v11082_v47 = vld [vmem:[%s12529_s16 + $0x4a8] ss:$16 sps:$4 sm:$0xff]  }
 0x2c6   : > { %2361 = vmax.xlane.f32.xlu1 %v2360_v31  ;;  %2358 = vmax.xlane.f32.xlu0 %v2357_v1  ;;  %v3110_v31 = vpack.c.bf16 %v13656_v5, %v13658_v42  ;;  %v13719_v1 = vpack.c.bf16 %v13679_v61, %v2137_v2  ;;  %v11601_v42 = vld [vmem:[%s12517_s13 + $0xb8] sm:$0xff]  ;;  %v11602_v2 = vld [vmem:[%s12517_s13 + $0xb0] sm:$0xff] }
 0x2c7   : > { %v2194_v3 = vpop.xlane.xlu1 %2193  ;;  %v2191_v56 = vpop.xlane.xlu0 %2190  ;;  %v2366_v61 = vsel %vm1576_vm0, %v11601_v42, -inf }
 0x2c8   : > { %6269 = vmatpush1.bf16.msra.mxu0 %v11061_v57  ;;  %6433 = vmatpush1.bf16.msra.mxu1 %v11064_v9  ;;  %v13723_v57 = vpack.c.bf16 %v2194_v3, %v2191_v56  ;;  %v4760_v9 = vrot.slane %v3698_v36, %v12694_v19  ;;  %v4764_v3 = vrot.slane %v3699_v48, %v12702_v25  ;;  %v3682_v56 = vunpack.c.l.b16 %v3110_v31  ;;  %v11091_v48 = vld [vmem:[%s12529_s16 + $0x4e0] ss:$16 sps:$4 sm:$0xff]  }
 0x2c9   : > { %6270 = vmatprep.subr.bf16.mxu0 %v11069_v35  ;;  %6434 = vmatprep.subr.bf16.mxu1 %v11072_v33  ;;  %v3683_v35 = vunpack.c.h.b16 %v3110_v31  ;;  %v3701_v33 = vunpack.c.h.b16 %v13705_v30  ;;  %v11603_v30 = vld [vmem:[%s12517_s13 + $0x478] sm:$0xff]  ;;  %v11094_v31 = vld [vmem:[%s12529_s16 + $0x4e8] ss:$16 sps:$4 sm:$0xff]  }
 0x2ca   : > { %2721 = vmax.xlane.f32.xlu1 %v2720_v10  ;;  %2718 = vmax.xlane.f32.xlu0 %v2717_v16  ;;  %v2363_v10 = vsel %vm1576_vm0, %v11602_v2, -inf  ;;  %v11090_v16 = vld [vmem:[%s12529_s16 + $0x4cc] ss:$16 sps:$4 sm:$0xff]  }
 0x2cb   : > { %v2146_v40 = vpop.xlane.xlu1 %2145  ;;  %v2143_v18 = vpop.xlane.xlu0 %2142 }
 0x2cc   : > { %6271 = vmatpush1.bf16.msra.mxu0 %v11067_v38  ;;  %6435 = vmatpush1.bf16.msra.mxu1 %v11070_v46  ;;  %v4769_v38 = vrot.slane %v3700_v32, %v12699_v23  ;;  %v3684_v46 = vunpack.c.l.b16 %v13719_v1  ;;  %v13739_v26 = vpack.c.bf16 %v2146_v40, %v2143_v18  ;;  %v4765_v40 = vsel %vm3749_vm1, %v4764_v3, %v4760_v9  ;;  %v11102_v3 = vld [vmem:[%s12529_s16 + $0x50c] ss:$16 sps:$4 sm:$0xff]  }
 0x2cd   : > { %6272 = vmatprep.subr.bf16.mxu0 %v11075_v63  ;;  %6436 = vmatprep.subr.bf16.mxu1 %v11078_v28  ;;  %v4681_v18 = vrot.slane %v3682_v56, %v12694_v19 }
 0x2ce   : > { %2313 = vmax.xlane.f32.xlu1 %v2312_v21  ;;  %2310 = vmax.xlane.f32.xlu0 %v2309_v39  ;;  %v3702_v21 = vunpack.c.l.b16 %v13723_v57  ;;  %v4770_v29 = vsel %vm3756_vm2, %v4769_v38, %v4765_v40  ;;  %v11097_v38 = vld [vmem:[%s12529_s16 + $0x500] ss:$16 sps:$4 sm:$0xff]  }
 0x2cf   : > { %v2200_v43 = vpop.xlane.xlu1 %2199  ;;  %v2197_v44 = vpop.xlane.xlu0 %2196 }
 0x2d0   : > { %6273 = vmatpush1.bf16.msra.mxu0 %v11073_v4  ;;  %6437 = vmatpush1.bf16.msra.mxu1 %v11076_v52  ;;  %v13741_v39 = vpack.c.bf16 %v2200_v43, %v2197_v44  ;;  %v2726_v4 = vsel %vm1576_vm0, %v11603_v30, -inf  ;;  %v11604_v52 = vld [vmem:[%s12517_s13 + $0x470] sm:$0xff]  ;;  %v4685_v43 = vrot.slane %v3683_v35, %v12702_v25  ;;  %v4774_v44 = vrot.slane %v3701_v33, %v12705_v27 }
 0x2d1   : > { %6274 = vmatprep.subr.bf16.mxu0 %v11081_v60  ;;  %6438 = vmatprep.subr.bf16.mxu1 %v11084_v49  ;;  %v2723_v36 = vsel %vm1576_vm0, %v11604_v52, -inf  ;;  %v4690_v60 = vrot.slane %v3684_v46, %v12699_v23  ;;  %v3703_v49 = vunpack.c.h.b16 %v13723_v57  ;;  %v4779_v32 = vrot.slane %v3702_v21, %v12712_v37  ;;  %v11100_v46 = vld [vmem:[%s12529_s16 + $0x508] ss:$16 sps:$4 sm:$0xff]  }
 0x2d2   : > { %2673 = vmax.xlane.f32.xlu1 %v2672_v12  ;;  %2670 = vmax.xlane.f32.xlu0 %v2669_v50  ;;  %v11096_v12 = vld [vmem:[%s12529_s16 + $0x4ec] ss:$16 sps:$4 sm:$0xff]   ;;  %v3685_v50 = vunpack.c.h.b16 %v13719_v1  ;;  %v3704_v9 = vunpack.c.l.b16 %v13741_v39  ;;  %v4686_v56 = vsel %vm3749_vm1, %v4685_v43, %v4681_v18  ;;  %v4775_v35 = vsel %vm3763_vm3, %v4774_v44, %v4770_v29  ;;  %v11105_v18 = vld [vmem:[%s12529_s16 + $0x524] ss:$16 sps:$4 sm:$0xff]  }
 0x2d3   : > { %v2152_v0 = vpop.xlane.xlu1 %2151  ;;  %v2149_v5 = vpop.xlane.xlu0 %2148  ;;  %v4784_v33 = vrot.slane %v3703_v49, %v12721_v45  ;;  %v4780_v21 = vsel %vm3770_vm4, %v4779_v32, %v4775_v35  ;;  %v3705_v30 = vunpack.c.h.b16 %v13741_v39  ;;  %v11108_v39 = vld [vmem:[%s12529_s16 + $0x52c] ss:$16 sps:$4 sm:$0xff]   ;;  %v11609_v44 = vld [vmem:[%s12517_s13 + $0xc8] sm:$0xff] }
 0x2d4   : > { %6275 = vmatpush1.bf16.msra.mxu0 %v11079_v51  ;;  %6439 = vmatpush1.bf16.msra.mxu1 %v11082_v47  ;;  %v3686_v51 = vunpack.c.l.b16 %v13739_v26  ;;  %v11605_v47 = vld [vmem:[%s12517_s13 + $0x38] sm:$0xff]  ;;  %v13764_v42 = vpack.c.bf16 %v2152_v0, %v2149_v5  ;;  %v4691_v0 = vsel %vm3756_vm2, %v4690_v60, %v4686_v56  ;;  %v4695_v5 = vrot.slane %v3685_v50, %v12705_v27  ;;  %v11610_v32 = vld [vmem:[%s12517_s13 + $0xc0] sm:$0xff] }
 0x2d5   : > { %6276 = vmatprep.subr.bf16.mxu0 %v11087_v24  ;;  %6440 = vmatprep.subr.bf16.mxu1 %v11090_v16  ;;  %v2318_v1 = vsel %vm1576_vm0, %v11605_v47, -inf  ;;  %v11099_v16 = vld [vmem:[%s12529_s16 + $0x504] ss:$16 sps:$4 sm:$0xff]   ;;  %v2372_v29 = vsel %vm1576_vm0, %v11609_v44, -inf  ;;  %v4785_v60 = vsel %vm3777_vm5, %v4784_v33, %v4780_v21 }
 0x2d6   : > { %2367 = vmax.xlane.f32.xlu1 %v2366_v61  ;;  %2364 = vmax.xlane.f32.xlu0 %v2363_v10  ;;  %v11606_v10 = vld [vmem:[%s12517_s13 + $0x30] sm:$0xff]  ;;  %v3688_v52 = vunpack.c.l.b16 %v13764_v42  ;;  %v4696_v50 = vsel %vm3763_vm3, %v4695_v5, %v4691_v0  ;;  %v11111_v35 = vld [vmem:[%s12529_s16 + $0x544] ss:$16 sps:$4 sm:$0xff]  }
 0x2d7   : > { %v2206_v63 = vpop.xlane.xlu1 %2205  ;;  %v2203_v28 = vpop.xlane.xlu0 %2202  ;;  %v2315_v24 = vsel %vm1576_vm0, %v11606_v10, -inf  ;;  %v11114_v0 = vld [vmem:[%s12529_s16 + $0x54c] ss:$16 sps:$4 sm:$0xff]   ;;  %v11611_v21 = vld [vmem:[%s12517_s13 + $0x488] sm:$0xff] }
 0x2d8   : > { %6277 = vmatpush1.bf16.msra.mxu0 %v11085_v14  ;;  %6441 = vmatpush1.bf16.msra.mxu1 %v11088_v17  ;;  %v13766_v57 = vpack.c.bf16 %v2206_v63, %v2203_v28  ;;  %v11607_v14 = vld [vmem:[%s12517_s13 + $0x3f8] sm:$0xff]  ;;  %v3687_v63 = vunpack.c.h.b16 %v13739_v26  ;;  %v4700_v28 = vrot.slane %v3686_v51, %v12712_v37  ;;  %v2369_v51 = vsel %vm1576_vm0, %v11610_v32, -inf }
 0x2d9   : > { %6278 = vmatprep.subr.bf16.mxu0 %v11093_v58  ;;  %6442 = vmatprep.subr.bf16.mxu1 %v11096_v12  ;;  %v2678_v17 = vsel %vm1576_vm0, %v11607_v14, -inf  ;;  %v11608_v12 = vld [vmem:[%s12517_s13 + $0x3f0] sm:$0xff]  ;;  %v4710_v10 = vrot.slane %v3688_v52, %v12730_v53 }
 0x2da   : > { %2727 = vmax.xlane.f32.xlu1 %v2726_v4  ;;  %2724 = vmax.xlane.f32.xlu0 %v2723_v36  ;;  %v4789_v4 = vrot.slane %v3704_v9, %v12730_v53  ;;  %v3706_v36 = vunpack.c.l.b16 %v13766_v57  ;;  %v2675_v40 = vsel %vm1576_vm0, %v11608_v12, -inf  ;;  %v4701_v47 = vsel %vm3770_vm4, %v4700_v28, %v4696_v50  ;;  %v11117_v12 = vld [vmem:[%s12529_s16 + $0x564] ss:$16 sps:$4 sm:$0xff]  }
 0x2db   : > { %v2158_v61 = vpop.xlane.xlu1 %2157  ;;  %v2155_v2 = vpop.xlane.xlu0 %2154  ;;  %v4794_v9 = vrot.slane %v3705_v30, %v12737_v62 }
 0x2dc   : > { %6279 = vmatpush1.bf16.msra.mxu0 %v11091_v48  ;;  %6443 = vmatpush1.bf16.msra.mxu1 %v11094_v31  ;;  %v13792_v43 = vpack.c.bf16 %v2158_v61, %v2155_v2  ;;  %v11103_v48 = vld [vmem:[%s12529_s16 + $0x520] ss:$16 sps:$4 sm:$0xff]   ;;  %v11106_v31 = vld [vmem:[%s12529_s16 + $0x528] ss:$16 sps:$4 sm:$0xff]   ;;  %v3689_v61 = vunpack.c.h.b16 %v13764_v42  ;;  %v4790_v2 = vsel %vm15723_vm6, %v4789_v4, %v4785_v60 }
 0x2dd   : > { %6280 = vmatprep.subr.bf16.mxu0 %v11099_v16  ;;  %6444 = vmatprep.subr.bf16.mxu1 %v11102_v3  ;;  %v4799_v16 = vrot.slane %v3706_v36, %v12745_v8  ;;  %v4795_v14 = vsel %vm15741_vm7, %v4794_v9, %v4790_v2 }
 0x2de   : > { %2319 = vmax.xlane.f32.xlu1 %v2318_v1  ;;  %2316 = vmax.xlane.f32.xlu0 %v2315_v24  ;;  %v4705_v1 = vrot.slane %v3687_v63, %v12721_v45  ;;  %v3707_v24 = vunpack.c.h.b16 %v13766_v57  ;;  %v3690_v42 = vunpack.c.l.b16 %v13792_v43  ;;  %v11112_v57 = vld [vmem:[%s12529_s16 + $0x548] ss:$16 sps:$4 sm:$0xff]   ;;  %v2732_v63 = vsel %vm1576_vm0, %v11611_v21, -inf }
 0x2df   : > { %v2212_v58 = vpop.xlane.xlu1 %2211  ;;  %v2209_v26 = vpop.xlane.xlu0 %2208  ;;  %v4800_v30 = vsel %vm3798_vm8, %v4799_v16, %v4795_v14 }
 0x2e0   : > { %v13798_v49 = vpack.c.bf16 %v2212_v58, %v2209_v26  ;;  %6281 = vmatpush1.bf16.msra.mxu0 %v11097_v38  ;;  %6445 = vmatpush1.bf16.msra.mxu1 %v11100_v46  ;;  %v11109_v38 = vld [vmem:[%s12529_s16 + $0x540] ss:$16 sps:$4 sm:$0xff]   ;;  %v4706_v46 = vsel %vm3777_vm5, %v4705_v1, %v4701_v47  ;;  %v4804_v4 = vrot.slane %v3707_v24, %v12750_v13  ;;  %v11612_v58 = vld [vmem:[%s12517_s13 + $0x480] sm:$0xff] }
 0x2e1   : > { %6282 = vmatprep.subr.bf16.mxu0 %v11105_v18  ;;  %6446 = vmatprep.subr.bf16.mxu1 %v11108_v39  ;;  %v4711_v28 = vsel %vm15723_vm6, %v4710_v10, %v4706_v46  ;;  %v2729_v26 = vsel %vm1576_vm0, %v11612_v58, -inf  ;;  %v3691_v18 = vunpack.c.h.b16 %v13792_v43  ;;  %v4720_v39 = vrot.slane %v3690_v42, %v12745_v8  ;;  %v11613_v1 = vld [vmem:[%s12517_s13 + $0x48] sm:$0xff]  ;;  %v11126_v24 = vld [vmem:[%s12529_s16 + $0x58c] ss:$16 sps:$4 sm:$0xff]   ;;  %v11124_v46 = vld [vmem:[%s12529_s16 + $0x588] ss:$16 sps:$4 sm:$0xff]  }
 0x2e2   : > { %2679 = vmax.xlane.f32.xlu1 %v2678_v17  ;;  %2676 = vmax.xlane.f32.xlu0 %v2675_v40  ;;  %v3708_v5 = vunpack.c.l.b16 %v13798_v49  ;;  %v4715_v17 = vrot.slane %v3689_v61, %v12737_v62  ;;  %v11120_v40 = vld [vmem:[%s12529_s16 + $0x56c] ss:$16 sps:$4 sm:$0xff]   ;;  %v3709_v44 = vunpack.c.h.b16 %v13798_v49  ;;  %v4805_v49 = vsel %vm15717_vm9, %v4804_v4, %v4800_v30  ;;  %v11123_v10 = vld [vmem:[%s12529_s16 + $0x584] ss:$16 sps:$4 sm:$0xff]  }
 0x2e3   : > { %v2164_v3 = vpop.xlane.xlu1 %2163  ;;  %v2161_v56 = vpop.xlane.xlu0 %2160  ;;  %v2324_v9 = vsel %vm1576_vm0, %v11613_v1, -inf  ;;  %v11614_v61 = vld [vmem:[%s12517_s13 + $0x40] sm:$0xff]  ;;  %v11618_v1 = vld [vmem:[%s12517_s13 + $0xd0] sm:$0xff] }
 0x2e4   : > { %v13816_v33 = vpack.c.bf16 %v2164_v3, %v2161_v56  ;;  %6283 = vmatpush1.bf16.msra.mxu0 %v11103_v48  ;;  %6447 = vmatpush1.bf16.msra.mxu1 %v11106_v31  ;;  %v4809_v50 = vrot.slane %v3708_v5, %v12764_v34  ;;  %v11115_v48 = vld [vmem:[%s12529_s16 + $0x560] ss:$16 sps:$4 sm:$0xff]   ;;  %v11118_v31 = vld [vmem:[%s12529_s16 + $0x568] ss:$16 sps:$4 sm:$0xff]   ;;  %v4716_v43 = vsel %vm15741_vm7, %v4715_v17, %v4711_v28  ;;  %v2321_v2 = vsel %vm1576_vm0, %v11614_v61, -inf }
 0x2e5   : > { %6284 = vmatprep.subr.bf16.mxu0 %v11111_v35  ;;  %6448 = vmatprep.subr.bf16.mxu1 %v11114_v0  ;;  %v4721_v16 = vsel %vm3798_vm8, %v4720_v39, %v4716_v43  ;;  %v4725_v3 = vrot.slane %v3691_v18, %v12750_v13  ;;  %v4814_v56 = vrot.slane %v3709_v44, %v12771_v41  ;;  %vm15742_vm7 = vcmask 720512   ;;  %v11616_v30 = vld [vmem:[%s12517_s13 + $0x400] sm:$0xff]  ;;  %v11135_v61 = vld [vmem:[%s12529_s16 + $0x5c4] ss:$16 sps:$4 sm:$0xff]  }
 0x2e6   : > { %2373 = vmax.xlane.f32.xlu1 %v2372_v29  ;;  %2370 = vmax.xlane.f32.xlu0 %v2369_v51  ;;  %v3692_v60 = vunpack.c.l.b16 %v13816_v33  ;;  %v4810_v0 = vsel %vm15742_vm7, %v4809_v50, %v4805_v49  ;;  %v3693_v42 = vunpack.c.h.b16 %v13816_v33  ;;  %v11615_v33 = vld [vmem:[%s12517_s13 + $0x408] sm:$0xff]  ;;  %v2681_v4 = vsel %vm1576_vm0, %v11616_v30, -inf  ;;  %v11130_v50 = vld [vmem:[%s12529_s16 + $0x5a8] ss:$16 sps:$4 sm:$0xff]  }
 0x2e7   : > { %v2218_v52 = vpop.xlane.xlu1 %2217  ;;  %v2215_v36 = vpop.xlane.xlu0 %2214  ;;  %v2684_v28 = vsel %vm1576_vm0, %v11615_v33, -inf  ;;  %v4726_v58 = vsel %vm15717_vm9, %v4725_v3, %v4721_v16  ;;  %v11620_v33 = vld [vmem:[%s12517_s13 + $0x490] sm:$0xff]  ;;  %v11141_v30 = vld [vmem:[%s12529_s16 + $0x5e4] ss:$16 sps:$4 sm:$0xff]  }
 0x2e8   : > { %v3124_v29 = vpack.c.bf16 %v2218_v52, %v2215_v36  ;;  %6285 = vmatpush1.bf16.msra.mxu0 %v11109_v38  ;;  %6449 = vmatpush1.bf16.msra.mxu1 %v11112_v57  ;;  %v4730_v5 = vrot.slane %v3692_v60, %v12764_v34  ;;  %v11121_v57 = vld [vmem:[%s12529_s16 + $0x580] ss:$16 sps:$4 sm:$0xff]   ;;  %v11129_v52 = vld [vmem:[%s12529_s16 + $0x5a4] ss:$16 sps:$4 sm:$0xff]   ;;  %v11132_v36 = vld [vmem:[%s12529_s16 + $0x5ac] ss:$16 sps:$4 sm:$0xff]   ;;  %v4735_v18 = vrot.slane %v3693_v42, %v12771_v41 }
 0x2e9   : > { %6286 = vmatprep.subr.bf16.mxu0 %v11117_v12  ;;  %6450 = vmatprep.subr.bf16.mxu1 %v11120_v40  ;;  %v11136_v42 = vld [vmem:[%s12529_s16 + $0x5c8] ss:$16 sps:$4 sm:$0xff]  }
 0x2ea   : > { %v3710_v32 = vunpack.c.l.b16 %v3124_v29  ;;  %2733 = vmax.xlane.f32.xlu1 %v2732_v63  ;;  %2730 = vmax.xlane.f32.xlu0 %v2729_v26  ;;  %v3711_v38 = vunpack.c.h.b16 %v3124_v29  ;;  %v4815_v26 = vsel %vm15716_vm11, %v4814_v56, %v4810_v0  ;;  %v4731_v40 = vsel %vm15742_vm7, %v4730_v5, %v4726_v58  ;;  %v11127_v29 = vld [vmem:[%s12529_s16 + $0x5a0] ss:$16 sps:$4 sm:$0xff]  }
 0x2eb   : > { %v2170_v51 = vpop.xlane.xlu1 %2169  ;;  %v2167_v47 = vpop.xlane.xlu0 %2166  ;;  %v4736_v3 = vsel %vm15716_vm11, %v4735_v18, %v4731_v40  ;;  %v11133_v0 = vld [vmem:[%s12529_s16 + $0x5c0] ss:$16 sps:$4 sm:$0xff]   ;;  %vm15743_vm7 = vcmask 523712  }
 0x2ec   : > { %v3116_v35 = vpack.c.bf16 %v2170_v51, %v2167_v47  ;;  %6287 = vmatpush1.bf16.msra.mxu0 %v11115_v48  ;;  %6451 = vmatpush1.bf16.msra.mxu1 %v11118_v31  ;;  %v4819_v14 = vrot.slane %v3710_v32, %v12780_v54  ;;  %v4824_v39 = vrot.slane %v3711_v38, %v12783_v55  ;;  %v11617_v51 = vld [vmem:[%s12517_s13 + $0xd8] sm:$0xff] }
 0x2ed   : > { %6288 = vmatprep.subr.bf16.mxu0 %v11123_v10  ;;  %6452 = vmatprep.subr.bf16.mxu1 %v11126_v24  ;;  %v2378_v47 = vsel %vm1576_vm0, %v11617_v51, -inf  ;;  %v11139_v40 = vld [vmem:[%s12529_s16 + $0x5e0] ss:$16 sps:$4 sm:$0xff]  }
 0x2ee   : > { %v3694_v17 = vunpack.c.l.b16 %v3116_v35  ;;  %2325 = vmax.xlane.f32.xlu1 %v2324_v9  ;;  %2322 = vmax.xlane.f32.xlu0 %v2321_v2  ;;  %v3695_v44 = vunpack.c.h.b16 %v3116_v35  ;;  %v4820_v60 = vsel %vm3826_vm12, %v4819_v14, %v4815_v26  ;;  %v2375_v9 = vsel %vm1576_vm0, %v11618_v1, -inf  ;;  %v11138_v2 = vld [vmem:[%s12529_s16 + $0x5cc] ss:$16 sps:$4 sm:$0xff]   ;;  %v11148_v1 = vld [vmem:[%s12529_s16 + $0x608] ss:$16 sps:$4 sm:$0xff]  }
 0x2ef   : > { %v2224_v21 = vpop.xlane.xlu1 %2223  ;;  %v2221_v63 = vpop.xlane.xlu0 %2220  ;;  %v4825_v56 = vsel %vm3833_vm13, %v4824_v39, %v4820_v60  ;;  %v11144_v26 = vld [vmem:[%s12529_s16 + $0x5ec] ss:$16 sps:$4 sm:$0xff]   ;;  %v11142_v39 = vld [vmem:[%s12529_s16 + $0x5e8] ss:$16 sps:$4 sm:$0xff]  }
 0x2f0   : > { %v3125_v12 = vpack.c.bf16 %v2224_v21, %v2221_v63  ;;  %6289 = vmatpush1.bf16.msra.mxu0 %v11121_v57  ;;  %6453 = vmatpush1.bf16.msra.mxu1 %v11124_v46  ;;  %v4740_v48 = vrot.slane %v3694_v17, %v12780_v54  ;;  %v4745_v35 = vrot.slane %v3695_v44, %v12783_v55  ;;  %v11619_v21 = vld [vmem:[%s12517_s13 + $0x498] sm:$0xff] }
 0x2f1   : > { %6290 = vmatprep.subr.bf16.mxu0 %v11129_v52  ;;  %6454 = vmatprep.subr.bf16.mxu1 %v11132_v36  ;;  %v2738_v63 = vsel %vm1576_vm0, %v11619_v21, -inf }
 0x2f2   : > { %v3712_v31 = vunpack.c.l.b16 %v3125_v12  ;;  %v3713_v32 = vunpack.c.h.b16 %v3125_v12  ;;  %2685 = vmax.xlane.f32.xlu1 %v2684_v28  ;;  %2682 = vmax.xlane.f32.xlu0 %v2681_v4  ;;  %v4741_v5 = vsel %vm3826_vm12, %v4740_v48, %v4736_v3  ;;  %v2735_v28 = vsel %vm1576_vm0, %v11620_v33, -inf  ;;  %v11622_v48 = vld [vmem:[%s12517_s13 + $0x50] sm:$0xff] }
 0x2f3   : > { %v2176_v43 = vpop.xlane.xlu1 %2175  ;;  %v2173_v49 = vpop.xlane.xlu0 %2172  ;;  %v4746_v12 = vsel %vm3833_vm13, %v4745_v35, %v4741_v5  ;;  %v11151_v35 = vld [vmem:[%s12529_s16 + $0x620] ss:$16 sps:$4 sm:$0xff]   ;;  %v11162_v33 = vld [vmem:[%s12529_s16 + $0x64c] ss:$16 sps:$4 sm:$0xff]  }
 0x2f4   : > { %v4829_v10 = vrot.slane %v3712_v31, %v12794_v7  ;;  %v4834_v24 = vrot.slane %v3713_v32, %v12801_v15  ;;  %v3117_v16 = vpack.c.bf16 %v2176_v43, %v2173_v49  ;;  %6291 = vmatpush1.bf16.msra.mxu0 %v11127_v29  ;;  %6455 = vmatpush1.bf16.msra.mxu1 %v11130_v50  ;;  %v11621_v50 = vld [vmem:[%s12517_s13 + $0x58] sm:$0xff]  ;;  %v2327_v31 = vsel %vm1576_vm0, %v11622_v48, -inf  ;;  %v11150_v49 = vld [vmem:[%s12529_s16 + $0x60c] ss:$16 sps:$4 sm:$0xff]   ;;  %v11629_v48 = vld [vmem:[%s12517_s13 + $0x68] sm:$0xff] }
 0x2f5   : > { %6292 = vmatprep.subr.bf16.mxu0 %v11135_v61  ;;  %6456 = vmatprep.subr.bf16.mxu1 %v11138_v2  ;;  %v2330_v60 = vsel %vm1576_vm0, %v11621_v50, -inf  ;;  %v11147_v43 = vld [vmem:[%s12529_s16 + $0x604] ss:$16 sps:$4 sm:$0xff]  }
 0x2f6   : > { %v3696_v38 = vunpack.c.l.b16 %v3117_v16  ;;  %v3697_v57 = vunpack.c.h.b16 %v3117_v16  ;;  %2379 = vmax.xlane.f32.xlu1 %v2378_v47  ;;  %2376 = vmax.xlane.f32.xlu0 %v2375_v9  ;;  %v4830_v46 = vsel %vm3840_vm14, %v4829_v10, %v4825_v56  ;;  %v11145_v47 = vld [vmem:[%s12529_s16 + $0x600] ss:$16 sps:$4 sm:$0xff]   ;;  %v11624_v16 = vld [vmem:[%s12517_s13 + $0x410] sm:$0xff] }
 0x2f7   : > { %v13886_v14 = vpop.xlane.xlu1 %2229  ;;  %v13888_v17 = vpop.xlane.xlu0 %2226  ;;  %v4835_v4 = vsel %vm3847_vm15, %v4834_v24, %v4830_v46  ;;  %v11623_v10 = vld [vmem:[%s12517_s13 + $0x418] sm:$0xff]  ;;  %v2687_v3 = vsel %vm1576_vm0, %v11624_v16, -inf  ;;  %v11156_v56 = vld [vmem:[%s12529_s16 + $0x62c] ss:$16 sps:$4 sm:$0xff]  }
 0x2f8   : > { %v4750_v52 = vrot.slane %v3696_v38, %v12794_v7  ;;  %v4755_v36 = vrot.slane %v3697_v57, %v12801_v15  ;;  %v4960_v58 = vsel %vm4954_vm10, %v4835_v4, %v13208_v59  ;;  %6293 = vmatpush1.bf16.msra.mxu0 %v11133_v0  ;;  %6457 = vmatpush1.bf16.msra.mxu1 %v11136_v42  ;;  %v2690_v24 = vsel %vm1576_vm0, %v11623_v10, -inf  ;;  %v11154_v0 = vld [vmem:[%s12529_s16 + $0x628] ss:$16 sps:$4 sm:$0xff]   ;;  %v11625_v38 = vld [vmem:[%s12517_s13 + $0xe8] sm:$0xff] }
 0x2f9   : > { %v4968_v18 = vpack.c.b16 %v4960_v58, %v4960_v58  ;;  %6294 = vmatprep.subr.bf16.mxu0 %v11141_v30  ;;  %6458 = vmatprep.subr.bf16.mxu1 %v11144_v26  ;;  %v2384_v57 = vsel %vm1576_vm0, %v11625_v38, -inf  ;;  %v11626_v46 = vld [vmem:[%s12517_s13 + $0xe0] sm:$0xff] }
 0x2fa   : > { %v4751_v44 = vsel %vm3840_vm14, %v4750_v52, %v4746_v12  ;;  %2739 = vmax.xlane.f32.xlu1 %v2738_v63  ;;  %2736 = vmax.xlane.f32.xlu0 %v2735_v28  ;;  %v2381_v21 = vsel %vm1576_vm0, %v11626_v46, -inf  ;;  %v11159_v63 = vld [vmem:[%s12529_s16 + $0x644] ss:$16 sps:$4 sm:$0xff]   ;;  %v11157_v28 = vld [vmem:[%s12529_s16 + $0x640] ss:$16 sps:$4 sm:$0xff]   ;;  %v11628_v26 = vld [vmem:[%s12517_s13 + $0x4a0] sm:$0xff] }
 0x2fb   : > { %v13905_v29 = vpop.xlane.xlu1 %2235  ;;  %6296 = vmatprep.mubr.bf16.mxu0 %v4968_v18  ;;  %v13907_v59 = vpop.xlane.xlu0 %2232  ;;  %v4756_v32 = vsel %vm3847_vm15, %v4755_v36, %v4751_v44  ;;  %6460 = vmatprep.mubr.bf16.mxu1 %v4968_v18  ;;  %v11160_v30 = vld [vmem:[%s12529_s16 + $0x648] ss:$16 sps:$4 sm:$0xff]   ;;  %v11627_v36 = vld [vmem:[%s12517_s13 + $0x4a8] sm:$0xff]  ;;  %v2741_v12 = vsel %vm1576_vm0, %v11628_v26, -inf  ;;  %v11168_v18 = vld [vmem:[%s12529_s16 + $0x66c] ss:$16 sps:$4 sm:$0xff]  }
 0x2fc   : > { %6295 = vmatpush1.bf16.msra.mxu0 %v11139_v40  ;;  %6459 = vmatpush1.bf16.msra.mxu1 %v11142_v39  ;;  %v4959_v51 = vsel %vm4954_vm10, %v4756_v32, %v13135_v20  ;;  %v11153_v20 = vld [vmem:[%s12529_s16 + $0x624] ss:$16 sps:$4 sm:$0xff]   ;;  %v2744_v58 = vsel %vm1576_vm0, %v11627_v36, -inf  ;;  %v11163_v39 = vld [vmem:[%s12529_s16 + $0x660] ss:$16 sps:$4 sm:$0xff]   ;;  %v11630_v32 = vld [vmem:[%s12517_s13 + $0x60] sm:$0xff]  ;;  %v3127_v10 = vpack.c.bf16 %v13905_v29, %v13907_v59 }
 0x2fd   : > { %v4967_v9 = vpack.c.b16 %v4959_v51, %v4959_v51  ;;  %6305 = vmatprep.subr.bf16.mxu0 %v11147_v43  ;;  %6469 = vmatprep.subr.bf16.mxu1 %v11150_v49  ;;  %v11165_v40 = vld [vmem:[%s12529_s16 + $0x664] ss:$16 sps:$4 sm:$0xff]   ;;  %v11166_v44 = vld [vmem:[%s12529_s16 + $0x668] ss:$16 sps:$4 sm:$0xff]   ;;  %v2333_v43 = vsel %vm1576_vm0, %v11630_v32, -inf }
 0x2fe   : > { %2331 = vmax.xlane.f32.xlu1 %v2330_v60  ;;  %2328 = vmax.xlane.f32.xlu0 %v2327_v31  ;;  %v2336_v31 = vsel %vm1576_vm0, %v11629_v48, -inf  ;;  %v11171_v49 = vld [vmem:[%s12529_s16 + $0x684] ss:$16 sps:$4 sm:$0xff]   ;;  %v11174_v51 = vld [vmem:[%s12529_s16 + $0x68c] ss:$16 sps:$4 sm:$0xff]  }
 0x2ff   : > { %v13920_v61 = vpop.xlane.xlu1 %2241  ;;  %v13922_v2 = vpop.xlane.xlu0 %2238  ;;  %6297 = vmatmul.mubr.bf16.vlgmr.msra.gmra.mrb[0].mxu0 %v4967_v9  ;;  %6461 = vmatmul.mubr.bf16.vlgmr.msra.gmra.mrb[0].mxu1 %v4967_v9  ;;  %v11172_v9 = vld [vmem:[%s12529_s16 + $0x688] ss:$16 sps:$4 sm:$0xff]   ;;  %v11180_v29 = vld [vmem:[%s12529_s16 + $0x6ac] ss:$16 sps:$4 sm:$0xff]  }
 0x300   : > { %6306 = vmatpush1.bf16.msra.mxu0 %v11145_v47  ;;  %6470 = vmatpush1.bf16.msra.mxu1 %v11148_v1  ;;  %v3126_v47 = vpack.c.bf16 %v13886_v14, %v13888_v17  ;;  %v11169_v1 = vld [vmem:[%s12529_s16 + $0x680] ss:$16 sps:$4 sm:$0xff]   ;;  %v11632_v17 = vld [vmem:[%s12517_s13 + $0x420] sm:$0xff]  ;;  %v13986_v46 = vpack.c.bf16 %v13920_v61, %v13922_v2 }
 0x301   : > { %6307 = vmatprep.subr.bf16.mxu0 %v11153_v20  ;;  %6471 = vmatprep.subr.bf16.mxu1 %v11156_v56  ;;  %v2693_v20 = vsel %vm1576_vm0, %v11632_v17, -inf  ;;  %v11177_v56 = vld [vmem:[%s12529_s16 + $0x6a4] ss:$16 sps:$4 sm:$0xff]   ;;  %v11178_v38 = vld [vmem:[%s12529_s16 + $0x6a8] ss:$16 sps:$4 sm:$0xff]  }
 0x302   : > { %2691 = vmax.xlane.f32.xlu1 %v2690_v24  ;;  %2688 = vmax.xlane.f32.xlu0 %v2687_v3  ;;  %v11631_v3 = vld [vmem:[%s12517_s13 + $0x428] sm:$0xff]  ;;  %v3714_v59 = vunpack.c.l.b16 %v3126_v47  ;;  %v11186_v26 = vld [vmem:[%s12529_s16 + $0x6cc] ss:$16 sps:$4 sm:$0xff]  }
 0x303   : > { %v13932_v42 = vpop.xlane.xlu1 %2247  ;;  %v13934_v5 = vpop.xlane.xlu0 %2244  ;;  %v2696_v14 = vsel %vm1576_vm0, %v11631_v3, -inf  ;;  %v11187_v17 = vld [vmem:[%s12529_s16 + $0x6e0] ss:$16 sps:$4 sm:$0xff]  }
 0x304   : > { %6308 = vmatpush1.bf16.msra.mxu0 %v11151_v35  ;;  %6472 = vmatpush1.bf16.msra.mxu1 %v11154_v0  ;;  %v3715_v35 = vunpack.c.h.b16 %v3126_v47  ;;  %v11175_v0 = vld [vmem:[%s12529_s16 + $0x6a0] ss:$16 sps:$4 sm:$0xff]   ;;  %v4839_v61 = vrot.slane %v3714_v59, %v12694_v19  ;;  %v14004_v48 = vpack.c.bf16 %v13932_v42, %v13934_v5  ;;  %v3610_v42 = vunpack.c.l.b16 %v13265_v6 }
 0x305   : > { %6309 = vmatprep.subr.bf16.mxu0 %v11159_v63  ;;  %6473 = vmatprep.subr.bf16.mxu1 %v11162_v33  ;;  %v11633_v33 = vld [vmem:[%s12517_s13 + $0xf8] sm:$0xff]  ;;  %v3611_v5 = vunpack.c.h.b16 %v13265_v6 }
 0x306   : > { %2385 = vmax.xlane.f32.xlu1 %v2384_v57  ;;  %2382 = vmax.xlane.f32.xlu0 %v2381_v21  ;;  %v3716_v57 = vunpack.c.l.b16 %v3127_v10  ;;  %v4843_v2 = vrot.slane %v3715_v35, %v12702_v25  ;;  %v3720_v6 = vunpack.c.l.b16 %v14004_v48 }
 0x307   : > { %v13944_v4 = vpop.xlane.xlu1 %2253  ;;  %v13946_v52 = vpop.xlane.xlu0 %2250 }
 0x308   : > { %6310 = vmatpush1.bf16.msra.mxu0 %v11157_v28  ;;  %6474 = vmatpush1.bf16.msra.mxu1 %v11160_v30  ;;  %v2390_v28 = vsel %vm1576_vm0, %v11633_v33, -inf  ;;  %v11634_v30 = vld [vmem:[%s12517_s13 + $0xf0] sm:$0xff]  ;;  %v14028_v59 = vpack.c.bf16 %v13944_v4, %v13946_v52  ;;  %v4326_v4 = vrot.slane %v3610_v42, %v12694_v19  ;;  %v4330_v52 = vrot.slane %v3611_v5, %v12702_v25  ;;  %v11641_v5 = vld [vmem:[%s12517_s13 + $0x188] sm:$0xff] }
 0x309   : > { %6311 = vmatprep.subr.bf16.mxu0 %v11165_v40  ;;  %6475 = vmatprep.subr.bf16.mxu1 %v11168_v18  ;;  %v2387_v36 = vsel %vm1576_vm0, %v11634_v30, -inf  ;;  %v11181_v40 = vld [vmem:[%s12529_s16 + $0x6c0] ss:$16 sps:$4 sm:$0xff]   ;;  %v11184_v18 = vld [vmem:[%s12529_s16 + $0x6c8] ss:$16 sps:$4 sm:$0xff]  }
 0x30a   : > { %2745 = vmax.xlane.f32.xlu1 %v2744_v58  ;;  %2742 = vmax.xlane.f32.xlu0 %v2741_v12  ;;  %v11183_v58 = vld [vmem:[%s12529_s16 + $0x6c4] ss:$16 sps:$4 sm:$0xff]   ;;  %v3717_v12 = vunpack.c.h.b16 %v3127_v10  ;;  %v4844_v10 = vsel %vm3749_vm1, %v4843_v2, %v4839_v61  ;;  %v11638_v33 = vld [vmem:[%s12517_s13 + $0x70] sm:$0xff]  ;;  %v11193_v61 = vld [vmem:[%s12529_s16 + $0x700] ss:$16 sps:$4 sm:$0xff]  }
 0x30b   : > { %v13956_v50 = vpop.xlane.xlu1 %2277  ;;  %v13958_v60 = vpop.xlane.xlu0 %2274  ;;  %v11195_v30 = vld [vmem:[%s12529_s16 + $0x704] ss:$16 sps:$4 sm:$0xff]   ;;  %v11196_v2 = vld [vmem:[%s12529_s16 + $0x708] ss:$16 sps:$4 sm:$0xff]  }
 0x30c   : > { %6312 = vmatpush1.bf16.msra.mxu0 %v11163_v39  ;;  %6476 = vmatpush1.bf16.msra.mxu1 %v11166_v44  ;;  %v4848_v39 = vrot.slane %v3716_v57, %v12699_v23  ;;  %v3718_v44 = vunpack.c.l.b16 %v13986_v46  ;;  %v4853_v3 = vrot.slane %v3717_v12, %v12705_v27  ;;  %v3134_v35 = vpack.c.bf16 %v13956_v50, %v13958_v60  ;;  %v11637_v57 = vld [vmem:[%s12517_s13 + $0x78] sm:$0xff] }
 0x30d   : > { %6313 = vmatprep.subr.bf16.mxu0 %v11171_v49  ;;  %6477 = vmatprep.subr.bf16.mxu1 %v11174_v51  ;;  %v11636_v51 = vld [vmem:[%s12517_s13 + $0x4b0] sm:$0xff] }
 0x30e   : > { %2337 = vmax.xlane.f32.xlu1 %v2336_v31  ;;  %2334 = vmax.xlane.f32.xlu0 %v2333_v43  ;;  %v11635_v43 = vld [vmem:[%s12517_s13 + $0x4b8] sm:$0xff]  ;;  %v2747_v47 = vsel %vm1576_vm0, %v11636_v51, -inf }
 0x30f   : > { %v13972_v24 = vpop.xlane.xlu1 %1923  ;;  %v13974_v16 = vpop.xlane.xlu0 %1920  ;;  %v2750_v49 = vsel %vm1576_vm0, %v11635_v43, -inf }
 0x310   : > { %6314 = vmatpush1.bf16.msra.mxu0 %v11169_v1  ;;  %6478 = vmatpush1.bf16.msra.mxu1 %v11172_v9  ;;  %v11189_v1 = vld [vmem:[%s12529_s16 + $0x6e4] ss:$16 sps:$4 sm:$0xff]   ;;  %v11192_v9 = vld [vmem:[%s12529_s16 + $0x6ec] ss:$16 sps:$4 sm:$0xff]   ;;  %v14042_v50 = vpack.c.bf16 %v13972_v24, %v13974_v16  ;;  %v4868_v24 = vrot.slane %v3720_v6, %v12730_v53  ;;  %v11202_v6 = vld [vmem:[%s12529_s16 + $0x728] ss:$16 sps:$4 sm:$0xff]  }
 0x311   : > { %6315 = vmatprep.subr.bf16.mxu0 %v11177_v56  ;;  %6479 = vmatprep.subr.bf16.mxu1 %v11180_v29  ;;  %v4849_v56 = vsel %vm3756_vm2, %v4848_v39, %v4844_v10  ;;  %v4858_v29 = vrot.slane %v3718_v44, %v12712_v37  ;;  %v11639_v16 = vld [vmem:[%s12517_s13 + $0x438] sm:$0xff]  ;;  %v3731_v39 = vunpack.c.h.b16 %v3134_v35  ;;  %v2444_v10 = vsel %vm1576_vm0, %v11641_v5, -inf }
 0x312   : > { %2697 = vmax.xlane.f32.xlu1 %v2696_v14  ;;  %2694 = vmax.xlane.f32.xlu0 %v2693_v20  ;;  %v3719_v14 = vunpack.c.h.b16 %v13986_v46  ;;  %v11190_v20 = vld [vmem:[%s12529_s16 + $0x6e8] ss:$16 sps:$4 sm:$0xff]   ;;  %v2342_v46 = vsel %vm1576_vm0, %v11637_v57, -inf  ;;  %v4854_v60 = vsel %vm3763_vm3, %v4853_v3, %v4849_v56  ;;  %v11213_v5 = vld [vmem:[%s12529_s16 + $0x764] ss:$16 sps:$4 sm:$0xff]  }
 0x313   : > { %v13988_v21 = vpop.xlane.xlu1 %2283  ;;  %v2281_v63 = vpop.xlane.xlu0 %2280  ;;  %v4859_v12 = vsel %vm3770_vm4, %v4858_v29, %v4854_v60  ;;  %v11199_v29 = vld [vmem:[%s12529_s16 + $0x720] ss:$16 sps:$4 sm:$0xff]  }
 0x314   : > { %6316 = vmatpush1.bf16.msra.mxu0 %v11175_v0  ;;  %6480 = vmatpush1.bf16.msra.mxu1 %v11178_v38 }
 0x315   : > { %6317 = vmatprep.subr.bf16.mxu0 %v11183_v58  ;;  %6481 = vmatprep.subr.bf16.mxu1 %v11186_v26  ;;  %v4863_v58 = vrot.slane %v3719_v14, %v12721_v45  ;;  %v14047_v26 = vpack.c.bf16 %v13988_v21, %v2281_v63  ;;  %v2702_v21 = vsel %vm1576_vm0, %v11639_v16, -inf  ;;  %v3722_v63 = vunpack.c.l.b16 %v14028_v59 }
 0x316   : > { %2391 = vmax.xlane.f32.xlu1 %v2390_v28  ;;  %2388 = vmax.xlane.f32.xlu0 %v2387_v36  ;;  %v2339_v28 = vsel %vm1576_vm0, %v11638_v33, -inf  ;;  %v11198_v36 = vld [vmem:[%s12529_s16 + $0x70c] ss:$16 sps:$4 sm:$0xff]   ;;  %v3613_v33 = vunpack.c.h.b16 %v14042_v50 }
 0x317   : > { %v14006_v31 = vpop.xlane.xlu1 %2259  ;;  %v14008_v32 = vpop.xlane.xlu0 %2256  ;;  %v4864_v3 = vsel %vm3777_vm5, %v4863_v58, %v4859_v12  ;;  %v3732_v14 = vunpack.c.l.b16 %v14047_v26  ;;  %v11643_v58 = vld [vmem:[%s12517_s13 + $0x548] sm:$0xff]  ;;  %v11644_v12 = vld [vmem:[%s12517_s13 + $0x540] sm:$0xff] }
 0x318   : > { %6318 = vmatpush1.bf16.msra.mxu0 %v11181_v40  ;;  %6482 = vmatpush1.bf16.msra.mxu1 %v11184_v18  ;;  %v3721_v40 = vunpack.c.h.b16 %v14004_v48  ;;  %v3730_v18 = vunpack.c.l.b16 %v3134_v35  ;;  %v11201_v48 = vld [vmem:[%s12529_s16 + $0x724] ss:$16 sps:$4 sm:$0xff]   ;;  %v4869_v35 = vsel %vm15723_vm6, %v4868_v24, %v4864_v3  ;;  %v11216_v3 = vld [vmem:[%s12529_s16 + $0x76c] ss:$16 sps:$4 sm:$0xff]  }
 0x319   : > { %6319 = vmatprep.subr.bf16.mxu0 %v11189_v1  ;;  %6483 = vmatprep.subr.bf16.mxu1 %v11192_v9  ;;  %v4331_v1 = vsel %vm3749_vm1, %v4330_v52, %v4326_v4  ;;  %v3612_v9 = vunpack.c.l.b16 %v14042_v50  ;;  %v3733_v52 = vunpack.c.h.b16 %v14047_v26  ;;  %v4927_v50 = vrot.slane %v3732_v14, %v12699_v23  ;;  %v11645_v24 = vld [vmem:[%s12517_s13 + $0x108] sm:$0xff]  ;;  %v11208_v26 = vld [vmem:[%s12529_s16 + $0x748] ss:$16 sps:$4 sm:$0xff]  }
 0x31a   : > { %2751 = vmax.xlane.f32.xlu1 %v2750_v49  ;;  %2748 = vmax.xlane.f32.xlu0 %v2747_v47  ;;  %v11640_v49 = vld [vmem:[%s12517_s13 + $0x430] sm:$0xff]  ;;  %v14099_v16 = vsel %vm1576_vm0, %v11645_v24, -inf }
 0x31b   : > { %v1930_v0 = vpop.xlane.xlu1 %1929  ;;  %v1927_v38 = vpop.xlane.xlu0 %1926  ;;  %v2699_v51 = vsel %vm1576_vm0, %v11640_v49, -inf  ;;  %v11204_v47 = vld [vmem:[%s12529_s16 + $0x72c] ss:$16 sps:$4 sm:$0xff]   ;;  %v4335_v4 = vrot.slane %v3612_v9, %v12699_v23 }
 0x31c   : > { %6320 = vmatpush1.bf16.msra.mxu0 %v11187_v17  ;;  %6484 = vmatpush1.bf16.msra.mxu1 %v11190_v20  ;;  %v14063_v42 = vpack.c.bf16 %v1930_v0, %v1927_v38  ;;  %v14071_v17 = vpack.c.bf16 %v14006_v31, %v14008_v32  ;;  %v11642_v20 = vld [vmem:[%s12517_s13 + $0x180] sm:$0xff]  ;;  %v4873_v0 = vrot.slane %v3721_v40, %v12737_v62  ;;  %v3723_v38 = vunpack.c.h.b16 %v14028_v59  ;;  %v11207_v59 = vld [vmem:[%s12529_s16 + $0x744] ss:$16 sps:$4 sm:$0xff]  }
 0x31d   : > { %6321 = vmatprep.subr.bf16.mxu0 %v11195_v30  ;;  %6485 = vmatprep.subr.bf16.mxu1 %v11198_v36  ;;  %v2441_v56 = vsel %vm1576_vm0, %v11642_v20, -inf  ;;  %v4878_v31 = vrot.slane %v3722_v63, %v12745_v8  ;;  %v4918_v32 = vrot.slane %v3730_v18, %v12694_v19  ;;  %v11210_v36 = vld [vmem:[%s12529_s16 + $0x74c] ss:$16 sps:$4 sm:$0xff]   ;;  %v2801_v40 = vsel %vm1576_vm0, %v11644_v12, -inf }
 0x31e   : > { %2343 = vmax.xlane.f32.xlu1 %v2342_v46  ;;  %2340 = vmax.xlane.f32.xlu0 %v2339_v28  ;;  %v4922_v46 = vrot.slane %v3731_v39, %v12702_v25  ;;  %v3614_v60 = vunpack.c.l.b16 %v14063_v42  ;;  %v4874_v63 = vsel %vm15743_vm7, %v4873_v0, %v4869_v35  ;;  %v4883_v18 = vrot.slane %v3723_v38, %v12750_v13  ;;  %v11211_v0 = vld [vmem:[%s12529_s16 + $0x760] ss:$16 sps:$4 sm:$0xff]   ;;  %v11214_v38 = vld [vmem:[%s12529_s16 + $0x768] ss:$16 sps:$4 sm:$0xff]  }
 0x31f   : > { %v2290_v44 = vpop.xlane.xlu1 %2289  ;;  %v2287_v43 = vpop.xlane.xlu0 %2286  ;;  %v4336_v14 = vsel %vm3756_vm2, %v4335_v4, %v4331_v1  ;;  %v11219_v4 = vld [vmem:[%s12519_s15 + $0x4] ss:$16 sps:$4 sm:$0xff]   ;;  %vm15744_vm7 = vcmask 720512  }
 0x320   : > { %6322 = vmatpush1.bf16.msra.mxu0 %v11193_v61  ;;  %6486 = vmatpush1.bf16.msra.mxu1 %v11196_v2  ;;  %v14080_v57 = vpack.c.bf16 %v2290_v44, %v2287_v43  ;;  %v2804_v61 = vsel %vm1576_vm0, %v11643_v58, -inf  ;;  %v3724_v2 = vunpack.c.l.b16 %v14071_v17  ;;  %v4879_v43 = vsel %vm3798_vm8, %v4878_v31, %v4874_v63 }
 0x321   : > { %6323 = vmatprep.subr.bf16.mxu0 %v11201_v48  ;;  %6487 = vmatprep.subr.bf16.mxu1 %v11204_v47  ;;  %v4923_v49 = vsel %vm3749_vm1, %v4922_v46, %v4918_v32  ;;  %v3615_v48 = vunpack.c.h.b16 %v14063_v42  ;;  %v4345_v20 = vrot.slane %v3614_v60, %v12712_v37  ;;  %v3725_v42 = vunpack.c.h.b16 %v14071_v17  ;;  %v11646_v46 = vld [vmem:[%s12517_s13 + $0x100] sm:$0xff] }
 0x322   : > { %2703 = vmax.xlane.f32.xlu1 %v2702_v21  ;;  %2700 = vmax.xlane.f32.xlu0 %v2699_v51  ;;  %v11205_v21 = vld [vmem:[%s12529_s16 + $0x740] ss:$16 sps:$4 sm:$0xff]   ;;  %v3734_v39 = vunpack.c.l.b16 %v14080_v57  ;;  %v4340_v51 = vrot.slane %v3613_v33, %v12705_v27  ;;  %v3735_v35 = vunpack.c.h.b16 %v14080_v57  ;;  %v2393_v17 = vsel %vm1576_vm0, %v11646_v46, -inf }
 0x323   : > { %v2266_v28 = vpop.xlane.xlu1 %2265  ;;  %v2263_v30 = vpop.xlane.xlu0 %2262  ;;  %v4884_v33 = vsel %vm15717_vm9, %v4883_v18, %v4879_v43  ;;  %v4893_v12 = vrot.slane %v3725_v42, %v12771_v41  ;;  %vm15720_vm9 = vcmask 523264  }
 0x324   : > { %6324 = vmatpush1.bf16.msra.mxu0 %v11199_v29  ;;  %6488 = vmatpush1.bf16.msra.mxu1 %v11202_v6  ;;  %v14106_v44 = vpack.c.bf16 %v2266_v28, %v2263_v30  ;;  %v4928_v29 = vsel %vm3756_vm2, %v4927_v50, %v4923_v49  ;;  %v4888_v6 = vrot.slane %v3724_v2, %v12764_v34 }
 0x325   : > { %6325 = vmatprep.subr.bf16.mxu0 %v11207_v59  ;;  %6489 = vmatprep.subr.bf16.mxu1 %v11210_v36  ;;  %v4937_v1 = vrot.slane %v3734_v39, %v12712_v37  ;;  %v4341_v57 = vsel %vm3763_vm3, %v4340_v51, %v4336_v14  ;;  %v4350_v28 = vrot.slane %v3615_v48, %v12721_v45  ;;  %v11647_v48 = vld [vmem:[%s12517_s13 + $0x198] sm:$0xff] }
 0x326   : > { %2445 = vmax.xlane.f32.xlu1 %v2444_v10  ;;  %2442 = vmax.xlane.f32.xlu0 %v2441_v56  ;;  %v4932_v10 = vrot.slane %v3733_v52, %v12705_v27  ;;  %v3726_v31 = vunpack.c.l.b16 %v14106_v44  ;;  %v11222_v52 = vld [vmem:[%s12519_s15 + $0xc] ss:$16 sps:$4 sm:$0xff]   ;;  %v4346_v58 = vsel %vm3770_vm4, %v4345_v20, %v4341_v57  ;;  %v4889_v2 = vsel %vm15744_vm7, %v4888_v6, %v4884_v33 }
 0x327   : > { %v1936_v47 = vpop.xlane.xlu1 %1935  ;;  %v1933_v9 = vpop.xlane.xlu0 %1932  ;;  %v3727_v24 = vunpack.c.h.b16 %v14106_v44  ;;  %v4351_v39 = vsel %vm3777_vm5, %v4350_v28, %v4346_v58  ;;  %v2450_v44 = vsel %vm1576_vm0, %v11647_v48, -inf  ;;  %vm15745_vm7 = vcmask 523712   ;;  %v11653_v48 = vld [vmem:[%s12517_s13 + $0x118] sm:$0xff] }
 0x328   : > { %v3077_v56 = vpack.c.bf16 %v1936_v47, %v1933_v9  ;;  %6326 = vmatpush1.bf16.msra.mxu0 %v11205_v21  ;;  %6490 = vmatpush1.bf16.msra.mxu1 %v11208_v26  ;;  %v4933_v60 = vsel %vm3763_vm3, %v4932_v10, %v4928_v29  ;;  %v4898_v26 = vrot.slane %v3726_v31, %v12780_v54  ;;  %v11648_v47 = vld [vmem:[%s12517_s13 + $0x190] sm:$0xff]  ;;  %v11649_v29 = vld [vmem:[%s12517_s13 + $0x4c8] sm:$0xff] }
 0x329   : > { %6327 = vmatprep.subr.bf16.mxu0 %v11213_v5  ;;  %6491 = vmatprep.subr.bf16.mxu1 %v11216_v3  ;;  %v4938_v21 = vsel %vm3770_vm4, %v4937_v1, %v4933_v60  ;;  %v2447_v9 = vsel %vm1576_vm0, %v11648_v47, -inf  ;;  %v4894_v10 = vsel %vm15716_vm11, %v4893_v12, %v4889_v2  ;;  %v2756_v42 = vsel %vm1576_vm0, %v11649_v29, -inf  ;;  %vm15746_vm11 = vmmov %vm15745_vm7  ;;  %v11652_v2 = vld [vmem:[%s12517_s13 + $0x550] sm:$0xff] }
 0x32a   : > { %v3616_v32 = vunpack.c.l.b16 %v3077_v56  ;;  %2805 = vmax.xlane.f32.xlu1 %v2804_v61  ;;  %2802 = vmax.xlane.f32.xlu0 %v2801_v40  ;;  %v3617_v30 = vunpack.c.h.b16 %v3077_v56  ;;  %v4942_v40 = vrot.slane %v3735_v35, %v12721_v45  ;;  %v4903_v56 = vrot.slane %v3727_v24, %v12783_v55  ;;  %v11654_v47 = vld [vmem:[%s12517_s13 + $0x110] sm:$0xff] }
 0x32b   : > { %v2296_v59 = vpop.xlane.xlu1 %2295  ;;  %v2293_v36 = vpop.xlane.xlu0 %2292  ;;  %v4899_v6 = vsel %vm3826_vm12, %v4898_v26, %v4894_v10  ;;  %v2807_v12 = vsel %vm1576_vm0, %v11652_v2, -inf  ;;  %v11217_v26 = vld [vmem:[%s12519_s15] ss:$16 sps:$4 sm:$0xff]   ;;  %v11231_v10 = vld [vmem:[%s12519_s15 + $0x44] ss:$16 sps:$4 sm:$0xff]  }
 0x32c   : > { %v4355_v61 = vrot.slane %v3616_v32, %v12730_v53  ;;  %v3137_v50 = vpack.c.bf16 %v2296_v59, %v2293_v36  ;;  %6328 = vmatpush1.bf16.msra.mxu0 %v11211_v0  ;;  %6492 = vmatpush1.bf16.msra.mxu1 %v11214_v38  ;;  %v4360_v43 = vrot.slane %v3617_v30, %v12737_v62  ;;  %v11650_v32 = vld [vmem:[%s12517_s13 + $0x4c0] sm:$0xff] }
 0x32d   : > { %9665 = vmatprep.subr.bf16.mxu0 %v11219_v4  ;;  %9829 = vmatprep.subr.bf16.mxu1 %v11222_v52  ;;  %v4943_v20 = vsel %vm3777_vm5, %v4942_v40, %v4938_v21  ;;  %v2753_v46 = vsel %vm1576_vm0, %v11650_v32, -inf  ;;  %v4904_v36 = vsel %vm3833_vm13, %v4903_v56, %v4899_v6 }
 0x32e   : > { %v3736_v63 = vunpack.c.l.b16 %v3137_v50  ;;  %v3737_v18 = vunpack.c.h.b16 %v3137_v50  ;;  %2397 = vmax.xlane.f32.xlu1 %v14099_v16  ;;  %2394 = vmax.xlane.f32.xlu0 %v2393_v17  ;;  %v4356_v5 = vsel %vm15723_vm6, %v4355_v61, %v4351_v39  ;;  %v11651_v61 = vld [vmem:[%s12517_s13 + $0x558] sm:$0xff]  ;;  %v11225_v39 = vld [vmem:[%s12519_s15 + $0x24] ss:$16 sps:$4 sm:$0xff]  }
 0x32f   : > { %v2272_v49 = vpop.xlane.xlu1 %2271  ;;  %v2269_v51 = vpop.xlane.xlu0 %2268  ;;  %v4361_v17 = vsel %vm15745_vm7, %v4360_v43, %v4356_v5  ;;  %v2810_v50 = vsel %vm1576_vm0, %v11651_v61, -inf  ;;  %v11228_v43 = vld [vmem:[%s12519_s15 + $0x2c] ss:$16 sps:$4 sm:$0xff]   ;;  %v11223_v5 = vld [vmem:[%s12519_s15 + $0x20] ss:$16 sps:$4 sm:$0xff]  }
 0x330   : > { %v4947_v16 = vrot.slane %v3736_v63, %v12730_v53  ;;  %v4952_v3 = vrot.slane %v3737_v18, %v12737_v62  ;;  %v3133_v14 = vpack.c.bf16 %v2272_v49, %v2269_v51  ;;  %v11220_v63 = vld [vmem:[%s12519_s15 + $0x8] ss:$16 sps:$4 sm:$0xff]  }
 0x332   : > { %v4948_v35 = vsel %vm15723_vm6, %v4947_v16, %v4943_v20  ;;  %v3728_v0 = vunpack.c.l.b16 %v3133_v14  ;;  %v3729_v38 = vunpack.c.h.b16 %v3133_v14  ;;  %2451 = vmax.xlane.f32.xlu1 %v2450_v44  ;;  %2448 = vmax.xlane.f32.xlu0 %v2447_v9  ;;  %v2402_v44 = vsel %vm1576_vm0, %v11653_v48, -inf  ;;  %v11226_v16 = vld [vmem:[%s12519_s15 + $0x28] ss:$16 sps:$4 sm:$0xff]   ;;  %v11234_v20 = vld [vmem:[%s12519_s15 + $0x4c] ss:$16 sps:$4 sm:$0xff]  }
 0x333   : > { %v2350_v1 = vpop.xlane.xlu1 %2349  ;;  %v2347_v31 = vpop.xlane.xlu0 %2346  ;;  %v4953_v33 = vsel %vm15746_vm11, %v4952_v3, %v4948_v35  ;;  %v11656_v35 = vld [vmem:[%s12517_s13 + $0x4d0] sm:$0xff]  ;;  %vm15747_vm11 = vmmov %vm15745_vm7 }
 0x334   : > { %v4908_v57 = vrot.slane %v3728_v0, %v12794_v7  ;;  %v4913_v28 = vrot.slane %v3729_v38, %v12801_v15  ;;  %v6543_v30 = vpack.c.bf16 %v2350_v1, %v2347_v31  ;;  %v4962_v59 = vsel %vm4954_vm10, %v4953_v33, %v4361_v17  ;;  %v11229_v1 = vld [vmem:[%s12519_s15 + $0x40] ss:$16 sps:$4 sm:$0xff]   ;;  %v11232_v31 = vld [vmem:[%s12519_s15 + $0x48] ss:$16 sps:$4 sm:$0xff]   ;;  %v11237_v17 = vld [vmem:[%s12519_s15 + $0x64] ss:$16 sps:$4 sm:$0xff]  }
 0x335   : > { %v4970_v4 = vpack.c.b16 %v4962_v59, %v4962_v59  ;;  %v2759_v0 = vsel %vm1576_vm0, %v11656_v35, -inf  ;;  %v11240_v33 = vld [vmem:[%s12519_s15 + $0x6c] ss:$16 sps:$4 sm:$0xff]  }
 0x336   : > { %v4909_v52 = vsel %vm3840_vm14, %v4908_v57, %v4904_v36  ;;  %2757 = vmax.xlane.f32.xlu1 %v2756_v42  ;;  %2754 = vmax.xlane.f32.xlu0 %v2753_v46  ;;  %v7031_v3 = vunpack.c.l.b16 %v6543_v30  ;;  %v7032_v14 = vunpack.c.h.b16 %v6543_v30  ;;  %v11655_v42 = vld [vmem:[%s12517_s13 + $0x4d8] sm:$0xff] }
 0x337   : > { %v2710_v60 = vpop.xlane.xlu1 %2709  ;;  %10498 = vmatprep.mubr.msk.bf16.mxu0 %vm15720_vm9, %v4970_v4  ;;  %10499 = vmatprep.mubr.msk.bf16.mxu1 %vm15720_vm9, %v4970_v4  ;;  %v2707_v58 = vpop.xlane.xlu0 %2706  ;;  %v4914_v40 = vsel %vm3847_vm15, %v4913_v28, %v4909_v52  ;;  %v2762_v6 = vsel %vm1576_vm0, %v11655_v42, -inf  ;;  %v11657_v52 = vld [vmem:[%s12517_s13 + $0x1a8] sm:$0xff]  ;;  %vm15748_vm9 = vmmov %vm15745_vm7 }
 0x338   : > { %v14174_v24 = vpack.c.bf16 %v2710_v60, %v2707_v58  ;;  %v4961_v21 = vsel %vm4954_vm10, %v4914_v40, %v13273_v22  ;;  %v2399_v22 = vsel %vm1576_vm0, %v11654_v47, -inf  ;;  %v7337_v32 = vrot.slane %v7031_v3, %v12694_v19  ;;  %v11658_v58 = vld [vmem:[%s12517_s13 + $0x1a0] sm:$0xff] }
 0x339   : > { %v4969_v18 = vpack.c.b16 %v4961_v21, %v4961_v21  ;;  %v7341_v46 = vrot.slane %v7032_v14, %v12702_v25  ;;  %v2456_v60 = vsel %vm1576_vm0, %v11657_v52, -inf  ;;  %v2453_v61 = vsel %vm1576_vm0, %v11658_v58, -inf  ;;  %v11235_v40 = vld [vmem:[%s12519_s15 + $0x60] ss:$16 sps:$4 sm:$0xff]   ;;  %v11244_v14 = vld [vmem:[%s12519_s15 + $0x88] ss:$16 sps:$4 sm:$0xff]  }
 0x33a   : > { %2811 = vmax.xlane.f32.xlu1 %v2810_v50  ;;  %2808 = vmax.xlane.f32.xlu0 %v2807_v12  ;;  %v7151_v30 = vunpack.c.l.b16 %v14174_v24  ;;  %v7152_v59 = vunpack.c.h.b16 %v14174_v24  ;;  %v11238_v24 = vld [vmem:[%s12519_s15 + $0x68] ss:$16 sps:$4 sm:$0xff]   ;;  %v11241_v3 = vld [vmem:[%s12519_s15 + $0x80] ss:$16 sps:$4 sm:$0xff]   ;;  %v11255_v52 = vld [vmem:[%s12519_s15 + $0xc4] ss:$16 sps:$4 sm:$0xff]  }
 0x33b   : > { %v2302_v49 = vpop.xlane.xlu1 %2301  ;;  %6338 = vmatmul.mubr.bf16.vlgmr.msra.gmra.mrb[0].mxu0 %v4969_v18  ;;  %6502 = vmatmul.mubr.bf16.vlgmr.msra.gmra.mrb[0].mxu1 %v4969_v18  ;;  %v2299_v51 = vpop.xlane.xlu0 %2298  ;;  %v7342_v21 = vsel %vm3749_vm1, %v7341_v46, %v7337_v32  ;;  %v11662_v32 = vld [vmem:[%s12517_s13 + $0x120] sm:$0xff] }
 0x33c   : > { %v14186_v9 = vpack.c.bf16 %v2302_v49, %v2299_v51  ;;  %9666 = vmatpush1.bf16.msra.mxu0 %v11217_v26  ;;  %9830 = vmatpush1.bf16.msra.mxu1 %v11220_v63  ;;  %v11243_v26 = vld [vmem:[%s12519_s15 + $0x84] ss:$16 sps:$4 sm:$0xff]   ;;  %v11246_v63 = vld [vmem:[%s12519_s15 + $0x8c] ss:$16 sps:$4 sm:$0xff]   ;;  %v7929_v49 = vrot.slane %v7151_v30, %v12694_v19  ;;  %v7933_v51 = vrot.slane %v7152_v59, %v12702_v25 }
 0x33d   : > { %9667 = vmatprep.subr.bf16.mxu0 %v11225_v39  ;;  %9831 = vmatprep.subr.bf16.mxu1 %v11228_v43  ;;  %v11659_v39 = vld [vmem:[%s12517_s13 + $0x568] sm:$0xff] }
 0x33e   : > { %2403 = vmax.xlane.f32.xlu1 %v2402_v44  ;;  %2400 = vmax.xlane.f32.xlu0 %v2399_v22  ;;  %v2816_v43 = vsel %vm1576_vm0, %v11659_v39, -inf  ;;  %v11660_v22 = vld [vmem:[%s12517_s13 + $0x560] sm:$0xff]  ;;  %v7934_v35 = vsel %vm3749_vm1, %v7933_v51, %v7929_v49  ;;  %v11256_v51 = vld [vmem:[%s12519_s15 + $0xc8] ss:$16 sps:$4 sm:$0xff]  }
 0x33f   : > { %v2356_v56 = vpop.xlane.xlu1 %2355  ;;  %v2353_v29 = vpop.xlane.xlu0 %2352  ;;  %v11253_v49 = vld [vmem:[%s12519_s15 + $0xc0] ss:$16 sps:$4 sm:$0xff]  }
 0x340   : > { %v6544_v38 = vpack.c.bf16 %v2356_v56, %v2353_v29  ;;  %9668 = vmatpush1.bf16.msra.mxu0 %v11223_v5  ;;  %9832 = vmatpush1.bf16.msra.mxu1 %v11226_v16  ;;  %v2813_v5 = vsel %vm1576_vm0, %v11660_v22, -inf  ;;  %v11249_v56 = vld [vmem:[%s12519_s15 + $0xa4] ss:$16 sps:$4 sm:$0xff]   ;;  %v11252_v29 = vld [vmem:[%s12519_s15 + $0xac] ss:$16 sps:$4 sm:$0xff]  }
 0x341   : > { %9669 = vmatprep.subr.bf16.mxu0 %v11231_v10  ;;  %9833 = vmatprep.subr.bf16.mxu1 %v11234_v20  ;;  %v7015_v10 = vunpack.c.l.b16 %v14186_v9  ;;  %v7016_v20 = vunpack.c.h.b16 %v14186_v9  ;;  %v2405_v9 = vsel %vm1576_vm0, %v11662_v32, -inf  ;;  %v11259_v32 = vld [vmem:[%s12519_s15 + $0xe0] ss:$16 sps:$4 sm:$0xff]  }
 0x342   : > { %v7033_v57 = vunpack.c.l.b16 %v6544_v38  ;;  %v7034_v28 = vunpack.c.h.b16 %v6544_v38  ;;  %2763 = vmax.xlane.f32.xlu1 %v2762_v6  ;;  %2760 = vmax.xlane.f32.xlu0 %v2759_v0 }
 0x343   : > { %v2662_v36 = vpop.xlane.xlu1 %2661  ;;  %v2659_v4 = vpop.xlane.xlu0 %2658  ;;  %v7258_v30 = vrot.slane %v7015_v10, %v12694_v19  ;;  %v7262_v59 = vrot.slane %v7016_v20, %v12702_v25 }
 0x344   : > { %v7346_v50 = vrot.slane %v7033_v57, %v12699_v23  ;;  %v7351_v2 = vrot.slane %v7034_v28, %v12705_v27  ;;  %v14210_v12 = vpack.c.bf16 %v2662_v36, %v2659_v4  ;;  %9670 = vmatpush1.bf16.msra.mxu0 %v11229_v1  ;;  %9834 = vmatpush1.bf16.msra.mxu1 %v11232_v31  ;;  %v11661_v1 = vld [vmem:[%s12517_s13 + $0x128] sm:$0xff]  ;;  %v11247_v57 = vld [vmem:[%s12519_s15 + $0xa0] ss:$16 sps:$4 sm:$0xff]  }
 0x345   : > { %9671 = vmatprep.subr.bf16.mxu0 %v11237_v17  ;;  %9835 = vmatprep.subr.bf16.mxu1 %v11240_v33  ;;  %v2408_v31 = vsel %vm1576_vm0, %v11661_v1, -inf  ;;  %v11250_v28 = vld [vmem:[%s12519_s15 + $0xa8] ss:$16 sps:$4 sm:$0xff]  }
 0x346   : > { %v7347_v18 = vsel %vm3756_vm2, %v7346_v50, %v7342_v21  ;;  %2457 = vmax.xlane.f32.xlu1 %v2456_v60  ;;  %2454 = vmax.xlane.f32.xlu0 %v2453_v61  ;;  %v7135_v36 = vunpack.c.l.b16 %v14210_v12  ;;  %v7136_v4 = vunpack.c.h.b16 %v14210_v12  ;;  %v11258_v60 = vld [vmem:[%s12519_s15 + $0xcc] ss:$16 sps:$4 sm:$0xff]  }
 0x347   : > { %v14223_v48 = vsel %vm3763_vm3, %v7351_v2, %v7347_v18  ;;  %v2716_v44 = vpop.xlane.xlu1 %2715  ;;  %v2713_v47 = vpop.xlane.xlu0 %2712  ;;  %v11663_v21 = vld [vmem:[%s12517_s13 + $0x4e8] sm:$0xff] }
 0x348   : > { %v6604_v16 = vpack.c.bf16 %v2716_v44, %v2713_v47  ;;  %9672 = vmatpush1.bf16.msra.mxu0 %v11235_v40  ;;  %9836 = vmatpush1.bf16.msra.mxu1 %v11238_v24  ;;  %v2768_v12 = vsel %vm1576_vm0, %v11663_v21, -inf  ;;  %v7263_v44 = vsel %vm3749_vm1, %v7262_v59, %v7258_v30  ;;  %v7850_v47 = vrot.slane %v7135_v36, %v12694_v19  ;;  %v11265_v21 = vld [vmem:[%s12519_s15 + $0x100] ss:$16 sps:$4 sm:$0xff]  }
 0x349   : > { %9673 = vmatprep.subr.bf16.mxu0 %v11243_v26  ;;  %9837 = vmatprep.subr.bf16.mxu1 %v11246_v63  ;;  %v11664_v26 = vld [vmem:[%s12517_s13 + $0x4e0] sm:$0xff]  ;;  %v7854_v22 = vrot.slane %v7136_v4, %v12702_v25 }
 0x34a   : > { %v7153_v42 = vunpack.c.l.b16 %v6604_v16  ;;  %v7154_v6 = vunpack.c.h.b16 %v6604_v16  ;;  %2817 = vmax.xlane.f32.xlu1 %v2816_v43  ;;  %2814 = vmax.xlane.f32.xlu0 %v2813_v5  ;;  %v2765_v63 = vsel %vm1576_vm0, %v11664_v26, -inf  ;;  %v11261_v5 = vld [vmem:[%s12519_s15 + $0xe4] ss:$16 sps:$4 sm:$0xff]   ;;  %v11264_v16 = vld [vmem:[%s12519_s15 + $0xec] ss:$16 sps:$4 sm:$0xff]  }
 0x34b   : > { %v2308_v0 = vpop.xlane.xlu1 %2307  ;;  %v2305_v38 = vpop.xlane.xlu0 %2304  ;;  %v11273_v26 = vld [vmem:[%s12519_s15 + $0x124] ss:$16 sps:$4 sm:$0xff]  }
 0x34c   : > { %v7938_v46 = vrot.slane %v7153_v42, %v12699_v23  ;;  %v7943_v17 = vrot.slane %v7154_v6, %v12705_v27  ;;  %v6536_v33 = vpack.c.bf16 %v2308_v0, %v2305_v38  ;;  %9674 = vmatpush1.bf16.msra.mxu0 %v11241_v3  ;;  %9838 = vmatpush1.bf16.msra.mxu1 %v11244_v14  ;;  %v11665_v42 = vld [vmem:[%s12517_s13 + $0x1b8] sm:$0xff] }
 0x34d   : > { %9675 = vmatprep.subr.bf16.mxu0 %v11249_v56  ;;  %9839 = vmatprep.subr.bf16.mxu1 %v11252_v29  ;;  %v2462_v6 = vsel %vm1576_vm0, %v11665_v42, -inf  ;;  %v11282_v42 = vld [vmem:[%s12519_s15 + $0x14c] ss:$16 sps:$4 sm:$0xff]  }
 0x34e   : > { %v7939_v58 = vsel %vm3756_vm2, %v7938_v46, %v7934_v35  ;;  %v7017_v61 = vunpack.c.l.b16 %v6536_v33  ;;  %v7018_v50 = vunpack.c.h.b16 %v6536_v33  ;;  %2409 = vmax.xlane.f32.xlu1 %v2408_v31  ;;  %2406 = vmax.xlane.f32.xlu0 %v2405_v9  ;;  %v11666_v35 = vld [vmem:[%s12517_s13 + $0x1b0] sm:$0xff]  ;;  %v11262_v9 = vld [vmem:[%s12519_s15 + $0xe8] ss:$16 sps:$4 sm:$0xff]   ;;  %v7855_v46 = vsel %vm3749_vm1, %v7854_v22, %v7850_v47  ;;  %v11270_v33 = vld [vmem:[%s12519_s15 + $0x10c] ss:$16 sps:$4 sm:$0xff]  }
 0x34f   : > { %v14250_v2 = vsel %vm3763_vm3, %v7943_v17, %v7939_v58  ;;  %v2668_v40 = vpop.xlane.xlu1 %2667  ;;  %v2665_v24 = vpop.xlane.xlu0 %2664  ;;  %v2459_v0 = vsel %vm1576_vm0, %v11666_v35, -inf  ;;  %v11267_v17 = vld [vmem:[%s12519_s15 + $0x104] ss:$16 sps:$4 sm:$0xff]   ;;  %v11669_v47 = vld [vmem:[%s12517_s13 + $0x138] sm:$0xff] }
 0x350   : > { %v7267_v18 = vrot.slane %v7017_v61, %v12699_v23  ;;  %v7272_v39 = vrot.slane %v7018_v50, %v12705_v27  ;;  %v6596_v43 = vpack.c.bf16 %v2668_v40, %v2665_v24  ;;  %9676 = vmatpush1.bf16.msra.mxu0 %v11247_v57  ;;  %9840 = vmatpush1.bf16.msra.mxu1 %v11250_v28  ;;  %v11668_v58 = vld [vmem:[%s12517_s13 + $0x570] sm:$0xff]  ;;  %v2414_v22 = vsel %vm1576_vm0, %v11669_v47, -inf }
 0x351   : > { %9677 = vmatprep.subr.bf16.mxu0 %v11255_v52  ;;  %9841 = vmatprep.subr.bf16.mxu1 %v11258_v60  ;;  %v11667_v52 = vld [vmem:[%s12517_s13 + $0x578] sm:$0xff]  ;;  %v2819_v61 = vsel %vm1576_vm0, %v11668_v58, -inf }
 0x352   : > { %v7268_v3 = vsel %vm3756_vm2, %v7267_v18, %v7263_v44  ;;  %v7137_v14 = vunpack.c.l.b16 %v6596_v43  ;;  %v7138_v10 = vunpack.c.h.b16 %v6596_v43  ;;  %2769 = vmax.xlane.f32.xlu1 %v2768_v12  ;;  %2766 = vmax.xlane.f32.xlu0 %v2765_v63  ;;  %v2822_v60 = vsel %vm1576_vm0, %v11667_v52, -inf  ;;  %v11268_v12 = vld [vmem:[%s12519_s15 + $0x108] ss:$16 sps:$4 sm:$0xff]   ;;  %v11276_v63 = vld [vmem:[%s12519_s15 + $0x12c] ss:$16 sps:$4 sm:$0xff]  }
 0x353   : > { %v14267_v20 = vsel %vm3763_vm3, %v7272_v39, %v7268_v3  ;;  %v2362_v56 = vpop.xlane.xlu1 %2361  ;;  %v2359_v29 = vpop.xlane.xlu0 %2358 }
 0x354   : > { %v7859_v38 = vrot.slane %v7137_v14, %v12699_v23  ;;  %v7864_v1 = vrot.slane %v7138_v10, %v12705_v27  ;;  %v6545_v31 = vpack.c.bf16 %v2362_v56, %v2359_v29  ;;  %9678 = vmatpush1.bf16.msra.mxu0 %v11253_v49  ;;  %9842 = vmatpush1.bf16.msra.mxu1 %v11256_v51  ;;  %v11271_v10 = vld [vmem:[%s12519_s15 + $0x120] ss:$16 sps:$4 sm:$0xff]   ;;  %v11274_v56 = vld [vmem:[%s12519_s15 + $0x128] ss:$16 sps:$4 sm:$0xff]   ;;  %v11279_v29 = vld [vmem:[%s12519_s15 + $0x144] ss:$16 sps:$4 sm:$0xff]  }
 0x355   : > { %9679 = vmatprep.subr.bf16.mxu0 %v11261_v5  ;;  %9843 = vmatprep.subr.bf16.mxu1 %v11264_v16  ;;  %v11670_v5 = vld [vmem:[%s12517_s13 + $0x130] sm:$0xff] }
 0x356   : > { %v7860_v57 = vsel %vm3756_vm2, %v7859_v38, %v7855_v46  ;;  %v7035_v28 = vunpack.c.l.b16 %v6545_v31  ;;  %v7036_v30 = vunpack.c.h.b16 %v6545_v31  ;;  %2463 = vmax.xlane.f32.xlu1 %v2462_v6  ;;  %2460 = vmax.xlane.f32.xlu0 %v2459_v0  ;;  %v2411_v16 = vsel %vm1576_vm0, %v11670_v5, -inf  ;;  %v11672_v46 = vld [vmem:[%s12517_s13 + $0x4f0] sm:$0xff] }
 0x357   : > { %v14282_v59 = vsel %vm3763_vm3, %v7864_v1, %v7860_v57  ;;  %v2722_v36 = vpop.xlane.xlu1 %2721  ;;  %v2719_v4 = vpop.xlane.xlu0 %2718 }
 0x358   : > { %v7356_v50 = vrot.slane %v7035_v28, %v12712_v37  ;;  %v7361_v40 = vrot.slane %v7036_v30, %v12721_v45  ;;  %v6605_v24 = vpack.c.bf16 %v2722_v36, %v2719_v4  ;;  %9680 = vmatpush1.bf16.msra.mxu0 %v11259_v32  ;;  %9844 = vmatpush1.bf16.msra.mxu1 %v11262_v9  ;;  %v11671_v32 = vld [vmem:[%s12517_s13 + $0x4f8] sm:$0xff]  ;;  %v11277_v28 = vld [vmem:[%s12519_s15 + $0x140] ss:$16 sps:$4 sm:$0xff]   ;;  %v11285_v36 = vld [vmem:[%s12519_s15 + $0x164] ss:$16 sps:$4 sm:$0xff]  }
 0x359   : > { %9681 = vmatprep.subr.bf16.mxu0 %v11267_v17  ;;  %9845 = vmatprep.subr.bf16.mxu1 %v11270_v33  ;;  %v2774_v9 = vsel %vm1576_vm0, %v11671_v32, -inf  ;;  %v2771_v17 = vsel %vm1576_vm0, %v11672_v46, -inf  ;;  %v11280_v30 = vld [vmem:[%s12519_s15 + $0x148] ss:$16 sps:$4 sm:$0xff]   ;;  %v11288_v4 = vld [vmem:[%s12519_s15 + $0x16c] ss:$16 sps:$4 sm:$0xff]  }
 0x35a   : > { %v7357_v18 = vsel %vm3770_vm4, %v7356_v50, %v14223_v48  ;;  %v7155_v39 = vunpack.c.l.b16 %v6605_v24  ;;  %v7156_v43 = vunpack.c.h.b16 %v6605_v24  ;;  %2823 = vmax.xlane.f32.xlu1 %v2822_v60  ;;  %2820 = vmax.xlane.f32.xlu0 %v2819_v61  ;;  %v11673_v24 = vld [vmem:[%s12517_s13 + $0x1c8] sm:$0xff]  ;;  %v11295_v32 = vld [vmem:[%s12519_s15 + $0x1a0] ss:$16 sps:$4 sm:$0xff]   ;;  %v11303_v46 = vld [vmem:[%s12519_s15 + $0x1c4] ss:$16 sps:$4 sm:$0xff]  }
 0x35b   : > { %v14297_v49 = vsel %vm3777_vm5, %v7361_v40, %v7357_v18  ;;  %v2314_v51 = vpop.xlane.xlu1 %2313  ;;  %v2311_v44 = vpop.xlane.xlu0 %2310  ;;  %v11283_v18 = vld [vmem:[%s12519_s15 + $0x160] ss:$16 sps:$4 sm:$0xff]  }
 0x35c   : > { %v7948_v48 = vrot.slane %v7155_v39, %v12712_v37  ;;  %v7953_v3 = vrot.slane %v7156_v43, %v12721_v45  ;;  %v6537_v14 = vpack.c.bf16 %v2314_v51, %v2311_v44  ;;  %9682 = vmatpush1.bf16.msra.mxu0 %v11265_v21  ;;  %9846 = vmatpush1.bf16.msra.mxu1 %v11268_v12  ;;  %v2468_v21 = vsel %vm1576_vm0, %v11673_v24, -inf  ;;  %v11674_v12 = vld [vmem:[%s12517_s13 + $0x1c0] sm:$0xff]  ;;  %v11286_v39 = vld [vmem:[%s12519_s15 + $0x168] ss:$16 sps:$4 sm:$0xff]   ;;  %v11294_v51 = vld [vmem:[%s12519_s15 + $0x18c] ss:$16 sps:$4 sm:$0xff]  }
 0x35d   : > { %9683 = vmatprep.subr.bf16.mxu0 %v11273_v26  ;;  %9847 = vmatprep.subr.bf16.mxu1 %v11276_v63  ;;  %v11291_v43 = vld [vmem:[%s12519_s15 + $0x184] ss:$16 sps:$4 sm:$0xff]  }
 0x35e   : > { %v7949_v6 = vsel %vm3770_vm4, %v7948_v48, %v14250_v2  ;;  %v7019_v35 = vunpack.c.l.b16 %v6537_v14  ;;  %v7020_v0 = vunpack.c.h.b16 %v6537_v14  ;;  %2415 = vmax.xlane.f32.xlu1 %v2414_v22  ;;  %2412 = vmax.xlane.f32.xlu0 %v2411_v16  ;;  %v11675_v16 = vld [vmem:[%s12517_s13 + $0x588] sm:$0xff] }
 0x35f   : > { %v14312_v38 = vsel %vm3777_vm5, %v7953_v3, %v7949_v6  ;;  %v2674_v1 = vpop.xlane.xlu1 %2673  ;;  %v2671_v31 = vpop.xlane.xlu0 %2670  ;;  %v2828_v48 = vsel %vm1576_vm0, %v11675_v16, -inf  ;;  %v11676_v3 = vld [vmem:[%s12517_s13 + $0x580] sm:$0xff] }
 0x360   : > { %v7277_v2 = vrot.slane %v7019_v35, %v12712_v37  ;;  %v7282_v33 = vrot.slane %v7020_v0, %v12721_v45  ;;  %v6597_v57 = vpack.c.bf16 %v2674_v1, %v2671_v31  ;;  %9684 = vmatpush1.bf16.msra.mxu0 %v11271_v10  ;;  %9848 = vmatpush1.bf16.msra.mxu1 %v11274_v56  ;;  %v2825_v14 = vsel %vm1576_vm0, %v11676_v3, -inf  ;;  %v11292_v10 = vld [vmem:[%s12519_s15 + $0x188] ss:$16 sps:$4 sm:$0xff]   ;;  %v11297_v56 = vld [vmem:[%s12519_s15 + $0x1a4] ss:$16 sps:$4 sm:$0xff]  }
 0x361   : > { %9685 = vmatprep.subr.bf16.mxu0 %v11279_v29  ;;  %9849 = vmatprep.subr.bf16.mxu1 %v11282_v42  ;;  %v11300_v29 = vld [vmem:[%s12519_s15 + $0x1ac] ss:$16 sps:$4 sm:$0xff]   ;;  %v11678_v1 = vld [vmem:[%s12517_s13 + $0x140] sm:$0xff] }
 0x362   : > { %v7278_v52 = vsel %vm3770_vm4, %v7277_v2, %v14267_v20  ;;  %v7139_v60 = vunpack.c.l.b16 %v6597_v57  ;;  %v7140_v58 = vunpack.c.h.b16 %v6597_v57  ;;  %2775 = vmax.xlane.f32.xlu1 %v2774_v9  ;;  %2772 = vmax.xlane.f32.xlu0 %v2771_v17  ;;  %v2465_v20 = vsel %vm1576_vm0, %v11674_v12, -inf  ;;  %v11677_v35 = vld [vmem:[%s12517_s13 + $0x148] sm:$0xff]  ;;  %v11681_v12 = vld [vmem:[%s12517_s13 + $0x1d8] sm:$0xff] }
 0x363   : > { %v14327_v61 = vsel %vm3777_vm5, %v7282_v33, %v7278_v52  ;;  %v14329_v50 = vpop.xlane.xlu1 %2367  ;;  %v14331_v40 = vpop.xlane.xlu0 %2364  ;;  %v2420_v0 = vsel %vm1576_vm0, %v11677_v35, -inf  ;;  %v2417_v31 = vsel %vm1576_vm0, %v11678_v1, -inf  ;;  %v11298_v9 = vld [vmem:[%s12519_s15 + $0x1a8] ss:$16 sps:$4 sm:$0xff]   ;;  %v11306_v17 = vld [vmem:[%s12519_s15 + $0x1cc] ss:$16 sps:$4 sm:$0xff]  }
 0x364   : > { %v7869_v26 = vrot.slane %v7139_v60, %v12712_v37  ;;  %v7874_v63 = vrot.slane %v7140_v58, %v12721_v45  ;;  %9686 = vmatpush1.bf16.msra.mxu0 %v11277_v28  ;;  %9850 = vmatpush1.bf16.msra.mxu1 %v11280_v30  ;;  %v11679_v57 = vld [vmem:[%s12517_s13 + $0x508] sm:$0xff]  ;;  %v11680_v30 = vld [vmem:[%s12517_s13 + $0x500] sm:$0xff] }
 0x365   : > { %9687 = vmatprep.subr.bf16.mxu0 %v11285_v36  ;;  %9851 = vmatprep.subr.bf16.mxu1 %v11288_v4  ;;  %v2780_v28 = vsel %vm1576_vm0, %v11679_v57, -inf  ;;  %v2777_v36 = vsel %vm1576_vm0, %v11680_v30, -inf  ;;  %v11301_v4 = vld [vmem:[%s12519_s15 + $0x1c0] ss:$16 sps:$4 sm:$0xff]   ;;  %v11304_v52 = vld [vmem:[%s12519_s15 + $0x1c8] ss:$16 sps:$4 sm:$0xff]  }
 0x366   : > { %v7870_v44 = vsel %vm3770_vm4, %v7869_v26, %v14282_v59  ;;  %2469 = vmax.xlane.f32.xlu1 %v2468_v21  ;;  %2466 = vmax.xlane.f32.xlu0 %v2465_v20  ;;  %v11289_v59 = vld [vmem:[%s12519_s15 + $0x180] ss:$16 sps:$4 sm:$0xff]   ;;  %v11309_v60 = vld [vmem:[%s12519_s15 + $0x1e4] ss:$16 sps:$4 sm:$0xff]   ;;  %v11312_v58 = vld [vmem:[%s12519_s15 + $0x1ec] ss:$16 sps:$4 sm:$0xff]  }
 0x367   : > { %v14346_v47 = vsel %vm3777_vm5, %v7874_v63, %v7870_v44  ;;  %v14348_v22 = vpop.xlane.xlu1 %2727  ;;  %v14350_v5 = vpop.xlane.xlu0 %2724  ;;  %v2474_v20 = vsel %vm1576_vm0, %v11681_v12, -inf  ;;  %v11682_v26 = vld [vmem:[%s12517_s13 + $0x1d0] sm:$0xff]  ;;  %v11683_v44 = vld [vmem:[%s12517_s13 + $0x598] sm:$0xff] }
 0x368   : > { %9688 = vmatpush1.bf16.msra.mxu0 %v11283_v18  ;;  %9852 = vmatpush1.bf16.msra.mxu1 %v11286_v39  ;;  %v2471_v63 = vsel %vm1576_vm0, %v11682_v26, -inf  ;;  %v11307_v18 = vld [vmem:[%s12519_s15 + $0x1e0] ss:$16 sps:$4 sm:$0xff]   ;;  %v11310_v39 = vld [vmem:[%s12519_s15 + $0x1e8] ss:$16 sps:$4 sm:$0xff]   ;;  %v2834_v16 = vsel %vm1576_vm0, %v11683_v44, -inf  ;;  %v14440_v44 = vpack.c.bf16 %v14348_v22, %v14350_v5 }
 0x369   : > { %9689 = vmatprep.subr.bf16.mxu0 %v11291_v43  ;;  %9853 = vmatprep.subr.bf16.mxu1 %v11294_v51  ;;  %v11318_v1 = vld [vmem:[%s12519_s15 + $0x20c] ss:$16 sps:$4 sm:$0xff]  }
 0x36a   : > { %2829 = vmax.xlane.f32.xlu1 %v2828_v48  ;;  %2826 = vmax.xlane.f32.xlu0 %v2825_v14  ;;  %v11684_v48 = vld [vmem:[%s12517_s13 + $0x590] sm:$0xff] }
 0x36b   : > { %v14360_v42 = vpop.xlane.xlu1 %2319  ;;  %v14362_v6 = vpop.xlane.xlu0 %2316  ;;  %v2831_v3 = vsel %vm1576_vm0, %v11684_v48, -inf }
 0x36c   : > { %9690 = vmatpush1.bf16.msra.mxu0 %v11289_v59  ;;  %9854 = vmatpush1.bf16.msra.mxu1 %v11292_v10  ;;  %v11685_v10 = vld [vmem:[%s12517_s13 + $0x158] sm:$0xff] }
 0x36d   : > { %9691 = vmatprep.subr.bf16.mxu0 %v11297_v56  ;;  %9855 = vmatprep.subr.bf16.mxu1 %v11300_v29  ;;  %v2426_v56 = vsel %vm1576_vm0, %v11685_v10, -inf  ;;  %v11686_v29 = vld [vmem:[%s12517_s13 + $0x150] sm:$0xff]  ;;  %v11693_v10 = vld [vmem:[%s12517_s13 + $0x168] sm:$0xff] }
 0x36e   : > { %2421 = vmax.xlane.f32.xlu1 %v2420_v0  ;;  %2418 = vmax.xlane.f32.xlu0 %v2417_v31  ;;  %v2423_v35 = vsel %vm1576_vm0, %v11686_v29, -inf  ;;  %v11315_v0 = vld [vmem:[%s12519_s15 + $0x204] ss:$16 sps:$4 sm:$0xff]  }
 0x36f   : > { %v14372_v2 = vpop.xlane.xlu1 %2679  ;;  %v14374_v33 = vpop.xlane.xlu0 %2676 }
 0x370   : > { %9692 = vmatpush1.bf16.msra.mxu0 %v11295_v32  ;;  %9856 = vmatpush1.bf16.msra.mxu1 %v11298_v9  ;;  %v11687_v9 = vld [vmem:[%s12517_s13 + $0x518] sm:$0xff] }
 0x371   : > { %9693 = vmatprep.subr.bf16.mxu0 %v11303_v46  ;;  %9857 = vmatprep.subr.bf16.mxu1 %v11306_v17  ;;  %v2786_v46 = vsel %vm1576_vm0, %v11687_v9, -inf  ;;  %v11688_v17 = vld [vmem:[%s12517_s13 + $0x510] sm:$0xff] }
 0x372   : > { %2781 = vmax.xlane.f32.xlu1 %v2780_v28  ;;  %2778 = vmax.xlane.f32.xlu0 %v2777_v36  ;;  %v2783_v57 = vsel %vm1576_vm0, %v11688_v17, -inf  ;;  %v11689_v36 = vld [vmem:[%s12517_s13 + $0x1e8] sm:$0xff] }
 0x373   : > { %v14384_v24 = vpop.xlane.xlu1 %2373  ;;  %v14386_v21 = vpop.xlane.xlu0 %2370 }
 0x374   : > { %9694 = vmatpush1.bf16.msra.mxu0 %v11301_v4  ;;  %9858 = vmatpush1.bf16.msra.mxu1 %v11304_v52  ;;  %v2480_v4 = vsel %vm1576_vm0, %v11689_v36, -inf  ;;  %v11690_v52 = vld [vmem:[%s12517_s13 + $0x1e0] sm:$0xff]  ;;  %v11698_v36 = vld [vmem:[%s12517_s13 + $0x1f0] sm:$0xff] }
 0x375   : > { %9695 = vmatprep.subr.bf16.mxu0 %v11309_v60  ;;  %9859 = vmatprep.subr.bf16.mxu1 %v11312_v58  ;;  %v2477_v60 = vsel %vm1576_vm0, %v11690_v52, -inf  ;;  %v11699_v52 = vld [vmem:[%s12517_s13 + $0x5b8] sm:$0xff] }
 0x376   : > { %2475 = vmax.xlane.f32.xlu1 %v2474_v20  ;;  %2472 = vmax.xlane.f32.xlu0 %v2471_v63  ;;  %v11691_v20 = vld [vmem:[%s12517_s13 + $0x5a8] sm:$0xff]  ;;  %v11692_v63 = vld [vmem:[%s12517_s13 + $0x5a0] sm:$0xff] }
 0x377   : > { %v14394_v43 = vpop.xlane.xlu1 %2733  ;;  %v14396_v51 = vpop.xlane.xlu0 %2730  ;;  %v2840_v26 = vsel %vm1576_vm0, %v11691_v20, -inf  ;;  %v11700_v20 = vld [vmem:[%s12517_s13 + $0x5b0] sm:$0xff] }
 0x378   : > { %9696 = vmatpush1.bf16.msra.mxu0 %v11307_v18  ;;  %9860 = vmatpush1.bf16.msra.mxu1 %v11310_v39  ;;  %v2837_v18 = vsel %vm1576_vm0, %v11692_v63, -inf  ;;  %v6546_v39 = vpack.c.bf16 %v14329_v50, %v14331_v40  ;;  %v2432_v50 = vsel %vm1576_vm0, %v11693_v10, -inf  ;;  %v11694_v40 = vld [vmem:[%s12517_s13 + $0x160] sm:$0xff]  ;;  %v11702_v10 = vld [vmem:[%s12517_s13 + $0x170] sm:$0xff] }
 0x379   : > { %9706 = vmatprep.subr.bf16.mxu0 %v11315_v0  ;;  %9870 = vmatprep.subr.bf16.mxu1 %v11318_v1  ;;  %v2429_v22 = vsel %vm1576_vm0, %v11694_v40, -inf  ;;  %v11697_v1 = vld [vmem:[%s12517_s13 + $0x1f8] sm:$0xff] }
 0x37a   : > { %2835 = vmax.xlane.f32.xlu1 %v2834_v16  ;;  %2832 = vmax.xlane.f32.xlu0 %v2831_v3  ;;  %v14444_v16 = vpack.c.bf16 %v14360_v42, %v14362_v6  ;;  %v7037_v5 = vunpack.c.l.b16 %v6546_v39  ;;  %v7157_v42 = vunpack.c.l.b16 %v14440_v44  ;;  %v2486_v9 = vsel %vm1576_vm0, %v11697_v1, -inf }
 0x37b   : > { %v14402_v14 = vpop.xlane.xlu1 %2325  ;;  %v14404_v59 = vpop.xlane.xlu0 %2322  ;;  %v7038_v63 = vunpack.c.h.b16 %v6546_v39 }
 0x37c   : > { %v7021_v6 = vunpack.c.l.b16 %v14444_v16  ;;  %v7366_v40 = vrot.slane %v7037_v5, %v12730_v53  ;;  %v7958_v39 = vrot.slane %v7157_v42, %v12730_v53 }
 0x37e   : > { %2427 = vmax.xlane.f32.xlu1 %v2426_v56  ;;  %2424 = vmax.xlane.f32.xlu0 %v2423_v35  ;;  %v11695_v56 = vld [vmem:[%s12517_s13 + $0x528] sm:$0xff]  ;;  %v11696_v35 = vld [vmem:[%s12517_s13 + $0x520] sm:$0xff] }
 0x37f   : > { %v14412_v31 = vpop.xlane.xlu1 %2685  ;;  %v14414_v32 = vpop.xlane.xlu0 %2682  ;;  %v2792_v29 = vsel %vm1576_vm0, %v11695_v56, -inf  ;;  %v2789_v0 = vsel %vm1576_vm0, %v11696_v35, -inf  ;;  %v7287_v56 = vrot.slane %v7021_v6, %v12730_v53  ;;  %v11703_v35 = vld [vmem:[%s12517_s13 + $0x538] sm:$0xff]  ;;  %v11705_v6 = vld [vmem:[%s12517_s13 + $0x288] sm:$0xff] }
 0x380   : > { %v14503_v5 = vsel %vm1576_vm0, %v11703_v35, -inf  ;;  %v7367_v35 = vsel %vm15723_vm6, %v7366_v40, %v14297_v49  ;;  %v14543_v49 = vsel %vm1576_vm0, %v11709_v11, -inf }
 0x382   : > { %2787 = vmax.xlane.f32.xlu1 %v2786_v46  ;;  %2784 = vmax.xlane.f32.xlu0 %v2783_v57  ;;  %v14464_v46 = vpack.c.bf16 %v14372_v2, %v14374_v33  ;;  %v14482_v2 = vpack.c.bf16 %v14384_v24, %v14386_v21  ;;  %v11701_v33 = vld [vmem:[%s12517_s13 + $0x178] sm:$0xff]  ;;  %v14497_v24 = vpack.c.bf16 %v14394_v43, %v14396_v51  ;;  %v7022_v21 = vunpack.c.h.b16 %v14444_v16 }
 0x383   : > { %v14420_v28 = vpop.xlane.xlu1 %2379  ;;  %v14422_v30 = vpop.xlane.xlu0 %2376  ;;  %v6539_v43 = vpack.c.bf16 %v14402_v14, %v14404_v59  ;;  %v11708_v14 = vld [vmem:[%s12517_s13 + $0x640] sm:$0xff] }
 0x384   : > { %v7141_v1 = vunpack.c.l.b16 %v14464_v46  ;;  %v14528_v59 = vsel %vm1576_vm0, %v11708_v14, -inf  ;;  %v6599_v14 = vpack.c.bf16 %v14412_v31, %v14414_v32 }
 0x386   : > { %2481 = vmax.xlane.f32.xlu1 %v2480_v4  ;;  %2478 = vmax.xlane.f32.xlu0 %v2477_v60  ;;  %v2483_v4 = vsel %vm1576_vm0, %v11698_v36, -inf  ;;  %v14474_v60 = vsel %vm1576_vm0, %v11699_v52, -inf  ;;  %v7371_v52 = vrot.slane %v7038_v63, %v12737_v62  ;;  %v7159_v63 = vunpack.c.l.b16 %v14497_v24 }
 0x387   : > { %v14428_v58 = vpop.xlane.xlu1 %2739  ;;  %v14430_v12 = vpop.xlane.xlu0 %2736  ;;  %v7879_v40 = vrot.slane %v7141_v1, %v12730_v53  ;;  %v7024_v53 = vunpack.c.h.b16 %v6539_v43 }
 0x388   : > { %v6608_v32 = vpack.c.bf16 %v14428_v58, %v14430_v12  ;;  %v7968_v1 = vrot.slane %v7159_v63, %v12745_v8  ;;  %v7143_v58 = vunpack.c.l.b16 %v6599_v14 }
 0x389   : > { %v7880_v12 = vsel %vm15723_vm6, %v7879_v40, %v14346_v47 }
 0x38a   : > { %2841 = vmax.xlane.f32.xlu1 %v2840_v26  ;;  %2838 = vmax.xlane.f32.xlu0 %v2837_v18  ;;  %v14478_v26 = vsel %vm1576_vm0, %v11700_v20, -inf  ;;  %v14486_v18 = vsel %vm1576_vm0, %v11701_v33, -inf  ;;  %v7039_v20 = vunpack.c.l.b16 %v14482_v2  ;;  %v11707_v33 = vld [vmem:[%s12517_s13 + $0x648] sm:$0xff]  ;;  %v7889_v40 = vrot.slane %v7143_v58, %v12745_v8 }
 0x38b   : > { %v14446_v48 = vpop.xlane.xlu1 %2331  ;;  %v14448_v3 = vpop.xlane.xlu0 %2328 }
 0x38c   : > { %v7376_v31 = vrot.slane %v7039_v20, %v12745_v8  ;;  %v6540_v47 = vpack.c.bf16 %v14446_v48, %v14448_v3 }
 0x38e   : > { %2433 = vmax.xlane.f32.xlu1 %v2432_v50  ;;  %2430 = vmax.xlane.f32.xlu0 %v2429_v22  ;;  %v14490_v50 = vsel %vm1576_vm0, %v11702_v10, -inf  ;;  %v7158_v22 = vunpack.c.h.b16 %v14440_v44  ;;  %v11704_v44 = vld [vmem:[%s12517_s13 + $0x530] sm:$0xff]  ;;  %v14524_v10 = vsel %vm1576_vm0, %v11707_v33, -inf  ;;  %v7292_v33 = vrot.slane %v7022_v21, %v12737_v62 }
 0x38f   : > { %v14466_v17 = vpop.xlane.xlu1 %2691  ;;  %v14468_v57 = vpop.xlane.xlu0 %2688  ;;  %v14507_v42 = vsel %vm1576_vm0, %v11704_v44, -inf  ;;  %v7959_v44 = vsel %vm15723_vm6, %v7958_v39, %v14312_v38  ;;  %v7142_v38 = vunpack.c.h.b16 %v14464_v46  ;;  %v7372_v46 = vsel %vm15747_vm11, %v7371_v52, %v7367_v35 }
 0x390   : > { %vm15750_vm11 = vcmask 654912  }
 0x392   : > { %2793 = vmax.xlane.f32.xlu1 %v2792_v29  ;;  %2790 = vmax.xlane.f32.xlu0 %v2789_v0  ;;  %v14514_v29 = vsel %vm1576_vm0, %v11705_v6, -inf  ;;  %v11706_v0 = vld [vmem:[%s12517_s13 + $0x280] sm:$0xff]  ;;  %v7963_v6 = vrot.slane %v7158_v22, %v12737_v62  ;;  %v7023_v22 = vunpack.c.l.b16 %v6539_v43  ;;  %v7161_v43 = vunpack.c.l.b16 %v6608_v32 }
 0x393   : > { %v2386_v51 = vpop.xlane.xlu1 %2385  ;;  %v2383_v16 = vpop.xlane.xlu0 %2382  ;;  %v14518_v36 = vsel %vm1576_vm0, %v11706_v0, -inf  ;;  %v7288_v0 = vsel %vm15723_vm6, %v7287_v56, %v14327_v61  ;;  %v6548_v61 = vpack.c.bf16 %v14420_v28, %v14422_v30  ;;  %v7040_v56 = vunpack.c.h.b16 %v14482_v2  ;;  %v11711_v28 = vld [vmem:[%s12517_s13 + $0x298] sm:$0xff] }
 0x394   : > { %v14562_v30 = vsel %vm1576_vm0, %v11711_v28, -inf  ;;  %v7964_v2 = vsel %vm15745_vm7, %v7963_v6, %v7959_v44  ;;  %v7293_v20 = vsel %vm15748_vm9, %v7292_v33, %v7288_v0  ;;  %v7297_v52 = vrot.slane %v7023_v22, %v12745_v8  ;;  %vm15749_vm9 = vmmov %vm15745_vm7 }
 0x395   : > { %v7041_v35 = vunpack.c.l.b16 %v6548_v61  ;;  %v7377_v44 = vsel %vm3798_vm8, %v7376_v31, %v7372_v46  ;;  %v7381_v6 = vrot.slane %v7040_v56, %v12750_v13  ;;  %v6549_v0 = vpack.c.bf16 %v2386_v51, %v2383_v16  ;;  %v11712_v46 = vld [vmem:[%s12517_s13 + $0x290] sm:$0xff]  ;;  %vm15751_vm7 = vmmov %vm15750_vm11 }
 0x396   : > { %2487 = vmax.xlane.f32.xlu1 %v2486_v9  ;;  %2484 = vmax.xlane.f32.xlu0 %v2483_v4  ;;  %v11710_v9 = vld [vmem:[%s12517_s13 + $0x200] sm:$0xff]  ;;  %v7160_v4 = vunpack.c.h.b16 %v14497_v24  ;;  %v7884_v24 = vrot.slane %v7142_v38, %v12737_v62  ;;  %v7144_v33 = vunpack.c.h.b16 %v6599_v14  ;;  %v7302_v38 = vrot.slane %v7024_v53, %v12750_v13  ;;  %vm15752_vm6 = vmmov %vm15751_vm7 }
 0x397   : > { %v2746_v39 = vpop.xlane.xlu1 %2745  ;;  %v2743_v21 = vpop.xlane.xlu0 %2742  ;;  %v14555_v11 = vsel %vm1576_vm0, %v11710_v9, -inf  ;;  %v7042_v22 = vunpack.c.h.b16 %v6548_v61  ;;  %v7298_v51 = vsel %vm3798_vm8, %v7297_v52, %v7293_v20  ;;  %v7386_v16 = vrot.slane %v7041_v35, %v12764_v34 }
 0x398   : > { %v6609_v28 = vpack.c.bf16 %v2746_v39, %v2743_v21  ;;  %v7162_v56 = vunpack.c.h.b16 %v6608_v32  ;;  %v14586_v48 = vsel %vm1576_vm0, %v11712_v46, -inf  ;;  %v7885_v53 = vsel %vm15749_vm9, %v7884_v24, %v7880_v12 }
 0x399   : > { %v7382_v3 = vsel %vm15750_vm11, %v7381_v6, %v7377_v44  ;;  %v7978_v61 = vrot.slane %v7161_v43, %v12764_v34  ;;  %v7894_v39 = vrot.slane %v7144_v33, %v12750_v13  ;;  %v7025_v21 = vunpack.c.l.b16 %v6540_v47 }
 0x39a   : > { %2847 = vmax.xlane.f32.xlu1 %v14474_v60  ;;  %2844 = vmax.xlane.f32.xlu0 %v14478_v26  ;;  %v7969_v60 = vsel %vm3798_vm8, %v7968_v1, %v7964_v2  ;;  %v7973_v26 = vrot.slane %v7160_v4, %v12750_v13  ;;  %v6600_v32 = vpack.c.bf16 %v14466_v17, %v14468_v57  ;;  %v7163_v20 = vunpack.c.l.b16 %v6609_v28 }
 0x39b   : > { %v2338_v63 = vpop.xlane.xlu1 %2337  ;;  %v2335_v9 = vpop.xlane.xlu0 %2334  ;;  %v7303_v4 = vsel %vm15752_vm6, %v7302_v38, %v7298_v51  ;;  %v7890_v1 = vsel %vm3798_vm8, %v7889_v40, %v7885_v53  ;;  %v7391_v2 = vrot.slane %v7042_v22, %v12771_v41  ;;  %vm15753_vm9 = vcmask 720512  }
 0x39c   : > { %v7387_v58 = vsel %vm15753_vm9, %v7386_v16, %v7382_v3  ;;  %v7983_v12 = vrot.slane %v7162_v56, %v12771_v41  ;;  %v7044_v24 = vunpack.c.h.b16 %v6549_v0  ;;  %v6541_v52 = vpack.c.bf16 %v2338_v63, %v2335_v9  ;;  %vm15754_vm11 = vmmov %vm15753_vm9 }
 0x39d   : > { %v7026_v57 = vunpack.c.h.b16 %v6540_v47  ;;  %v7988_v38 = vrot.slane %v7163_v20, %v12780_v54 }
 0x39e   : > { %2439 = vmax.xlane.f32.xlu1 %v14486_v18  ;;  %2436 = vmax.xlane.f32.xlu0 %v14490_v50  ;;  %v7043_v18 = vunpack.c.l.b16 %v6549_v0  ;;  %v7974_v50 = vsel %vm15751_vm7, %v7973_v26, %v7969_v60  ;;  %v7895_v60 = vsel %vm15752_vm6, %v7894_v39, %v7890_v1  ;;  %v7145_v26 = vunpack.c.l.b16 %v6600_v32 }
 0x39f   : > { %v2698_v31 = vpop.xlane.xlu1 %2697  ;;  %v2695_v14 = vpop.xlane.xlu0 %2694  ;;  %v7979_v17 = vsel %vm15754_vm11, %v7978_v61, %v7974_v50  ;;  %vm15755_vm7 = vcmask 786112   ;;  %v7401_v47 = vrot.slane %v7044_v24, %v12783_v55  ;;  %v7027_v40 = vunpack.c.l.b16 %v6541_v52 }
 0x3a0   : > { %v7396_v6 = vrot.slane %v7043_v18, %v12780_v54  ;;  %v7392_v33 = vsel %vm15755_vm7, %v7391_v2, %v7387_v58  ;;  %v6601_v0 = vpack.c.bf16 %v2698_v31, %v2695_v14  ;;  %vm15756_vm9 = vmmov %vm15755_vm7 }
 0x3a1   : > { %v7984_v9 = vsel %vm15756_vm9, %v7983_v12, %v7979_v17  ;;  %v7317_v1 = vrot.slane %v7027_v40, %v12780_v54  ;;  %vm15757_vm6 = vmmov %vm15755_vm7 }
 0x3a2   : > { %2799 = vmax.xlane.f32.xlu1 %v14503_v5  ;;  %2796 = vmax.xlane.f32.xlu0 %v14507_v42  ;;  %v7307_v5 = vrot.slane %v7025_v21, %v12764_v34  ;;  %v7164_v42 = vunpack.c.h.b16 %v6609_v28  ;;  %v7312_v28 = vrot.slane %v7026_v57, %v12771_v41  ;;  %v7397_v56 = vsel %vm3826_vm12, %v7396_v6, %v7392_v33  ;;  %vm15758_vm7 = vmmov %vm15754_vm11 }
 0x3a3   : > { %v2392_v35 = vpop.xlane.xlu1 %2391  ;;  %v2389_v44 = vpop.xlane.xlu0 %2388  ;;  %v7989_v3 = vsel %vm3826_vm12, %v7988_v38, %v7984_v9  ;;  %v7147_v61 = vunpack.c.l.b16 %v6601_v0  ;;  %v7402_v39 = vsel %vm3833_vm13, %v7401_v47, %v7397_v56  ;;  %v7028_v21 = vunpack.c.h.b16 %v6541_v52  ;;  %vm15759_vm9 = vmmov %vm15757_vm6 }
 0x3a4   : > { %v6550_v43 = vpack.c.bf16 %v2392_v35, %v2389_v44  ;;  %v7308_v14 = vsel %vm15754_vm11, %v7307_v5, %v7303_v4  ;;  %v7993_v53 = vrot.slane %v7164_v42, %v12783_v55  ;;  %v7148_v52 = vunpack.c.h.b16 %v6601_v0 }
 0x3a5   : > { %v7909_v17 = vrot.slane %v7147_v61, %v12780_v54  ;;  %vm15762_vm11 = vcmask 458112  }
 0x3a6   : > { %v7045_v63 = vunpack.c.l.b16 %v6550_v43  ;;  %2541 = vmax.xlane.f32.xlu1 %v14514_v29  ;;  %2538 = vmax.xlane.f32.xlu0 %v14518_v36  ;;  %v7046_v22 = vunpack.c.h.b16 %v6550_v43  ;;  %v7146_v29 = vunpack.c.h.b16 %v6600_v32  ;;  %v7899_v36 = vrot.slane %v7145_v26, %v12764_v34 }
 0x3a7   : > { %v2752_v51 = vpop.xlane.xlu1 %2751  ;;  %v2749_v16 = vpop.xlane.xlu0 %2748  ;;  %v7994_v35 = vsel %vm3833_vm13, %v7993_v53, %v7989_v3  ;;  %v7322_v43 = vrot.slane %v7028_v21, %v12783_v55  ;;  %v7914_v9 = vrot.slane %v7148_v52, %v12783_v55  ;;  %v11715_v21 = vld [vmem:[%s12517_s13 + $0x658] sm:$0xff] }
 0x3a8   : > { %v7406_v46 = vrot.slane %v7045_v63, %v12794_v7  ;;  %v6610_v31 = vpack.c.bf16 %v2752_v51, %v2749_v16  ;;  %v7411_v32 = vrot.slane %v7046_v22, %v12801_v15  ;;  %v7900_v44 = vsel %vm15758_vm7, %v7899_v36, %v7895_v60  ;;  %v11324_v52 = vld [vmem:[%s12519_s15 + $0x22c] ss:$16 sps:$4 sm:$0xff]  }
 0x3aa   : > { %v7165_v18 = vunpack.c.l.b16 %v6610_v31  ;;  %v7166_v50 = vunpack.c.h.b16 %v6610_v31  ;;  %2901 = vmax.xlane.f32.xlu1 %v14524_v10  ;;  %2898 = vmax.xlane.f32.xlu0 %v14528_v59  ;;  %v7407_v24 = vsel %vm3840_vm14, %v7406_v46, %v7402_v39  ;;  %v7313_v10 = vsel %vm15757_vm6, %v7312_v28, %v7308_v14  ;;  %v11713_v31 = vld [vmem:[%s12517_s13 + $0x5c8] sm:$0xff]  ;;  %vm15763_vm6 = vmmov %vm15762_vm11 }
 0x3ab   : > { %v2344_v4 = vpop.xlane.xlu1 %2343  ;;  %v2341_v2 = vpop.xlane.xlu0 %2340  ;;  %v7904_v59 = vrot.slane %v7146_v29, %v12771_v41  ;;  %v7412_v33 = vsel %vm3847_vm15, %v7411_v32, %v7407_v24  ;;  %v7318_v60 = vsel %vm3826_vm12, %v7317_v1, %v7313_v10  ;;  %v2852_v14 = vsel %vm1576_vm0, %v11713_v31, -inf  ;;  %v11714_v29 = vld [vmem:[%s12517_s13 + $0x5c0] sm:$0xff]  ;;  %v11716_v32 = vld [vmem:[%s12517_s13 + $0x650] sm:$0xff]  ;;  %v11316_v10 = vld [vmem:[%s12519_s15 + $0x208] ss:$16 sps:$4 sm:$0xff]  }
 0x3ac   : > { %v7998_v20 = vrot.slane %v7165_v18, %v12794_v7  ;;  %v8003_v58 = vrot.slane %v7166_v50, %v12801_v15  ;;  %v6542_v12 = vpack.c.bf16 %v2344_v4, %v2341_v2  ;;  %v7323_v16 = vsel %vm3833_vm13, %v7322_v43, %v7318_v60  ;;  %v11313_v24 = vld [vmem:[%s12519_s15 + $0x200] ss:$16 sps:$4 sm:$0xff]   ;;  %v11333_v31 = vld [vmem:[%s12519_s15 + $0x264] ss:$16 sps:$4 sm:$0xff]   ;;  %vm15764_vm7 = vmmov %vm15763_vm6 }
 0x3ad   : > { %v2849_v36 = vsel %vm1576_vm0, %v11714_v29, -inf  ;;  %v2906_v1 = vsel %vm1576_vm0, %v11715_v21, -inf  ;;  %v2903_v4 = vsel %vm1576_vm0, %v11716_v32, -inf  ;;  %v11718_v43 = vld [vmem:[%s12517_s13 + $0x210] sm:$0xff] }
 0x3ae   : > { %v7029_v57 = vunpack.c.l.b16 %v6542_v12  ;;  %2493 = vmax.xlane.f32.xlu1 %v14543_v49  ;;  %2490 = vmax.xlane.f32.xlu0 %v14555_v11  ;;  %v7999_v6 = vsel %vm3840_vm14, %v7998_v20, %v7994_v35  ;;  %v7030_v5 = vunpack.c.h.b16 %v6542_v12  ;;  %v7905_v11 = vsel %vm15759_vm9, %v7904_v59, %v7900_v44  ;;  %v11321_v35 = vld [vmem:[%s12519_s15 + $0x224] ss:$16 sps:$4 sm:$0xff]  }
 0x3af   : > { %v2704_v26 = vpop.xlane.xlu1 %2703  ;;  %v2701_v42 = vpop.xlane.xlu0 %2700  ;;  %v8004_v38 = vsel %vm3847_vm15, %v8003_v58, %v7999_v6  ;;  %v7910_v40 = vsel %vm3826_vm12, %v7909_v17, %v7905_v11  ;;  %vm15765_vm9 = vcmask 523712  }
 0x3b0   : > { %v7327_v0 = vrot.slane %v7029_v57, %v12794_v7  ;;  %v6602_v63 = vpack.c.bf16 %v2704_v26, %v2701_v42  ;;  %v8440_v49 = vsel %vm4954_vm10, %v8004_v38, %v7412_v33  ;;  %v7332_v28 = vrot.slane %v7030_v5, %v12801_v15  ;;  %v11717_v57 = vld [vmem:[%s12517_s13 + $0x218] sm:$0xff]  ;;  %v11319_v42 = vld [vmem:[%s12519_s15 + $0x220] ss:$16 sps:$4 sm:$0xff]  }
 0x3b1   : > { %v8448_v47 = vpack.c.b16 %v8440_v49, %v8440_v49  ;;  %v7915_v61 = vsel %vm3833_vm13, %v7914_v9, %v7910_v40  ;;  %v2498_v6 = vsel %vm1576_vm0, %v11717_v57, -inf  ;;  %v2495_v5 = vsel %vm1576_vm0, %v11718_v43, -inf  ;;  %v11322_v33 = vld [vmem:[%s12519_s15 + $0x228] ss:$16 sps:$4 sm:$0xff]   ;;  %v11720_v40 = vld [vmem:[%s12517_s13 + $0x5d0] sm:$0xff] }
 0x3b2   : > { %v7149_v22 = vunpack.c.l.b16 %v6602_v63  ;;  %v7150_v51 = vunpack.c.h.b16 %v6602_v63  ;;  %2547 = vmax.xlane.f32.xlu1 %v14562_v30  ;;  %2544 = vmax.xlane.f32.xlu0 %v14586_v48  ;;  %v7328_v30 = vsel %vm3840_vm14, %v7327_v0, %v7323_v16  ;;  %v11327_v0 = vld [vmem:[%s12519_s15 + $0x244] ss:$16 sps:$4 sm:$0xff]   ;;  %v11330_v63 = vld [vmem:[%s12519_s15 + $0x24c] ss:$16 sps:$4 sm:$0xff]   ;;  %v11325_v16 = vld [vmem:[%s12519_s15 + $0x240] ss:$16 sps:$4 sm:$0xff]  }
 0x3b3   : > { %v2446_v56 = vpop.xlane.xlu1 %2445  ;;  %9697 = vmatprep.mubr.bf16.mxu0 %v8448_v47  ;;  %9861 = vmatprep.mubr.bf16.mxu1 %v8448_v47  ;;  %v2443_v46 = vpop.xlane.xlu0 %2442  ;;  %v7333_v2 = vsel %vm3847_vm15, %v7332_v28, %v7328_v30  ;;  %v11719_v9 = vld [vmem:[%s12517_s13 + $0x5d8] sm:$0xff] }
 0x3b4   : > { %v7919_v48 = vrot.slane %v7149_v22, %v12794_v7  ;;  %v7924_v53 = vrot.slane %v7150_v51, %v12801_v15  ;;  %v6559_v3 = vpack.c.bf16 %v2446_v56, %v2443_v46  ;;  %v2858_v47 = vsel %vm1576_vm0, %v11719_v9, -inf  ;;  %v11328_v28 = vld [vmem:[%s12519_s15 + $0x248] ss:$16 sps:$4 sm:$0xff]  }
 0x3b5   : > { %v2855_v22 = vsel %vm1576_vm0, %v11720_v40, -inf }
 0x3b6   : > { %v7920_v18 = vsel %vm3840_vm14, %v7919_v48, %v7915_v61  ;;  %2853 = vmax.xlane.f32.xlu1 %v2852_v14  ;;  %2850 = vmax.xlane.f32.xlu0 %v2849_v36  ;;  %v7063_v38 = vunpack.c.l.b16 %v6559_v3  ;;  %v7064_v60 = vunpack.c.h.b16 %v6559_v3  ;;  %v11336_v14 = vld [vmem:[%s12519_s15 + $0x26c] ss:$16 sps:$4 sm:$0xff]  }
 0x3b7   : > { %v2806_v50 = vpop.xlane.xlu1 %2805  ;;  %v2803_v39 = vpop.xlane.xlu0 %2802  ;;  %v7925_v20 = vsel %vm3847_vm15, %v7924_v53, %v7920_v18  ;;  %v11721_v61 = vld [vmem:[%s12517_s13 + $0x2a8] sm:$0xff] }
 0x3b8   : > { %v14663_v58 = vpack.c.bf16 %v2806_v50, %v2803_v39  ;;  %v8439_v12 = vsel %vm4954_vm10, %v7925_v20, %v7333_v2  ;;  %v7495_v56 = vrot.slane %v7063_v38, %v12694_v19  ;;  %v7499_v46 = vrot.slane %v7064_v60, %v12702_v25  ;;  %v11722_v50 = vld [vmem:[%s12517_s13 + $0x2a0] sm:$0xff]  ;;  %v11334_v2 = vld [vmem:[%s12519_s15 + $0x268] ss:$16 sps:$4 sm:$0xff]  }
 0x3b9   : > { %v8447_v59 = vpack.c.b16 %v8439_v12, %v8439_v12  ;;  %v2552_v18 = vsel %vm1576_vm0, %v11721_v61, -inf  ;;  %v2549_v39 = vsel %vm1576_vm0, %v11722_v50, -inf  ;;  %v11342_v12 = vld [vmem:[%s12519_s15 + $0x28c] ss:$16 sps:$4 sm:$0xff]  }
 0x3ba   : > { %2907 = vmax.xlane.f32.xlu1 %v2906_v1  ;;  %2904 = vmax.xlane.f32.xlu0 %v2903_v4  ;;  %v7183_v30 = vunpack.c.l.b16 %v14663_v58  ;;  %v7184_v48 = vunpack.c.h.b16 %v14663_v58  ;;  %v11331_v4 = vld [vmem:[%s12519_s15 + $0x260] ss:$16 sps:$4 sm:$0xff]   ;;  %v7500_v20 = vsel %vm3749_vm1, %v7499_v46, %v7495_v56  ;;  %v11339_v58 = vld [vmem:[%s12519_s15 + $0x284] ss:$16 sps:$4 sm:$0xff]  }
 0x3bb   : > { %v2398_v44 = vpop.xlane.xlu1 %2397  ;;  %9698 = vmatmul.mubr.bf16.vlgmr.msra.gmra.mrb[4].mxu0 %v8447_v59  ;;  %9862 = vmatmul.mubr.bf16.vlgmr.msra.gmra.mrb[4].mxu1 %v8447_v59  ;;  %v2395_v17 = vpop.xlane.xlu0 %2394 }
 0x3bc   : > { %v14674_v26 = vpack.c.bf16 %v2398_v44, %v2395_v17  ;;  %9707 = vmatpush1.bf16.msra.mxu0 %v11313_v24  ;;  %9871 = vmatpush1.bf16.msra.mxu1 %v11316_v10  ;;  %v11723_v10 = vld [vmem:[%s12517_s13 + $0x668] sm:$0xff] }
 0x3bd   : > { %9708 = vmatprep.subr.bf16.mxu0 %v11321_v35  ;;  %9872 = vmatprep.subr.bf16.mxu1 %v11324_v52  ;;  %v2912_v59 = vsel %vm1576_vm0, %v11723_v10, -inf  ;;  %v8087_v35 = vrot.slane %v7183_v30, %v12694_v19  ;;  %v8091_v52 = vrot.slane %v7184_v48, %v12702_v25  ;;  %v11349_v10 = vld [vmem:[%s12519_s15 + $0x2c0] ss:$16 sps:$4 sm:$0xff]  }
 0x3be   : > { %2499 = vmax.xlane.f32.xlu1 %v2498_v6  ;;  %2496 = vmax.xlane.f32.xlu0 %v2495_v5  ;;  %v11724_v6 = vld [vmem:[%s12517_s13 + $0x660] sm:$0xff]  ;;  %v7047_v38 = vunpack.c.l.b16 %v14674_v26  ;;  %v7048_v60 = vunpack.c.h.b16 %v14674_v26 }
 0x3bf   : > { %v2452_v49 = vpop.xlane.xlu1 %2451  ;;  %v2449_v11 = vpop.xlane.xlu0 %2448  ;;  %v2909_v43 = vsel %vm1576_vm0, %v11724_v6, -inf  ;;  %v8092_v9 = vsel %vm3749_vm1, %v8091_v52, %v8087_v35  ;;  %v11360_v6 = vld [vmem:[%s12519_s15 + $0x2ec] ss:$16 sps:$4 sm:$0xff]  }
 0x3c0   : > { %v6560_v51 = vpack.c.bf16 %v2452_v49, %v2449_v11  ;;  %9709 = vmatpush1.bf16.msra.mxu0 %v11319_v42  ;;  %9873 = vmatpush1.bf16.msra.mxu1 %v11322_v33  ;;  %v11337_v42 = vld [vmem:[%s12519_s15 + $0x280] ss:$16 sps:$4 sm:$0xff]   ;;  %v11340_v33 = vld [vmem:[%s12519_s15 + $0x288] ss:$16 sps:$4 sm:$0xff]  }
 0x3c1   : > { %9710 = vmatprep.subr.bf16.mxu0 %v11327_v0  ;;  %9874 = vmatprep.subr.bf16.mxu1 %v11330_v63  ;;  %v11345_v0 = vld [vmem:[%s12519_s15 + $0x2a4] ss:$16 sps:$4 sm:$0xff]   ;;  %v11348_v63 = vld [vmem:[%s12519_s15 + $0x2ac] ss:$16 sps:$4 sm:$0xff]  }
 0x3c2   : > { %v7065_v29 = vunpack.c.l.b16 %v6560_v51  ;;  %v7066_v36 = vunpack.c.h.b16 %v6560_v51  ;;  %2859 = vmax.xlane.f32.xlu1 %v2858_v47  ;;  %2856 = vmax.xlane.f32.xlu0 %v2855_v22  ;;  %v11725_v22 = vld [vmem:[%s12517_s13 + $0x228] sm:$0xff] }
 0x3c3   : > { %v2758_v53 = vpop.xlane.xlu1 %2757  ;;  %v2755_v3 = vpop.xlane.xlu0 %2754  ;;  %v2504_v51 = vsel %vm1576_vm0, %v11725_v22, -inf  ;;  %v11355_v22 = vld [vmem:[%s12519_s15 + $0x2e0] ss:$16 sps:$4 sm:$0xff]  }
 0x3c4   : > { %v7504_v21 = vrot.slane %v7065_v29, %v12699_v23  ;;  %v7509_v1 = vrot.slane %v7066_v36, %v12705_v27  ;;  %v14698_v32 = vpack.c.bf16 %v2758_v53, %v2755_v3  ;;  %9711 = vmatpush1.bf16.msra.mxu0 %v11325_v16  ;;  %9875 = vmatpush1.bf16.msra.mxu1 %v11328_v28  ;;  %v11726_v16 = vld [vmem:[%s12517_s13 + $0x220] sm:$0xff]  ;;  %v11354_v3 = vld [vmem:[%s12519_s15 + $0x2cc] ss:$16 sps:$4 sm:$0xff]  }
 0x3c5   : > { %9712 = vmatprep.subr.bf16.mxu0 %v11333_v31  ;;  %9876 = vmatprep.subr.bf16.mxu1 %v11336_v14  ;;  %v2501_v26 = vsel %vm1576_vm0, %v11726_v16, -inf  ;;  %v11343_v31 = vld [vmem:[%s12519_s15 + $0x2a0] ss:$16 sps:$4 sm:$0xff]   ;;  %v11346_v14 = vld [vmem:[%s12519_s15 + $0x2a8] ss:$16 sps:$4 sm:$0xff]   ;;  %v7416_v29 = vrot.slane %v7047_v38, %v12694_v19  ;;  %v7420_v36 = vrot.slane %v7048_v60, %v12702_v25 }
 0x3c6   : > { %v7505_v24 = vsel %vm3756_vm2, %v7504_v21, %v7500_v20  ;;  %2553 = vmax.xlane.f32.xlu1 %v2552_v18  ;;  %2550 = vmax.xlane.f32.xlu0 %v2549_v39  ;;  %v7167_v30 = vunpack.c.l.b16 %v14698_v32  ;;  %v7168_v48 = vunpack.c.h.b16 %v14698_v32  ;;  %v11351_v53 = vld [vmem:[%s12519_s15 + $0x2c4] ss:$16 sps:$4 sm:$0xff]  }
 0x3c7   : > { %v14711_v44 = vsel %vm3763_vm3, %v7509_v1, %v7505_v24  ;;  %v2812_v17 = vpop.xlane.xlu1 %2811  ;;  %v2809_v57 = vpop.xlane.xlu0 %2808  ;;  %v7421_v35 = vsel %vm3749_vm1, %v7420_v36, %v7416_v29 }
 0x3c8   : > { %v6620_v5 = vpack.c.bf16 %v2812_v17, %v2809_v57  ;;  %9713 = vmatpush1.bf16.msra.mxu0 %v11331_v4  ;;  %9877 = vmatpush1.bf16.msra.mxu1 %v11334_v2  ;;  %v11727_v4 = vld [vmem:[%s12517_s13 + $0x5e8] sm:$0xff]  ;;  %v11728_v2 = vld [vmem:[%s12517_s13 + $0x5e0] sm:$0xff]  ;;  %v8008_v52 = vrot.slane %v7167_v30, %v12694_v19  ;;  %v8012_v17 = vrot.slane %v7168_v48, %v12702_v25  ;;  %v11731_v30 = vld [vmem:[%s12517_s13 + $0x678] sm:$0xff] }
 0x3c9   : > { %9714 = vmatprep.subr.bf16.mxu0 %v11339_v58  ;;  %9878 = vmatprep.subr.bf16.mxu1 %v11342_v12  ;;  %v2864_v32 = vsel %vm1576_vm0, %v11727_v4, -inf  ;;  %v2861_v20 = vsel %vm1576_vm0, %v11728_v2, -inf  ;;  %v11357_v57 = vld [vmem:[%s12519_s15 + $0x2e4] ss:$16 sps:$4 sm:$0xff]   ;;  %v2918_v48 = vsel %vm1576_vm0, %v11731_v30, -inf }
 0x3ca   : > { %v7185_v49 = vunpack.c.l.b16 %v6620_v5  ;;  %v7186_v11 = vunpack.c.h.b16 %v6620_v5  ;;  %2913 = vmax.xlane.f32.xlu1 %v2912_v59  ;;  %2910 = vmax.xlane.f32.xlu0 %v2909_v43  ;;  %v11352_v59 = vld [vmem:[%s12519_s15 + $0x2c8] ss:$16 sps:$4 sm:$0xff]   ;;  %v8013_v16 = vsel %vm3749_vm1, %v8012_v17, %v8008_v52  ;;  %v11369_v4 = vld [vmem:[%s12519_s15 + $0x324] ss:$16 sps:$4 sm:$0xff]  }
 0x3cb   : > { %v2404_v47 = vpop.xlane.xlu1 %2403  ;;  %v2401_v40 = vpop.xlane.xlu0 %2400  ;;  %v11734_v52 = vld [vmem:[%s12517_s13 + $0x230] sm:$0xff] }
 0x3cc   : > { %v8096_v28 = vrot.slane %v7185_v49, %v12699_v23  ;;  %v8101_v56 = vrot.slane %v7186_v11, %v12705_v27  ;;  %v6552_v46 = vpack.c.bf16 %v2404_v47, %v2401_v40  ;;  %9715 = vmatpush1.bf16.msra.mxu0 %v11337_v42  ;;  %9879 = vmatpush1.bf16.msra.mxu1 %v11340_v33  ;;  %v11730_v49 = vld [vmem:[%s12517_s13 + $0x2b0] sm:$0xff]  ;;  %v2507_v17 = vsel %vm1576_vm0, %v11734_v52, -inf }
 0x3cd   : > { %9716 = vmatprep.subr.bf16.mxu0 %v11345_v0  ;;  %9880 = vmatprep.subr.bf16.mxu1 %v11348_v63  ;;  %v11729_v0 = vld [vmem:[%s12517_s13 + $0x2b8] sm:$0xff]  ;;  %v2555_v11 = vsel %vm1576_vm0, %v11730_v49, -inf }
 0x3ce   : > { %v8097_v61 = vsel %vm3756_vm2, %v8096_v28, %v8092_v9  ;;  %v7049_v18 = vunpack.c.l.b16 %v6552_v46  ;;  %v7050_v50 = vunpack.c.h.b16 %v6552_v46  ;;  %2505 = vmax.xlane.f32.xlu1 %v2504_v51  ;;  %2502 = vmax.xlane.f32.xlu0 %v2501_v26  ;;  %v2558_v63 = vsel %vm1576_vm0, %v11729_v0, -inf  ;;  %v11358_v51 = vld [vmem:[%s12519_s15 + $0x2e8] ss:$16 sps:$4 sm:$0xff]   ;;  %v11363_v26 = vld [vmem:[%s12519_s15 + $0x304] ss:$16 sps:$4 sm:$0xff]  }
 0x3cf   : > { %v14738_v39 = vsel %vm3763_vm3, %v8101_v56, %v8097_v61  ;;  %v2764_v21 = vpop.xlane.xlu1 %2763  ;;  %v2761_v1 = vpop.xlane.xlu0 %2760  ;;  %v11366_v28 = vld [vmem:[%s12519_s15 + $0x30c] ss:$16 sps:$4 sm:$0xff]  }
 0x3d0   : > { %v7425_v58 = vrot.slane %v7049_v18, %v12699_v23  ;;  %v7430_v12 = vrot.slane %v7050_v50, %v12705_v27  ;;  %v6612_v24 = vpack.c.bf16 %v2764_v21, %v2761_v1  ;;  %9717 = vmatpush1.bf16.msra.mxu0 %v11343_v31  ;;  %9881 = vmatpush1.bf16.msra.mxu1 %v11346_v14  ;;  %v11361_v21 = vld [vmem:[%s12519_s15 + $0x300] ss:$16 sps:$4 sm:$0xff]   ;;  %v11364_v1 = vld [vmem:[%s12519_s15 + $0x308] ss:$16 sps:$4 sm:$0xff]  }
 0x3d1   : > { %9718 = vmatprep.subr.bf16.mxu0 %v11351_v53  ;;  %9882 = vmatprep.subr.bf16.mxu1 %v11354_v3  ;;  %v11732_v53 = vld [vmem:[%s12517_s13 + $0x670] sm:$0xff] }
 0x3d2   : > { %v7426_v43 = vsel %vm3756_vm2, %v7425_v58, %v7421_v35  ;;  %v7169_v5 = vunpack.c.l.b16 %v6612_v24  ;;  %v7170_v42 = vunpack.c.h.b16 %v6612_v24  ;;  %2865 = vmax.xlane.f32.xlu1 %v2864_v32  ;;  %2862 = vmax.xlane.f32.xlu0 %v2861_v20  ;;  %v2915_v3 = vsel %vm1576_vm0, %v11732_v53, -inf  ;;  %v11372_v32 = vld [vmem:[%s12519_s15 + $0x32c] ss:$16 sps:$4 sm:$0xff]  }
 0x3d3   : > { %v14755_v33 = vsel %vm3763_vm3, %v7430_v12, %v7426_v43  ;;  %v2458_v38 = vpop.xlane.xlu1 %2457  ;;  %v2455_v60 = vpop.xlane.xlu0 %2454  ;;  %v11367_v43 = vld [vmem:[%s12519_s15 + $0x320] ss:$16 sps:$4 sm:$0xff]  }
 0x3d4   : > { %v8017_v9 = vrot.slane %v7169_v5, %v12699_v23  ;;  %v8022_v47 = vrot.slane %v7170_v42, %v12705_v27  ;;  %v6561_v40 = vpack.c.bf16 %v2458_v38, %v2455_v60  ;;  %9719 = vmatpush1.bf16.msra.mxu0 %v11349_v10  ;;  %9883 = vmatpush1.bf16.msra.mxu1 %v11352_v59  ;;  %v11733_v59 = vld [vmem:[%s12517_s13 + $0x238] sm:$0xff]  ;;  %v11375_v42 = vld [vmem:[%s12519_s15 + $0x344] ss:$16 sps:$4 sm:$0xff]  }
 0x3d5   : > { %9720 = vmatprep.subr.bf16.mxu0 %v11357_v57  ;;  %9884 = vmatprep.subr.bf16.mxu1 %v11360_v6  ;;  %v2510_v35 = vsel %vm1576_vm0, %v11733_v59, -inf  ;;  %v11370_v5 = vld [vmem:[%s12519_s15 + $0x328] ss:$16 sps:$4 sm:$0xff]   ;;  %v11378_v38 = vld [vmem:[%s12519_s15 + $0x34c] ss:$16 sps:$4 sm:$0xff]  }
 0x3d6   : > { %v8018_v56 = vsel %vm3756_vm2, %v8017_v9, %v8013_v16  ;;  %v7067_v46 = vunpack.c.l.b16 %v6561_v40  ;;  %v7068_v31 = vunpack.c.h.b16 %v6561_v40  ;;  %2559 = vmax.xlane.f32.xlu1 %v2558_v63  ;;  %2556 = vmax.xlane.f32.xlu0 %v2555_v11 }
 0x3d7   : > { %v14770_v14 = vsel %vm3763_vm3, %v8022_v47, %v8018_v56  ;;  %v2818_v29 = vpop.xlane.xlu1 %2817  ;;  %v2815_v36 = vpop.xlane.xlu0 %2814  ;;  %v11735_v47 = vld [vmem:[%s12517_s13 + $0x5f8] sm:$0xff] }
 0x3d8   : > { %v7514_v61 = vrot.slane %v7067_v46, %v12712_v37  ;;  %v7519_v18 = vrot.slane %v7068_v31, %v12721_v45  ;;  %v6621_v50 = vpack.c.bf16 %v2818_v29, %v2815_v36  ;;  %9721 = vmatpush1.bf16.msra.mxu0 %v11355_v22  ;;  %9885 = vmatpush1.bf16.msra.mxu1 %v11358_v51  ;;  %v2870_v40 = vsel %vm1576_vm0, %v11735_v47, -inf  ;;  %v11736_v22 = vld [vmem:[%s12517_s13 + $0x5f0] sm:$0xff]  ;;  %v11376_v56 = vld [vmem:[%s12519_s15 + $0x348] ss:$16 sps:$4 sm:$0xff]   ;;  %v11384_v31 = vld [vmem:[%s12519_s15 + $0x36c] ss:$16 sps:$4 sm:$0xff]  }
 0x3d9   : > { %9722 = vmatprep.subr.bf16.mxu0 %v11363_v26  ;;  %9886 = vmatprep.subr.bf16.mxu1 %v11366_v28  ;;  %v2867_v51 = vsel %vm1576_vm0, %v11736_v22, -inf  ;;  %v11373_v28 = vld [vmem:[%s12519_s15 + $0x340] ss:$16 sps:$4 sm:$0xff]   ;;  %v11381_v46 = vld [vmem:[%s12519_s15 + $0x364] ss:$16 sps:$4 sm:$0xff]  }
 0x3da   : > { %v7515_v2 = vsel %vm3770_vm4, %v7514_v61, %v14711_v44  ;;  %v7187_v20 = vunpack.c.l.b16 %v6621_v50  ;;  %v7188_v58 = vunpack.c.h.b16 %v6621_v50  ;;  %2919 = vmax.xlane.f32.xlu1 %v2918_v48  ;;  %2916 = vmax.xlane.f32.xlu0 %v2915_v3  ;;  %v11737_v61 = vld [vmem:[%s12517_s13 + $0x2c8] sm:$0xff]  ;;  %v11738_v50 = vld [vmem:[%s12517_s13 + $0x2c0] sm:$0xff] }
 0x3db   : > { %v14785_v12 = vsel %vm3777_vm5, %v7519_v18, %v7515_v2  ;;  %v2410_v24 = vpop.xlane.xlu1 %2409  ;;  %v2407_v10 = vpop.xlane.xlu0 %2406  ;;  %v2564_v18 = vsel %vm1576_vm0, %v11737_v61, -inf  ;;  %v11387_v2 = vld [vmem:[%s12519_s15 + $0x384] ss:$16 sps:$4 sm:$0xff]   ;;  %v11745_v61 = vld [vmem:[%s12517_s13 + $0x2d8] sm:$0xff] }
 0x3dc   : > { %v8106_v44 = vrot.slane %v7187_v20, %v12712_v37  ;;  %v8111_v57 = vrot.slane %v7188_v58, %v12721_v45  ;;  %v6553_v6 = vpack.c.bf16 %v2410_v24, %v2407_v10  ;;  %9723 = vmatpush1.bf16.msra.mxu0 %v11361_v21  ;;  %9887 = vmatpush1.bf16.msra.mxu1 %v11364_v1  ;;  %v11390_v20 = vld [vmem:[%s12519_s15 + $0x38c] ss:$16 sps:$4 sm:$0xff]   ;;  %v11399_v47 = vld [vmem:[%s12519_s15 + $0x3c4] ss:$16 sps:$4 sm:$0xff]  }
 0x3dd   : > { %9724 = vmatprep.subr.bf16.mxu0 %v11369_v4  ;;  %9888 = vmatprep.subr.bf16.mxu1 %v11372_v32  ;;  %v11379_v4 = vld [vmem:[%s12519_s15 + $0x360] ss:$16 sps:$4 sm:$0xff]   ;;  %v11382_v32 = vld [vmem:[%s12519_s15 + $0x368] ss:$16 sps:$4 sm:$0xff]  }
 0x3de   : > { %v8107_v60 = vsel %vm3770_vm4, %v8106_v44, %v14738_v39  ;;  %v7051_v0 = vunpack.c.l.b16 %v6553_v6  ;;  %v7052_v63 = vunpack.c.h.b16 %v6553_v6  ;;  %2511 = vmax.xlane.f32.xlu1 %v2510_v35  ;;  %2508 = vmax.xlane.f32.xlu0 %v2507_v17  ;;  %v11739_v35 = vld [vmem:[%s12517_s13 + $0x688] sm:$0xff]  ;;  %v11740_v17 = vld [vmem:[%s12517_s13 + $0x680] sm:$0xff] }
 0x3df   : > { %v14800_v49 = vsel %vm3777_vm5, %v8111_v57, %v8107_v60  ;;  %v2770_v11 = vpop.xlane.xlu1 %2769  ;;  %v2767_v9 = vpop.xlane.xlu0 %2766  ;;  %v2924_v52 = vsel %vm1576_vm0, %v11739_v35, -inf  ;;  %v2921_v44 = vsel %vm1576_vm0, %v11740_v17, -inf  ;;  %v11388_v57 = vld [vmem:[%s12519_s15 + $0x388] ss:$16 sps:$4 sm:$0xff]   ;;  %v11393_v6 = vld [vmem:[%s12519_s15 + $0x3a4] ss:$16 sps:$4 sm:$0xff]  }
 0x3e0   : > { %v7435_v39 = vrot.slane %v7051_v0, %v12712_v37  ;;  %v7440_v16 = vrot.slane %v7052_v63, %v12721_v45  ;;  %v6613_v26 = vpack.c.bf16 %v2770_v11, %v2767_v9  ;;  %9725 = vmatpush1.bf16.msra.mxu0 %v11367_v43  ;;  %9889 = vmatpush1.bf16.msra.mxu1 %v11370_v5  ;;  %v11396_v43 = vld [vmem:[%s12519_s15 + $0x3ac] ss:$16 sps:$4 sm:$0xff]   ;;  %v11742_v0 = vld [vmem:[%s12517_s13 + $0x240] sm:$0xff]  ;;  %v11394_v9 = vld [vmem:[%s12519_s15 + $0x3a8] ss:$16 sps:$4 sm:$0xff]  }
 0x3e1   : > { %9726 = vmatprep.subr.bf16.mxu0 %v11375_v42  ;;  %9890 = vmatprep.subr.bf16.mxu1 %v11378_v38  ;;  %v11741_v38 = vld [vmem:[%s12517_s13 + $0x248] sm:$0xff]  ;;  %v2513_v63 = vsel %vm1576_vm0, %v11742_v0, -inf  ;;  %v11391_v11 = vld [vmem:[%s12519_s15 + $0x3a0] ss:$16 sps:$4 sm:$0xff]  }
 0x3e2   : > { %v7436_v29 = vsel %vm3770_vm4, %v7435_v39, %v14755_v33  ;;  %v7171_v36 = vunpack.c.l.b16 %v6613_v26  ;;  %v7172_v30 = vunpack.c.h.b16 %v6613_v26  ;;  %2871 = vmax.xlane.f32.xlu1 %v2870_v40  ;;  %2868 = vmax.xlane.f32.xlu0 %v2867_v51  ;;  %v2561_v33 = vsel %vm1576_vm0, %v11738_v50, -inf  ;;  %v11402_v40 = vld [vmem:[%s12519_s15 + $0x3cc] ss:$16 sps:$4 sm:$0xff]   ;;  %v11744_v26 = vld [vmem:[%s12517_s13 + $0x600] sm:$0xff]  ;;  %v11746_v50 = vld [vmem:[%s12517_s13 + $0x2d0] sm:$0xff] }
 0x3e3   : > { %v14815_v48 = vsel %vm3777_vm5, %v7440_v16, %v7436_v29  ;;  %v14817_v53 = vpop.xlane.xlu1 %2463  ;;  %v14819_v3 = vpop.xlane.xlu0 %2460  ;;  %v2516_v60 = vsel %vm1576_vm0, %v11741_v38, -inf  ;;  %v11743_v39 = vld [vmem:[%s12517_s13 + $0x608] sm:$0xff] }
 0x3e4   : > { %v8027_v21 = vrot.slane %v7171_v36, %v12712_v37  ;;  %v8032_v1 = vrot.slane %v7172_v30, %v12721_v45  ;;  %9727 = vmatpush1.bf16.msra.mxu0 %v11373_v28  ;;  %9891 = vmatpush1.bf16.msra.mxu1 %v11376_v56  ;;  %v2876_v16 = vsel %vm1576_vm0, %v11743_v39, -inf  ;;  %v2873_v28 = vsel %vm1576_vm0, %v11744_v26, -inf  ;;  %v11397_v56 = vld [vmem:[%s12519_s15 + $0x3c0] ss:$16 sps:$4 sm:$0xff]   ;;  %v11408_v29 = vld [vmem:[%s12519_s15 + $0x3ec] ss:$16 sps:$4 sm:$0xff]  }
 0x3e5   : > { %9728 = vmatprep.subr.bf16.mxu0 %v11381_v46  ;;  %9892 = vmatprep.subr.bf16.mxu1 %v11384_v31  ;;  %v11400_v46 = vld [vmem:[%s12519_s15 + $0x3c8] ss:$16 sps:$4 sm:$0xff]   ;;  %v11405_v31 = vld [vmem:[%s12519_s15 + $0x3e4] ss:$16 sps:$4 sm:$0xff]   ;;  %v11414_v38 = vld [vmem:[%s12519_s15 + $0x40c] ss:$16 sps:$4 sm:$0xff]  }
 0x3e6   : > { %v8028_v58 = vsel %vm3770_vm4, %v8027_v21, %v14770_v14  ;;  %2565 = vmax.xlane.f32.xlu1 %v2564_v18  ;;  %2562 = vmax.xlane.f32.xlu0 %v2561_v33  ;;  %v11385_v14 = vld [vmem:[%s12519_s15 + $0x380] ss:$16 sps:$4 sm:$0xff]   ;;  %v2570_v18 = vsel %vm1576_vm0, %v11745_v61, -inf  ;;  %v2567_v33 = vsel %vm1576_vm0, %v11746_v50, -inf }
 0x3e7   : > { %v14834_v24 = vsel %vm3777_vm5, %v8032_v1, %v8028_v58  ;;  %v14836_v10 = vpop.xlane.xlu1 %2823  ;;  %v14838_v59 = vpop.xlane.xlu0 %2820  ;;  %v11403_v21 = vld [vmem:[%s12519_s15 + $0x3e0] ss:$16 sps:$4 sm:$0xff]   ;;  %v11406_v1 = vld [vmem:[%s12519_s15 + $0x3e8] ss:$16 sps:$4 sm:$0xff]  }
 0x3e8   : > { %9729 = vmatpush1.bf16.msra.mxu0 %v11379_v4  ;;  %9893 = vmatpush1.bf16.msra.mxu1 %v11382_v32  ;;  %v11748_v58 = vld [vmem:[%s12517_s13 + $0x690] sm:$0xff] }
 0x3e9   : > { %9730 = vmatprep.subr.bf16.mxu0 %v11387_v2  ;;  %9894 = vmatprep.subr.bf16.mxu1 %v11390_v20  ;;  %v11747_v2 = vld [vmem:[%s12517_s13 + $0x698] sm:$0xff]  ;;  %v2927_v35 = vsel %vm1576_vm0, %v11748_v58, -inf }
 0x3ea   : > { %2925 = vmax.xlane.f32.xlu1 %v2924_v52  ;;  %2922 = vmax.xlane.f32.xlu0 %v2921_v44  ;;  %v2930_v20 = vsel %vm1576_vm0, %v11747_v2, -inf  ;;  %v11749_v44 = vld [vmem:[%s12517_s13 + $0x258] sm:$0xff]  ;;  %v14926_v2 = vpack.c.bf16 %v14817_v53, %v14819_v3  ;;  %v11758_v53 = vld [vmem:[%s12517_s13 + $0x260] sm:$0xff] }
 0x3eb   : > { %v14848_v5 = vpop.xlane.xlu1 %2415  ;;  %v14850_v42 = vpop.xlane.xlu0 %2412  ;;  %v2525_v3 = vsel %vm1576_vm0, %v11758_v53, -inf }
 0x3ec   : > { %9731 = vmatpush1.bf16.msra.mxu0 %v11385_v14  ;;  %9895 = vmatpush1.bf16.msra.mxu1 %v11388_v57  ;;  %v2522_v14 = vsel %vm1576_vm0, %v11749_v44, -inf  ;;  %v11750_v57 = vld [vmem:[%s12517_s13 + $0x250] sm:$0xff]  ;;  %v14934_v58 = vpack.c.bf16 %v14848_v5, %v14850_v42  ;;  %v11759_v5 = vld [vmem:[%s12517_s13 + $0x628] sm:$0xff]  ;;  %v7070_v45 = vunpack.c.h.b16 %v14926_v2 }
 0x3ed   : > { %9732 = vmatprep.subr.bf16.mxu0 %v11393_v6  ;;  %9896 = vmatprep.subr.bf16.mxu1 %v11396_v43  ;;  %v2519_v6 = vsel %vm1576_vm0, %v11750_v57, -inf  ;;  %v11411_v43 = vld [vmem:[%s12519_s15 + $0x404] ss:$16 sps:$4 sm:$0xff]   ;;  %v2888_v42 = vsel %vm1576_vm0, %v11759_v5, -inf }
 0x3ee   : > { %2517 = vmax.xlane.f32.xlu1 %v2516_v60  ;;  %2514 = vmax.xlane.f32.xlu0 %v2513_v63  ;;  %v11751_v63 = vld [vmem:[%s12517_s13 + $0x618] sm:$0xff] }
 0x3ef   : > { %v14860_v22 = vpop.xlane.xlu1 %2775  ;;  %v14862_v51 = vpop.xlane.xlu0 %2772 }
 0x3f0   : > { %9733 = vmatpush1.bf16.msra.mxu0 %v11391_v11  ;;  %9897 = vmatpush1.bf16.msra.mxu1 %v11394_v9  ;;  %v2882_v11 = vsel %vm1576_vm0, %v11751_v63, -inf  ;;  %v11752_v9 = vld [vmem:[%s12517_s13 + $0x610] sm:$0xff]  ;;  %v11761_v63 = vld [vmem:[%s12517_s13 + $0x2f8] sm:$0xff]  ;;  %v14984_v5 = vpack.c.bf16 %v14860_v22, %v14862_v51 }
 0x3f1   : > { %9734 = vmatprep.subr.bf16.mxu0 %v11399_v47  ;;  %9898 = vmatprep.subr.bf16.mxu1 %v11402_v40  ;;  %v2879_v47 = vsel %vm1576_vm0, %v11752_v9, -inf }
 0x3f2   : > { %2877 = vmax.xlane.f32.xlu1 %v2876_v16  ;;  %2874 = vmax.xlane.f32.xlu0 %v2873_v28  ;;  %v11753_v16 = vld [vmem:[%s12517_s13 + $0x2e8] sm:$0xff]  ;;  %v11754_v28 = vld [vmem:[%s12517_s13 + $0x2e0] sm:$0xff] }
 0x3f3   : > { %v14872_v36 = vpop.xlane.xlu1 %2469  ;;  %v14874_v30 = vpop.xlane.xlu0 %2466  ;;  %v2576_v26 = vsel %vm1576_vm0, %v11753_v16, -inf }
 0x3f4   : > { %9735 = vmatpush1.bf16.msra.mxu0 %v11397_v56  ;;  %9899 = vmatpush1.bf16.msra.mxu1 %v11400_v46  ;;  %v2573_v56 = vsel %vm1576_vm0, %v11754_v28, -inf  ;;  %v11903_v46 = vmov 1983009808   ;;  %v15000_v22 = vpack.c.bf16 %v14872_v36, %v14874_v30  ;;  %v7054_v36 = vunpack.c.h.b16 %v14934_v58 }
 0x3f5   : > { %9736 = vmatprep.subr.bf16.mxu0 %v11405_v31  ;;  %9900 = vmatprep.subr.bf16.mxu1 %v11408_v29  ;;  %v6517_v31 = vunpack.c.l.s4 %v11903_v46 }
 0x3f6   : > { %2571 = vmax.xlane.f32.xlu1 %v2570_v18  ;;  %2568 = vmax.xlane.f32.xlu0 %v2567_v33  ;;  %v11755_v18 = vld [vmem:[%s12517_s13 + $0x6a8] sm:$0xff]  ;;  %v11756_v33 = vld [vmem:[%s12517_s13 + $0x6a0] sm:$0xff] }
 0x3f7   : > { %v14882_v4 = vpop.xlane.xlu1 %2829  ;;  %v14884_v32 = vpop.xlane.xlu0 %2826  ;;  %v2936_v50 = vsel %vm1576_vm0, %v11755_v18, -inf }
 0x3f8   : > { %9737 = vmatpush1.bf16.msra.mxu0 %v11403_v21  ;;  %9901 = vmatpush1.bf16.msra.mxu1 %v11406_v1  ;;  %v2933_v21 = vsel %vm1576_vm0, %v11756_v33, -inf  ;;  %v6518_v1 = vunpack.c.0.s8 %v6517_v31  ;;  %v11764_v31 = vld [vmem:[%s12517_s13 + $0x6b0] sm:$0xff] }
 0x3f9   : > { %9747 = vmatprep.subr.bf16.mxu0 %v11411_v43  ;;  %9911 = vmatprep.subr.bf16.mxu1 %v11414_v38  ;;  %v11760_v43 = vld [vmem:[%s12517_s13 + $0x620] sm:$0xff]  ;;  %v14965_v18 = vsel %vm1576_vm0, %v11764_v31, -inf }
 0x3fa   : > { %2931 = vmax.xlane.f32.xlu1 %v2930_v20  ;;  %2928 = vmax.xlane.f32.xlu0 %v2927_v35  ;;  %v14930_v20 = vpack.c.bf16 %v14836_v10, %v14838_v59  ;;  %v15760_v10 = vld [vmem:[#allocation8_spill] sm:$0xff]  ;;  %v2885_v38 = vsel %vm1576_vm0, %v11760_v43, -inf }
 0x3fb   : > { %v14890_v52 = vpop.xlane.xlu1 %2421  ;;  %v14892_v17 = vpop.xlane.xlu0 %2418  ;;  %v14945_v59 = vsub.s32 %v6518_v1, %v15760_v10  ;;  %v11765_v1 = vld [vmem:[%s12517_s13 + $0x278] sm:$0xff] }
 0x3fc   : > { %v7189_v9 = vunpack.c.l.b16 %v14930_v20  ;;  %v7190_v27 = vunpack.c.h.b16 %v14930_v20 }
 0x3fe   : > { %2523 = vmax.xlane.f32.xlu1 %v2522_v14  ;;  %2520 = vmax.xlane.f32.xlu0 %v2519_v6  ;;  %v11757_v14 = vld [vmem:[%s12517_s13 + $0x268] sm:$0xff]  ;;  %v7069_v6 = vunpack.c.l.b16 %v14926_v2 }
 0x3ff   : > { %v14900_v60 = vpop.xlane.xlu1 %2781  ;;  %v14902_v0 = vpop.xlane.xlu0 %2778  ;;  %v2528_v57 = vsel %vm1576_vm0, %v11757_v14, -inf  ;;  %v14972_v14 = vsel %vm1576_vm0, %v11765_v1, -inf  ;;  %v11769_v1 = vld [vmem:[%s12517_s13 + $0x308] sm:$0xff] }
 0x402   : > { %2883 = vmax.xlane.f32.xlu1 %v2882_v11  ;;  %2880 = vmax.xlane.f32.xlu0 %v2879_v47  ;;  %v14954_v11 = vsel %vm1576_vm0, %v11761_v63, -inf }
 0x403   : > { %v14908_v40 = vpop.xlane.xlu1 %2475  ;;  %v14910_v39 = vpop.xlane.xlu0 %2472 }
 0x406   : > { %2577 = vmax.xlane.f32.xlu1 %v2576_v26  ;;  %2574 = vmax.xlane.f32.xlu0 %v2573_v56  ;;  %v11762_v26 = vld [vmem:[%s12517_s13 + $0x2f0] sm:$0xff]  ;;  %v11763_v56 = vld [vmem:[%s12517_s13 + $0x6b8] sm:$0xff] }
 0x407   : > { %v14916_v29 = vpop.xlane.xlu1 %2835  ;;  %v14918_v61 = vpop.xlane.xlu0 %2832  ;;  %v2579_v28 = vsel %vm1576_vm0, %v11762_v26, -inf  ;;  %v14961_v46 = vsel %vm1576_vm0, %v11763_v56, -inf  ;;  %v11768_v56 = vld [vmem:[%s12517_s13 + $0x630] sm:$0xff] }
 0x408   : > { %v14990_v31 = vsel %vm1576_vm0, %v11768_v56, -inf }
 0x40a   : > { %2937 = vmax.xlane.f32.xlu1 %v2936_v50  ;;  %2934 = vmax.xlane.f32.xlu0 %v2933_v21  ;;  %v7053_v50 = vunpack.c.l.b16 %v14934_v58 }
 0x40b   : > { %v14936_v35 = vpop.xlane.xlu1 %2427  ;;  %v14938_v44 = vpop.xlane.xlu0 %2424 }
 0x40e   : > { %2529 = vmax.xlane.f32.xlu1 %v2528_v57  ;;  %v6339_v47 = vpop.f32.mrb[0].mxu0  ;;  %v6503_v16 = vpop.f32.mrb[0].mxu1  ;;  %2526 = vmax.xlane.f32.xlu0 %v2525_v3  ;;  %v11766_v57 = vld [vmem:[%s12517_s13 + $0x270] sm:$0xff]  ;;  %v11767_v3 = vld [vmem:[%s12517_s13 + $0x638] sm:$0xff] }
 0x40f   : > { %v14968_v33 = vpop.xlane.xlu1 %2787  ;;  %v6341_v21 = vpop.f32.mrb[1].mxu0  ;;  %v14976_v53 = vsel %vm1576_vm0, %v11766_v57, -inf  ;;  %v14980_v10 = vsel %vm1576_vm0, %v11767_v3, -inf  ;;  %v14994_v57 = vsel %vm1576_vm0, %v11769_v1, -inf  ;;  %v15761_v3 = vld [vmem:[#allocation13_spill] sm:$0xff]  ;;  %v15006_v1 = vpack.c.bf16 %v14882_v4, %v14884_v32 }
 0x410   : > { %v6514_v43 = vcombine.low %v6339_v47, %v6341_v21  ;;  %v6505_v63 = vpop.f32.mrb[1].mxu1  ;;  %v14986_v26 = vpop.xlane.xlu0 %2784  ;;  %v7524_v37 = vrot.slane %v7069_v6, %v15761_v3  ;;  %v8116_v56 = vrot.slane %v7189_v9, %v15761_v3  ;;  %v7445_v30 = vrot.slane %v7053_v50, %v15761_v3  ;;  %v11772_v50 = vld [vmem:[%s12517_s13 + $0x6c0] sm:$0xff] }
 0x411   : > { %v6515_v51 = vcombine.low %v6503_v16, %v6505_v63  ;;  %v6343_v47 = vpop.f32.mrb[2].mxu0  ;;  %v6507_v21 = vpop.f32.mrb[2].mxu1  ;;  %v11770_v16 = vld [vmem:[%s12517_s13 + $0x300] sm:$0xff]  ;;  %v7173_v32 = vunpack.c.l.b16 %v14984_v5  ;;  %v15025_v63 = vsel %vm1576_vm0, %v11772_v50, -inf  ;;  %v7191_v50 = vunpack.c.l.b16 %v15006_v1 }
 0x412   : > { %v6522_v2 = vrot.slane %v6514_v43, %v14945_v59  ;;  %v6344_v6 = vpop.f32.mrb[3].mxu0  ;;  %v6508_v23 = vpop.f32.mrb[3].mxu1  ;;  %2889 = vmax.xlane.f32.xlu1 %v2888_v42  ;;  %2886 = vmax.xlane.f32.xlu0 %v2885_v38  ;;  %v15014_v4 = vsel %vm1576_vm0, %v11770_v16, -inf  ;;  %v6555_v43 = vpack.c.bf16 %v14890_v52, %v14892_v17  ;;  %v11771_v38 = vld [vmem:[%s12517_s13 + $0x6c8] sm:$0xff]  ;;  %v7071_v47 = vunpack.c.l.b16 %v15000_v22 }
 0x413   : > { %v6529_v20 = vrot.slane %v6515_v51, %v14945_v59  ;;  %v2482_v9 = vpop.xlane.xlu1 %2481  ;;  %v3017_v23 = vld [vmem:[#allocation2] sm:$0xff]  ;;  %v15021_v58 = vsel %vm1576_vm0, %v11771_v38, -inf  ;;  %v7529_v51 = vrot.slane %v7070_v45, %v12737_v62  ;;  %v11773_v6 = vld [vmem:[%s12517_s13 + $0x318] sm:$0xff]  ;;  %v7525_v52 = vsel %vm15762_vm11, %v7524_v37, %v14785_v12  ;;  %vm15766_vm11 = vmmov %vm15765_vm9 }
 0x414   : > { %v2479_v42 = vpop.xlane.xlu0 %2478  ;;  %v15031_v16 = vsel %vm1576_vm0, %v11773_v6, -inf  ;;  %v8117_v17 = vsel %vm15763_vm6, %v8116_v56, %v14800_v49  ;;  %v8121_v38 = vrot.slane %v7190_v27, %v12737_v62  ;;  %v7446_v45 = vsel %vm15764_vm7, %v7445_v30, %v14815_v48  ;;  %vm15767_vm6 = vmmov %vm15765_vm9 }
 0x415   : > { %v6530_v21 = vcombine.low %v6522_v2, %v6529_v20  ;;  %v7450_v2 = vrot.slane %v7054_v36, %v12737_v62  ;;  %v6615_v20 = vpack.c.bf16 %v14900_v60, %v14902_v0  ;;  %v7174_v49 = vunpack.c.h.b16 %v14984_v5  ;;  %v11774_v60 = vld [vmem:[%s12517_s13 + $0x310] sm:$0xff] }
 0x416   : > { %2583 = vmax.xlane.f32.xlu1 %v14954_v11  ;;  %2580 = vmax.xlane.f32.xlu0 %v2579_v28  ;;  %v8037_v27 = vrot.slane %v7173_v32, %v15761_v3  ;;  %v7055_v56 = vunpack.c.l.b16 %v6555_v43  ;;  %v6564_v11 = vpack.c.bf16 %v14908_v40, %v14910_v39  ;;  %v7072_v6 = vunpack.c.h.b16 %v15000_v22  ;;  %v11775_v40 = vld [vmem:[%s12517_s13 + $0x6d8] sm:$0xff] }
 0x417   : > { %v6532_v37 = vadd.f32 %v6530_v21, %v3017_v23  ;;  %v2842_v12 = vpop.xlane.xlu1 %2841  ;;  %v7534_v48 = vrot.slane %v7071_v47, %v12745_v8  ;;  %v6624_v36 = vpack.c.bf16 %v14916_v29, %v14918_v61  ;;  %v15055_v0 = vsel %vm1576_vm0, %v11774_v60, -inf  ;;  %v11776_v60 = vld [vmem:[%s12517_s13 + $0x6d0] sm:$0xff] }
 0x418   : > { %v2839_v28 = vpop.xlane.xlu0 %2838  ;;  %v7530_v5 = vsel %vm15765_vm9, %v7529_v51, %v7525_v52  ;;  %v7192_v30 = vunpack.c.h.b16 %v15006_v1  ;;  %v8126_v32 = vrot.slane %v7191_v50, %v12745_v8  ;;  %v15064_v39 = vsel %vm1576_vm0, %v11775_v40, -inf  ;;  %vm15768_vm9 = vmmov %vm15767_vm6 }
 0x419   : > { %6533 = vst [vmem:[#allocation2] sm:$0xff] %v6532_v37  ;;  %v8122_v29 = vsel %vm15766_vm11, %v8121_v38, %v8117_v17  ;;  %v7451_v61 = vsel %vm15767_vm6, %v7450_v2, %v7446_v45  ;;  %v7056_v22 = vunpack.c.h.b16 %v6555_v43  ;;  %v7175_v23 = vunpack.c.l.b16 %v6615_v20 }
 0x41a   : > { %2943 = vmax.xlane.f32.xlu1 %v14961_v46  ;;  %2940 = vmax.xlane.f32.xlu0 %v14965_v18  ;;  %v8038_v1 = vsel %vm15764_vm7, %v8037_v27, %v14834_v24  ;;  %v8042_v51 = vrot.slane %v7174_v49, %v12737_v62  ;;  %v7455_v46 = vrot.slane %v7055_v56, %v12745_v8  ;;  %v7073_v21 = vunpack.c.l.b16 %v6564_v11 }
 0x41b   : > { %v2434_v47 = vpop.xlane.xlu1 %2433  ;;  %v7535_v52 = vsel %vm3798_vm8, %v7534_v48, %v7530_v5  ;;  %v7539_v50 = vrot.slane %v7072_v6, %v12750_v13  ;;  %v7193_v37 = vunpack.c.l.b16 %v6624_v36  ;;  %v6565_v17 = vpack.c.bf16 %v2482_v9, %v2479_v42 }
 0x41c   : > { %v2431_v18 = vpop.xlane.xlu0 %2430  ;;  %v8127_v43 = vsel %vm3798_vm8, %v8126_v32, %v8122_v29  ;;  %v8131_v38 = vrot.slane %v7192_v30, %v12750_v13  ;;  %v7176_v45 = vunpack.c.h.b16 %v6615_v20  ;;  %v6556_v24 = vpack.c.bf16 %v14936_v35, %v14938_v44 }
 0x41d   : > { %v7460_v2 = vrot.slane %v7056_v22, %v12750_v13  ;;  %v8047_v49 = vrot.slane %v7175_v23, %v12745_v8  ;;  %v7074_v27 = vunpack.c.h.b16 %v6564_v11  ;;  %v6625_v56 = vpack.c.bf16 %v2842_v12, %v2839_v28 }
 0x41e   : > { %2535 = vmax.xlane.f32.xlu1 %v14972_v14  ;;  %2532 = vmax.xlane.f32.xlu0 %v14976_v53  ;;  %v7456_v42 = vsel %vm3798_vm8, %v7455_v46, %v7451_v61  ;;  %v7544_v6 = vrot.slane %v7073_v21, %v12764_v34  ;;  %v7194_v48 = vunpack.c.h.b16 %v6624_v36  ;;  %v15086_v35 = vsel %vm1576_vm0, %v11776_v60, -inf }
 0x41f   : > { %v2794_v9 = vpop.xlane.xlu1 %2793  ;;  %v8043_v44 = vsel %vm15768_vm9, %v8042_v51, %v8038_v1  ;;  %vm15769_vm11 = vcmask 654912   ;;  %v8136_v53 = vrot.slane %v7193_v37, %v12764_v34  ;;  %v7075_v5 = vunpack.c.l.b16 %v6565_v17 }
 0x420   : > { %v2791_v20 = vpop.xlane.xlu0 %2790  ;;  %v7540_v14 = vsel %vm15769_vm11, %v7539_v50, %v7535_v52  ;;  %vm15770_vm6 = vmmov %vm15769_vm11  ;;  %v8052_v11 = vrot.slane %v7176_v45, %v12750_v13  ;;  %v7057_v28 = vunpack.c.l.b16 %v6556_v24  ;;  %v6616_v36 = vpack.c.bf16 %v14968_v33, %v14986_v26 }
 0x421   : > { %v8132_v12 = vsel %vm15770_vm6, %v8131_v38, %v8127_v43  ;;  %vm15771_vm7 = vmmov %vm15770_vm6  ;;  %v8048_v32 = vsel %vm3798_vm8, %v8047_v49, %v8043_v44  ;;  %v7549_v40 = vrot.slane %v7074_v27, %v12771_v41  ;;  %v7195_v29 = vunpack.c.l.b16 %v6625_v56 }
 0x422   : > { %2895 = vmax.xlane.f32.xlu1 %v14980_v10  ;;  %2892 = vmax.xlane.f32.xlu0 %v14990_v31  ;;  %v7461_v30 = vsel %vm15771_vm7, %v7460_v2, %v7456_v42  ;;  %vm15772_vm9 = vcmask 720512   ;;  %v8141_v23 = vrot.slane %v7194_v48, %v12771_v41  ;;  %v7076_v1 = vunpack.c.h.b16 %v6565_v17 }
 0x423   : > { %v2488_v61 = vpop.xlane.xlu1 %2487  ;;  %v7545_v22 = vsel %vm15772_vm9, %v7544_v6, %v7540_v14  ;;  %v6557_v51 = vpack.c.bf16 %v2434_v47, %v2431_v18  ;;  %vm15773_vm11 = vmmov %vm15772_vm9  ;;  %v7058_v10 = vunpack.c.h.b16 %v6556_v24  ;;  %v7554_v26 = vrot.slane %v7075_v5, %v12780_v54 }
 0x424   : > { %v2485_v46 = vpop.xlane.xlu0 %2484  ;;  %v8137_v33 = vsel %vm15773_vm11, %v8136_v53, %v8132_v12  ;;  %v8053_v21 = vsel %vm15770_vm6, %v8052_v11, %v8048_v32  ;;  %v7465_v52 = vrot.slane %v7057_v28, %v12764_v34  ;;  %v7177_v50 = vunpack.c.l.b16 %v6616_v36 }
 0x425   : > { %v6566_v31 = vpack.c.bf16 %v2488_v61, %v2485_v46  ;;  %v7196_v37 = vunpack.c.h.b16 %v6625_v56  ;;  %vm15774_vm7 = vcmask 786112   ;;  %v8146_v47 = vrot.slane %v7195_v29, %v12780_v54 }
 0x426   : > { %2589 = vmax.xlane.f32.xlu1 %v14994_v57  ;;  %2586 = vmax.xlane.f32.xlu0 %v15014_v4  ;;  %v7550_v17 = vsel %vm15774_vm7, %v7549_v40, %v7545_v22  ;;  %v6617_v18 = vpack.c.bf16 %v2794_v9, %v2791_v20  ;;  %vm15775_vm9 = vmmov %vm15774_vm7  ;;  %v7559_v24 = vrot.slane %v7076_v1, %v12783_v55  ;;  %v7059_v2 = vunpack.c.l.b16 %v6557_v51 }
 0x427   : > { %v7077_v43 = vunpack.c.l.b16 %v6566_v31  ;;  %v2848_v38 = vpop.xlane.xlu1 %2847  ;;  %v8142_v45 = vsel %vm15775_vm9, %v8141_v23, %v8137_v33  ;;  %v7078_v49 = vunpack.c.h.b16 %v6566_v31  ;;  %v7470_v56 = vrot.slane %v7058_v10, %v12771_v41  ;;  %vm15776_vm6 = vmmov %vm15774_vm7 }
 0x428   : > { %v2845_v27 = vpop.xlane.xlu0 %2844  ;;  %v7555_v57 = vsel %vm3826_vm12, %v7554_v26, %v7550_v17  ;;  %v7466_v6 = vsel %vm15773_vm11, %v7465_v52, %v7461_v30  ;;  %v7178_v48 = vunpack.c.h.b16 %v6616_v36  ;;  %v8057_v9 = vrot.slane %v7177_v50, %v12764_v34  ;;  %vm15777_vm7 = vmmov %vm15773_vm11 }
 0x429   : > { %v7564_v4 = vrot.slane %v7077_v43, %v12794_v7  ;;  %v6626_v42 = vpack.c.bf16 %v2848_v38, %v2845_v27  ;;  %v8151_v20 = vrot.slane %v7196_v37, %v12783_v55  ;;  %v8147_v60 = vsel %vm3826_vm12, %v8146_v47, %v8142_v45  ;;  %vm15778_vm9 = vmmov %vm15776_vm6  ;;  %v11777_v38 = vld [vmem:[%s12517_s13 + $0x328] sm:$0xff] }
 0x42a   : > { %2949 = vmax.xlane.f32.xlu1 %v15021_v58  ;;  %2946 = vmax.xlane.f32.xlu0 %v15025_v63  ;;  %v7179_v44 = vunpack.c.l.b16 %v6617_v18  ;;  %v7560_v12 = vsel %vm3833_vm13, %v7559_v24, %v7555_v57  ;;  %v7060_v11 = vunpack.c.h.b16 %v6557_v51  ;;  %v7475_v28 = vrot.slane %v7059_v2, %v12780_v54 }
 0x42b   : > { %v7197_v14 = vunpack.c.l.b16 %v6626_v42  ;;  %v7198_v53 = vunpack.c.h.b16 %v6626_v42  ;;  %v2440_v5 = vpop.xlane.xlu1 %2439  ;;  %v7569_v36 = vrot.slane %v7078_v49, %v12801_v15  ;;  %v7565_v63 = vsel %vm3840_vm14, %v7564_v4, %v7560_v12 }
 0x42c   : > { %v2437_v30 = vpop.xlane.xlu0 %2436  ;;  %v7471_v29 = vsel %vm15776_vm6, %v7470_v56, %v7466_v6  ;;  %v8062_v61 = vrot.slane %v7178_v48, %v12771_v41  ;;  %v8152_v22 = vsel %vm3833_vm13, %v8151_v20, %v8147_v60  ;;  %v7180_v23 = vunpack.c.h.b16 %v6617_v18  ;;  %v11778_v56 = vld [vmem:[%s12517_s13 + $0x320] sm:$0xff] }
 0x42d   : > { %v8156_v32 = vrot.slane %v7197_v14, %v12794_v7  ;;  %v8161_v58 = vrot.slane %v7198_v53, %v12801_v15  ;;  %v6558_v40 = vpack.c.bf16 %v2440_v5, %v2437_v30  ;;  %v8058_v1 = vsel %vm15777_vm7, %v8057_v9, %v8053_v21  ;;  %v11779_v14 = vld [vmem:[%s12517_s13 + $0x6e8] sm:$0xff]  ;;  %v11780_v5 = vld [vmem:[%s12517_s13 + $0x6e0] sm:$0xff] }
 0x42e   : > { %2595 = vmax.xlane.f32.xlu1 %v15031_v16  ;;  %2592 = vmax.xlane.f32.xlu0 %v15055_v0  ;;  %v8067_v51 = vrot.slane %v7179_v44, %v12780_v54  ;;  %v7480_v26 = vrot.slane %v7060_v11, %v12783_v55  ;;  %v7570_v50 = vsel %vm3847_vm15, %v7569_v36, %v7565_v63  ;;  %v2600_v45 = vsel %vm1576_vm0, %v11777_v38, -inf }
 0x42f   : > { %v7061_v46 = vunpack.c.l.b16 %v6558_v40  ;;  %v2800_v33 = vpop.xlane.xlu1 %2799  ;;  %v8157_v10 = vsel %vm3840_vm14, %v8156_v32, %v8152_v22  ;;  %v7062_v31 = vunpack.c.h.b16 %v6558_v40  ;;  %v7476_v16 = vsel %vm3826_vm12, %v7475_v28, %v7471_v29  ;;  %v11412_v40 = vld [vmem:[%s12519_s15 + $0x408] ss:$16 sps:$4 sm:$0xff]  }
 0x430   : > { %v2797_v52 = vpop.xlane.xlu0 %2796  ;;  %v8162_v37 = vsel %vm3847_vm15, %v8161_v58, %v8157_v10  ;;  %v8063_v47 = vsel %vm15778_vm9, %v8062_v61, %v8058_v1  ;;  %v8072_v18 = vrot.slane %v7180_v23, %v12783_v55  ;;  %v2597_v57 = vsel %vm1576_vm0, %v11778_v56, -inf  ;;  %v11409_v58 = vld [vmem:[%s12519_s15 + $0x400] ss:$16 sps:$4 sm:$0xff]   ;;  %v11781_v61 = vld [vmem:[%s12517_s13 + $0x338] sm:$0xff] }
 0x431   : > { %v7485_v0 = vrot.slane %v7061_v46, %v12794_v7  ;;  %v6618_v21 = vpack.c.bf16 %v2800_v33, %v2797_v52  ;;  %v8442_v17 = vsel %vm4954_vm10, %v8162_v37, %v7570_v50  ;;  %v8068_v24 = vsel %vm3826_vm12, %v8067_v51, %v8063_v47  ;;  %v11782_v23 = vld [vmem:[%s12517_s13 + $0x330] sm:$0xff]  ;;  %v11420_v46 = vld [vmem:[%s12519_s15 + $0x42c] ss:$16 sps:$4 sm:$0xff]  }
 0x432   : > { %2955 = vmax.xlane.f32.xlu1 %v15064_v39  ;;  %2952 = vmax.xlane.f32.xlu0 %v15086_v35  ;;  %v8450_v43 = vpack.c.b16 %v8442_v17, %v8442_v17  ;;  %v7481_v4 = vsel %vm3833_vm13, %v7480_v26, %v7476_v16  ;;  %v7490_v39 = vrot.slane %v7062_v31, %v12801_v15  ;;  %v2960_v53 = vsel %vm1576_vm0, %v11779_v14, -inf  ;;  %v11417_v51 = vld [vmem:[%s12519_s15 + $0x424] ss:$16 sps:$4 sm:$0xff]   ;;  %v11415_v26 = vld [vmem:[%s12519_s15 + $0x420] ss:$16 sps:$4 sm:$0xff]   ;;  %v11783_v16 = vld [vmem:[%s12517_s13 + $0x6f8] sm:$0xff] }
 0x433   : > { %v7181_v2 = vunpack.c.l.b16 %v6618_v21  ;;  %v7182_v49 = vunpack.c.h.b16 %v6618_v21  ;;  %v2542_v27 = vpop.xlane.xlu1 %2541  ;;  %v7486_v42 = vsel %vm3840_vm14, %v7485_v0, %v7481_v4  ;;  %v8073_v20 = vsel %vm3833_vm13, %v8072_v18, %v8068_v24  ;;  %v11418_v31 = vld [vmem:[%s12519_s15 + $0x428] ss:$16 sps:$4 sm:$0xff]   ;;  %v11784_v21 = vld [vmem:[%s12517_s13 + $0x6f0] sm:$0xff]  ;;  %v11426_v18 = vld [vmem:[%s12519_s15 + $0x44c] ss:$16 sps:$4 sm:$0xff]  }
 0x434   : > { %9738 = vmatprep.mubr.bf16.mxu0 %v8450_v43  ;;  %9902 = vmatprep.mubr.bf16.mxu1 %v8450_v43  ;;  %v2539_v35 = vpop.xlane.xlu0 %2538  ;;  %v2957_v12 = vsel %vm1576_vm0, %v11780_v5, -inf  ;;  %v7491_v28 = vsel %vm3847_vm15, %v7490_v39, %v7486_v42  ;;  %v2606_v22 = vsel %vm1576_vm0, %v11781_v61, -inf  ;;  %v2603_v1 = vsel %vm1576_vm0, %v11782_v23, -inf  ;;  %v11423_v47 = vld [vmem:[%s12519_s15 + $0x444] ss:$16 sps:$4 sm:$0xff]   ;;  %v11785_v4 = vld [vmem:[%s12517_s13 + $0x348] sm:$0xff] }
 0x435   : > { %v8077_v6 = vrot.slane %v7181_v2, %v12794_v7  ;;  %v8082_v48 = vrot.slane %v7182_v49, %v12801_v15  ;;  %v6575_v9 = vpack.c.bf16 %v2542_v27, %v2539_v35  ;;  %v2966_v0 = vsel %vm1576_vm0, %v11783_v16, -inf  ;;  %v11424_v24 = vld [vmem:[%s12519_s15 + $0x448] ss:$16 sps:$4 sm:$0xff]   ;;  %v11786_v35 = vld [vmem:[%s12517_s13 + $0x340] sm:$0xff] }
 0x436   : > { %2601 = vmax.xlane.f32.xlu1 %v2600_v45  ;;  %2598 = vmax.xlane.f32.xlu0 %v2597_v57  ;;  %v2963_v17 = vsel %vm1576_vm0, %v11784_v21, -inf  ;;  %v11421_v45 = vld [vmem:[%s12519_s15 + $0x440] ss:$16 sps:$4 sm:$0xff]   ;;  %v2612_v39 = vsel %vm1576_vm0, %v11785_v4, -inf  ;;  %v2609_v42 = vsel %vm1576_vm0, %v11786_v35, -inf  ;;  %v11789_v21 = vld [vmem:[%s12517_s13 + $0x708] sm:$0xff] }
 0x437   : > { %v8078_v60 = vsel %vm3840_vm14, %v8077_v6, %v8073_v20  ;;  %v2902_v44 = vpop.xlane.xlu1 %2901  ;;  %v7095_v52 = vunpack.c.l.b16 %v6575_v9  ;;  %v7096_v50 = vunpack.c.h.b16 %v6575_v9  ;;  %v11429_v6 = vld [vmem:[%s12519_s15 + $0x464] ss:$16 sps:$4 sm:$0xff]   ;;  %v11442_v4 = vld [vmem:[%s12519_s15 + $0x4a8] ss:$16 sps:$4 sm:$0xff]   ;;  %vm15786_vm7 = vcmask 523712  }
 0x438   : > { %v2899_v11 = vpop.xlane.xlu0 %2898  ;;  %v8083_v36 = vsel %vm3847_vm15, %v8082_v48, %v8078_v60  ;;  %v11432_v48 = vld [vmem:[%s12519_s15 + $0x46c] ss:$16 sps:$4 sm:$0xff]   ;;  %v11435_v61 = vld [vmem:[%s12519_s15 + $0x484] ss:$16 sps:$4 sm:$0xff]   ;;  %vm15787_vm9 = vmmov %vm15786_vm7 }
 0x439   : > { %v15163_v30 = vpack.c.bf16 %v2902_v44, %v2899_v11  ;;  %v8441_v32 = vsel %vm4954_vm10, %v8083_v36, %v7491_v28  ;;  %v7653_v2 = vrot.slane %v7095_v52, %v12694_v19  ;;  %v7657_v49 = vrot.slane %v7096_v50, %v12702_v25  ;;  %v15779_v44 = vld [vmem:[#allocation9_spill] sm:$0xff]  ;;  %v11427_v11 = vld [vmem:[%s12519_s15 + $0x460] ss:$16 sps:$4 sm:$0xff]  }
 0x43a   : > { %2961 = vmax.xlane.f32.xlu1 %v2960_v53  ;;  %2958 = vmax.xlane.f32.xlu0 %v2957_v12  ;;  %v8449_v63 = vpack.c.b16 %v8441_v32, %v8441_v32  ;;  %v15780_v53 = vld [vmem:[#allocation10_spill] sm:$0xff]  ;;  %v11430_v28 = vld [vmem:[%s12519_s15 + $0x468] ss:$16 sps:$4 sm:$0xff]  }
 0x43b   : > { %v2494_v29 = vpop.xlane.xlu1 %2493  ;;  %v7215_v9 = vunpack.c.l.b16 %v15163_v30  ;;  %v7216_v20 = vunpack.c.h.b16 %v15163_v30  ;;  %v7658_v36 = vsel %vm3749_vm1, %v7657_v49, %v7653_v2 }
 0x43c   : > { %9739 = vmatmul.mubr.bf16.vlgmr.msra.gmra.mrb[4].mxu0 %v8449_v63  ;;  %9903 = vmatmul.mubr.bf16.vlgmr.msra.gmra.mrb[4].mxu1 %v8449_v63  ;;  %v2491_v33 = vpop.xlane.xlu0 %2490  ;;  %v11788_v63 = vld [vmem:[%s12517_s13 + $0x380] sm:$0xff] }
 0x43d   : > { %v15174_v10 = vpack.c.bf16 %v2494_v29, %v2491_v33  ;;  %9748 = vmatpush1.bf16.msra.mxu0 %v11409_v58  ;;  %9912 = vmatpush1.bf16.msra.mxu1 %v11412_v40  ;;  %v11787_v58 = vld [vmem:[%s12517_s13 + $0x388] sm:$0xff]  ;;  %v2633_v29 = vsel %vm1576_vm0, %v11788_v63, -inf  ;;  %v8245_v23 = vrot.slane %v7215_v9, %v12694_v19 }
 0x43e   : > { %2607 = vmax.xlane.f32.xlu1 %v2606_v22  ;;  %2604 = vmax.xlane.f32.xlu0 %v2603_v1  ;;  %v2636_v40 = vsel %vm1576_vm0, %v11787_v58, -inf  ;;  %v11438_v22 = vld [vmem:[%s12519_s15 + $0x48c] ss:$16 sps:$4 sm:$0xff]   ;;  %v8249_v1 = vrot.slane %v7216_v20, %v12702_v25  ;;  %v11448_v63 = vld [vmem:[%s12519_s15 + $0x4c8] ss:$16 sps:$4 sm:$0xff]  }
 0x43f   : > { %v2548_v37 = vpop.xlane.xlu1 %2547  ;;  %9749 = vmatprep.subr.bf16.mxu0 %v11417_v51  ;;  %9913 = vmatprep.subr.bf16.mxu1 %v11420_v46  ;;  %v7079_v52 = vunpack.c.l.b16 %v15174_v10  ;;  %v7080_v50 = vunpack.c.h.b16 %v15174_v10 }
 0x440   : > { %v2545_v43 = vpop.xlane.xlu0 %2544  ;;  %v8250_v10 = vsel %vm3749_vm1, %v8249_v1, %v8245_v23  ;;  %v11793_v23 = vld [vmem:[%s12517_s13 + $0x398] sm:$0xff] }
 0x441   : > { %v6576_v38 = vpack.c.bf16 %v2548_v37, %v2545_v43  ;;  %9750 = vmatpush1.bf16.msra.mxu0 %v11415_v26  ;;  %9914 = vmatpush1.bf16.msra.mxu1 %v11418_v31  ;;  %v11433_v26 = vld [vmem:[%s12519_s15 + $0x480] ss:$16 sps:$4 sm:$0xff]   ;;  %v11436_v31 = vld [vmem:[%s12519_s15 + $0x488] ss:$16 sps:$4 sm:$0xff]   ;;  %v11441_v43 = vld [vmem:[%s12519_s15 + $0x4a4] ss:$16 sps:$4 sm:$0xff]   ;;  %v7578_v35 = vrot.slane %v7080_v50, %v12702_v25 }
 0x442   : > { %2967 = vmax.xlane.f32.xlu1 %v2966_v0  ;;  %2964 = vmax.xlane.f32.xlu0 %v2963_v17  ;;  %v2972_v17 = vsel %vm1576_vm0, %v11789_v21, -inf  ;;  %v2642_v1 = vsel %vm1576_vm0, %v11793_v23, -inf }
 0x443   : > { %v7097_v27 = vunpack.c.l.b16 %v6576_v38  ;;  %v7098_v56 = vunpack.c.h.b16 %v6576_v38  ;;  %v2854_v57 = vpop.xlane.xlu1 %2853  ;;  %9751 = vmatprep.subr.bf16.mxu0 %v11423_v47  ;;  %9915 = vmatprep.subr.bf16.mxu1 %v11426_v18  ;;  %v11790_v47 = vld [vmem:[%s12517_s13 + $0x700] sm:$0xff]  ;;  %v11444_v38 = vld [vmem:[%s12519_s15 + $0x4ac] ss:$16 sps:$4 sm:$0xff]  }
 0x444   : > { %v2851_v60 = vpop.xlane.xlu0 %2850  ;;  %v2969_v18 = vsel %vm1576_vm0, %v11790_v47, -inf }
 0x445   : > { %v7662_v14 = vrot.slane %v7097_v27, %v15779_v44  ;;  %v7667_v5 = vrot.slane %v7098_v56, %v15780_v53  ;;  %v15198_v12 = vpack.c.bf16 %v2854_v57, %v2851_v60  ;;  %9752 = vmatpush1.bf16.msra.mxu0 %v11421_v45  ;;  %9916 = vmatpush1.bf16.msra.mxu1 %v11424_v24  ;;  %v11791_v27 = vld [vmem:[%s12517_s13 + $0x748] sm:$0xff]  ;;  %v11439_v57 = vld [vmem:[%s12519_s15 + $0x4a0] ss:$16 sps:$4 sm:$0xff]  }
 0x446   : > { %2613 = vmax.xlane.f32.xlu1 %v2612_v39  ;;  %2610 = vmax.xlane.f32.xlu0 %v2609_v42  ;;  %v2996_v56 = vsel %vm1576_vm0, %v11791_v27, -inf  ;;  %v7574_v39 = vrot.slane %v7079_v52, %v12694_v19  ;;  %v11794_v52 = vld [vmem:[%s12517_s13 + $0x390] sm:$0xff] }
 0x447   : > { %v7663_v30 = vsel %vm3756_vm2, %v7662_v14, %v7658_v36  ;;  %v2908_v32 = vpop.xlane.xlu1 %2907  ;;  %9753 = vmatprep.subr.bf16.mxu0 %v11429_v6  ;;  %9917 = vmatprep.subr.bf16.mxu1 %v11432_v48  ;;  %v7199_v42 = vunpack.c.l.b16 %v15198_v12  ;;  %v7200_v6 = vunpack.c.h.b16 %v15198_v12  ;;  %v11792_v14 = vld [vmem:[%s12517_s13 + $0x740] sm:$0xff]  ;;  %v2639_v50 = vsel %vm1576_vm0, %v11794_v52, -inf  ;;  %v11799_v52 = vld [vmem:[%s12517_s13 + $0x718] sm:$0xff] }
 0x448   : > { %v15213_v51 = vsel %vm3763_vm3, %v7667_v5, %v7663_v30  ;;  %v2905_v46 = vpop.xlane.xlu0 %2904  ;;  %v2993_v5 = vsel %vm1576_vm0, %v11792_v14, -inf }
 0x449   : > { %v6636_v33 = vpack.c.bf16 %v2908_v32, %v2905_v46  ;;  %9754 = vmatpush1.bf16.msra.mxu0 %v11427_v11  ;;  %9918 = vmatpush1.bf16.msra.mxu1 %v11430_v28  ;;  %v11447_v11 = vld [vmem:[%s12519_s15 + $0x4c4] ss:$16 sps:$4 sm:$0xff]   ;;  %v11450_v28 = vld [vmem:[%s12519_s15 + $0x4cc] ss:$16 sps:$4 sm:$0xff]  }
 0x44a   : > { %2637 = vmax.xlane.f32.xlu1 %v2636_v40  ;;  %2634 = vmax.xlane.f32.xlu0 %v2633_v29  ;;  %v11445_v40 = vld [vmem:[%s12519_s15 + $0x4c0] ss:$16 sps:$4 sm:$0xff]   ;;  %v7579_v29 = vsel %vm3749_vm1, %v7578_v35, %v7574_v39  ;;  %v11459_v39 = vld [vmem:[%s12519_s15 + $0x504] ss:$16 sps:$4 sm:$0xff]   ;;  %v11462_v35 = vld [vmem:[%s12519_s15 + $0x50c] ss:$16 sps:$4 sm:$0xff]  }
 0x44b   : > { %v7217_v37 = vunpack.c.l.b16 %v6636_v33  ;;  %v7218_v16 = vunpack.c.h.b16 %v6636_v33  ;;  %v2500_v0 = vpop.xlane.xlu1 %2499  ;;  %9755 = vmatprep.subr.bf16.mxu0 %v11435_v61  ;;  %9919 = vmatprep.subr.bf16.mxu1 %v11438_v22  ;;  %v8166_v61 = vrot.slane %v7199_v42, %v12694_v19  ;;  %v8170_v22 = vrot.slane %v7200_v6, %v12702_v25 }
 0x44c   : > { %v2497_v45 = vpop.xlane.xlu0 %2496 }
 0x44d   : > { %v8254_v24 = vrot.slane %v7217_v37, %v15779_v44  ;;  %v8259_v2 = vrot.slane %v7218_v16, %v15780_v53  ;;  %v6568_v49 = vpack.c.bf16 %v2500_v0, %v2497_v45  ;;  %9756 = vmatpush1.bf16.msra.mxu0 %v11433_v26  ;;  %9920 = vmatpush1.bf16.msra.mxu1 %v11436_v31  ;;  %v11453_v37 = vld [vmem:[%s12519_s15 + $0x4e4] ss:$16 sps:$4 sm:$0xff]   ;;  %v11456_v16 = vld [vmem:[%s12519_s15 + $0x4ec] ss:$16 sps:$4 sm:$0xff]  }
 0x44e   : > { %2973 = vmax.xlane.f32.xlu1 %v2972_v17  ;;  %2970 = vmax.xlane.f32.xlu0 %v2969_v18  ;;  %v11795_v45 = vld [vmem:[%s12517_s13 + $0x758] sm:$0xff] }
 0x44f   : > { %v8255_v48 = vsel %vm3756_vm2, %v8254_v24, %v8250_v10  ;;  %v7081_v9 = vunpack.c.l.b16 %v6568_v49  ;;  %v7082_v20 = vunpack.c.h.b16 %v6568_v49  ;;  %v2860_v60 = vpop.xlane.xlu1 %2859  ;;  %9757 = vmatprep.subr.bf16.mxu0 %v11441_v43  ;;  %9921 = vmatprep.subr.bf16.mxu1 %v11444_v38  ;;  %v11451_v43 = vld [vmem:[%s12519_s15 + $0x4e0] ss:$16 sps:$4 sm:$0xff]   ;;  %v11454_v38 = vld [vmem:[%s12519_s15 + $0x4e8] ss:$16 sps:$4 sm:$0xff]   ;;  %v8171_v10 = vsel %vm3749_vm1, %v8170_v22, %v8166_v61  ;;  %v11465_v61 = vld [vmem:[%s12519_s15 + $0x524] ss:$16 sps:$4 sm:$0xff]  }
 0x450   : > { %v15242_v36 = vsel %vm3763_vm3, %v8259_v2, %v8255_v48  ;;  %v2857_v12 = vpop.xlane.xlu0 %2856  ;;  %v3002_v24 = vsel %vm1576_vm0, %v11795_v45, -inf  ;;  %v15781_v48 = vld [vmem:[#allocation11_spill] sm:$0xff] }
 0x451   : > { %v7583_v30 = vrot.slane %v7081_v9, %v15779_v44  ;;  %v7588_v32 = vrot.slane %v7082_v20, %v15780_v53  ;;  %v6628_v58 = vpack.c.bf16 %v2860_v60, %v2857_v12  ;;  %9758 = vmatpush1.bf16.msra.mxu0 %v11439_v57  ;;  %9922 = vmatpush1.bf16.msra.mxu1 %v11442_v4  ;;  %v11796_v57 = vld [vmem:[%s12517_s13 + $0x750] sm:$0xff]  ;;  %v15782_v20 = vld [vmem:[#allocation12_spill] sm:$0xff]  ;;  %v11468_v22 = vld [vmem:[%s12519_s15 + $0x52c] ss:$16 sps:$4 sm:$0xff]  }
 0x452   : > { %2997 = vmax.xlane.f32.xlu1 %v2996_v56  ;;  %2994 = vmax.xlane.f32.xlu0 %v2993_v5  ;;  %v2999_v4 = vsel %vm1576_vm0, %v11796_v57, -inf  ;;  %v11457_v5 = vld [vmem:[%s12519_s15 + $0x500] ss:$16 sps:$4 sm:$0xff]  }
 0x453   : > { %v7584_v46 = vsel %vm3756_vm2, %v7583_v30, %v7579_v29  ;;  %v7201_v33 = vunpack.c.l.b16 %v6628_v58  ;;  %v7202_v26 = vunpack.c.h.b16 %v6628_v58  ;;  %v2554_v31 = vpop.xlane.xlu1 %2553  ;;  %9759 = vmatprep.subr.bf16.mxu0 %v11447_v11  ;;  %9923 = vmatprep.subr.bf16.mxu1 %v11450_v28  ;;  %v11460_v11 = vld [vmem:[%s12519_s15 + $0x508] ss:$16 sps:$4 sm:$0xff]  }
 0x454   : > { %v15259_v0 = vsel %vm3763_vm3, %v7588_v32, %v7584_v46  ;;  %v2551_v21 = vpop.xlane.xlu0 %2550  ;;  %v11797_v28 = vld [vmem:[%s12517_s13 + $0x358] sm:$0xff] }
 0x455   : > { %v8175_v17 = vrot.slane %v7201_v33, %v15779_v44  ;;  %v8180_v47 = vrot.slane %v7202_v26, %v15780_v53  ;;  %v6577_v18 = vpack.c.bf16 %v2554_v31, %v2551_v21  ;;  %9760 = vmatpush1.bf16.msra.mxu0 %v11445_v40  ;;  %9924 = vmatpush1.bf16.msra.mxu1 %v11448_v63  ;;  %v2618_v12 = vsel %vm1576_vm0, %v11797_v28, -inf  ;;  %v11798_v63 = vld [vmem:[%s12517_s13 + $0x350] sm:$0xff]  ;;  %v11466_v31 = vld [vmem:[%s12519_s15 + $0x528] ss:$16 sps:$4 sm:$0xff]  }
 0x456   : > { %2643 = vmax.xlane.f32.xlu1 %v2642_v1  ;;  %2640 = vmax.xlane.f32.xlu0 %v2639_v50  ;;  %v2615_v29 = vsel %vm1576_vm0, %v11798_v63, -inf  ;;  %v11463_v26 = vld [vmem:[%s12519_s15 + $0x520] ss:$16 sps:$4 sm:$0xff]   ;;  %v2978_v50 = vsel %vm1576_vm0, %v11799_v52, -inf  ;;  %v11803_v63 = vld [vmem:[%s12517_s13 + $0x768] sm:$0xff] }
 0x457   : > { %v8176_v2 = vsel %vm3756_vm2, %v8175_v17, %v8171_v10  ;;  %v7099_v49 = vunpack.c.l.b16 %v6577_v18  ;;  %v7100_v27 = vunpack.c.h.b16 %v6577_v18  ;;  %v2914_v56 = vpop.xlane.xlu1 %2913  ;;  %9761 = vmatprep.subr.bf16.mxu0 %v11453_v37  ;;  %9925 = vmatprep.subr.bf16.mxu1 %v11456_v16  ;;  %v11805_v52 = vld [vmem:[%s12517_s13 + $0x368] sm:$0xff] }
 0x458   : > { %v15274_v42 = vsel %vm3763_vm3, %v8180_v47, %v8176_v2  ;;  %v2911_v6 = vpop.xlane.xlu0 %2910  ;;  %v11800_v47 = vld [vmem:[%s12517_s13 + $0x710] sm:$0xff] }
 0x459   : > { %v7672_v9 = vrot.slane %v7099_v49, %v15781_v48  ;;  %v7677_v60 = vrot.slane %v7100_v27, %v15782_v20  ;;  %v6637_v14 = vpack.c.bf16 %v2914_v56, %v2911_v6  ;;  %9762 = vmatpush1.bf16.msra.mxu0 %v11451_v43  ;;  %9926 = vmatpush1.bf16.msra.mxu1 %v11454_v38  ;;  %v2975_v18 = vsel %vm1576_vm0, %v11800_v47, -inf  ;;  %v11471_v43 = vld [vmem:[%s12519_s15 + $0x544] ss:$16 sps:$4 sm:$0xff]   ;;  %v11474_v38 = vld [vmem:[%s12519_s15 + $0x54c] ss:$16 sps:$4 sm:$0xff]  }
 0x45a   : > { %3003 = vmax.xlane.f32.xlu1 %v3002_v24  ;;  %3000 = vmax.xlane.f32.xlu0 %v2999_v4  ;;  %v11469_v49 = vld [vmem:[%s12519_s15 + $0x540] ss:$16 sps:$4 sm:$0xff]   ;;  %v11472_v27 = vld [vmem:[%s12519_s15 + $0x548] ss:$16 sps:$4 sm:$0xff]  }
 0x45b   : > { %v7673_v30 = vsel %vm3770_vm4, %v7672_v9, %v15213_v51  ;;  %v7219_v32 = vunpack.c.l.b16 %v6637_v14  ;;  %v7220_v58 = vunpack.c.h.b16 %v6637_v14  ;;  %v2506_v40 = vpop.xlane.xlu1 %2505  ;;  %9763 = vmatprep.subr.bf16.mxu0 %v11459_v39  ;;  %9927 = vmatprep.subr.bf16.mxu1 %v11462_v35  ;;  %v11801_v56 = vld [vmem:[%s12517_s13 + $0x3a8] sm:$0xff]  ;;  %v11802_v9 = vld [vmem:[%s12517_s13 + $0x3a0] sm:$0xff] }
 0x45c   : > { %v15289_v23 = vsel %vm3777_vm5, %v7677_v60, %v7673_v30  ;;  %v2503_v1 = vpop.xlane.xlu0 %2502  ;;  %v2648_v57 = vsel %vm1576_vm0, %v11801_v56, -inf  ;;  %v2645_v60 = vsel %vm1576_vm0, %v11802_v9, -inf  ;;  %v11477_v14 = vld [vmem:[%s12519_s15 + $0x564] ss:$16 sps:$4 sm:$0xff]   ;;  %v11475_v30 = vld [vmem:[%s12519_s15 + $0x560] ss:$16 sps:$4 sm:$0xff]  }
 0x45d   : > { %v8264_v51 = vrot.slane %v7219_v32, %v15781_v48  ;;  %v8269_v46 = vrot.slane %v7220_v58, %v15782_v20  ;;  %v6569_v33 = vpack.c.bf16 %v2506_v40, %v2503_v1  ;;  %9764 = vmatpush1.bf16.msra.mxu0 %v11457_v5  ;;  %9928 = vmatpush1.bf16.msra.mxu1 %v11460_v11  ;;  %v11480_v5 = vld [vmem:[%s12519_s15 + $0x56c] ss:$16 sps:$4 sm:$0xff]   ;;  %v11478_v32 = vld [vmem:[%s12519_s15 + $0x568] ss:$16 sps:$4 sm:$0xff]   ;;  %v11483_v1 = vld [vmem:[%s12519_s15 + $0x584] ss:$16 sps:$4 sm:$0xff]  }
 0x45e   : > { %2619 = vmax.xlane.f32.xlu1 %v2618_v12  ;;  %2616 = vmax.xlane.f32.xlu0 %v2615_v29  ;;  %v3008_v29 = vsel %vm1576_vm0, %v11803_v63, -inf  ;;  %v11811_v63 = vld [vmem:[%s12517_s13 + $0x778] sm:$0xff] }
 0x45f   : > { %v8265_v37 = vsel %vm3770_vm4, %v8264_v51, %v15242_v36  ;;  %v7083_v16 = vunpack.c.l.b16 %v6569_v33  ;;  %v7084_v21 = vunpack.c.h.b16 %v6569_v33  ;;  %v2866_v17 = vpop.xlane.xlu1 %2865  ;;  %9765 = vmatprep.subr.bf16.mxu0 %v11465_v61  ;;  %9929 = vmatprep.subr.bf16.mxu1 %v11468_v22  ;;  %v11804_v61 = vld [vmem:[%s12517_s13 + $0x760] sm:$0xff]  ;;  %v11486_v51 = vld [vmem:[%s12519_s15 + $0x58c] ss:$16 sps:$4 sm:$0xff]  }
 0x460   : > { %v15304_v10 = vsel %vm3777_vm5, %v8269_v46, %v8265_v37  ;;  %v2863_v45 = vpop.xlane.xlu0 %2862  ;;  %v3005_v22 = vsel %vm1576_vm0, %v11804_v61, -inf  ;;  %v11481_v33 = vld [vmem:[%s12519_s15 + $0x580] ss:$16 sps:$4 sm:$0xff]  }
 0x461   : > { %v7593_v36 = vrot.slane %v7083_v16, %v15781_v48  ;;  %v7598_v24 = vrot.slane %v7084_v21, %v15782_v20  ;;  %v6629_v2 = vpack.c.bf16 %v2866_v17, %v2863_v45  ;;  %9766 = vmatpush1.bf16.msra.mxu0 %v11463_v26  ;;  %9930 = vmatpush1.bf16.msra.mxu1 %v11466_v31  ;;  %v11484_v26 = vld [vmem:[%s12519_s15 + $0x588] ss:$16 sps:$4 sm:$0xff]   ;;  %v11806_v37 = vld [vmem:[%s12517_s13 + $0x360] sm:$0xff]  ;;  %v11492_v17 = vld [vmem:[%s12519_s15 + $0x5ac] ss:$16 sps:$4 sm:$0xff]  }
 0x462   : > { %2979 = vmax.xlane.f32.xlu1 %v2978_v50  ;;  %2976 = vmax.xlane.f32.xlu0 %v2975_v18  ;;  %v2624_v50 = vsel %vm1576_vm0, %v11805_v52, -inf  ;;  %v2621_v16 = vsel %vm1576_vm0, %v11806_v37, -inf  ;;  %v11489_v21 = vld [vmem:[%s12519_s15 + $0x5a4] ss:$16 sps:$4 sm:$0xff]   ;;  %v11487_v18 = vld [vmem:[%s12519_s15 + $0x5a0] ss:$16 sps:$4 sm:$0xff]  }
 0x463   : > { %v7594_v4 = vsel %vm3770_vm4, %v7593_v36, %v15259_v0  ;;  %v7203_v39 = vunpack.c.l.b16 %v6629_v2  ;;  %v7204_v35 = vunpack.c.h.b16 %v6629_v2  ;;  %v15314_v6 = vpop.xlane.xlu1 %2559  ;;  %9767 = vmatprep.subr.bf16.mxu0 %v11471_v43  ;;  %9931 = vmatprep.subr.bf16.mxu1 %v11474_v38  ;;  %v11490_v43 = vld [vmem:[%s12519_s15 + $0x5a8] ss:$16 sps:$4 sm:$0xff]   ;;  %v11812_v61 = vld [vmem:[%s12517_s13 + $0x770] sm:$0xff] }
 0x464   : > { %v15321_v11 = vsel %vm3777_vm5, %v7598_v24, %v7594_v4  ;;  %v15323_v28 = vpop.xlane.xlu0 %2556  ;;  %v11807_v45 = vld [vmem:[%s12517_s13 + $0x728] sm:$0xff]  ;;  %v11808_v24 = vld [vmem:[%s12517_s13 + $0x720] sm:$0xff]  ;;  %v11813_v52 = vld [vmem:[%s12517_s13 + $0x378] sm:$0xff] }
 0x465   : > { %v8185_v0 = vrot.slane %v7203_v39, %v15781_v48  ;;  %v8190_v12 = vrot.slane %v7204_v35, %v15782_v20  ;;  %9768 = vmatpush1.bf16.msra.mxu0 %v11469_v49  ;;  %9932 = vmatpush1.bf16.msra.mxu1 %v11472_v27  ;;  %v2984_v36 = vsel %vm1576_vm0, %v11807_v45, -inf  ;;  %v2981_v2 = vsel %vm1576_vm0, %v11808_v24, -inf  ;;  %v11495_v49 = vld [vmem:[%s12519_s15 + $0x5c4] ss:$16 sps:$4 sm:$0xff]   ;;  %v11498_v27 = vld [vmem:[%s12519_s15 + $0x5cc] ss:$16 sps:$4 sm:$0xff]  }
 0x466   : > { %2649 = vmax.xlane.f32.xlu1 %v2648_v57  ;;  %2646 = vmax.xlane.f32.xlu0 %v2645_v60  ;;  %v11493_v57 = vld [vmem:[%s12519_s15 + $0x5c0] ss:$16 sps:$4 sm:$0xff]   ;;  %v11496_v4 = vld [vmem:[%s12519_s15 + $0x5c8] ss:$16 sps:$4 sm:$0xff]  }
 0x467   : > { %v8186_v58 = vsel %vm3770_vm4, %v8185_v0, %v15274_v42  ;;  %v15331_v40 = vpop.xlane.xlu1 %2919  ;;  %9769 = vmatprep.subr.bf16.mxu0 %v11477_v14  ;;  %9933 = vmatprep.subr.bf16.mxu1 %v11480_v5  ;;  %v11809_v35 = vld [vmem:[%s12517_s13 + $0x3b8] sm:$0xff]  ;;  %v11810_v60 = vld [vmem:[%s12517_s13 + $0x3b0] sm:$0xff] }
 0x468   : > { %v15340_v46 = vsel %vm3777_vm5, %v8190_v12, %v8186_v58  ;;  %v15342_v42 = vpop.xlane.xlu0 %2916  ;;  %v2654_v9 = vsel %vm1576_vm0, %v11809_v35, -inf  ;;  %v2651_v14 = vsel %vm1576_vm0, %v11810_v60, -inf  ;;  %v11501_v5 = vld [vmem:[%s12519_s15 + $0x5e4] ss:$16 sps:$4 sm:$0xff]   ;;  %v11504_v0 = vld [vmem:[%s12519_s15 + $0x5ec] ss:$16 sps:$4 sm:$0xff]  }
 0x469   : > { %9770 = vmatpush1.bf16.msra.mxu0 %v11475_v30  ;;  %9934 = vmatpush1.bf16.msra.mxu1 %v11478_v32  ;;  %v11499_v30 = vld [vmem:[%s12519_s15 + $0x5e0] ss:$16 sps:$4 sm:$0xff]   ;;  %v11502_v32 = vld [vmem:[%s12519_s15 + $0x5e8] ss:$16 sps:$4 sm:$0xff]   ;;  %v6638_v35 = vpack.c.bf16 %v15331_v40, %v15342_v42 }
 0x46a   : > { %3009 = vmax.xlane.f32.xlu1 %v3008_v29  ;;  %3006 = vmax.xlane.f32.xlu0 %v3005_v22  ;;  %v3014_v29 = vsel %vm1576_vm0, %v11811_v63, -inf  ;;  %v3011_v22 = vsel %vm1576_vm0, %v11812_v61, -inf  ;;  %v11814_v37 = vld [vmem:[%s12517_s13 + $0x370] sm:$0xff] }
 0x46b   : > { %v15346_v31 = vpop.xlane.xlu1 %2511  ;;  %9771 = vmatprep.subr.bf16.mxu0 %v11483_v1  ;;  %9935 = vmatprep.subr.bf16.mxu1 %v11486_v51  ;;  %v11507_v1 = vld [vmem:[%s12519_s15 + $0x604] ss:$16 sps:$4 sm:$0xff]   ;;  %v11510_v51 = vld [vmem:[%s12519_s15 + $0x60c] ss:$16 sps:$4 sm:$0xff]   ;;  %v7222_v42 = vunpack.c.h.b16 %v6638_v35 }
 0x46c   : > { %v15354_v47 = vpop.xlane.xlu0 %2508  ;;  %v11816_v45 = vld [vmem:[%s12517_s13 + $0x730] sm:$0xff] }
 0x46d   : > { %9772 = vmatpush1.bf16.msra.mxu0 %v11481_v33  ;;  %9936 = vmatpush1.bf16.msra.mxu1 %v11484_v26 }
 0x46e   : > { %2625 = vmax.xlane.f32.xlu1 %v2624_v50  ;;  %2622 = vmax.xlane.f32.xlu0 %v2621_v16  ;;  %v2630_v50 = vsel %vm1576_vm0, %v11813_v52, -inf  ;;  %v2627_v16 = vsel %vm1576_vm0, %v11814_v37, -inf }
 0x46f   : > { %v15358_v38 = vpop.xlane.xlu1 %2871  ;;  %9773 = vmatprep.subr.bf16.mxu0 %v11489_v21  ;;  %9937 = vmatprep.subr.bf16.mxu1 %v11492_v17 }
 0x470   : > { %v15366_v56 = vpop.xlane.xlu0 %2868 }
 0x471   : > { %9774 = vmatpush1.bf16.msra.mxu0 %v11487_v18  ;;  %9938 = vmatpush1.bf16.msra.mxu1 %v11490_v43  ;;  %v11815_v18 = vld [vmem:[%s12517_s13 + $0x738] sm:$0xff]  ;;  %v6630_v63 = vpack.c.bf16 %v15358_v38, %v15366_v56 }
 0x472   : > { %2985 = vmax.xlane.f32.xlu1 %v2984_v36  ;;  %2982 = vmax.xlane.f32.xlu0 %v2981_v2  ;;  %v2990_v43 = vsel %vm1576_vm0, %v11815_v18, -inf  ;;  %v2987_v36 = vsel %vm1576_vm0, %v11816_v45, -inf  ;;  %vm15783_vm0 = vcmask 458112  }
 0x473   : > { %v15370_v39 = vpop.xlane.xlu1 %2565  ;;  %9775 = vmatprep.subr.bf16.mxu0 %v11495_v49  ;;  %9939 = vmatprep.subr.bf16.mxu1 %v11498_v27  ;;  %vm15784_vm11 = vmmov %vm15783_vm0 }
 0x474   : > { %v2563_v12 = vpop.xlane.xlu0 %2562  ;;  %vm15785_vm6 = vmmov %vm15783_vm0 }
 0x475   : > { %9776 = vmatpush1.bf16.msra.mxu0 %v11493_v57  ;;  %9940 = vmatpush1.bf16.msra.mxu1 %v11496_v4  ;;  %v6578_v4 = vpack.c.bf16 %v15314_v6, %v15323_v28  ;;  %v6579_v6 = vpack.c.bf16 %v15370_v39, %v2563_v12  ;;  %v8279_v39 = vrot.slane %v7222_v42, %v12737_v62 }
 0x476   : > { %2655 = vmax.xlane.f32.xlu1 %v2654_v9  ;;  %2652 = vmax.xlane.f32.xlu0 %v2651_v14  ;;  %v6570_v9 = vpack.c.bf16 %v15346_v31, %v15354_v47 }
 0x477   : > { %v2926_v58 = vpop.xlane.xlu1 %2925  ;;  %9777 = vmatprep.subr.bf16.mxu0 %v11501_v5  ;;  %9941 = vmatprep.subr.bf16.mxu1 %v11504_v0  ;;  %v7101_v5 = vunpack.c.l.b16 %v6578_v4  ;;  %v7221_v0 = vunpack.c.l.b16 %v6638_v35  ;;  %v7102_v28 = vunpack.c.h.b16 %v6578_v4  ;;  %v7103_v37 = vunpack.c.l.b16 %v6579_v6 }
 0x478   : > { %v2923_v33 = vpop.xlane.xlu0 %2922  ;;  %v7086_v47 = vunpack.c.h.b16 %v6570_v9  ;;  %v7104_v4 = vunpack.c.h.b16 %v6579_v6 }
 0x479   : > { %9778 = vmatpush1.bf16.msra.mxu0 %v11499_v30  ;;  %9942 = vmatpush1.bf16.msra.mxu1 %v11502_v32  ;;  %v7085_v30 = vunpack.c.l.b16 %v6570_v9  ;;  %v7682_v40 = vrot.slane %v7101_v5, %v15761_v3  ;;  %v6639_v61 = vpack.c.bf16 %v2926_v58, %v2923_v33  ;;  %v8274_v31 = vrot.slane %v7221_v0, %v15761_v3 }
 0x47a   : > { %3015 = vmax.xlane.f32.xlu1 %v3014_v29  ;;  %3012 = vmax.xlane.f32.xlu0 %v3011_v22  ;;  %v7687_v56 = vrot.slane %v7102_v28, %v12737_v62  ;;  %v7692_v35 = vrot.slane %v7103_v37, %v12745_v8 }
 0x47b   : > { %v2518_v26 = vpop.xlane.xlu1 %2517  ;;  %9788 = vmatprep.subr.bf16.mxu0 %v11507_v1  ;;  %9952 = vmatprep.subr.bf16.mxu1 %v11510_v51  ;;  %v7603_v22 = vrot.slane %v7085_v30, %v15761_v3  ;;  %v7205_v51 = vunpack.c.l.b16 %v6630_v63  ;;  %v7683_v38 = vsel %vm15783_vm0, %v7682_v40, %v15289_v23  ;;  %v7223_v12 = vunpack.c.l.b16 %v6639_v61  ;;  %vm15788_vm0 = vmmov %vm15786_vm7 }
 0x47c   : > { %v2515_v21 = vpop.xlane.xlu0 %2514  ;;  %v8275_v58 = vsel %vm15784_vm11, %v8274_v31, %v15304_v10  ;;  %v7688_v5 = vsel %vm15786_vm7, %v7687_v56, %v7683_v38  ;;  %v7224_v10 = vunpack.c.h.b16 %v6639_v61  ;;  %vm15789_vm11 = vmmov %vm15785_vm6  ;;  %v7697_v40 = vrot.slane %v7104_v4, %v12750_v13 }
 0x47d   : > { %v6571_v52 = vpack.c.bf16 %v2518_v26, %v2515_v21  ;;  %v7604_v33 = vsel %vm15785_vm6, %v7603_v22, %v15321_v11  ;;  %v7206_v21 = vunpack.c.h.b16 %v6630_v63  ;;  %v8284_v0 = vrot.slane %v7223_v12, %v12745_v8  ;;  %vm15790_vm6 = vmmov %vm15788_vm0 }
 0x47e   : > { %2631 = vmax.xlane.f32.xlu1 %v2630_v50  ;;  %2628 = vmax.xlane.f32.xlu0 %v2627_v16  ;;  %v7608_v16 = vrot.slane %v7086_v47, %v12737_v62  ;;  %v8280_v11 = vsel %vm15787_vm9, %v8279_v39, %v8275_v58  ;;  %v7693_v28 = vsel %vm3798_vm8, %v7692_v35, %v7688_v5  ;;  %vm15791_vm7 = vcmask 654912  }
 0x47f   : > { %v2878_v17 = vpop.xlane.xlu1 %2877  ;;  %v7087_v45 = vunpack.c.l.b16 %v6571_v52  ;;  %v8285_v31 = vsel %vm3798_vm8, %v8284_v0, %v8280_v11  ;;  %v8289_v47 = vrot.slane %v7224_v10, %v12750_v13  ;;  %vm15792_vm9 = vmmov %vm15791_vm7 }
 0x480   : > { %v2875_v24 = vpop.xlane.xlu0 %2874 }
 0x481   : > { %v6631_v18 = vpack.c.bf16 %v2878_v17, %v2875_v24  ;;  %v7609_v17 = vsel %vm15788_vm0, %v7608_v16, %v7604_v33  ;;  %v7088_v24 = vunpack.c.h.b16 %v6571_v52  ;;  %v7613_v6 = vrot.slane %v7087_v45, %v12745_v8  ;;  %vm15793_vm0 = vmmov %vm15791_vm7 }
 0x482   : > { %2991 = vmax.xlane.f32.xlu1 %v2990_v43  ;;  %2988 = vmax.xlane.f32.xlu0 %v2987_v36  ;;  %v8195_v43 = vrot.slane %v7205_v51, %v15761_v3 }
 0x483   : > { %v2572_v2 = vpop.xlane.xlu1 %2571  ;;  %v7207_v30 = vunpack.c.l.b16 %v6631_v18  ;;  %v7208_v22 = vunpack.c.h.b16 %v6631_v18  ;;  %v7614_v39 = vsel %vm3798_vm8, %v7613_v6, %v7609_v17 }
 0x484   : > { %v2569_v49 = vpop.xlane.xlu0 %2568 }
 0x485   : > { %v6580_v23 = vpack.c.bf16 %v2572_v2, %v2569_v49  ;;  %v8196_v2 = vsel %vm15789_vm11, %v8195_v43, %v15340_v46  ;;  %v8200_v49 = vrot.slane %v7206_v21, %v12737_v62  ;;  %v7618_v46 = vrot.slane %v7088_v24, %v12750_v13 }
 0x486   : > { %v8205_v52 = vrot.slane %v7207_v30, %v12745_v8  ;;  %v8210_v18 = vrot.slane %v7208_v22, %v12750_v13  ;;  %vm15794_vm11 = vcmask 720512  }
 0x487   : > { %v2932_v27 = vpop.xlane.xlu1 %2931  ;;  %v7106_v37 = vunpack.c.h.b16 %v6580_v23  ;;  %v7619_v43 = vsel %vm15793_vm0, %v7618_v46, %v7614_v39 }
 0x488   : > { %v2929_v57 = vpop.xlane.xlu0 %2928 }
 0x489   : > { %v6640_v9 = vpack.c.bf16 %v2932_v27, %v2929_v57  ;;  %v7105_v27 = vunpack.c.l.b16 %v6580_v23  ;;  %v7707_v23 = vrot.slane %v7106_v37, %v12771_v41 }
 0x48b   : > { %v2524_v60 = vpop.xlane.xlu1 %2523  ;;  %v7225_v42 = vunpack.c.l.b16 %v6640_v9  ;;  %v7702_v12 = vrot.slane %v7105_v27, %v12764_v34  ;;  %v7226_v58 = vunpack.c.h.b16 %v6640_v9 }
 0x48c   : > { %v2521_v14 = vpop.xlane.xlu0 %2520 }
 0x48d   : > { %v6572_v51 = vpack.c.bf16 %v2524_v60, %v2521_v14  ;;  %v8294_v16 = vrot.slane %v7225_v42, %v12764_v34  ;;  %v8290_v14 = vsel %vm15792_vm9, %v8289_v47, %v8285_v31  ;;  %v8299_v9 = vrot.slane %v7226_v58, %v12771_v41 }
 0x48e   : > { %vm15797_vm9 = vcmask 786112  }
 0x48f   : > { %v15400_v32 = vpop.xlane.xlu1 %2883  ;;  %v7089_v21 = vunpack.c.l.b16 %v6572_v51  ;;  %v7090_v17 = vunpack.c.h.b16 %v6572_v51 }
 0x490   : > { %v15404_v29 = vpop.xlane.xlu0 %2880 }
 0x491   : > { %v7623_v30 = vrot.slane %v7089_v21, %v12764_v34  ;;  %v7628_v22 = vrot.slane %v7090_v17, %v12771_v41 }
 0x493   : > { %v2578_v1 = vpop.xlane.xlu1 %2577 }
 0x494   : > { %v2575_v50 = vpop.xlane.xlu0 %2574 }
 0x495   : > { %v6581_v61 = vpack.c.bf16 %v2578_v1, %v2575_v50  ;;  %v8201_v1 = vsel %vm15790_vm6, %v8200_v49, %v8196_v2  ;;  %v7698_v50 = vsel %vm15791_vm7, %v7697_v40, %v7693_v28  ;;  %vm15795_vm6 = vmmov %vm15794_vm11 }
 0x496   : > { %v8206_v45 = vsel %vm3798_vm8, %v8205_v52, %v8201_v1  ;;  %v7703_v35 = vsel %vm15794_vm11, %v7702_v12, %v7698_v50  ;;  %v8295_v11 = vsel %vm15795_vm6, %v8294_v16, %v8290_v14  ;;  %vm15796_vm7 = vmmov %vm15793_vm0 }
 0x497   : > { %v2938_v26 = vpop.xlane.xlu1 %2937  ;;  %v7107_v60 = vunpack.c.l.b16 %v6581_v61  ;;  %v7108_v5 = vunpack.c.h.b16 %v6581_v61  ;;  %v8211_v24 = vsel %vm15796_vm7, %v8210_v18, %v8206_v45  ;;  %v7708_v6 = vsel %vm15797_vm9, %v7707_v23, %v7703_v35  ;;  %vm15798_vm0 = vmmov %vm15797_vm9 }
 0x498   : > { %v2935_v36 = vpop.xlane.xlu0 %2934  ;;  %vm15799_vm11 = vmmov %vm15795_vm6 }
 0x499   : > { %v6641_v38 = vpack.c.bf16 %v2938_v26, %v2935_v36  ;;  %v6632_v26 = vpack.c.bf16 %v15400_v32, %v15404_v29  ;;  %v7712_v32 = vrot.slane %v7107_v60, %v12780_v54  ;;  %v7717_v42 = vrot.slane %v7108_v5, %v12783_v55  ;;  %vm15800_vm6 = vmmov %vm15798_vm0 }
 0x49a   : > { %v7624_v37 = vsel %vm15799_vm11, %v7623_v30, %v7619_v43  ;;  %vm15801_vm7 = vmmov %vm15799_vm11  ;;  %vm15804_vm11 = vcmask 523712  }
 0x49b   : > { %v2530_v63 = vpop.xlane.xlu1 %2529  ;;  %v7227_v36 = vunpack.c.l.b16 %v6641_v38  ;;  %v7209_v2 = vunpack.c.l.b16 %v6632_v26  ;;  %v7228_v49 = vunpack.c.h.b16 %v6641_v38  ;;  %v7713_v51 = vsel %vm3826_vm12, %v7712_v32, %v7708_v6  ;;  %vm15802_vm9 = vmmov %vm15798_vm0 }
 0x49c   : > { %v2527_v57 = vpop.xlane.xlu0 %2526  ;;  %v7210_v38 = vunpack.c.h.b16 %v6632_v26  ;;  %v7718_v16 = vsel %vm3833_vm13, %v7717_v42, %v7713_v51 }
 0x49d   : > { %v6573_v10 = vpack.c.bf16 %v2530_v63, %v2527_v57  ;;  %v8304_v27 = vrot.slane %v7227_v36, %v12780_v54  ;;  %v8300_v57 = vsel %vm15798_vm0, %v8299_v9, %v8295_v11  ;;  %v8309_v39 = vrot.slane %v7228_v49, %v12783_v55 }
 0x49e   : > { %v7629_v36 = vsel %vm15800_vm6, %v7628_v22, %v7624_v37  ;;  %vm15803_vm0 = vcmask 458112  }
 0x49f   : > { %v2890_v56 = vpop.xlane.xlu1 %2889  ;;  %v7091_v61 = vunpack.c.l.b16 %v6573_v10  ;;  %v8305_v12 = vsel %vm3826_vm12, %v8304_v27, %v8300_v57  ;;  %v7092_v60 = vunpack.c.h.b16 %v6573_v10  ;;  %vm15805_vm6 = vmmov %vm15803_vm0 }
 0x4a0   : > { %v2887_v33 = vpop.xlane.xlu0 %2886  ;;  %v8310_v35 = vsel %vm3833_vm13, %v8309_v39, %v8305_v12 }
 0x4a1   : > { %v6633_v28 = vpack.c.bf16 %v2890_v56, %v2887_v33  ;;  %v8215_v56 = vrot.slane %v7209_v2, %v12764_v34  ;;  %v7633_v14 = vrot.slane %v7091_v61, %v12780_v54  ;;  %v7638_v32 = vrot.slane %v7092_v60, %v12783_v55 }
 0x4a3   : > { %v2584_v4 = vpop.xlane.xlu1 %2583  ;;  %v7211_v58 = vunpack.c.l.b16 %v6633_v28  ;;  %v7212_v9 = vunpack.c.h.b16 %v6633_v28  ;;  %v8216_v5 = vsel %vm15801_vm7, %v8215_v56, %v8211_v24  ;;  %v7634_v6 = vsel %vm3826_vm12, %v7633_v14, %v7629_v36  ;;  %v11505_v14 = vld [vmem:[%s12519_s15 + $0x600] ss:$16 sps:$4 sm:$0xff]   ;;  %vm15806_vm7 = vmmov %vm15804_vm11 }
 0x4a4   : > { %v2581_v0 = vpop.xlane.xlu0 %2580  ;;  %v7639_v22 = vsel %vm3833_vm13, %v7638_v32, %v7634_v6  ;;  %v11519_v32 = vld [vmem:[%s12519_s15 + $0x644] ss:$16 sps:$4 sm:$0xff]  }
 0x4a5   : > { %v6582_v29 = vpack.c.bf16 %v2584_v4, %v2581_v0  ;;  %v8220_v4 = vrot.slane %v7210_v38, %v12771_v41  ;;  %v8225_v10 = vrot.slane %v7211_v58, %v12780_v54 }
 0x4a7   : > { %v7109_v40 = vunpack.c.l.b16 %v6582_v29  ;;  %v2944_v63 = vpop.xlane.xlu1 %2943  ;;  %v7110_v31 = vunpack.c.h.b16 %v6582_v29 }
 0x4a8   : > { %v2941_v47 = vpop.xlane.xlu0 %2940 }
 0x4a9   : > { %v7722_v46 = vrot.slane %v7109_v40, %v12794_v7  ;;  %v6642_v52 = vpack.c.bf16 %v2944_v63, %v2941_v47  ;;  %v7727_v18 = vrot.slane %v7110_v31, %v12801_v15  ;;  %v8221_v40 = vsel %vm15802_vm9, %v8220_v4, %v8216_v5  ;;  %v11514_v5 = vld [vmem:[%s12519_s15 + $0x628] ss:$16 sps:$4 sm:$0xff]  }
 0x4aa   : > { %v8230_v63 = vrot.slane %v7212_v9, %v12783_v55  ;;  %v8226_v42 = vsel %vm3826_vm12, %v8225_v10, %v8221_v40  ;;  %v11511_v9 = vld [vmem:[%s12519_s15 + $0x620] ss:$16 sps:$4 sm:$0xff]   ;;  %vm15807_vm9 = vcmask 654912  }
 0x4ab   : > { %v7229_v33 = vunpack.c.l.b16 %v6642_v52  ;;  %v7230_v1 = vunpack.c.h.b16 %v6642_v52  ;;  %v2536_v50 = vpop.xlane.xlu1 %2535  ;;  %v7723_v23 = vsel %vm3840_vm14, %v7722_v46, %v7718_v16  ;;  %v11517_v40 = vld [vmem:[%s12519_s15 + $0x640] ss:$16 sps:$4 sm:$0xff]  }
 0x4ac   : > { %v2533_v21 = vpop.xlane.xlu0 %2532  ;;  %v7728_v2 = vsel %vm3847_vm15, %v7727_v18, %v7723_v23  ;;  %v8231_v39 = vsel %vm3833_vm13, %v8230_v63, %v8226_v42  ;;  %v11508_v18 = vld [vmem:[%s12519_s15 + $0x608] ss:$16 sps:$4 sm:$0xff]   ;;  %v11516_v23 = vld [vmem:[%s12519_s15 + $0x62c] ss:$16 sps:$4 sm:$0xff]  }
 0x4ad   : > { %v8314_v26 = vrot.slane %v7229_v33, %v12794_v7  ;;  %v8319_v43 = vrot.slane %v7230_v1, %v12801_v15  ;;  %v6574_v45 = vpack.c.bf16 %v2536_v50, %v2533_v21  ;;  %v11520_v63 = vld [vmem:[%s12519_s15 + $0x648] ss:$16 sps:$4 sm:$0xff]  }
 0x4af   : > { %v7093_v0 = vunpack.c.l.b16 %v6574_v45  ;;  %v2896_v11 = vpop.xlane.xlu1 %2895  ;;  %v8315_v17 = vsel %vm3840_vm14, %v8314_v26, %v8310_v35  ;;  %v7094_v29 = vunpack.c.h.b16 %v6574_v45  ;;  %v11513_v45 = vld [vmem:[%s12519_s15 + $0x624] ss:$16 sps:$4 sm:$0xff]  }
 0x4b0   : > { %v2893_v30 = vpop.xlane.xlu0 %2892  ;;  %v8320_v49 = vsel %vm3847_vm15, %v8319_v43, %v8315_v17 }
 0x4b1   : > { %v7643_v27 = vrot.slane %v7093_v0, %v12794_v7  ;;  %v6634_v28 = vpack.c.bf16 %v2896_v11, %v2893_v30  ;;  %v8444_v24 = vsel %vm4954_vm10, %v8320_v49, %v7728_v2  ;;  %v7648_v51 = vrot.slane %v7094_v29, %v12801_v15  ;;  %v11522_v29 = vld [vmem:[%s12519_s15 + $0x64c] ss:$16 sps:$4 sm:$0xff]  }
 0x4b2   : > { %v8452_v57 = vpack.c.b16 %v8444_v24, %v8444_v24 }
 0x4b3   : > { %v7213_v61 = vunpack.c.l.b16 %v6634_v28  ;;  %v7214_v31 = vunpack.c.h.b16 %v6634_v28  ;;  %v2590_v47 = vpop.xlane.xlu1 %2589  ;;  %v7644_v52 = vsel %vm3840_vm14, %v7643_v27, %v7639_v22 }
 0x4b4   : > { %9779 = vmatprep.mubr.bf16.mxu0 %v8452_v57  ;;  %9943 = vmatprep.mubr.bf16.mxu1 %v8452_v57  ;;  %v2587_v46 = vpop.xlane.xlu0 %2586  ;;  %v7649_v33 = vsel %vm3847_vm15, %v7648_v51, %v7644_v52 }
 0x4b5   : > { %v8235_v37 = vrot.slane %v7213_v61, %v12794_v7  ;;  %v8240_v38 = vrot.slane %v7214_v31, %v12801_v15  ;;  %v6583_v56 = vpack.c.bf16 %v2590_v47, %v2587_v46  ;;  %v11525_v31 = vld [vmem:[%s12519_s15 + $0x664] ss:$16 sps:$4 sm:$0xff]   ;;  %v11528_v47 = vld [vmem:[%s12519_s15 + $0x66c] ss:$16 sps:$4 sm:$0xff]  }
 0x4b7   : > { %v8236_v12 = vsel %vm3840_vm14, %v8235_v37, %v8231_v39  ;;  %v2950_v58 = vpop.xlane.xlu1 %2949  ;;  %v7111_v21 = vunpack.c.l.b16 %v6583_v56  ;;  %v7112_v26 = vunpack.c.h.b16 %v6583_v56 }
 0x4b8   : > { %v8241_v1 = vsel %vm3847_vm15, %v8240_v38, %v8236_v12  ;;  %v2947_v50 = vpop.xlane.xlu0 %2946 }
 0x4b9   : > { %v6643_v16 = vpack.c.bf16 %v2950_v58, %v2947_v50  ;;  %v8443_v60 = vsel %vm4954_vm10, %v8241_v1, %v7649_v33  ;;  %v7732_v10 = vrot.slane %v7111_v21, %v12694_v19  ;;  %v7736_v0 = vrot.slane %v7112_v26, %v12702_v25  ;;  %v11523_v58 = vld [vmem:[%s12519_s15 + $0x660] ss:$16 sps:$4 sm:$0xff]   ;;  %v11526_v33 = vld [vmem:[%s12519_s15 + $0x668] ss:$16 sps:$4 sm:$0xff]   ;;  %v11531_v50 = vld [vmem:[%s12519_s15 + $0x684] ss:$16 sps:$4 sm:$0xff]  }
 0x4ba   : > { %v8451_v43 = vpack.c.b16 %v8443_v60, %v8443_v60 }
 0x4bb   : > { %v2596_v36 = vpop.xlane.xlu1 %2595  ;;  %v7231_v11 = vunpack.c.l.b16 %v6643_v16  ;;  %v7232_v17 = vunpack.c.h.b16 %v6643_v16  ;;  %v7737_v57 = vsel %vm3749_vm1, %v7736_v0, %v7732_v10  ;;  %v11534_v16 = vld [vmem:[%s12519_s15 + $0x68c] ss:$16 sps:$4 sm:$0xff]  }
 0x4bc   : > { %9780 = vmatmul.mubr.bf16.vlgmr.msra.gmra.mrb[4].mxu0 %v8451_v43  ;;  %9944 = vmatmul.mubr.bf16.vlgmr.msra.gmra.mrb[4].mxu1 %v8451_v43  ;;  %v2593_v4 = vpop.xlane.xlu0 %2592 }
 0x4bd   : > { %v6584_v35 = vpack.c.bf16 %v2596_v36, %v2593_v4  ;;  %9789 = vmatpush1.bf16.msra.mxu0 %v11505_v14  ;;  %9953 = vmatpush1.bf16.msra.mxu1 %v11508_v18  ;;  %v8324_v42 = vrot.slane %v7231_v11, %v12694_v19  ;;  %v8328_v61 = vrot.slane %v7232_v17, %v12702_v25  ;;  %v11529_v36 = vld [vmem:[%s12519_s15 + $0x680] ss:$16 sps:$4 sm:$0xff]   ;;  %v11532_v4 = vld [vmem:[%s12519_s15 + $0x688] ss:$16 sps:$4 sm:$0xff]  }
 0x4be   : > { %9790 = vmatprep.subr.bf16.mxu0 %v11513_v45  ;;  %9954 = vmatprep.subr.bf16.mxu1 %v11516_v23  ;;  %v11535_v17 = vld [vmem:[%s12519_s15 + $0x6a0] ss:$16 sps:$4 sm:$0xff]  }
 0x4bf   : > { %v7113_v30 = vunpack.c.l.b16 %v6584_v35  ;;  %v7114_v2 = vunpack.c.h.b16 %v6584_v35  ;;  %v2956_v49 = vpop.xlane.xlu1 %2955  ;;  %v8329_v1 = vsel %vm3749_vm1, %v8328_v61, %v8324_v42  ;;  %v11537_v35 = vld [vmem:[%s12519_s15 + $0x6a4] ss:$16 sps:$4 sm:$0xff]   ;;  %v11550_v42 = vld [vmem:[%s12519_s15 + $0x6e8] ss:$16 sps:$4 sm:$0xff]  }
 0x4c0   : > { %v2953_v6 = vpop.xlane.xlu0 %2952  ;;  %v11555_v61 = vld [vmem:[%s12519_s15 + $0x704] ss:$16 sps:$4 sm:$0xff]  }
 0x4c1   : > { %v7741_v27 = vrot.slane %v7113_v30, %v15779_v44  ;;  %v7746_v28 = vrot.slane %v7114_v2, %v15780_v53  ;;  %v6644_v24 = vpack.c.bf16 %v2956_v49, %v2953_v6  ;;  %9791 = vmatpush1.bf16.msra.mxu0 %v11511_v9  ;;  %9955 = vmatpush1.bf16.msra.mxu1 %v11514_v5  ;;  %v11540_v9 = vld [vmem:[%s12519_s15 + $0x6ac] ss:$16 sps:$4 sm:$0xff]   ;;  %v11541_v6 = vld [vmem:[%s12519_s15 + $0x6c0] ss:$16 sps:$4 sm:$0xff]  }
 0x4c2   : > { %9792 = vmatprep.subr.bf16.mxu0 %v11519_v32  ;;  %9956 = vmatprep.subr.bf16.mxu1 %v11522_v29  ;;  %v11538_v32 = vld [vmem:[%s12519_s15 + $0x6a8] ss:$16 sps:$4 sm:$0xff]   ;;  %v11543_v29 = vld [vmem:[%s12519_s15 + $0x6c4] ss:$16 sps:$4 sm:$0xff]   ;;  %v11546_v30 = vld [vmem:[%s12519_s15 + $0x6cc] ss:$16 sps:$4 sm:$0xff]  }
 0x4c3   : > { %v7742_v22 = vsel %vm3756_vm2, %v7741_v27, %v7737_v57  ;;  %v7233_v51 = vunpack.c.l.b16 %v6644_v24  ;;  %v7234_v46 = vunpack.c.h.b16 %v6644_v24  ;;  %v2602_v52 = vpop.xlane.xlu1 %2601  ;;  %v11544_v27 = vld [vmem:[%s12519_s15 + $0x6c8] ss:$16 sps:$4 sm:$0xff]   ;;  %v11552_v24 = vld [vmem:[%s12519_s15 + $0x6ec] ss:$16 sps:$4 sm:$0xff]   ;;  %v11547_v57 = vld [vmem:[%s12519_s15 + $0x6e0] ss:$16 sps:$4 sm:$0xff]  }
 0x4c4   : > { %v7747_v37 = vsel %vm3763_vm3, %v7746_v28, %v7742_v22  ;;  %v2599_v38 = vpop.xlane.xlu0 %2598  ;;  %v11549_v28 = vld [vmem:[%s12519_s15 + $0x6e4] ss:$16 sps:$4 sm:$0xff]  }
 0x4c5   : > { %v8333_v56 = vrot.slane %v7233_v51, %v15779_v44  ;;  %v8338_v39 = vrot.slane %v7234_v46, %v15780_v53  ;;  %v6585_v12 = vpack.c.bf16 %v2602_v52, %v2599_v38  ;;  %9793 = vmatpush1.bf16.msra.mxu0 %v11517_v40  ;;  %9957 = vmatpush1.bf16.msra.mxu1 %v11520_v63  ;;  %v11553_v51 = vld [vmem:[%s12519_s15 + $0x700] ss:$16 sps:$4 sm:$0xff]   ;;  %v11556_v46 = vld [vmem:[%s12519_s15 + $0x708] ss:$16 sps:$4 sm:$0xff]   ;;  %v11561_v52 = vld [vmem:[%s12519_s15 + $0x724] ss:$16 sps:$4 sm:$0xff]  }
 0x4c6   : > { %9794 = vmatprep.subr.bf16.mxu0 %v11525_v31  ;;  %9958 = vmatprep.subr.bf16.mxu1 %v11528_v47  ;;  %v11558_v31 = vld [vmem:[%s12519_s15 + $0x70c] ss:$16 sps:$4 sm:$0xff]  }
 0x4c7   : > { %v8334_v60 = vsel %vm3756_vm2, %v8333_v56, %v8329_v1  ;;  %v7115_v14 = vunpack.c.l.b16 %v6585_v12  ;;  %v7116_v18 = vunpack.c.h.b16 %v6585_v12  ;;  %v15524_v21 = vpop.xlane.xlu1 %2961  ;;  %v11562_v12 = vld [vmem:[%s12519_s15 + $0x728] ss:$16 sps:$4 sm:$0xff]  }
 0x4c8   : > { %v15527_v26 = vsel %vm3763_vm3, %v8338_v39, %v8334_v60  ;;  %v15529_v43 = vpop.xlane.xlu0 %2958  ;;  %v11559_v39 = vld [vmem:[%s12519_s15 + $0x720] ss:$16 sps:$4 sm:$0xff]   ;;  %v11568_v60 = vld [vmem:[%s12519_s15 + $0x748] ss:$16 sps:$4 sm:$0xff]  }
 0x4c9   : > { %v7751_v45 = vrot.slane %v7115_v14, %v15781_v48  ;;  %v7756_v23 = vrot.slane %v7116_v18, %v15782_v20  ;;  %9795 = vmatpush1.bf16.msra.mxu0 %v11523_v58  ;;  %9959 = vmatpush1.bf16.msra.mxu1 %v11526_v33  ;;  %v11567_v58 = vld [vmem:[%s12519_s15 + $0x744] ss:$16 sps:$4 sm:$0xff]   ;;  %v11570_v33 = vld [vmem:[%s12519_s15 + $0x74c] ss:$16 sps:$4 sm:$0xff]  }
 0x4ca   : > { %9796 = vmatprep.subr.bf16.mxu0 %v11531_v50  ;;  %9960 = vmatprep.subr.bf16.mxu1 %v11534_v16  ;;  %v11565_v16 = vld [vmem:[%s12519_s15 + $0x740] ss:$16 sps:$4 sm:$0xff]   ;;  %v11573_v14 = vld [vmem:[%s12519_s15 + $0x764] ss:$16 sps:$4 sm:$0xff]   ;;  %v11576_v18 = vld [vmem:[%s12519_s15 + $0x76c] ss:$16 sps:$4 sm:$0xff]  }
 0x4cb   : > { %v7752_v5 = vsel %vm3770_vm4, %v7751_v45, %v7747_v37  ;;  %v15538_v10 = vpop.xlane.xlu1 %2607  ;;  %v11564_v37 = vld [vmem:[%s12519_s15 + $0x72c] ss:$16 sps:$4 sm:$0xff]  }
 0x4cc   : > { %v15541_v0 = vsel %vm3777_vm5, %v7756_v23, %v7752_v5  ;;  %v15543_v11 = vpop.xlane.xlu0 %2604  ;;  %v6645_v5 = vpack.c.bf16 %v15524_v21, %v15529_v43 }
 0x4cd   : > { %9797 = vmatpush1.bf16.msra.mxu0 %v11529_v36  ;;  %9961 = vmatpush1.bf16.msra.mxu1 %v11532_v4  ;;  %v11571_v36 = vld [vmem:[%s12519_s15 + $0x760] ss:$16 sps:$4 sm:$0xff]   ;;  %v11574_v4 = vld [vmem:[%s12519_s15 + $0x768] ss:$16 sps:$4 sm:$0xff]  }
 0x4ce   : > { %9798 = vmatprep.subr.bf16.mxu0 %v11537_v35  ;;  %9962 = vmatprep.subr.bf16.mxu1 %v11540_v9 }
 0x4cf   : > { %v15549_v2 = vpop.xlane.xlu1 %2967 }
 0x4d0   : > { %v15551_v49 = vpop.xlane.xlu0 %2964 }
 0x4d1   : > { %9799 = vmatpush1.bf16.msra.mxu0 %v11535_v17  ;;  %9963 = vmatpush1.bf16.msra.mxu1 %v11538_v32  ;;  %v6586_v17 = vpack.c.bf16 %v15538_v10, %v15543_v11 }
 0x4d2   : > { %9800 = vmatprep.subr.bf16.mxu0 %v11543_v29  ;;  %9964 = vmatprep.subr.bf16.mxu1 %v11546_v30  ;;  %v7235_v30 = vunpack.c.l.b16 %v6645_v5 }
 0x4d3   : > { %v2614_v40 = vpop.xlane.xlu1 %2613 }
 0x4d4   : > { %v2611_v63 = vpop.xlane.xlu0 %2610 }
 0x4d5   : > { %9801 = vmatpush1.bf16.msra.mxu0 %v11541_v6  ;;  %9965 = vmatpush1.bf16.msra.mxu1 %v11544_v27  ;;  %v7117_v6 = vunpack.c.l.b16 %v6586_v17 }
 0x4d6   : > { %9802 = vmatprep.subr.bf16.mxu0 %v11549_v28  ;;  %9966 = vmatprep.subr.bf16.mxu1 %v11552_v24  ;;  %v6646_v28 = vpack.c.bf16 %v15549_v2, %v15551_v49 }
 0x4d7   : > { %v2638_v47 = vpop.xlane.xlu1 %2637  ;;  %v7761_v21 = vrot.slane %v7117_v6, %v15761_v3 }
 0x4d8   : > { %v2635_v22 = vpop.xlane.xlu0 %2634 }
 0x4d9   : > { %9803 = vmatpush1.bf16.msra.mxu0 %v11547_v57  ;;  %9967 = vmatpush1.bf16.msra.mxu1 %v11550_v42  ;;  %v6587_v57 = vpack.c.bf16 %v2614_v40, %v2611_v63  ;;  %v7236_v42 = vunpack.c.h.b16 %v6645_v5  ;;  %v7762_v2 = vsel %vm15803_vm0, %v7761_v21, %v15541_v0 }
 0x4da   : > { %9804 = vmatprep.subr.bf16.mxu0 %v11555_v61  ;;  %9968 = vmatprep.subr.bf16.mxu1 %v11558_v31  ;;  %v8343_v61 = vrot.slane %v7235_v30, %v15781_v48  ;;  %v7118_v31 = vunpack.c.h.b16 %v6586_v17 }
 0x4db   : > { %v2974_v38 = vpop.xlane.xlu1 %2973  ;;  %v7119_v11 = vunpack.c.l.b16 %v6587_v57 }
 0x4dc   : > { %v2971_v56 = vpop.xlane.xlu0 %2970  ;;  %v7766_v49 = vrot.slane %v7118_v31, %v12737_v62 }
 0x4dd   : > { %9805 = vmatpush1.bf16.msra.mxu0 %v11553_v51  ;;  %9969 = vmatpush1.bf16.msra.mxu1 %v11556_v46  ;;  %v7237_v51 = vunpack.c.l.b16 %v6646_v28  ;;  %v6591_v46 = vpack.c.bf16 %v2638_v47, %v2635_v22  ;;  %v7771_v47 = vrot.slane %v7119_v11, %v12745_v8 }
 0x4de   : > { %9806 = vmatprep.subr.bf16.mxu0 %v11561_v52  ;;  %9970 = vmatprep.subr.bf16.mxu1 %v11564_v37  ;;  %v8348_v52 = vrot.slane %v7236_v42, %v15782_v20  ;;  %v6647_v37 = vpack.c.bf16 %v2974_v38, %v2971_v56  ;;  %v7767_v0 = vsel %vm15804_vm11, %v7766_v49, %v7762_v2  ;;  %vm15813_vm11 = vmmov %vm15806_vm7 }
 0x4df   : > { %v2998_v1 = vpop.xlane.xlu1 %2997  ;;  %v7127_v22 = vunpack.c.l.b16 %v6591_v46  ;;  %v7128_v56 = vunpack.c.h.b16 %v6591_v46  ;;  %v7772_v17 = vsel %vm3798_vm8, %v7771_v47, %v7767_v0 }
 0x4e0   : > { %v2995_v50 = vpop.xlane.xlu0 %2994 }
 0x4e1   : > { %9807 = vmatpush1.bf16.msra.mxu0 %v11559_v39  ;;  %9971 = vmatpush1.bf16.msra.mxu1 %v11562_v12  ;;  %v8344_v39 = vsel %vm3770_vm4, %v8343_v61, %v15527_v26  ;;  %v6651_v40 = vpack.c.bf16 %v2998_v1, %v2995_v50  ;;  %v7238_v12 = vunpack.c.h.b16 %v6646_v28  ;;  %v7815_v6 = vrot.slane %v7128_v56, %v12702_v25 }
 0x4e2   : > { %9808 = vmatprep.subr.bf16.mxu0 %v11567_v58  ;;  %9972 = vmatprep.subr.bf16.mxu1 %v11570_v33  ;;  %v8353_v58 = vrot.slane %v7237_v51, %v15761_v3  ;;  %v7120_v33 = vunpack.c.h.b16 %v6587_v57  ;;  %v8349_v26 = vsel %vm3777_vm5, %v8348_v52, %v8344_v39  ;;  %v7240_v28 = vunpack.c.h.b16 %v6647_v37 }
 0x4e3   : > { %v2644_v45 = vpop.xlane.xlu1 %2643 }
 0x4e4   : > { %v2641_v23 = vpop.xlane.xlu0 %2640  ;;  %v8354_v50 = vsel %vm15805_vm6, %v8353_v58, %v8349_v26  ;;  %vm15814_vm6 = vmmov %vm15806_vm7 }
 0x4e5   : > { %9809 = vmatpush1.bf16.msra.mxu0 %v11565_v16  ;;  %9973 = vmatpush1.bf16.msra.mxu1 %v11568_v60  ;;  %v6592_v16 = vpack.c.bf16 %v2644_v45, %v2641_v23  ;;  %v7776_v45 = vrot.slane %v7120_v33, %v12750_v13 }
 0x4e6   : > { %9810 = vmatprep.subr.bf16.mxu0 %v11573_v14  ;;  %9974 = vmatprep.subr.bf16.mxu1 %v11576_v18  ;;  %v7239_v14 = vunpack.c.l.b16 %v6647_v37  ;;  %v7247_v18 = vunpack.c.l.b16 %v6651_v40 }
 0x4e7   : > { %v3004_v35 = vpop.xlane.xlu1 %3003  ;;  %v7129_v23 = vunpack.c.l.b16 %v6592_v16  ;;  %v7130_v21 = vunpack.c.h.b16 %v6592_v16 }
 0x4e8   : > { %v3001_v9 = vpop.xlane.xlu0 %3000  ;;  %v8363_v57 = vrot.slane %v7239_v14, %v12745_v8  ;;  %v8403_v61 = vrot.slane %v7247_v18, %v12694_v19 }
 0x4e9   : > { %9811 = vmatpush1.bf16.msra.mxu0 %v11571_v36  ;;  %9975 = vmatpush1.bf16.msra.mxu1 %v11574_v4  ;;  %v6652_v38 = vpack.c.bf16 %v3004_v35, %v3001_v9  ;;  %v7248_v36 = vunpack.c.h.b16 %v6651_v40  ;;  %v8358_v4 = vrot.slane %v7238_v12, %v12737_v62  ;;  %v7811_v35 = vrot.slane %v7127_v22, %v12694_v19 }
 0x4ea   : > { %v7820_v46 = vrot.slane %v7129_v23, %v15779_v44  ;;  %v8368_v19 = vrot.slane %v7240_v28, %v12750_v13  ;;  %v7825_v40 = vrot.slane %v7130_v21, %v15780_v53 }
 0x4eb   : > { %v2620_v32 = vpop.xlane.xlu1 %2619  ;;  %v7249_v9 = vunpack.c.l.b16 %v6652_v38  ;;  %v8407_v31 = vrot.slane %v7248_v36, %v12702_v25  ;;  %v7250_v52 = vunpack.c.h.b16 %v6652_v38  ;;  %v8359_v2 = vsel %vm15806_vm7, %v8358_v4, %v8354_v50 }
 0x4ec   : > { %v2617_v29 = vpop.xlane.xlu0 %2616  ;;  %v7816_v8 = vsel %vm3749_vm1, %v7815_v6, %v7811_v35  ;;  %vm15816_vm7 = vcmask 523264  }
 0x4ed   : > { %v6588_v42 = vpack.c.bf16 %v2620_v32, %v2617_v29  ;;  %v8364_v29 = vsel %vm3798_vm8, %v8363_v57, %v8359_v2  ;;  %v8408_v49 = vsel %vm3749_vm1, %v8407_v31, %v8403_v61  ;;  %v7821_v58 = vsel %vm3756_vm2, %v7820_v46, %v7816_v8  ;;  %vm15808_vm8 = vmmov %vm15807_vm9 }
 0x4ee   : > { %v8369_v22 = vsel %vm15808_vm8, %v8368_v19, %v8364_v29  ;;  %v7826_v26 = vsel %vm3763_vm3, %v7825_v40, %v7821_v58  ;;  %vm15809_vm1 = vcmask 720512  }
 0x4ef   : > { %v15579_v27 = vpop.xlane.xlu1 %2979  ;;  %v7121_v32 = vunpack.c.l.b16 %v6588_v42  ;;  %v7122_v47 = vunpack.c.h.b16 %v6588_v42 }
 0x4f0   : > { %v2977_v24 = vpop.xlane.xlu0 %2976 }
 0x4f1   : > { %v6648_v25 = vpack.c.bf16 %v15579_v27, %v2977_v24  ;;  %v7781_v38 = vrot.slane %v7121_v32, %v12764_v34 }
 0x4f3   : > { %v2650_v43 = vpop.xlane.xlu1 %2649  ;;  %v7241_v56 = vunpack.c.l.b16 %v6648_v25 }
 0x4f4   : > { %v2647_v10 = vpop.xlane.xlu0 %2646 }
 0x4f5   : > { %v6593_v30 = vpack.c.bf16 %v2650_v43, %v2647_v10  ;;  %v7777_v43 = vsel %vm15807_vm9, %v7776_v45, %v7772_v17  ;;  %v8412_v10 = vrot.slane %v7249_v9, %v15779_v44  ;;  %v8417_v44 = vrot.slane %v7250_v52, %v15780_v53  ;;  %vm15817_vm9 = vmmov %vm15816_vm7 }
 0x4f6   : > { %v8373_v6 = vrot.slane %v7241_v56, %v12764_v34 }
 0x4f7   : > { %v3010_v63 = vpop.xlane.xlu1 %3009  ;;  %v7131_v37 = vunpack.c.l.b16 %v6593_v30  ;;  %v7132_v33 = vunpack.c.h.b16 %v6593_v30  ;;  %v8413_v13 = vsel %vm3756_vm2, %v8412_v10, %v8408_v49  ;;  %v7782_v30 = vsel %vm15809_vm1, %v7781_v38, %v7777_v43  ;;  %vm15810_vm2 = vmmov %vm15803_vm0 }
 0x4f8   : > { %v3007_v60 = vpop.xlane.xlu0 %3006 }
 0x4f9   : > { %v6653_v51 = vpack.c.bf16 %v3010_v63, %v3007_v60  ;;  %v7830_v27 = vrot.slane %v7131_v37, %v15781_v48  ;;  %v7835_v50 = vrot.slane %v7132_v33, %v15782_v20 }
 0x4fb   : > { %v2626_v1 = vpop.xlane.xlu1 %2625  ;;  %v7251_v63 = vunpack.c.l.b16 %v6653_v51  ;;  %v7252_v14 = vunpack.c.h.b16 %v6653_v51  ;;  %v7831_v17 = vsel %vm3770_vm4, %v7830_v27, %v7826_v26 }
 0x4fc   : > { %v2623_v5 = vpop.xlane.xlu0 %2622  ;;  %v7836_v51 = vsel %vm3777_vm5, %v7835_v50, %v7831_v17 }
 0x4fd   : > { %v6589_v16 = vpack.c.bf16 %v2626_v1, %v2623_v5  ;;  %v8422_v0 = vrot.slane %v7251_v63, %v15781_v48  ;;  %v8418_v1 = vsel %vm3763_vm3, %v8417_v44, %v8413_v13  ;;  %v7786_v5 = vrot.slane %v7122_v47, %v12771_v41 }
 0x4fe   : > { %v7242_v48 = vunpack.c.h.b16 %v6648_v25  ;;  %v8427_v28 = vrot.slane %v7252_v14, %v15782_v20  ;;  %vm15811_vm3 = vcmask 786112  }
 0x4ff   : > { %v2986_v11 = vpop.xlane.xlu1 %2985  ;;  %v7123_v4 = vunpack.c.l.b16 %v6589_v16  ;;  %v8423_v57 = vsel %vm3770_vm4, %v8422_v0, %v8418_v1  ;;  %v7787_v10 = vsel %vm15811_vm3, %v7786_v5, %v7782_v30  ;;  %vm15812_vm4 = vmmov %vm15809_vm1 }
 0x500   : > { %v2983_v39 = vpop.xlane.xlu0 %2982  ;;  %v8378_v37 = vrot.slane %v7242_v48, %v12771_v41  ;;  %v8428_v8 = vsel %vm3777_vm5, %v8427_v28, %v8423_v57  ;;  %v8374_v32 = vsel %vm15812_vm4, %v8373_v6, %v8369_v22  ;;  %vm15815_vm5 = vmmov %vm15811_vm3  ;;  %v6534_v6 = vld [vmem:[#allocation3] sm:$0xff] }
 0x501   : > { %v6649_v53 = vpack.c.bf16 %v2986_v11, %v2983_v39  ;;  %v7124_v11 = vunpack.c.h.b16 %v6589_v16  ;;  %v7791_v46 = vrot.slane %v7123_v4, %v12780_v54 }
 0x503   : > { %v2656_v12 = vpop.xlane.xlu1 %2655  ;;  %v7243_v42 = vunpack.c.l.b16 %v6649_v53  ;;  %v7244_v19 = vunpack.c.h.b16 %v6649_v53  ;;  %v7792_v41 = vsel %vm3826_vm12, %v7791_v46, %v7787_v10 }
 0x504   : > { %v2653_v60 = vpop.xlane.xlu0 %2652 }
 0x505   : > { %v6594_v24 = vpack.c.bf16 %v2656_v12, %v2653_v60  ;;  %v8383_v25 = vrot.slane %v7243_v42, %v12780_v54  ;;  %v8379_v54 = vsel %vm15815_vm5, %v8378_v37, %v8374_v32  ;;  %v8388_v60 = vrot.slane %v7244_v19, %v12783_v55  ;;  %v10021_v42 = vld [vmem:[#allocation2] sm:$0xff] (!%p10742_p7) }
 0x507   : > { %v7133_v18 = vunpack.c.l.b16 %v6594_v24  ;;  %v3016_v36 = vpop.xlane.xlu1 %3015  ;;  %v7134_v45 = vunpack.c.h.b16 %v6594_v24  ;;  %v8384_v47 = vsel %vm3826_vm12, %v8383_v25, %v8379_v54 }
 0x508   : > { %v3013_v23 = vpop.xlane.xlu0 %3012 }
 0x509   : > { %v7840_v35 = vrot.slane %v7133_v18, %v15761_v3  ;;  %v6654_v9 = vpack.c.bf16 %v3016_v36, %v3013_v23  ;;  %v7845_v52 = vrot.slane %v7134_v45, %v12737_v62 }
 0x50b   : > { %v7253_v61 = vunpack.c.l.b16 %v6654_v9  ;;  %v7254_v31 = vunpack.c.h.b16 %v6654_v9  ;;  %v2632_v21 = vpop.xlane.xlu1 %2631  ;;  %v7841_v2 = vsel %vm15810_vm2, %v7840_v35, %v7836_v51 }
 0x50c   : > { %v2629_v39 = vpop.xlane.xlu0 %2628 }
 0x50d   : > { %v8432_v34 = vrot.slane %v7253_v61, %v15761_v3  ;;  %v8437_v20 = vrot.slane %v7254_v31, %v12737_v62  ;;  %v6590_v43 = vpack.c.bf16 %v2632_v21, %v2629_v39  ;;  %v7796_v3 = vrot.slane %v7124_v11, %v12783_v55  ;;  %v10025_v61 = vld [vmem:[%s15710_s3] sm:$0xf] (!%p10742_p7)  ;;  %v15818_v31 = vld [vmem:[#allocation8_spill] sm:$0xff] (!%p10742_p7) }
 0x50e   : > { %v7846_v62 = vsel %vm15813_vm11, %v7845_v52, %v7841_v2  ;;  %v8389_v55 = vsel %vm3833_vm13, %v8388_v60, %v8384_v47  ;;  %v10029_v21 = vsub.s32 (!%p10742_p7), 0, %v15818_v31  ;;  %v10033_v51 = vsub.s32 (!%p10742_p7), 1, %v15818_v31 }
 0x50f   : > { %v8433_v29 = vsel %vm15803_vm0, %v8432_v34, %v8428_v8  ;;  %v7125_v49 = vunpack.c.l.b16 %v6590_v43  ;;  %v2992_v40 = vpop.xlane.xlu1 %2991  ;;  %v7126_v12 = vunpack.c.h.b16 %v6590_v43  ;;  %v7797_v22 = vsel %vm3833_vm13, %v7796_v3, %v7792_v41  ;;  %v10105_v3 = vld [vmem:[%s15712_s5] sm:$0xf] (!%p10742_p7) }
 0x510   : > { %v8438_v63 = vsel %vm15814_vm6, %v8437_v20, %v8433_v29  ;;  %v2989_v58 = vpop.xlane.xlu0 %2988  ;;  %v10037_v11 = vsub.s32 (!%p10742_p7), 2, %v15818_v31  ;;  %v10041_v46 = vsub.s32 (!%p10742_p7), 3, %v15818_v31  ;;  %v10030_v52 = vrot.slane (!%p10742_p7), %v10025_v61, %v10029_v21 }
 0x511   : > { %v7801_v44 = vrot.slane %v7125_v49, %v12794_v7  ;;  %v6650_v33 = vpack.c.bf16 %v2992_v40, %v2989_v58  ;;  %v8446_v16 = vsel %vm4954_vm10, %v8438_v63, %v7846_v62  ;;  %v7806_v38 = vrot.slane %v7126_v12, %v12801_v15  ;;  %v10068_v49 = vld [vmem:[%s15711_s4] sm:$0xf] (!%p10742_p7) }
 0x512   : > { %v8454_v13 = vpack.c.b16 %v8446_v16, %v8446_v16  ;;  %v10034_v39 = vrot.slane (!%p10742_p7), %v10025_v61, %v10033_v51  ;;  %v10022_v2 = vmul.f32 (!%p10742_p7), 0.0625, %v10021_v42  ;;  %v10038_v34 = vrot.slane (!%p10742_p7), %v10025_v61, %v10037_v11 }
 0x513   : > { %v7245_v27 = vunpack.c.l.b16 %v6650_v33  ;;  %v7246_v24 = vunpack.c.h.b16 %v6650_v33  ;;  %v7802_v56 = vsel %vm3840_vm14, %v7801_v44, %v7797_v22  ;;  %v10042_v20 = vrot.slane (!%p10742_p7), %v10025_v61, %v10041_v46 }
 0x514   : > { %10740 = vmatprep.mubr.msk.bf16.mxu0 %vm15816_vm7, %v8454_v13  ;;  %10741 = vmatprep.mubr.msk.bf16.mxu1 %vm15817_vm9, %v8454_v13  ;;  %v7807_v53 = vsel %vm3847_vm15, %v7806_v38, %v7802_v56  ;;  %v10043_v10 = vcombine.low (!%p10742_p7), %v10030_v52, %v10034_v39  ;;  %v10073_v62 = vrot.slane (!%p10742_p7), %v10068_v49, %v10029_v21 }
 0x515   : > { %v8393_v14 = vrot.slane %v7245_v27, %v12794_v7  ;;  %v8398_v26 = vrot.slane %v7246_v24, %v12801_v15  ;;  %v10044_v37 = vcombine.low (!%p10742_p7), %v10038_v34, %v10042_v20  ;;  %v10077_v12 = vrot.slane (!%p10742_p7), %v10068_v49, %v10033_v51 }
 0x516   : > { %v10051_v8 = vrot.slane (!%p10742_p7), %v10043_v10, %v14945_v59  ;;  %v10081_v58 = vrot.slane (!%p10742_p7), %v10068_v49, %v10037_v11  ;;  %v10085_v41 = vrot.slane (!%p10742_p7), %v10068_v49, %v10041_v46  ;;  %v10110_v44 = vrot.slane (!%p10742_p7), %v10105_v3, %v10029_v21 }
 0x517   : > { %v8394_v0 = vsel %vm3840_vm14, %v8393_v14, %v8389_v55  ;;  %v10058_v32 = vrot.slane (!%p10742_p7), %v10044_v37, %v14945_v59  ;;  %v10114_v33 = vrot.slane (!%p10742_p7), %v10105_v3, %v10033_v51  ;;  %v10118_v16 = vrot.slane (!%p10742_p7), %v10105_v3, %v10037_v11 }
 0x518   : > { %v8399_v18 = vsel %vm3847_vm15, %v8398_v26, %v8394_v0  ;;  %v10122_v54 = vrot.slane (!%p10742_p7), %v10105_v3, %v10041_v46  ;;  %v10086_v60 = vcombine.low (!%p10742_p7), %v10073_v62, %v10077_v12  ;;  %v10087_v13 = vcombine.low (!%p10742_p7), %v10081_v58, %v10085_v41 }
 0x519   : > { %v8445_v36 = vsel %vm4954_vm10, %v8399_v18, %v7807_v53  ;;  %v10059_v25 = vcombine.low (!%p10742_p7), %v10051_v8, %v10058_v32  ;;  %v10123_v47 = vcombine.low (!%p10742_p7), %v10110_v44, %v10114_v33 }
 0x51a   : > { %v8453_v1 = vpack.c.b16 %v8445_v36, %v8445_v36  ;;  %v10124_v27 = vcombine.low (!%p10742_p7), %v10118_v16, %v10122_v54  ;;  %v10094_v24 = vrot.slane (!%p10742_p7), %v10086_v60, %v14945_v59  ;;  %v10101_v22 = vrot.slane (!%p10742_p7), %v10087_v13, %v14945_v59 }
 0x51b   : > { %v10131_v38 = vrot.slane (!%p10742_p7), %v10123_v47, %v14945_v59 }
 0x51c   : > { %9821 = vmatmul.mubr.bf16.vlgmr.msra.gmra.mrb[4].mxu0 %v8453_v1  ;;  %9985 = vmatmul.mubr.bf16.vlgmr.msra.gmra.mrb[4].mxu1 %v8453_v1  ;;  %v10138_v56 = vrot.slane (!%p10742_p7), %v10124_v27, %v14945_v59  ;;  %v10102_v26 = vcombine.low (!%p10742_p7), %v10094_v24, %v10101_v22 }
 0x51e   : > { %v10139_v0 = vcombine.low (!%p10742_p7), %v10131_v38, %v10138_v56 }
 0x5ef   : > { %v9822_v50 = vpop.f32.mrb[4].mxu0  ;;  %v9986_v4 = vpop.f32.mrb[4].mxu1 }
 0x5f0   : > { %v9824_v45 = vpop.f32.mrb[5].mxu0  ;;  %v9988_v23 = vpop.f32.mrb[5].mxu1 }
 0x5f1   : > { %v9997_v7 = vcombine.low %v9822_v50, %v9824_v45  ;;  %v9998_v5 = vcombine.low %v9986_v4, %v9988_v23  ;;  %v9826_v15 = vpop.f32.mrb[6].mxu0  ;;  %v9990_v17 = vpop.f32.mrb[6].mxu1 }
 0x5f2   : > { %v9827_v35 = vpop.f32.mrb[7].mxu0  ;;  %v9991_v9 = vpop.f32.mrb[7].mxu1 }
 0x5f3   : > { %v10005_v30 = vrot.slane %v9997_v7, %v14945_v59  ;;  %v10012_v48 = vrot.slane %v9998_v5, %v14945_v59  ;;  %10020 = sbr.rel (%p10742_p7) target bundleno = 1564 (0x61c), region = 94 }
 0x5f5   : > { %v10013_v28 = vcombine.low %v10005_v30, %v10012_v48 }
 0x5f7   : > { %v10015_v57 = vadd.f32 %v10013_v28, %v6534_v6 }
 0x5f9   : > { %10016 = vst [vmem:[#allocation3] sm:$0xff] %v10015_v57 }
 0x600   : > { %v10023_v43 = vld [vmem:[#allocation3] sm:$0xff] }
 0x601   : > { %v10024_v19 = vadd.f32 %v10023_v43, %v10022_v2 }
 0x603   : > { %v10061_v29 = vadd.f32 %v10059_v25, %v10024_v19 }
 0x605   : > { %v10063_v40 = vmin.f32 %v10061_v29, 0.0  ;;  %vm10062_vm10 = vcmp.gt.f32.partialorder %v10061_v29, 0.0 }
 0x607   : > { %v10064_v63 = vmul.f32 1.442695, %v10063_v40 }
 0x609   : > { %11817 = vpow2.f32 %v10064_v63 }
 0x613   : > { %v11818_v14 = vpop.eup %11817 }
 0x614   : > { %v10743_v55 = vadd.f32 -1.0, %v11818_v14 }
 0x616   : > { %v10067_v53 = vsel %vm10062_vm10, %v10061_v29, %v10743_v55 }
 0x617   : > { %v10104_v18 = vmul.f32 %v10102_v26, %v10067_v53 }
 0x619   : > { %v10141_v36 = vadd.f32 %v10139_v0, %v10104_v18 }
 0x61b   : > { %10142 = vst [vmem:[%s15713_s6] sm:$0xff] %v10141_v36 }
 0x61c PF: > { %s19_s26 = sadd.s32 1, %s11897_s26   ;;  %s15819_s21 = smov %s11881_s22 }
 0x61d   : > { %p16_p4 = scmp.ge.s32.totalorder %s19_s26, 4   ;;  %s15820_s22 = smov %s11885_s23 }
 0x61e   : > { %s15821_s23 = smov %s11987_s9  ;;  %s15822_s24 = smov %s11893_s25 }
 0x61f   : > { %s15823_s25 = smov %s15825_s28  ;;  %18 = sbr.rel (!%p16_p4) target bundleno = 4 (0x4), region = 141 }
 0x626   :  { %10164 = vsyncpa [#allocation6], 1 }
 0x627   :  { %10166 = vsyncpa [#allocation6 + $0x1], 1 }

</bundles_post_ra>
